<compile_context>
chip_gen: v6e
topology: v6e:2x2x1
jax: 0.10.0
libtpu: 0.0.40
codegen_flags: <defaults>
</compile_context>

<pallas_src>
import functools

import jax
import jax.numpy as jnp
from jax.experimental import pallas as pl
from jax.experimental.pallas import tpu as pltpu

LANE = 128


def _round_up(x, m):
    return (x + m - 1) // m * m


# ----------------------------- Pallas kernel ------------------------------- #

def _make_block_kernel(*, hout, wout, stride, hs, cinp, coutp, has_proj):
    """Fused BasicBlock kernel; one batch element per grid step."""
    m = hout * wout
    s = stride

    def tap(xp_ref, kh, kw):
        # (hout, wout, cinp) activation window feeding conv tap (kh, kw).
        # xp_ref holds the stride-parity decomposition of the spatially padded
        # input: parity part (ph, pw) occupies rows [(ph*s+pw)*hs, ...) of the
        # merged second axis, so every tap is a unit-stride static window.
        p = (kh % s) * s + (kw % s)
        r0 = p * hs + kh // s
        c0 = kw // s
        a = xp_ref[0, r0:r0 + hout, c0:c0 + wout, :]
        return a.reshape(m, cinp)

    def kernel(xp_ref, w1_ref, b1_ref, w2_ref, b2_ref, *rest):
        if has_proj:
            wsc_ref, bsc_ref, o_ref, acc_ref, h1p_ref = rest
        else:
            o_ref, acc_ref, h1p_ref = rest

        # ---- conv1 (3x3, stride s, pad 1) + bn1 (scale folded) + relu ------
        acc_ref[...] = jnp.dot(tap(xp_ref, 0, 0), w1_ref[0],
                               preferred_element_type=jnp.float32)
        for t in range(1, 9):
            kh, kw = divmod(t, 3)
            acc_ref[...] += jnp.dot(tap(xp_ref, kh, kw), w1_ref[t],
                                    preferred_element_type=jnp.float32)
        h1 = jnp.maximum(acc_ref[...] + b1_ref[...], 0.0)

        # Stage h1 into a zero-bordered VMEM scratch so conv2's taps are plain
        # static window reads (conv2 is 3x3, stride 1, pad 1).
        h1p_ref[...] = jnp.zeros_like(h1p_ref)
        h1p_ref[1:1 + hout, 1:1 + wout, :] = h1.reshape(hout, wout, coutp)

        # ---- conv2 (3x3, stride 1, pad 1) + bn2 (scale folded) -------------
        a0 = h1p_ref[0:hout, 0:wout, :].astype(jnp.bfloat16).reshape(m, coutp)
        acc_ref[...] = jnp.dot(a0, w2_ref[0],
                               preferred_element_type=jnp.float32)
        for t in range(1, 9):
            kh, kw = divmod(t, 3)
            a = h1p_ref[kh:kh + hout, kw:kw + wout, :]
            a = a.astype(jnp.bfloat16).reshape(m, coutp)
            acc_ref[...] += jnp.dot(a, w2_ref[t],
                                    preferred_element_type=jnp.float32)
        y = acc_ref[...] + b2_ref[...]

        # ---- shortcut (identity or fused 1x1 conv + bn) --------------------
        # The 1x1/stride-s shortcut reads x[n, s*ho, s*wo, :], which is exactly
        # the centre (1,1) tap window of the padded input.
        xs = tap(xp_ref, 1, 1)
        if has_proj:
            r = jnp.dot(xs, wsc_ref[...],
                        preferred_element_type=jnp.float32) + bsc_ref[...]
        else:
            r = xs.astype(jnp.float32)

        o_ref[0] = jnp.maximum(y + r, 0.0).astype(o_ref.dtype)

    return kernel


# ------------------------------- JAX glue ---------------------------------- #

def _bn_scale_bias(bn, eps=1e-5):
    gamma, beta, mean, var = bn
    scale = gamma / jnp.sqrt(var + eps)
    bias = beta - mean * scale
    return scale.astype(jnp.float32), bias.astype(jnp.float32)


def _pad_bias(bias, coutp):
    return jnp.pad(bias, (0, coutp - bias.shape[0]))[None, :].astype(jnp.float32)


def _conv3x3_taps_folded(w_oihw, scale, cinp, coutp):
    # (Cout, Cin, 3, 3) -> (9, Cin_pad, Cout_pad) bf16 with the BN scale folded
    # into the output-channel columns; tap index = kh*3 + kw.
    cout, cin = w_oihw.shape[:2]
    w = jnp.transpose(w_oihw, (2, 3, 1, 0)).reshape(9, cin, cout)
    w = w * scale[None, None, :]
    w = jnp.pad(w, ((0, 0), (0, cinp - cin), (0, coutp - cout)))
    return w.astype(jnp.bfloat16)


def _conv1x1_mat_folded(w_oihw, scale, cinp, coutp):
    cout, cin = w_oihw.shape[:2]
    w = jnp.transpose(w_oihw[:, :, 0, 0], (1, 0)) * scale[None, :]
    w = jnp.pad(w, ((0, cinp - cin), (0, coutp - cout)))
    return w.astype(jnp.bfloat16)


def _parity_decompose(x_nhwc, stride, pad, cinp):
    """Spatially+channel zero-pad the input and split it by stride parity so
    every 3x3 tap inside the kernel is a unit-stride window read.  Total size
    is ~1x the input (no im2col expansion)."""
    n, h, w, c = x_nhwc.shape
    s = stride
    xp = jnp.pad(x_nhwc, ((0, 0), (pad, pad), (pad, pad), (0, cinp - c)))
    hp, wp = h + 2 * pad, w + 2 * pad
    hs, ws = -(-hp // s), -(-wp // s)
    parts = []
    for ph in range(s):
        for pw in range(s):
            sub = xp[:, ph::s, pw::s, :]
            sub = jnp.pad(sub, ((0, 0), (0, hs - sub.shape[1]),
                                (0, ws - sub.shape[2]), (0, 0)))
            parts.append(sub)
    parts = jnp.stack(parts, axis=1)                 # (N, s*s, Hs, Ws, Cpad)
    parts = parts.reshape(n, s * s * hs, ws, cinp)   # merge parity into rows
    return parts.astype(jnp.bfloat16), hs, ws


@functools.partial(jax.jit, static_argnames=("stride",))
def basic_block_forward(params, x_nchw, *, stride):
    """Pallas-backed BasicBlock.forward.  Input/output are NCHW like PyTorch."""
    x = jnp.transpose(x_nchw, (0, 2, 3, 1)).astype(jnp.float32)  # -> NHWC
    n, h, w, cin = x.shape
    planes = params["w1"].shape[0]
    s = stride
    hout = (h + 2 - 3) // s + 1
    wout = (w + 2 - 3) // s + 1
    m = hout * wout
    cinp = _round_up(cin, LANE)
    coutp = _round_up(planes, LANE)
    has_proj = (s != 1) or (cin != planes)

    xparts, hs, ws = _parity_decompose(x, s, 1, cinp)

    sc1, bi1 = _bn_scale_bias(params["bn1"])
    sc2, bi2 = _bn_scale_bias(params["bn2"])
    w1 = _conv3x3_taps_folded(params["w1"], sc1, cinp, coutp)
    w2 = _conv3x3_taps_folded(params["w2"], sc2, coutp, coutp)
    b1 = _pad_bias(bi1, coutp)
    b2 = _pad_bias(bi2, coutp)

    in_specs = [
        pl.BlockSpec((1, s * s * hs, ws, cinp), lambda i: (i, 0, 0, 0)),  # x
        pl.BlockSpec((9, cinp, coutp), lambda i: (0, 0, 0)),              # w1
        pl.BlockSpec((1, coutp), lambda i: (0, 0)),                       # b1
        pl.BlockSpec((9, coutp, coutp), lambda i: (0, 0, 0)),             # w2
        pl.BlockSpec((1, coutp), lambda i: (0, 0)),                       # b2
    ]
    args = [xparts, w1, b1, w2, b2]
    if has_proj:
        scs, bis = _bn_scale_bias(params["bn_sc"])
        wsc = _conv1x1_mat_folded(params["w_sc"], scs, cinp, coutp)
        bsc = _pad_bias(bis, coutp)
        in_specs += [
            pl.BlockSpec((cinp, coutp), lambda i: (0, 0)),                # wsc
            pl.BlockSpec((1, coutp), lambda i: (0, 0)),                   # bsc
        ]
        args += [wsc, bsc]

    kernel = _make_block_kernel(hout=hout, wout=wout, stride=s, hs=hs,
                                cinp=cinp, coutp=coutp, has_proj=has_proj)

    out = pl.pallas_call(
        kernel,
        out_shape=jax.ShapeDtypeStruct((n, m, coutp), jnp.float32),
        grid_spec=pltpu.PrefetchScalarGridSpec(
            num_scalar_prefetch=0,
            grid=(n,),
            in_specs=in_specs,
            out_specs=pl.BlockSpec((1, m, coutp), lambda i: (i, 0, 0)),
            scratch_shapes=[
                pltpu.VMEM((m, coutp), jnp.float32),                   # acc
                pltpu.VMEM((hout + 2, wout + 2, coutp), jnp.float32),  # h1 pad
            ]),
        compiler_params=pltpu.CompilerParams(
            dimension_semantics=("parallel",),
            vmem_limit_bytes=32 * 1024 * 1024),
    )(*args)

    out = out[:, :, :planes].reshape(n, hout, wout, planes)
    return jnp.transpose(out, (0, 3, 1, 2))  # back to NCHW


# ------------------------------ params init -------------------------------- #

def init_basic_block(key, in_planes, planes, stride=1):
    ks = jax.random.split(key, 6)

    def conv_w(k, cout, cin, ksz):
        bound = float(cin * ksz * ksz) ** -0.5
        return jax.random.uniform(k, (cout, cin, ksz, ksz), jnp.float32,
                                  -bound, bound)

    def bn_p(k, c):
        k1, k2, k3, k4 = jax.random.split(k, 4)
        gamma = jax.random.uniform(k1, (c,), jnp.float32, 0.5, 1.5)
        beta = 0.1 * jax.random.normal(k2, (c,), jnp.float32)
        mean = 0.1 * jax.random.normal(k3, (c,), jnp.float32)
        var = jax.random.uniform(k4, (c,), jnp.float32, 0.5, 1.5)
        return (gamma, beta, mean, var)

    params = {
        "w1": conv_w(ks[0], planes, in_planes, 3),
        "bn1": bn_p(ks[1], planes),
        "w2": conv_w(ks[2], planes, planes, 3),
        "bn2": bn_p(ks[3], planes),
    }
    if stride != 1 or in_planes != planes:
        params["w_sc"] = conv_w(ks[4], planes, in_planes, 1)
        params["bn_sc"] = bn_p(ks[5], planes)
    return params


# --------------------------- pure-JAX reference ----------------------------- #

def reference_forward(params, x, *, stride, eps=1e-5):
    def conv(xx, w, s, pad):
        return jax.lax.conv_general_dilated(
            xx, w, (s, s), ((pad, pad), (pad, pad)),
            dimension_numbers=("NCHW", "OIHW", "NCHW"))

    def bn(xx, p):
        gamma, beta, mean, var = p
        sc = (gamma / jnp.sqrt(var + eps))[None, :, None, None]
        return (xx - mean[None, :, None, None]) * sc + beta[None, :, None, None]

    out = jax.nn.relu(bn(conv(x, params["w1"], stride, 1), params["bn1"]))
    out = bn(conv(out, params["w2"], 1, 1), params["bn2"])
    if stride != 1 or x.shape[1] != params["w1"].shape[0]:
        sc = bn(conv(x, params["w_sc"], stride, 0), params["bn_sc"])
    else:
        sc = x
    return jax.nn.relu(out + sc)


# ---------------------------------- main ------------------------------------ #

if __name__ == "__main__":
    key = jax.random.PRNGKey(0)
    kx, kp1, kp2 = jax.random.split(key, 3)

    x = jax.random.normal(kx, (2, 4, 16, 16), jnp.float32)  # NCHW

    # bf16 MXU inputs with f32 accumulation -> bf16-level comparison tolerance.
    ATOL, RTOL = 5e-2, 2e-2

    # Config 1: identity shortcut (in_planes == planes == 4, stride == 1)
    params1 = init_basic_block(kp1, in_planes=4, planes=4, stride=1)
    out1 = basic_block_forward(params1, x, stride=1)
    jax.block_until_ready(out1)
    ref1 = reference_forward(params1, x, stride=1)
    assert out1.shape == (2, 4, 16, 16)
    assert jnp.allclose(out1, ref1, atol=ATOL, rtol=RTOL), "identity config mismatch"

    # Config 2: projection shortcut (4 -> 8 channels, stride 2)
    params2 = init_basic_block(kp2, in_planes=4, planes=8, stride=2)
    out2 = basic_block_forward(params2, x, stride=2)
    jax.block_until_ready(out2)
    ref2 = reference_forward(params2, x, stride=2)
    assert out2.shape == (2, 8, 8, 8)
    assert jnp.allclose(out2, ref2, atol=ATOL, rtol=RTOL), "projection config mismatch"

    print("KERNEL_OK")
</pallas_src>

<mosaic_0001>
module attributes {stable_mosaic.version = 11 : i64} {
  func.func @kernel(%arg0: i32, %arg1: memref<1x18x18x128xbf16, #tpu.memory_space<vmem>>, %arg2: memref<9x128x128xbf16, #tpu.memory_space<vmem>>, %arg3: memref<1x128xf32, #tpu.memory_space<vmem>>, %arg4: memref<9x128x128xbf16, #tpu.memory_space<vmem>>, %arg5: memref<1x128xf32, #tpu.memory_space<vmem>>, %arg6: memref<1x256x128xf32, #tpu.memory_space<vmem>>, %arg7: memref<256x128xf32, #tpu.memory_space<vmem>>, %arg8: memref<18x18x128xf32, #tpu.memory_space<vmem>>) attributes {dimension_semantics = [#tpu.dimension_semantics<parallel>], iteration_bounds = array<i64: 2>, scalar_prefetch = 0 : i64, scratch_operands = 2 : i64, tpu.core_type = #tpu.core_type<tc>, window_params = [{transform_indices = @transform_0, window_bounds = array<i64: 1, 18, 18, 128>}, {pipeline_mode = #tpu.pipeline_mode<synchronous>, transform_indices = @transform_1, window_bounds = array<i64: 9, 128, 128>}, {pipeline_mode = #tpu.pipeline_mode<synchronous>, transform_indices = @transform_2, window_bounds = array<i64: 1, 128>}, {pipeline_mode = #tpu.pipeline_mode<synchronous>, transform_indices = @transform_3, window_bounds = array<i64: 9, 128, 128>}, {pipeline_mode = #tpu.pipeline_mode<synchronous>, transform_indices = @transform_4, window_bounds = array<i64: 1, 128>}, {transform_indices = @transform_5, window_bounds = array<i64: 1, 256, 128>}]} {
    %c0 = arith.constant 0 : index
    %c0_0 = arith.constant 0 : index
    %c0_1 = arith.constant 0 : index
    %c0_2 = arith.constant 0 : index
    %0 = vector.load %arg1[%c0, %c0_0, %c0_1, %c0_2] : memref<1x18x18x128xbf16, #tpu.memory_space<vmem>>, vector<1x16x16x128xbf16>
    %1 = vector.shape_cast %0 : vector<1x16x16x128xbf16> to vector<16x16x128xbf16>
    %2 = vector.shape_cast %1 : vector<16x16x128xbf16> to vector<256x128xbf16>
    %c0_3 = arith.constant 0 : index
    %c0_4 = arith.constant 0 : index
    %c0_5 = arith.constant 0 : index
    %3 = vector.load %arg2[%c0_3, %c0_4, %c0_5] : memref<9x128x128xbf16, #tpu.memory_space<vmem>>, vector<1x128x128xbf16>
    %4 = vector.shape_cast %3 : vector<1x128x128xbf16> to vector<128x128xbf16>
    %cst = arith.constant dense<0.000000e+00> : vector<256x128xf32>
    %5 = tpu.matmul %2, %4, %cst {dimension_numbers = #tpu.dot_dimension_numbers<[1], [0], [0], [1], [0, 0, 1, 1], [], []>} : vector<256x128xbf16>, vector<128x128xbf16>, vector<256x128xf32> -> vector<256x128xf32>
    %c0_6 = arith.constant 0 : index
    %c0_7 = arith.constant 0 : index
    %6 = vector.load %arg7[%c0_6, %c0_7] : memref<256x128xf32, #tpu.memory_space<vmem>>, vector<256x128xf32>
    tpu.vector_store %arg7[%c0_6, %c0_7], %5 {strides = array<i32>} : memref<256x128xf32, #tpu.memory_space<vmem>>, vector<256x128xf32>,
    %c0_8 = arith.constant 0 : index
    %c0_9 = arith.constant 0 : index
    %7 = vector.load %arg7[%c0_8, %c0_9] : memref<256x128xf32, #tpu.memory_space<vmem>>, vector<256x128xf32>
    %c0_10 = arith.constant 0 : index
    %c0_11 = arith.constant 0 : index
    %c1 = arith.constant 1 : index
    %c0_12 = arith.constant 0 : index
    %8 = vector.load %arg1[%c0_10, %c0_11, %c1, %c0_12] : memref<1x18x18x128xbf16, #tpu.memory_space<vmem>>, vector<1x16x16x128xbf16>
    %9 = vector.shape_cast %8 : vector<1x16x16x128xbf16> to vector<16x16x128xbf16>
    %10 = vector.shape_cast %9 : vector<16x16x128xbf16> to vector<256x128xbf16>
    %c1_13 = arith.constant 1 : index
    %c0_14 = arith.constant 0 : index
    %c0_15 = arith.constant 0 : index
    %11 = vector.load %arg2[%c1_13, %c0_14, %c0_15] : memref<9x128x128xbf16, #tpu.memory_space<vmem>>, vector<1x128x128xbf16>
    %12 = vector.shape_cast %11 : vector<1x128x128xbf16> to vector<128x128xbf16>
    %cst_16 = arith.constant dense<0.000000e+00> : vector<256x128xf32>
    %13 = tpu.matmul %10, %12, %cst_16 {dimension_numbers = #tpu.dot_dimension_numbers<[1], [0], [0], [1], [0, 0, 1, 1], [], []>} : vector<256x128xbf16>, vector<128x128xbf16>, vector<256x128xf32> -> vector<256x128xf32>
    %14 = arith.addf %7, %13 : vector<256x128xf32>
    %c0_17 = arith.constant 0 : index
    %c0_18 = arith.constant 0 : index
    %15 = vector.load %arg7[%c0_17, %c0_18] : memref<256x128xf32, #tpu.memory_space<vmem>>, vector<256x128xf32>
    tpu.vector_store %arg7[%c0_17, %c0_18], %14 {strides = array<i32>} : memref<256x128xf32, #tpu.memory_space<vmem>>, vector<256x128xf32>,
    %c0_19 = arith.constant 0 : index
    %c0_20 = arith.constant 0 : index
    %16 = vector.load %arg7[%c0_19, %c0_20] : memref<256x128xf32, #tpu.memory_space<vmem>>, vector<256x128xf32>
    %c0_21 = arith.constant 0 : index
    %c0_22 = arith.constant 0 : index
    %c2 = arith.constant 2 : index
    %c0_23 = arith.constant 0 : index
    %17 = vector.load %arg1[%c0_21, %c0_22, %c2, %c0_23] : memref<1x18x18x128xbf16, #tpu.memory_space<vmem>>, vector<1x16x16x128xbf16>
    %18 = vector.shape_cast %17 : vector<1x16x16x128xbf16> to vector<16x16x128xbf16>
    %19 = vector.shape_cast %18 : vector<16x16x128xbf16> to vector<256x128xbf16>
    %c2_24 = arith.constant 2 : index
    %c0_25 = arith.constant 0 : index
    %c0_26 = arith.constant 0 : index
    %20 = vector.load %arg2[%c2_24, %c0_25, %c0_26] : memref<9x128x128xbf16, #tpu.memory_space<vmem>>, vector<1x128x128xbf16>
    %21 = vector.shape_cast %20 : vector<1x128x128xbf16> to vector<128x128xbf16>
    %cst_27 = arith.constant dense<0.000000e+00> : vector<256x128xf32>
    %22 = tpu.matmul %19, %21, %cst_27 {dimension_numbers = #tpu.dot_dimension_numbers<[1], [0], [0], [1], [0, 0, 1, 1], [], []>} : vector<256x128xbf16>, vector<128x128xbf16>, vector<256x128xf32> -> vector<256x128xf32>
    %23 = arith.addf %16, %22 : vector<256x128xf32>
    %c0_28 = arith.constant 0 : index
    %c0_29 = arith.constant 0 : index
    %24 = vector.load %arg7[%c0_28, %c0_29] : memref<256x128xf32, #tpu.memory_space<vmem>>, vector<256x128xf32>
    tpu.vector_store %arg7[%c0_28, %c0_29], %23 {strides = array<i32>} : memref<256x128xf32, #tpu.memory_space<vmem>>, vector<256x128xf32>,
    %c0_30 = arith.constant 0 : index
    %c0_31 = arith.constant 0 : index
    %25 = vector.load %arg7[%c0_30, %c0_31] : memref<256x128xf32, #tpu.memory_space<vmem>>, vector<256x128xf32>
    %c0_32 = arith.constant 0 : index
    %c1_33 = arith.constant 1 : index
    %c0_34 = arith.constant 0 : index
    %c0_35 = arith.constant 0 : index
    %26 = vector.load %arg1[%c0_32, %c1_33, %c0_34, %c0_35] : memref<1x18x18x128xbf16, #tpu.memory_space<vmem>>, vector<1x16x16x128xbf16>
    %27 = vector.shape_cast %26 : vector<1x16x16x128xbf16> to vector<16x16x128xbf16>
    %28 = vector.shape_cast %27 : vector<16x16x128xbf16> to vector<256x128xbf16>
    %c3 = arith.constant 3 : index
    %c0_36 = arith.constant 0 : index
    %c0_37 = arith.constant 0 : index
    %29 = vector.load %arg2[%c3, %c0_36, %c0_37] : memref<9x128x128xbf16, #tpu.memory_space<vmem>>, vector<1x128x128xbf16>
    %30 = vector.shape_cast %29 : vector<1x128x128xbf16> to vector<128x128xbf16>
    %cst_38 = arith.constant dense<0.000000e+00> : vector<256x128xf32>
    %31 = tpu.matmul %28, %30, %cst_38 {dimension_numbers = #tpu.dot_dimension_numbers<[1], [0], [0], [1], [0, 0, 1, 1], [], []>} : vector<256x128xbf16>, vector<128x128xbf16>, vector<256x128xf32> -> vector<256x128xf32>
    %32 = arith.addf %25, %31 : vector<256x128xf32>
    %c0_39 = arith.constant 0 : index
    %c0_40 = arith.constant 0 : index
    %33 = vector.load %arg7[%c0_39, %c0_40] : memref<256x128xf32, #tpu.memory_space<vmem>>, vector<256x128xf32>
    tpu.vector_store %arg7[%c0_39, %c0_40], %32 {strides = array<i32>} : memref<256x128xf32, #tpu.memory_space<vmem>>, vector<256x128xf32>,
    %c0_41 = arith.constant 0 : index
    %c0_42 = arith.constant 0 : index
    %34 = vector.load %arg7[%c0_41, %c0_42] : memref<256x128xf32, #tpu.memory_space<vmem>>, vector<256x128xf32>
    %c0_43 = arith.constant 0 : index
    %c1_44 = arith.constant 1 : index
    %c1_45 = arith.constant 1 : index
    %c0_46 = arith.constant 0 : index
    %35 = vector.load %arg1[%c0_43, %c1_44, %c1_45, %c0_46] : memref<1x18x18x128xbf16, #tpu.memory_space<vmem>>, vector<1x16x16x128xbf16>
    %36 = vector.shape_cast %35 : vector<1x16x16x128xbf16> to vector<16x16x128xbf16>
    %37 = vector.shape_cast %36 : vector<16x16x128xbf16> to vector<256x128xbf16>
    %c4 = arith.constant 4 : index
    %c0_47 = arith.constant 0 : index
    %c0_48 = arith.constant 0 : index
    %38 = vector.load %arg2[%c4, %c0_47, %c0_48] : memref<9x128x128xbf16, #tpu.memory_space<vmem>>, vector<1x128x128xbf16>
    %39 = vector.shape_cast %38 : vector<1x128x128xbf16> to vector<128x128xbf16>
    %cst_49 = arith.constant dense<0.000000e+00> : vector<256x128xf32>
    %40 = tpu.matmul %37, %39, %cst_49 {dimension_numbers = #tpu.dot_dimension_numbers<[1], [0], [0], [1], [0, 0, 1, 1], [], []>} : vector<256x128xbf16>, vector<128x128xbf16>, vector<256x128xf32> -> vector<256x128xf32>
    %41 = arith.addf %34, %40 : vector<256x128xf32>
    %c0_50 = arith.constant 0 : index
    %c0_51 = arith.constant 0 : index
    %42 = vector.load %arg7[%c0_50, %c0_51] : memref<256x128xf32, #tpu.memory_space<vmem>>, vector<256x128xf32>
    tpu.vector_store %arg7[%c0_50, %c0_51], %41 {strides = array<i32>} : memref<256x128xf32, #tpu.memory_space<vmem>>, vector<256x128xf32>,
    %c0_52 = arith.constant 0 : index
    %c0_53 = arith.constant 0 : index
    %43 = vector.load %arg7[%c0_52, %c0_53] : memref<256x128xf32, #tpu.memory_space<vmem>>, vector<256x128xf32>
    %c0_54 = arith.constant 0 : index
    %c1_55 = arith.constant 1 : index
    %c2_56 = arith.constant 2 : index
    %c0_57 = arith.constant 0 : index
    %44 = vector.load %arg1[%c0_54, %c1_55, %c2_56, %c0_57] : memref<1x18x18x128xbf16, #tpu.memory_space<vmem>>, vector<1x16x16x128xbf16>
    %45 = vector.shape_cast %44 : vector<1x16x16x128xbf16> to vector<16x16x128xbf16>
    %46 = vector.shape_cast %45 : vector<16x16x128xbf16> to vector<256x128xbf16>
    %c5 = arith.constant 5 : index
    %c0_58 = arith.constant 0 : index
    %c0_59 = arith.constant 0 : index
    %47 = vector.load %arg2[%c5, %c0_58, %c0_59] : memref<9x128x128xbf16, #tpu.memory_space<vmem>>, vector<1x128x128xbf16>
    %48 = vector.shape_cast %47 : vector<1x128x128xbf16> to vector<128x128xbf16>
    %cst_60 = arith.constant dense<0.000000e+00> : vector<256x128xf32>
    %49 = tpu.matmul %46, %48, %cst_60 {dimension_numbers = #tpu.dot_dimension_numbers<[1], [0], [0], [1], [0, 0, 1, 1], [], []>} : vector<256x128xbf16>, vector<128x128xbf16>, vector<256x128xf32> -> vector<256x128xf32>
    %50 = arith.addf %43, %49 : vector<256x128xf32>
    %c0_61 = arith.constant 0 : index
    %c0_62 = arith.constant 0 : index
    %51 = vector.load %arg7[%c0_61, %c0_62] : memref<256x128xf32, #tpu.memory_space<vmem>>, vector<256x128xf32>
    tpu.vector_store %arg7[%c0_61, %c0_62], %50 {strides = array<i32>} : memref<256x128xf32, #tpu.memory_space<vmem>>, vector<256x128xf32>,
    %c0_63 = arith.constant 0 : index
    %c0_64 = arith.constant 0 : index
    %52 = vector.load %arg7[%c0_63, %c0_64] : memref<256x128xf32, #tpu.memory_space<vmem>>, vector<256x128xf32>
    %c0_65 = arith.constant 0 : index
    %c2_66 = arith.constant 2 : index
    %c0_67 = arith.constant 0 : index
    %c0_68 = arith.constant 0 : index
    %53 = vector.load %arg1[%c0_65, %c2_66, %c0_67, %c0_68] : memref<1x18x18x128xbf16, #tpu.memory_space<vmem>>, vector<1x16x16x128xbf16>
    %54 = vector.shape_cast %53 : vector<1x16x16x128xbf16> to vector<16x16x128xbf16>
    %55 = vector.shape_cast %54 : vector<16x16x128xbf16> to vector<256x128xbf16>
    %c6 = arith.constant 6 : index
    %c0_69 = arith.constant 0 : index
    %c0_70 = arith.constant 0 : index
    %56 = vector.load %arg2[%c6, %c0_69, %c0_70] : memref<9x128x128xbf16, #tpu.memory_space<vmem>>, vector<1x128x128xbf16>
    %57 = vector.shape_cast %56 : vector<1x128x128xbf16> to vector<128x128xbf16>
    %cst_71 = arith.constant dense<0.000000e+00> : vector<256x128xf32>
    %58 = tpu.matmul %55, %57, %cst_71 {dimension_numbers = #tpu.dot_dimension_numbers<[1], [0], [0], [1], [0, 0, 1, 1], [], []>} : vector<256x128xbf16>, vector<128x128xbf16>, vector<256x128xf32> -> vector<256x128xf32>
    %59 = arith.addf %52, %58 : vector<256x128xf32>
    %c0_72 = arith.constant 0 : index
    %c0_73 = arith.constant 0 : index
    %60 = vector.load %arg7[%c0_72, %c0_73] : memref<256x128xf32, #tpu.memory_space<vmem>>, vector<256x128xf32>
    tpu.vector_store %arg7[%c0_72, %c0_73], %59 {strides = array<i32>} : memref<256x128xf32, #tpu.memory_space<vmem>>, vector<256x128xf32>,
    %c0_74 = arith.constant 0 : index
    %c0_75 = arith.constant 0 : index
    %61 = vector.load %arg7[%c0_74, %c0_75] : memref<256x128xf32, #tpu.memory_space<vmem>>, vector<256x128xf32>
    %c0_76 = arith.constant 0 : index
    %c2_77 = arith.constant 2 : index
    %c1_78 = arith.constant 1 : index
    %c0_79 = arith.constant 0 : index
    %62 = vector.load %arg1[%c0_76, %c2_77, %c1_78, %c0_79] : memref<1x18x18x128xbf16, #tpu.memory_space<vmem>>, vector<1x16x16x128xbf16>
    %63 = vector.shape_cast %62 : vector<1x16x16x128xbf16> to vector<16x16x128xbf16>
    %64 = vector.shape_cast %63 : vector<16x16x128xbf16> to vector<256x128xbf16>
    %c7 = arith.constant 7 : index
    %c0_80 = arith.constant 0 : index
    %c0_81 = arith.constant 0 : index
    %65 = vector.load %arg2[%c7, %c0_80, %c0_81] : memref<9x128x128xbf16, #tpu.memory_space<vmem>>, vector<1x128x128xbf16>
    %66 = vector.shape_cast %65 : vector<1x128x128xbf16> to vector<128x128xbf16>
    %cst_82 = arith.constant dense<0.000000e+00> : vector<256x128xf32>
    %67 = tpu.matmul %64, %66, %cst_82 {dimension_numbers = #tpu.dot_dimension_numbers<[1], [0], [0], [1], [0, 0, 1, 1], [], []>} : vector<256x128xbf16>, vector<128x128xbf16>, vector<256x128xf32> -> vector<256x128xf32>
    %68 = arith.addf %61, %67 : vector<256x128xf32>
    %c0_83 = arith.constant 0 : index
    %c0_84 = arith.constant 0 : index
    %69 = vector.load %arg7[%c0_83, %c0_84] : memref<256x128xf32, #tpu.memory_space<vmem>>, vector<256x128xf32>
    tpu.vector_store %arg7[%c0_83, %c0_84], %68 {strides = array<i32>} : memref<256x128xf32, #tpu.memory_space<vmem>>, vector<256x128xf32>,
    %c0_85 = arith.constant 0 : index
    %c0_86 = arith.constant 0 : index
    %70 = vector.load %arg7[%c0_85, %c0_86] : memref<256x128xf32, #tpu.memory_space<vmem>>, vector<256x128xf32>
    %c0_87 = arith.constant 0 : index
    %c2_88 = arith.constant 2 : index
    %c2_89 = arith.constant 2 : index
    %c0_90 = arith.constant 0 : index
    %71 = vector.load %arg1[%c0_87, %c2_88, %c2_89, %c0_90] : memref<1x18x18x128xbf16, #tpu.memory_space<vmem>>, vector<1x16x16x128xbf16>
    %72 = vector.shape_cast %71 : vector<1x16x16x128xbf16> to vector<16x16x128xbf16>
    %73 = vector.shape_cast %72 : vector<16x16x128xbf16> to vector<256x128xbf16>
    %c8 = arith.constant 8 : index
    %c0_91 = arith.constant 0 : index
    %c0_92 = arith.constant 0 : index
    %74 = vector.load %arg2[%c8, %c0_91, %c0_92] : memref<9x128x128xbf16, #tpu.memory_space<vmem>>, vector<1x128x128xbf16>
    %75 = vector.shape_cast %74 : vector<1x128x128xbf16> to vector<128x128xbf16>
    %cst_93 = arith.constant dense<0.000000e+00> : vector<256x128xf32>
    %76 = tpu.matmul %73, %75, %cst_93 {dimension_numbers = #tpu.dot_dimension_numbers<[1], [0], [0], [1], [0, 0, 1, 1], [], []>} : vector<256x128xbf16>, vector<128x128xbf16>, vector<256x128xf32> -> vector<256x128xf32>
    %77 = arith.addf %70, %76 : vector<256x128xf32>
    %c0_94 = arith.constant 0 : index
    %c0_95 = arith.constant 0 : index
    %78 = vector.load %arg7[%c0_94, %c0_95] : memref<256x128xf32, #tpu.memory_space<vmem>>, vector<256x128xf32>
    tpu.vector_store %arg7[%c0_94, %c0_95], %77 {strides = array<i32>} : memref<256x128xf32, #tpu.memory_space<vmem>>, vector<256x128xf32>,
    %c0_96 = arith.constant 0 : index
    %c0_97 = arith.constant 0 : index
    %79 = vector.load %arg7[%c0_96, %c0_97] : memref<256x128xf32, #tpu.memory_space<vmem>>, vector<256x128xf32>
    %c0_98 = arith.constant 0 : index
    %c0_99 = arith.constant 0 : index
    %80 = vector.load %arg3[%c0_98, %c0_99] : memref<1x128xf32, #tpu.memory_space<vmem>>, vector<1x128xf32>
    %81 = vector.broadcast %80 : vector<1x128xf32> to vector<256x128xf32>
    %82 = arith.addf %79, %81 : vector<256x128xf32>
    %cst_100 = arith.constant 0.000000e+00 : f32
    %83 = vector.broadcast %cst_100 : f32 to vector<256x128xf32>
    %84 = arith.maximumf %82, %83 : vector<256x128xf32>
    %cst_101 = arith.constant 0.000000e+00 : f32
    %85 = vector.broadcast %cst_101 : f32 to vector<18x18x128xf32>
    %c0_102 = arith.constant 0 : index
    %c0_103 = arith.constant 0 : index
    %c0_104 = arith.constant 0 : index
    %86 = vector.load %arg8[%c0_102, %c0_103, %c0_104] : memref<18x18x128xf32, #tpu.memory_space<vmem>>, vector<18x18x128xf32>
    tpu.vector_store %arg8[%c0_102, %c0_103, %c0_104], %85 {strides = array<i32>} : memref<18x18x128xf32, #tpu.memory_space<vmem>>, vector<18x18x128xf32>,
    %87 = vector.shape_cast %84 : vector<256x128xf32> to vector<16x16x128xf32>
    %c1_105 = arith.constant 1 : index
    %c1_106 = arith.constant 1 : index
    %c0_107 = arith.constant 0 : index
    %88 = vector.load %arg8[%c1_105, %c1_106, %c0_107] : memref<18x18x128xf32, #tpu.memory_space<vmem>>, vector<16x16x128xf32>
    tpu.vector_store %arg8[%c1_105, %c1_106, %c0_107], %87 {strides = array<i32>} : memref<18x18x128xf32, #tpu.memory_space<vmem>>, vector<16x16x128xf32>,
    %c0_108 = arith.constant 0 : index
    %c0_109 = arith.constant 0 : index
    %c0_110 = arith.constant 0 : index
    %89 = vector.load %arg8[%c0_108, %c0_109, %c0_110] : memref<18x18x128xf32, #tpu.memory_space<vmem>>, vector<16x16x128xf32>
    %90 = arith.truncf %89 : vector<16x16x128xf32> to vector<16x16x128xbf16>
    %91 = vector.shape_cast %90 : vector<16x16x128xbf16> to vector<256x128xbf16>
    %c0_111 = arith.constant 0 : index
    %c0_112 = arith.constant 0 : index
    %c0_113 = arith.constant 0 : index
    %92 = vector.load %arg4[%c0_111, %c0_112, %c0_113] : memref<9x128x128xbf16, #tpu.memory_space<vmem>>, vector<1x128x128xbf16>
    %93 = vector.shape_cast %92 : vector<1x128x128xbf16> to vector<128x128xbf16>
    %cst_114 = arith.constant dense<0.000000e+00> : vector<256x128xf32>
    %94 = tpu.matmul %91, %93, %cst_114 {dimension_numbers = #tpu.dot_dimension_numbers<[1], [0], [0], [1], [0, 0, 1, 1], [], []>} : vector<256x128xbf16>, vector<128x128xbf16>, vector<256x128xf32> -> vector<256x128xf32>
    %c0_115 = arith.constant 0 : index
    %c0_116 = arith.constant 0 : index
    %95 = vector.load %arg7[%c0_115, %c0_116] : memref<256x128xf32, #tpu.memory_space<vmem>>, vector<256x128xf32>
    tpu.vector_store %arg7[%c0_115, %c0_116], %94 {strides = array<i32>} : memref<256x128xf32, #tpu.memory_space<vmem>>, vector<256x128xf32>,
    %c0_117 = arith.constant 0 : index
    %c1_118 = arith.constant 1 : index
    %c0_119 = arith.constant 0 : index
    %96 = vector.load %arg8[%c0_117, %c1_118, %c0_119] : memref<18x18x128xf32, #tpu.memory_space<vmem>>, vector<16x16x128xf32>
    %97 = arith.truncf %96 : vector<16x16x128xf32> to vector<16x16x128xbf16>
    %98 = vector.shape_cast %97 : vector<16x16x128xbf16> to vector<256x128xbf16>
    %c0_120 = arith.constant 0 : index
    %c0_121 = arith.constant 0 : index
    %99 = vector.load %arg7[%c0_120, %c0_121] : memref<256x128xf32, #tpu.memory_space<vmem>>, vector<256x128xf32>
    %c1_122 = arith.constant 1 : index
    %c0_123 = arith.constant 0 : index
    %c0_124 = arith.constant 0 : index
    %100 = vector.load %arg4[%c1_122, %c0_123, %c0_124] : memref<9x128x128xbf16, #tpu.memory_space<vmem>>, vector<1x128x128xbf16>
    %101 = vector.shape_cast %100 : vector<1x128x128xbf16> to vector<128x128xbf16>
    %cst_125 = arith.constant dense<0.000000e+00> : vector<256x128xf32>
    %102 = tpu.matmul %98, %101, %cst_125 {dimension_numbers = #tpu.dot_dimension_numbers<[1], [0], [0], [1], [0, 0, 1, 1], [], []>} : vector<256x128xbf16>, vector<128x128xbf16>, vector<256x128xf32> -> vector<256x128xf32>
    %103 = arith.addf %99, %102 : vector<256x128xf32>
    %c0_126 = arith.constant 0 : index
    %c0_127 = arith.constant 0 : index
    %104 = vector.load %arg7[%c0_126, %c0_127] : memref<256x128xf32, #tpu.memory_space<vmem>>, vector<256x128xf32>
    tpu.vector_store %arg7[%c0_126, %c0_127], %103 {strides = array<i32>} : memref<256x128xf32, #tpu.memory_space<vmem>>, vector<256x128xf32>,
    %c0_128 = arith.constant 0 : index
    %c2_129 = arith.constant 2 : index
    %c0_130 = arith.constant 0 : index
    %105 = vector.load %arg8[%c0_128, %c2_129, %c0_130] : memref<18x18x128xf32, #tpu.memory_space<vmem>>, vector<16x16x128xf32>
    %106 = arith.truncf %105 : vector<16x16x128xf32> to vector<16x16x128xbf16>
    %107 = vector.shape_cast %106 : vector<16x16x128xbf16> to vector<256x128xbf16>
    %c0_131 = arith.constant 0 : index
    %c0_132 = arith.constant 0 : index
    %108 = vector.load %arg7[%c0_131, %c0_132] : memref<256x128xf32, #tpu.memory_space<vmem>>, vector<256x128xf32>
    %c2_133 = arith.constant 2 : index
    %c0_134 = arith.constant 0 : index
    %c0_135 = arith.constant 0 : index
    %109 = vector.load %arg4[%c2_133, %c0_134, %c0_135] : memref<9x128x128xbf16, #tpu.memory_space<vmem>>, vector<1x128x128xbf16>
    %110 = vector.shape_cast %109 : vector<1x128x128xbf16> to vector<128x128xbf16>
    %cst_136 = arith.constant dense<0.000000e+00> : vector<256x128xf32>
    %111 = tpu.matmul %107, %110, %cst_136 {dimension_numbers = #tpu.dot_dimension_numbers<[1], [0], [0], [1], [0, 0, 1, 1], [], []>} : vector<256x128xbf16>, vector<128x128xbf16>, vector<256x128xf32> -> vector<256x128xf32>
    %112 = arith.addf %108, %111 : vector<256x128xf32>
    %c0_137 = arith.constant 0 : index
    %c0_138 = arith.constant 0 : index
    %113 = vector.load %arg7[%c0_137, %c0_138] : memref<256x128xf32, #tpu.memory_space<vmem>>, vector<256x128xf32>
    tpu.vector_store %arg7[%c0_137, %c0_138], %112 {strides = array<i32>} : memref<256x128xf32, #tpu.memory_space<vmem>>, vector<256x128xf32>,
    %c1_139 = arith.constant 1 : index
    %c0_140 = arith.constant 0 : index
    %c0_141 = arith.constant 0 : index
    %114 = vector.load %arg8[%c1_139, %c0_140, %c0_141] : memref<18x18x128xf32, #tpu.memory_space<vmem>>, vector<16x16x128xf32>
    %115 = arith.truncf %114 : vector<16x16x128xf32> to vector<16x16x128xbf16>
    %116 = vector.shape_cast %115 : vector<16x16x128xbf16> to vector<256x128xbf16>
    %c0_142 = arith.constant 0 : index
    %c0_143 = arith.constant 0 : index
    %117 = vector.load %arg7[%c0_142, %c0_143] : memref<256x128xf32, #tpu.memory_space<vmem>>, vector<256x128xf32>
    %c3_144 = arith.constant 3 : index
    %c0_145 = arith.constant 0 : index
    %c0_146 = arith.constant 0 : index
    %118 = vector.load %arg4[%c3_144, %c0_145, %c0_146] : memref<9x128x128xbf16, #tpu.memory_space<vmem>>, vector<1x128x128xbf16>
    %119 = vector.shape_cast %118 : vector<1x128x128xbf16> to vector<128x128xbf16>
    %cst_147 = arith.constant dense<0.000000e+00> : vector<256x128xf32>
    %120 = tpu.matmul %116, %119, %cst_147 {dimension_numbers = #tpu.dot_dimension_numbers<[1], [0], [0], [1], [0, 0, 1, 1], [], []>} : vector<256x128xbf16>, vector<128x128xbf16>, vector<256x128xf32> -> vector<256x128xf32>
    %121 = arith.addf %117, %120 : vector<256x128xf32>
    %c0_148 = arith.constant 0 : index
    %c0_149 = arith.constant 0 : index
    %122 = vector.load %arg7[%c0_148, %c0_149] : memref<256x128xf32, #tpu.memory_space<vmem>>, vector<256x128xf32>
    tpu.vector_store %arg7[%c0_148, %c0_149], %121 {strides = array<i32>} : memref<256x128xf32, #tpu.memory_space<vmem>>, vector<256x128xf32>,
    %c1_150 = arith.constant 1 : index
    %c1_151 = arith.constant 1 : index
    %c0_152 = arith.constant 0 : index
    %123 = vector.load %arg8[%c1_150, %c1_151, %c0_152] : memref<18x18x128xf32, #tpu.memory_space<vmem>>, vector<16x16x128xf32>
    %124 = arith.truncf %123 : vector<16x16x128xf32> to vector<16x16x128xbf16>
    %125 = vector.shape_cast %124 : vector<16x16x128xbf16> to vector<256x128xbf16>
    %c0_153 = arith.constant 0 : index
    %c0_154 = arith.constant 0 : index
    %126 = vector.load %arg7[%c0_153, %c0_154] : memref<256x128xf32, #tpu.memory_space<vmem>>, vector<256x128xf32>
    %c4_155 = arith.constant 4 : index
    %c0_156 = arith.constant 0 : index
    %c0_157 = arith.constant 0 : index
    %127 = vector.load %arg4[%c4_155, %c0_156, %c0_157] : memref<9x128x128xbf16, #tpu.memory_space<vmem>>, vector<1x128x128xbf16>
    %128 = vector.shape_cast %127 : vector<1x128x128xbf16> to vector<128x128xbf16>
    %cst_158 = arith.constant dense<0.000000e+00> : vector<256x128xf32>
    %129 = tpu.matmul %125, %128, %cst_158 {dimension_numbers = #tpu.dot_dimension_numbers<[1], [0], [0], [1], [0, 0, 1, 1], [], []>} : vector<256x128xbf16>, vector<128x128xbf16>, vector<256x128xf32> -> vector<256x128xf32>
    %130 = arith.addf %126, %129 : vector<256x128xf32>
    %c0_159 = arith.constant 0 : index
    %c0_160 = arith.constant 0 : index
    %131 = vector.load %arg7[%c0_159, %c0_160] : memref<256x128xf32, #tpu.memory_space<vmem>>, vector<256x128xf32>
    tpu.vector_store %arg7[%c0_159, %c0_160], %130 {strides = array<i32>} : memref<256x128xf32, #tpu.memory_space<vmem>>, vector<256x128xf32>,
    %c1_161 = arith.constant 1 : index
    %c2_162 = arith.constant 2 : index
    %c0_163 = arith.constant 0 : index
    %132 = vector.load %arg8[%c1_161, %c2_162, %c0_163] : memref<18x18x128xf32, #tpu.memory_space<vmem>>, vector<16x16x128xf32>
    %133 = arith.truncf %132 : vector<16x16x128xf32> to vector<16x16x128xbf16>
    %134 = vector.shape_cast %133 : vector<16x16x128xbf16> to vector<256x128xbf16>
    %c0_164 = arith.constant 0 : index
    %c0_165 = arith.constant 0 : index
    %135 = vector.load %arg7[%c0_164, %c0_165] : memref<256x128xf32, #tpu.memory_space<vmem>>, vector<256x128xf32>
    %c5_166 = arith.constant 5 : index
    %c0_167 = arith.constant 0 : index
    %c0_168 = arith.constant 0 : index
    %136 = vector.load %arg4[%c5_166, %c0_167, %c0_168] : memref<9x128x128xbf16, #tpu.memory_space<vmem>>, vector<1x128x128xbf16>
    %137 = vector.shape_cast %136 : vector<1x128x128xbf16> to vector<128x128xbf16>
    %cst_169 = arith.constant dense<0.000000e+00> : vector<256x128xf32>
    %138 = tpu.matmul %134, %137, %cst_169 {dimension_numbers = #tpu.dot_dimension_numbers<[1], [0], [0], [1], [0, 0, 1, 1], [], []>} : vector<256x128xbf16>, vector<128x128xbf16>, vector<256x128xf32> -> vector<256x128xf32>
    %139 = arith.addf %135, %138 : vector<256x128xf32>
    %c0_170 = arith.constant 0 : index
    %c0_171 = arith.constant 0 : index
    %140 = vector.load %arg7[%c0_170, %c0_171] : memref<256x128xf32, #tpu.memory_space<vmem>>, vector<256x128xf32>
    tpu.vector_store %arg7[%c0_170, %c0_171], %139 {strides = array<i32>} : memref<256x128xf32, #tpu.memory_space<vmem>>, vector<256x128xf32>,
    %c2_172 = arith.constant 2 : index
    %c0_173 = arith.constant 0 : index
    %c0_174 = arith.constant 0 : index
    %141 = vector.load %arg8[%c2_172, %c0_173, %c0_174] : memref<18x18x128xf32, #tpu.memory_space<vmem>>, vector<16x16x128xf32>
    %142 = arith.truncf %141 : vector<16x16x128xf32> to vector<16x16x128xbf16>
    %143 = vector.shape_cast %142 : vector<16x16x128xbf16> to vector<256x128xbf16>
    %c0_175 = arith.constant 0 : index
    %c0_176 = arith.constant 0 : index
    %144 = vector.load %arg7[%c0_175, %c0_176] : memref<256x128xf32, #tpu.memory_space<vmem>>, vector<256x128xf32>
    %c6_177 = arith.constant 6 : index
    %c0_178 = arith.constant 0 : index
    %c0_179 = arith.constant 0 : index
    %145 = vector.load %arg4[%c6_177, %c0_178, %c0_179] : memref<9x128x128xbf16, #tpu.memory_space<vmem>>, vector<1x128x128xbf16>
    %146 = vector.shape_cast %145 : vector<1x128x128xbf16> to vector<128x128xbf16>
    %cst_180 = arith.constant dense<0.000000e+00> : vector<256x128xf32>
    %147 = tpu.matmul %143, %146, %cst_180 {dimension_numbers = #tpu.dot_dimension_numbers<[1], [0], [0], [1], [0, 0, 1, 1], [], []>} : vector<256x128xbf16>, vector<128x128xbf16>, vector<256x128xf32> -> vector<256x128xf32>
    %148 = arith.addf %144, %147 : vector<256x128xf32>
    %c0_181 = arith.constant 0 : index
    %c0_182 = arith.constant 0 : index
    %149 = vector.load %arg7[%c0_181, %c0_182] : memref<256x128xf32, #tpu.memory_space<vmem>>, vector<256x128xf32>
    tpu.vector_store %arg7[%c0_181, %c0_182], %148 {strides = array<i32>} : memref<256x128xf32, #tpu.memory_space<vmem>>, vector<256x128xf32>,
    %c2_183 = arith.constant 2 : index
    %c1_184 = arith.constant 1 : index
    %c0_185 = arith.constant 0 : index
    %150 = vector.load %arg8[%c2_183, %c1_184, %c0_185] : memref<18x18x128xf32, #tpu.memory_space<vmem>>, vector<16x16x128xf32>
    %151 = arith.truncf %150 : vector<16x16x128xf32> to vector<16x16x128xbf16>
    %152 = vector.shape_cast %151 : vector<16x16x128xbf16> to vector<256x128xbf16>
    %c0_186 = arith.constant 0 : index
    %c0_187 = arith.constant 0 : index
    %153 = vector.load %arg7[%c0_186, %c0_187] : memref<256x128xf32, #tpu.memory_space<vmem>>, vector<256x128xf32>
    %c7_188 = arith.constant 7 : index
    %c0_189 = arith.constant 0 : index
    %c0_190 = arith.constant 0 : index
    %154 = vector.load %arg4[%c7_188, %c0_189, %c0_190] : memref<9x128x128xbf16, #tpu.memory_space<vmem>>, vector<1x128x128xbf16>
    %155 = vector.shape_cast %154 : vector<1x128x128xbf16> to vector<128x128xbf16>
    %cst_191 = arith.constant dense<0.000000e+00> : vector<256x128xf32>
    %156 = tpu.matmul %152, %155, %cst_191 {dimension_numbers = #tpu.dot_dimension_numbers<[1], [0], [0], [1], [0, 0, 1, 1], [], []>} : vector<256x128xbf16>, vector<128x128xbf16>, vector<256x128xf32> -> vector<256x128xf32>
    %157 = arith.addf %153, %156 : vector<256x128xf32>
    %c0_192 = arith.constant 0 : index
    %c0_193 = arith.constant 0 : index
    %158 = vector.load %arg7[%c0_192, %c0_193] : memref<256x128xf32, #tpu.memory_space<vmem>>, vector<256x128xf32>
    tpu.vector_store %arg7[%c0_192, %c0_193], %157 {strides = array<i32>} : memref<256x128xf32, #tpu.memory_space<vmem>>, vector<256x128xf32>,
    %c2_194 = arith.constant 2 : index
    %c2_195 = arith.constant 2 : index
    %c0_196 = arith.constant 0 : index
    %159 = vector.load %arg8[%c2_194, %c2_195, %c0_196] : memref<18x18x128xf32, #tpu.memory_space<vmem>>, vector<16x16x128xf32>
    %160 = arith.truncf %159 : vector<16x16x128xf32> to vector<16x16x128xbf16>
    %161 = vector.shape_cast %160 : vector<16x16x128xbf16> to vector<256x128xbf16>
    %c0_197 = arith.constant 0 : index
    %c0_198 = arith.constant 0 : index
    %162 = vector.load %arg7[%c0_197, %c0_198] : memref<256x128xf32, #tpu.memory_space<vmem>>, vector<256x128xf32>
    %c8_199 = arith.constant 8 : index
    %c0_200 = arith.constant 0 : index
    %c0_201 = arith.constant 0 : index
    %163 = vector.load %arg4[%c8_199, %c0_200, %c0_201] : memref<9x128x128xbf16, #tpu.memory_space<vmem>>, vector<1x128x128xbf16>
    %164 = vector.shape_cast %163 : vector<1x128x128xbf16> to vector<128x128xbf16>
    %cst_202 = arith.constant dense<0.000000e+00> : vector<256x128xf32>
    %165 = tpu.matmul %161, %164, %cst_202 {dimension_numbers = #tpu.dot_dimension_numbers<[1], [0], [0], [1], [0, 0, 1, 1], [], []>} : vector<256x128xbf16>, vector<128x128xbf16>, vector<256x128xf32> -> vector<256x128xf32>
    %166 = arith.addf %162, %165 : vector<256x128xf32>
    %c0_203 = arith.constant 0 : index
    %c0_204 = arith.constant 0 : index
    %167 = vector.load %arg7[%c0_203, %c0_204] : memref<256x128xf32, #tpu.memory_space<vmem>>, vector<256x128xf32>
    tpu.vector_store %arg7[%c0_203, %c0_204], %166 {strides = array<i32>} : memref<256x128xf32, #tpu.memory_space<vmem>>, vector<256x128xf32>,
    %c0_205 = arith.constant 0 : index
    %c0_206 = arith.constant 0 : index
    %168 = vector.load %arg7[%c0_205, %c0_206] : memref<256x128xf32, #tpu.memory_space<vmem>>, vector<256x128xf32>
    %c0_207 = arith.constant 0 : index
    %c0_208 = arith.constant 0 : index
    %169 = vector.load %arg5[%c0_207, %c0_208] : memref<1x128xf32, #tpu.memory_space<vmem>>, vector<1x128xf32>
    %170 = vector.broadcast %169 : vector<1x128xf32> to vector<256x128xf32>
    %171 = arith.addf %168, %170 : vector<256x128xf32>
    %c0_209 = arith.constant 0 : index
    %c1_210 = arith.constant 1 : index
    %c1_211 = arith.constant 1 : index
    %c0_212 = arith.constant 0 : index
    %172 = vector.load %arg1[%c0_209, %c1_210, %c1_211, %c0_212] : memref<1x18x18x128xbf16, #tpu.memory_space<vmem>>, vector<1x16x16x128xbf16>
    %173 = vector.shape_cast %172 : vector<1x16x16x128xbf16> to vector<16x16x128xbf16>
    %174 = vector.shape_cast %173 : vector<16x16x128xbf16> to vector<256x128xbf16>
    %175 = arith.extf %174 : vector<256x128xbf16> to vector<256x128xf32>
    %176 = arith.addf %171, %175 : vector<256x128xf32>
    %cst_213 = arith.constant 0.000000e+00 : f32
    %177 = vector.broadcast %cst_213 : f32 to vector<256x128xf32>
    %178 = arith.maximumf %176, %177 : vector<256x128xf32>
    %c0_214 = arith.constant 0 : index
    %c0_215 = arith.constant 0 : index
    %c0_216 = arith.constant 0 : index
    %179 = vector.load %arg6[%c0_214, %c0_215, %c0_216] : memref<1x256x128xf32, #tpu.memory_space<vmem>>, vector<1x256x128xf32>
    %180 = vector.shape_cast %179 : vector<1x256x128xf32> to vector<256x128xf32>
    %181 = vector.shape_cast %178 : vector<256x128xf32> to vector<1x256x128xf32>
    tpu.vector_store %arg6[%c0_214, %c0_215, %c0_216], %181 {strides = array<i32>} : memref<1x256x128xf32, #tpu.memory_space<vmem>>, vector<1x256x128xf32>,
    return
  }
  func.func @transform_0(%arg0: i32) -> (i32, i32, i32, i32) {
    %c0_i32 = arith.constant 0 : i32
    %c0_i32_0 = arith.constant 0 : i32
    %c0_i32_1 = arith.constant 0 : i32
    %c0_i32_2 = arith.constant 0 : i32
    return %arg0, %c0_i32, %c0_i32_0, %c0_i32_1 : i32, i32, i32, i32
  }
  func.func @transform_1(%arg0: i32) -> (i32, i32, i32) {
    %c0_i32 = arith.constant 0 : i32
    %c0_i32_0 = arith.constant 0 : i32
    %c0_i32_1 = arith.constant 0 : i32
    %c0_i32_2 = arith.constant 0 : i32
    return %c0_i32, %c0_i32_0, %c0_i32_1 : i32, i32, i32
  }
  func.func @transform_2(%arg0: i32) -> (i32, i32) {
    %c0_i32 = arith.constant 0 : i32
    %c0_i32_0 = arith.constant 0 : i32
    %c0_i32_1 = arith.constant 0 : i32
    return %c0_i32, %c0_i32_0 : i32, i32
  }
  func.func @transform_3(%arg0: i32) -> (i32, i32, i32) {
    %c0_i32 = arith.constant 0 : i32
    %c0_i32_0 = arith.constant 0 : i32
    %c0_i32_1 = arith.constant 0 : i32
    %c0_i32_2 = arith.constant 0 : i32
    return %c0_i32, %c0_i32_0, %c0_i32_1 : i32, i32, i32
  }
  func.func @transform_4(%arg0: i32) -> (i32, i32) {
    %c0_i32 = arith.constant 0 : i32
    %c0_i32_0 = arith.constant 0 : i32
    %c0_i32_1 = arith.constant 0 : i32
    return %c0_i32, %c0_i32_0 : i32, i32
  }
  func.func @transform_5(%arg0: i32) -> (i32, i32, i32) {
    %c0_i32 = arith.constant 0 : i32
    %c0_i32_0 = arith.constant 0 : i32
    %c0_i32_1 = arith.constant 0 : i32
    return %arg0, %c0_i32, %c0_i32_0 : i32, i32, i32
  }
}

</mosaic_0001>

<bundles_post_ra>
// kernel: basic_block_forward.1
= control target key start
LH: loop header
LB: loop body
LE: loop exit
PB: predicated region body
PF: predicated region fallthrough
CT: control target
= control target key end

     0   :  { %s12377_s18 = smov 0   ;;  %s15749_s0 = inlined_call_operand.vmem [shape: bf16[2,18,18,128], index: 0, kind: input, shape index: {}]   ;;  %s15750_s1 = inlined_call_operand.vmem [shape: bf16[9,128,128], index: 1, kind: input, shape index: {}]   ;;  %s15751_s2 = inlined_call_operand.vmem [shape: f32[1,128], index: 2, kind: input, shape index: {}]   ;;  %s15752_s3 = inlined_call_operand.vmem [shape: bf16[9,128,128], index: 3, kind: input, shape index: {}]   ;;  %s15753_s4 = inlined_call_operand.vmem [shape: f32[1,128], index: 4, kind: input, shape index: {}]   ;;  %s15754_s5 = inlined_call_operand.vmem [shape: f32[2,256,128], index: 5, kind: output, shape index: {}]  }
   0x1 LB: > { %s9929_s19 = sadd.s32 4294967295, %s12343_s18   ;;  %p9933_p0 = scmp.ge.s32.totalorder %s12343_s18, 1  ;;  %s12343_s18 = sphi %s12377_s18, %s15_s18  }
   0x2   : > { %p187_p1 = scmp.lt.s32.totalorder %s12343_s18, 3 }
   0x4   : > { %p188_p2 = pnand %p9933_p0, %p187_p1 }
   0x6   : > { %191 = sbr.rel (%p188_p2) target bundleno = 1059 (0x423), region = 40 }
   0xb   : > { %v12144_v0 = vld [vmem:[%s15750_s1 + $0x38] sm:$0xff]   ;;  %v12146_v2 = vld [vmem:[%s15750_s1 + $0x30] sm:$0xff]   ;;  %p215_p3 = scmp.lt.s32.totalorder %s9929_s19, 1  ;;  %v12148_v4 = vld [vmem:[%s15750_s1 + $0x28] sm:$0xff]   ;;  %vm691_vm0 = vsmask.f32 3328 }
   0xc   : > { %v12145_v1 = vld [vmem:[%s15750_s1 + $0x78] sm:$0xff]   ;;  %11270 = vmatprep.subr.bf16.mxu0 %v12144_v0  ;;  %v12147_v3 = vld [vmem:[%s15750_s1 + $0x70] sm:$0xff]   ;;  %v12149_v5 = vld [vmem:[%s15750_s1 + $0x68] sm:$0xff]   ;;  %vm692_vm1 = vsmask.f32 7440  ;;  %v15758_v37 = vmov 0 }
   0xd   : > { %11318 = vmatprep.subr.bf16.mxu1 %v12145_v1  ;;  %11271 = vmatpush3.bf16.msra.mxu0 %v12144_v0  ;;  %s16133_s19 = smov (!%p215_p3, %s9929_s19), 1  ;;  %v12150_v6 = vld [vmem:[%s15750_s1 + $0x20] sm:$0xff]   ;;  %v12152_v8 = vld [vmem:[%s15750_s1 + $0x18] sm:$0xff]   ;;  %v12154_v10 = vld [vmem:[%s15750_s1 + $0x10] sm:$0xff]   ;;  %vm1560_vm3 = vcmask 1042432   ;;  %vm1561_vm4 = vcmask 1046532  }
   0xe   : > { %11319 = vmatpush3.bf16.msra.mxu1 %v12145_v1  ;;  %11272 = vmatprep.subr.bf16.mxu0 %v12146_v2  ;;  %v12151_v7 = vld [vmem:[%s15750_s1 + $0x60] sm:$0xff]   ;;  %s12134_s11 = smul.u32 216, %s16133_s19  ;;  %v12153_v9 = vld [vmem:[%s15750_s1 + $0x58] sm:$0xff]   ;;  %v12155_v11 = vld [vmem:[%s15750_s1 + $0x50] sm:$0xff]   ;;  %s10837_s29 = sshll.u32 %s16133_s19, 8 }
   0xf   : > { %11320 = vmatprep.subr.bf16.mxu1 %v12147_v3  ;;  %v12156_v16 = vld [vmem:[%s15750_s1 + $0x8] sm:$0xff]   ;;  %v12158_v31 = vld [vmem:[%s15750_s1] sm:$0xff]   ;;  %vm12447_vm2 = vmor %vm691_vm0, %vm692_vm1  ;;  %s15502_s6 = scalar_lea.vmem %s15754_s5, %s10837_s29 }
  0x10   : > { %s12424_s22 = scalar_lea.vmem %s15749_s0, %s12134_s11  ;;  %v12157_v19 = vld [vmem:[%s15750_s1 + $0x48] sm:$0xff]   ;;  %v15759_v37 = vsel %vm12447_vm2, 4294967295, %v15758_v37  ;;  %v12159_v45 = vld [vmem:[%s15750_s1 + $0x40] sm:$0xff]   ;;  %v12162_v62 = vld [vmem:[%s15750_s1 + $0xb8] sm:$0xff]  }
  0x11   : > { %11273 = vmatpush3.bf16.msra.mxu0 %v12146_v2  ;;  %v12160_v12 = vld [vmem:[%s12424_s22] sm:$0xff]   ;;  %v645_v15 = vld [vmem:[%s12424_s22 + $0x8] sm:$0x1]  ;;  %v646_v25 = vld [vmem:[%s12424_s22 + $0xc] sm:$0xf]  ;;  %15760 = vst [vmem:[#allocation4_spill] sm:$0xff] %v15759_v37 }
  0x12   : > { %11321 = vmatpush3.bf16.msra.mxu1 %v12147_v3  ;;  %11274 = vmatprep.subr.bf16.mxu0 %v12148_v4  ;;  %v643_v13 = vld [vmem:[%s12424_s22] sm:$0xf]  ;;  %v644_v14 = vld [vmem:[%s12424_s22 + $0x4] sm:$0xf]  ;;  %v714_v22 = vshll.u32 %v645_v15, 16  ;;  %v719_v30 = vshrl.u32 %v646_v25, 16  ;;  %vm12629_vm5 = vmor %vm1560_vm3, %vm1561_vm4 }
  0x13   : > { %11322 = vmatprep.subr.bf16.mxu1 %v12149_v5  ;;  %11286 = vmatprep.mubr.bf16.mxu0 %v12160_v12  ;;  %v695_v17 = vshrl.u32 %v643_v13, 16  ;;  %v698_v18 = vshll.u32 %v643_v13, 16  ;;  %v704_v20 = vshll.u32 %v644_v14, 16  ;;  %v708_v21 = vshrl.u32 %v644_v14, 16  ;;  %v647_v29 = vld [vmem:[%s12424_s22 + $0x10] sm:$0xf] }
  0x14   : > { %v716_v28 = vrot.slane %v714_v22, 5  ;;  %v648_v33 = vld [vmem:[%s12424_s22 + $0x14] sm:$0x1]  ;;  %v722_v34 = vshll.u32 %v646_v25, 16  ;;  %v728_v35 = vshll.u32 %v647_v29, 16  ;;  %v732_v36 = vshrl.u32 %v647_v29, 16 }
  0x15   : > { %11275 = vmatpush3.bf16.msra.mxu0 %v12148_v4  ;;  %v697_v23 = vrot.slane %v695_v17, 4  ;;  %v700_v24 = vrot.slane %v698_v18, 5  ;;  %v706_v26 = vrot.slane %v704_v20, 5  ;;  %v710_v27 = vrot.slane %v708_v21, 4  ;;  %v649_v51 = vld [vmem:[%s12424_s22 + $0x18] sm:$0xf] }
  0x16   : > { %11323 = vmatpush3.bf16.msra.mxu1 %v12149_v5  ;;  %11276 = vmatprep.subr.bf16.mxu0 %v12150_v6  ;;  %v721_v39 = vrot.slane %v719_v30, 4  ;;  %v738_v40 = vshll.u32 %v648_v33, 16  ;;  %v724_v42 = vrot.slane %v722_v34, 5  ;;  %v730_v43 = vrot.slane %v728_v35, 5  ;;  %v650_v52 = vld [vmem:[%s12424_s22 + $0x1c] sm:$0xf] }
  0x17   : > { %11324 = vmatprep.subr.bf16.mxu1 %v12151_v7  ;;  %v701_v32 = vor.u32 %v700_v24, %v697_v23  ;;  %v711_v38 = vor.u32 %v710_v27, %v706_v26  ;;  %v734_v44 = vrot.slane %v732_v36, 4  ;;  %v651_v53 = vld [vmem:[%s12424_s22 + $0x20] sm:$0x1]  ;;  %v743_v55 = vshrl.u32 %v649_v51, 16  ;;  %v12161_v59 = vld [vmem:[%s12424_s22 + $0xc] sm:$0xff]   ;;  %v12164_v36 = vld [vmem:[%s12424_s22 + $0x24] sm:$0xff]  }
  0x18   : > { %v740_v47 = vrot.slane %v738_v40, 5  ;;  %v725_v49 = vor.u32 %v724_v42, %v721_v39  ;;  %v746_v56 = vshll.u32 %v649_v51, 16  ;;  %v752_v57 = vshll.u32 %v650_v52, 16  ;;  %v652_v4 = vld [vmem:[%s12424_s22 + $0x24] sm:$0xf]  ;;  %v12165_v20 = vld [vmem:[%s15750_s1 + $0xb0] sm:$0xff]  }
  0x19   : > { %11277 = vmatpush3.bf16.msra.mxu0 %v12150_v6  ;;  %v702_v41 = vrot.slane %v701_v32, 4  ;;  %v712_v46 = vrot.slane %v711_v38, 4  ;;  %v735_v50 = vor.u32 %v734_v44, %v730_v43  ;;  %v756_v63 = vshrl.u32 %v650_v52, 16  ;;  %v655_v27 = vld [vmem:[%s12424_s22 + $0x30] sm:$0xf] }
  0x1a   : > { %11325 = vmatpush3.bf16.msra.mxu1 %v12151_v7  ;;  %11278 = vmatprep.subr.bf16.mxu0 %v12152_v8  ;;  %v726_v60 = vrot.slane %v725_v49, 4  ;;  %v745_v0 = vrot.slane %v743_v55, 4  ;;  %v748_v1 = vrot.slane %v746_v56, 5  ;;  %v754_v2 = vrot.slane %v752_v57, 5  ;;  %v12163_v7 = vld [vmem:[%s12424_s22 + $0x18] sm:$0xff]   ;;  %v12171_v57 = vld [vmem:[%s15750_s1 + $0xa0] sm:$0xff]  }
  0x1b   : > { %11326 = vmatprep.subr.bf16.mxu1 %v12153_v9  ;;  %v707_v48 = vsel %vm12447_vm2, %v702_v41, %v706_v26  ;;  %v717_v54 = vsel %vm12447_vm2, %v712_v46, %v716_v28  ;;  %v736_v61 = vrot.slane %v735_v50, 4  ;;  %v762_v3 = vshll.u32 %v651_v53, 16  ;;  %v12168_v28 = vld [vmem:[%s15750_s1 + $0xa8] sm:$0xff]   ;;  %v656_v32 = vld [vmem:[%s12424_s22 + $0x34] sm:$0xf] }
  0x1c   : > { %v9977_v58 = vcombine.low %v707_v48, %v717_v54  ;;  %v731_v5 = vsel %vm12447_vm2, %v726_v60, %v730_v43  ;;  %v749_v13 = vor.u32 %v748_v1, %v745_v0  ;;  %v770_v15 = vshll.u32 %v652_v4, 16  ;;  %v657_v33 = vld [vmem:[%s12424_s22 + $0x38] sm:$0x1]  ;;  %v12166_v43 = vld [vmem:[%s12424_s22 + $0x30] sm:$0xff]   ;;  %v658_v46 = vld [vmem:[%s12424_s22 + $0x3c] sm:$0xf] }
  0x1d   : > { %11279 = vmatpush3.bf16.msra.mxu0 %v12152_v8  ;;  %v741_v6 = vsel %vm12447_vm2, %v736_v61, %v740_v47  ;;  %v758_v8 = vrot.slane %v756_v63, 4  ;;  %v764_v14 = vrot.slane %v762_v3, 5  ;;  %v791_v34 = vshrl.u32 %v655_v27, 16  ;;  %v659_v51 = vld [vmem:[%s12424_s22 + $0x40] sm:$0xf] }
  0x1e   : > { %11327 = vmatpush3.bf16.msra.mxu1 %v12153_v9  ;;  %11280 = vmatprep.subr.bf16.mxu0 %v12154_v10  ;;  %v653_v9 = vld [vmem:[%s12424_s22 + $0x28] sm:$0xf]  ;;  %v9978_v12 = vcombine.low %v731_v5, %v741_v6  ;;  %v750_v21 = vrot.slane %v749_v13, 4  ;;  %v772_v22 = vrot.slane %v770_v15, 5  ;;  %v794_v39 = vshll.u32 %v655_v27, 16  ;;  %v12167_v13 = vld [vmem:[%s12424_s22 + $0x3c] sm:$0xff]  }
  0x1f   : > { %11328 = vmatprep.subr.bf16.mxu1 %v12155_v11  ;;  %11334 = vmatprep.mubr.bf16.mxu1 %v9977_v58  ;;  %v776_v18 = vshll.u32 %v653_v9, 16  ;;  %v800_v40 = vshll.u32 %v656_v32, 16  ;;  %v793_v44 = vrot.slane %v791_v34, 4  ;;  %v810_v50 = vshll.u32 %v657_v33, 16  ;;  %v660_v54 = vld [vmem:[%s12424_s22 + $0x44] sm:$0x1] }
  0x20   : > { %v755_v29 = vsel %vm12447_vm2, %v750_v21, %v754_v2  ;;  %v796_v48 = vrot.slane %v794_v39, 5  ;;  %v815_v55 = vshrl.u32 %v658_v46, 16  ;;  %v818_v56 = vshll.u32 %v658_v46, 16  ;;  %v661_v6 = vld [vmem:[%s12424_s22 + $0x48] sm:$0xf]  ;;  %v12174_v33 = vld [vmem:[%s15750_s1 + $0x98] sm:$0xff]  }
  0x21   : > { %11281 = vmatpush3.bf16.msra.mxu0 %v12154_v10  ;;  %v654_v10 = vld [vmem:[%s12424_s22 + $0x2c] sm:$0x1]  ;;  %v778_v25 = vrot.slane %v776_v18, 5  ;;  %v802_v49 = vrot.slane %v800_v40, 5  ;;  %v812_v60 = vrot.slane %v810_v50, 5  ;;  %v824_v61 = vshll.u32 %v659_v51, 16 }
  0x22   : > { %11329 = vmatpush3.bf16.msra.mxu1 %v12155_v11  ;;  %11282 = vmatprep.subr.bf16.mxu0 %v12156_v16  ;;  %v767_v11 = vshrl.u32 %v652_v4, 16  ;;  %v786_v23 = vshll.u32 %v654_v10, 16  ;;  %v817_v0 = vrot.slane %v815_v55, 4  ;;  %v820_v1 = vrot.slane %v818_v56, 5  ;;  %v663_v10 = vld [vmem:[%s12424_s22 + $0x50] sm:$0x1] }
  0x23   : > { %11330 = vmatprep.subr.bf16.mxu1 %v12157_v19  ;;  %v826_v3 = vrot.slane %v824_v61, 5  ;;  %v828_v4 = vshrl.u32 %v659_v51, 16  ;;  %v834_v5 = vshll.u32 %v660_v54, 16  ;;  %v665_v27 = vld [vmem:[%s12424_s22 + $0x58] sm:$0xf] }
  0x24   : > { %v769_v17 = vrot.slane %v767_v11, 4  ;;  %v839_v11 = vshrl.u32 %v661_v6, 16  ;;  %v12175_v39 = vld [vmem:[%s15750_s1 + $0xf8] sm:$0xff]  }
  0x25   : > { %11283 = vmatpush3.bf16.msra.mxu0 %v12156_v16  ;;  %v759_v16 = vor.u32 %v758_v8, %v754_v2  ;;  %v821_v8 = vor.u32 %v820_v1, %v817_v0  ;;  %v836_v15 = vrot.slane %v834_v5, 5 }
  0x26   : > { %11331 = vmatpush3.bf16.msra.mxu1 %v12157_v19  ;;  %11284 = vmatprep.subr.bf16.mxu0 %v12158_v31  ;;  %v780_v19 = vshrl.u32 %v653_v9, 16  ;;  %v773_v30 = vor.u32 %v772_v22, %v769_v17  ;;  %v662_v9 = vld [vmem:[%s12424_s22 + $0x4c] sm:$0xf] }
  0x27   : > { %11332 = vmatprep.subr.bf16.mxu1 %v12159_v45  ;;  %v760_v24 = vrot.slane %v759_v16, 4  ;;  %v842_v16 = vshll.u32 %v661_v6, 16  ;;  %v822_v18 = vrot.slane %v821_v8, 4  ;;  %v848_v21 = vshll.u32 %v662_v9, 16 }
  0x28   : > { %v782_v26 = vrot.slane %v780_v19, 4  ;;  %v774_v42 = vrot.slane %v773_v30, 4  ;;  %v12169_v19 = vld [vmem:[%s12424_s22 + $0x48] sm:$0xff]   ;;  %v858_v30 = vshll.u32 %v663_v10, 16 }
  0x29   : > { %11285 = vmatpush3.bf16.msra.mxu0 %v12158_v31  ;;  %v788_v31 = vrot.slane %v786_v23, 5  ;;  %v765_v35 = vsel %vm12447_vm2, %v760_v24, %v764_v14  ;;  %v830_v14 = vrot.slane %v828_v4, 4  ;;  %v844_v24 = vrot.slane %v842_v16, 5  ;;  %v670_v10 = vld [vmem:[%s12424_s22 + $0x6c] sm:$0xf] }
  0x2a   : > { %11333 = vmatpush3.bf16.msra.mxu1 %v12159_v45  ;;  %11366 = vmatprep.subr.bf16.mxu0 %v12162_v62  ;;  %v783_v38 = vor.u32 %v782_v26, %v778_v25  ;;  %v9979_v41 = vcombine.low %v755_v29, %v765_v35  ;;  %v804_v45 = vshrl.u32 %v656_v32, 16  ;;  %v779_v52 = vsel %vm12447_vm2, %v774_v42, %v778_v25  ;;  %v664_v26 = vld [vmem:[%s12424_s22 + $0x54] sm:$0xf] }
  0x2b   : > { %v831_v23 = vor.u32 %v830_v14, %v826_v3  ;;  %v852_v25 = vshrl.u32 %v662_v9, 16  ;;  %v827_v29 = vsel %vm12447_vm2, %v822_v18, %v826_v3  ;;  %v863_v32 = vshrl.u32 %v664_v26, 16  ;;  %11414 = vmatprep.subr.bf16.mxu1 %v12175_v39  ;;  %v12172_v3 = vld [vmem:[%s12424_s22 + $0x60] sm:$0xff]   ;;  %v672_v16 = vld [vmem:[%s12424_s22 + $0x74] sm:$0x1] }
  0x2c   : > { %11287 = vmatmul.mubr.bf16.vlgmr.msra.gmra.mxu0 %v12161_v59  ;;  %v784_v47 = vrot.slane %v783_v38, 4  ;;  %v806_v53 = vrot.slane %v804_v45, 4  ;;  %v797_v59 = vor.u32 %v796_v48, %v793_v44  ;;  %v866_v38 = vshll.u32 %v664_v26, 16 }
  0x2d   : > { %11335 = vmatmul.mubr.bf16.vlgmr.msra.gmra.mxu1 %v9978_v12  ;;  %11367 = vmatpush3.bf16.msra.mxu0 %v12162_v62  ;;  %v832_v34 = vrot.slane %v831_v23, 4  ;;  %v860_v40 = vrot.slane %v858_v30, 5  ;;  %v872_v42 = vshll.u32 %v665_v27, 16  ;;  %v12173_v30 = vld [vmem:[%s12424_s22 + $0x6c] sm:$0xff]  }
  0x2e   : > { %11290 = vmatprep.mubr.bf16.mxu0 %v12163_v7  ;;  %11368 = vmatprep.subr.bf16.mxu0 %v12165_v20  ;;  %v789_v58 = vsel %vm12447_vm2, %v784_v47, %v788_v31  ;;  %v807_v63 = vor.u32 %v806_v53, %v802_v49  ;;  %v798_v2 = vrot.slane %v797_v59, 4  ;;  %v666_v31 = vld [vmem:[%s12424_s22 + $0x5c] sm:$0x1]  ;;  %v868_v47 = vrot.slane %v866_v38, 5  ;;  %v12176_v53 = vld [vmem:[%s15750_s1 + $0xf0] sm:$0xff]   ;;  %v12181_v38 = vld [vmem:[%s15750_s1 + $0xe0] sm:$0xff]  }
  0x2f   : > { %11338 = vmatprep.mubr.bf16.mxu1 %v9979_v41  ;;  %v9980_v62 = vcombine.low %v779_v52, %v789_v58  ;;  %v865_v41 = vrot.slane %v863_v32, 4  ;;  %v837_v44 = vsel %vm12447_vm2, %v832_v34, %v836_v15  ;;  %v882_v51 = vshll.u32 %v666_v31, 16  ;;  %v667_v52 = vld [vmem:[%s12424_s22 + $0x60] sm:$0xf]  ;;  %11415 = vmatpush3.bf16.msra.mxu1 %v12175_v39  ;;  %v669_v58 = vld [vmem:[%s12424_s22 + $0x68] sm:$0x1] }
  0x30   : > { %v808_v7 = vrot.slane %v807_v63, 4  ;;  %v803_v12 = vsel %vm12447_vm2, %v798_v2, %v802_v49  ;;  %v9982_v48 = vcombine.low %v827_v29, %v837_v44  ;;  %v874_v49 = vrot.slane %v872_v42, 5  ;;  %11416 = vmatprep.subr.bf16.mxu1 %v12176_v53  ;;  %v671_v15 = vld [vmem:[%s12424_s22 + $0x70] sm:$0xf]  ;;  %v673_v42 = vld [vmem:[%s12424_s22 + $0x78] sm:$0xf] }
  0x31   : > { %11369 = vmatpush3.bf16.msra.mxu0 %v12165_v20  ;;  %v841_v20 = vrot.slane %v839_v11, 4  ;;  %v869_v56 = vor.u32 %v868_v47, %v865_v41  ;;  %v887_v59 = vshrl.u32 %v667_v52, 16  ;;  %v890_v63 = vshll.u32 %v667_v52, 16  ;;  %v12179_v11 = vld [vmem:[%s15750_s1 + $0x90] sm:$0xff]   ;;  %v12177_v41 = vld [vmem:[%s12424_s22 + $0x78] sm:$0xff]  }
  0x32   : > { %11370 = vmatprep.subr.bf16.mxu0 %v12168_v28  ;;  %v813_v17 = vsel %vm12447_vm2, %v808_v7, %v812_v60  ;;  %v12170_v60 = vld [vmem:[%s12424_s22 + $0x54] sm:$0xff]   ;;  %v906_v14 = vshll.u32 %v669_v58, 16  ;;  %v924_v29 = vshrl.u32 %v671_v15, 16  ;;  %v930_v32 = vshll.u32 %v672_v16, 16  ;;  %v675_v47 = vld [vmem:[%s12424_s22 + $0x80] sm:$0x1] }
  0x33   : > { %v9981_v22 = vcombine.low %v803_v12, %v813_v17  ;;  %v845_v35 = vor.u32 %v844_v24, %v841_v20  ;;  %v870_v2 = vrot.slane %v869_v56, 4  ;;  %v889_v4 = vrot.slane %v887_v59, 4  ;;  %11417 = vmatpush3.bf16.msra.mxu1 %v12176_v53  ;;  %v676_v56 = vld [vmem:[%s12424_s22 + $0x84] sm:$0xf] }
  0x34   : > { %11291 = vmatmul.mubr.bf16.gmra.mxu0 %v12164_v36  ;;  %v854_v36 = vrot.slane %v852_v25, 4  ;;  %v892_v8 = vrot.slane %v890_v63, 5  ;;  %v914_v20 = vshll.u32 %v670_v10, 16  ;;  %v908_v23 = vrot.slane %v906_v14, 5 }
  0x35   : > { %11339 = vmatmul.mubr.bf16.gmra.mxu1 %v9980_v62  ;;  %11294 = vmatprep.mubr.bf16.mxu0 %v12166_v43  ;;  %v876_v43 = vshrl.u32 %v665_v27, 16  ;;  %v846_v45 = vrot.slane %v845_v35, 4  ;;  %v884_v62 = vrot.slane %v882_v51, 5  ;;  %v875_v12 = vsel %vm12447_vm2, %v870_v2, %v874_v49 }
  0x36   : > { %11371 = vmatpush3.bf16.msra.mxu0 %v12168_v28  ;;  %v850_v28 = vrot.slane %v848_v21, 5  ;;  %11342 = vmatprep.mubr.bf16.mxu1 %v9981_v22  ;;  %v893_v18 = vor.u32 %v892_v8, %v889_v4  ;;  %v920_v24 = vshll.u32 %v671_v15, 16  ;;  %v916_v27 = vrot.slane %v914_v20, 5  ;;  %v12184_v8 = vld [vmem:[%s15750_s1 + $0x88] sm:$0xff]   ;;  %v12186_v20 = vld [vmem:[%s15750_s1 + $0xd0] sm:$0xff]  }
  0x37   : > { %11372 = vmatprep.subr.bf16.mxu0 %v12171_v57  ;;  %v878_v50 = vrot.slane %v876_v43, 4  ;;  %v674_v43 = vld [vmem:[%s12424_s22 + $0x7c] sm:$0xf]  ;;  %v954_v52 = vshll.u32 %v675_v47, 16 }
  0x38   : > { %v855_v46 = vor.u32 %v854_v36, %v850_v28  ;;  %v851_v54 = vsel %vm12447_vm2, %v846_v45, %v850_v28  ;;  %v894_v25 = vrot.slane %v893_v18, 4  ;;  %v922_v31 = vrot.slane %v920_v24, 5  ;;  %v679_v24 = vld [vmem:[%s12424_s22 + $0x90] sm:$0xf] }
  0x39   : > { %v879_v61 = vor.u32 %v878_v50, %v874_v49  ;;  %v926_v36 = vrot.slane %v924_v29, 4  ;;  %v938_v49 = vshll.u32 %v673_v42, 16  ;;  %v944_v50 = vshll.u32 %v674_v43, 16  ;;  %v681_v29 = vld [vmem:[%s12424_s22 + $0x98] sm:$0x1] }
  0x3a   : > { %11373 = vmatpush3.bf16.msra.mxu0 %v12171_v57  ;;  %v856_v55 = vrot.slane %v855_v46, 4  ;;  %v668_v57 = vld [vmem:[%s12424_s22 + $0x64] sm:$0xf]  ;;  %v948_v51 = vshrl.u32 %v674_v43, 16 }
  0x3b   : > { %11374 = vmatprep.subr.bf16.mxu0 %v12174_v33  ;;  %v896_v0 = vshll.u32 %v668_v57, 16  ;;  %v900_v5 = vshrl.u32 %v668_v57, 16  ;;  %v880_v7 = vrot.slane %v879_v61, 4  ;;  %v927_v46 = vor.u32 %v926_v36, %v922_v31  ;;  %v677_v57 = vld [vmem:[%s12424_s22 + $0x88] sm:$0xf] }
  0x3c   : > { %11295 = vmatmul.mubr.bf16.gmra.mxu0 %v12167_v13  ;;  %v861_v1 = vsel %vm12447_vm2, %v856_v55, %v860_v40  ;;  %v932_v40 = vrot.slane %v930_v32, 5  ;;  %v940_v58 = vrot.slane %v938_v49, 5  ;;  %v946_v59 = vrot.slane %v944_v50, 5 }
  0x3d   : > { %11298 = vmatprep.mubr.bf16.mxu0 %v12169_v19  ;;  %11343 = vmatmul.mubr.bf16.gmra.mxu1 %v9982_v48  ;;  %v9983_v6 = vcombine.low %v851_v54, %v861_v1  ;;  %v898_v9 = vrot.slane %v896_v0, 5  ;;  %v902_v13 = vrot.slane %v900_v5, 4  ;;  %v885_v17 = vsel %vm12447_vm2, %v880_v7, %v884_v62  ;;  %v678_v62 = vld [vmem:[%s12424_s22 + $0x8c] sm:$0x1] }
  0x3e   : > { %11375 = vmatpush3.bf16.msra.mxu0 %v12174_v33  ;;  %v911_v19 = vshrl.u32 %v670_v10, 16  ;;  %v9984_v21 = vcombine.low %v875_v12, %v885_v17  ;;  %v12180_v33 = vld [vmem:[%s15750_s1 + $0xe8] sm:$0xff]   ;;  %v935_v48 = vshrl.u32 %v673_v42, 16  ;;  %v928_v54 = vrot.slane %v927_v46, 4  ;;  %v12185_v17 = vld [vmem:[%s15750_s1 + $0xd8] sm:$0xff]  }
  0x3f   : > { %11346 = vmatprep.mubr.bf16.mxu1 %v9983_v6  ;;  %11376 = vmatprep.subr.bf16.mxu0 %v12179_v11  ;;  %v903_v22 = vor.u32 %v902_v13, %v898_v9  ;;  %v899_v34 = vsel %vm12447_vm2, %v894_v25, %v898_v9  ;;  %v956_v61 = vrot.slane %v954_v52, 5  ;;  %v959_v0 = vshrl.u32 %v676_v56, 16  ;;  %v12178_v6 = vld [vmem:[%s12424_s22 + $0x84] sm:$0xff]   ;;  %v12182_v13 = vld [vmem:[%s12424_s22 + $0x90] sm:$0xff]  }
  0x40   : > { %v913_v26 = vrot.slane %v911_v19, 4  ;;  %11418 = vmatprep.subr.bf16.mxu1 %v12180_v33  ;;  %v937_v55 = vrot.slane %v935_v48, 4  ;;  %v933_v63 = vsel %vm12447_vm2, %v928_v54, %v932_v40  ;;  %v962_v1 = vshll.u32 %v676_v56, 16  ;;  %v680_v25 = vld [vmem:[%s12424_s22 + $0x94] sm:$0xf]  ;;  %v12189_v56 = vld [vmem:[%s15750_s1 + $0x80] sm:$0xff]  }
  0x41   : > { %v904_v28 = vrot.slane %v903_v22, 4  ;;  %11419 = vmatpush3.bf16.msra.mxu1 %v12180_v33  ;;  %v968_v2 = vshll.u32 %v677_v57, 16  ;;  %v972_v7 = vshrl.u32 %v677_v57, 16  ;;  %v961_v9 = vrot.slane %v959_v0, 4  ;;  %v684_v48 = vld [vmem:[%s12424_s22 + $0xa4] sm:$0x1] }
  0x42   : > { %11377 = vmatpush3.bf16.msra.mxu0 %v12179_v11  ;;  %v917_v35 = vor.u32 %v916_v27, %v913_v26  ;;  %11420 = vmatprep.subr.bf16.mxu1 %v12181_v38  ;;  %v941_v4 = vor.u32 %v940_v58, %v937_v55  ;;  %v964_v10 = vrot.slane %v962_v1, 5  ;;  %v978_v12 = vshll.u32 %v678_v62, 16 }
  0x43   : > { %v909_v39 = vsel %vm12447_vm2, %v904_v28, %v908_v23  ;;  %v970_v11 = vrot.slane %v968_v2, 5  ;;  %v974_v16 = vrot.slane %v972_v7, 4  ;;  %11378 = vmatprep.subr.bf16.mxu0 %v12184_v8  ;;  %v983_v28 = vshrl.u32 %v679_v24, 16 }
  0x44   : > { %11299 = vmatmul.mubr.bf16.gmra.mxu0 %v12170_v60  ;;  %v9985_v44 = vcombine.low %v899_v34, %v909_v39  ;;  %v918_v45 = vrot.slane %v917_v35, 4  ;;  %v950_v60 = vrot.slane %v948_v51, 4  ;;  %v942_v14 = vrot.slane %v941_v4, 4  ;;  %v682_v39 = vld [vmem:[%s12424_s22 + $0x9c] sm:$0xf]  ;;  %v12187_v51 = vld [vmem:[%s12424_s22 + $0xa8] sm:$0xff]  }
  0x45   : > { %11302 = vmatprep.mubr.bf16.mxu0 %v12172_v3  ;;  %11347 = vmatmul.mubr.bf16.gmra.mxu1 %v9984_v21  ;;  %v965_v18 = vor.u32 %v964_v10, %v961_v9  ;;  %v980_v19 = vrot.slane %v978_v12, 5  ;;  %v975_v23 = vor.u32 %v974_v16, %v970_v11  ;;  %v992_v32 = vshll.u32 %v680_v25, 16  ;;  %v687_v9 = vld [vmem:[%s12424_s22 + $0xb0] sm:$0x1]  ;;  %v12191_v12 = vld [vmem:[%s15750_s1 + $0xc0] sm:$0xff]  }
  0x46   : > { %11350 = vmatprep.mubr.bf16.mxu1 %v9985_v44  ;;  %v923_v53 = vsel %vm12447_vm2, %v918_v45, %v922_v31  ;;  %11421 = vmatpush3.bf16.msra.mxu1 %v12181_v38  ;;  %v951_v5 = vor.u32 %v950_v60, %v946_v59  ;;  %v947_v21 = vsel %vm12447_vm2, %v942_v14, %v946_v59  ;;  %v996_v33 = vshrl.u32 %v680_v25, 16  ;;  %v12183_v44 = vld [vmem:[%s12424_s22 + $0x9c] sm:$0xff]   ;;  %v12190_v60 = vld [vmem:[%s15750_s1 + $0xc8] sm:$0xff]  }
  0x47   : > { %v9986_v3 = vcombine.low %v923_v53, %v933_v63  ;;  %11379 = vmatpush3.bf16.msra.mxu0 %v12184_v8  ;;  %11422 = vmatprep.subr.bf16.mxu1 %v12185_v17  ;;  %v966_v27 = vrot.slane %v965_v18, 4  ;;  %v976_v31 = vrot.slane %v975_v23, 4  ;;  %v1002_v34 = vshll.u32 %v681_v29, 16  ;;  %v683_v45 = vld [vmem:[%s12424_s22 + $0xa0] sm:$0xf] }
  0x48   : > { %v952_v15 = vrot.slane %v951_v5, 4  ;;  %v985_v36 = vrot.slane %v983_v28, 4  ;;  %v998_v42 = vrot.slane %v996_v33, 4  ;;  %v1007_v49 = vshrl.u32 %v682_v39, 16  ;;  %11380 = vmatprep.subr.bf16.mxu0 %v12189_v56  ;;  %v685_v5 = vld [vmem:[%s12424_s22 + $0xa8] sm:$0xf] }
  0x49   : > { %v971_v35 = vsel %vm12447_vm2, %v966_v27, %v970_v11  ;;  %v981_v40 = vsel %vm12447_vm2, %v976_v31, %v980_v19  ;;  %v1004_v43 = vrot.slane %v1002_v34, 5  ;;  %v1010_v50 = vshll.u32 %v682_v39, 16  ;;  %v12617_v27 = vld [vmem:[%s15750_s1 + $0x138] sm:$0xff]  }
  0x4a   : > { %v957_v22 = vsel %vm12447_vm2, %v952_v15, %v956_v61  ;;  %11423 = vmatpush3.bf16.msra.mxu1 %v12185_v17  ;;  %v9988_v46 = vcombine.low %v971_v35, %v981_v40  ;;  %v1016_v53 = vshll.u32 %v683_v45, 16  ;;  %v1020_v54 = vshrl.u32 %v683_v45, 16  ;;  %v12188_v17 = vld [vmem:[%s12424_s22 + $0xb4] sm:$0xff]  }
  0x4b   : > { %v9987_v26 = vcombine.low %v947_v21, %v957_v22  ;;  %11424 = vmatprep.subr.bf16.mxu1 %v12186_v20  ;;  %v1026_v55 = vshll.u32 %v684_v48, 16  ;;  %v1009_v58 = vrot.slane %v1007_v49, 4  ;;  %v1012_v59 = vrot.slane %v1010_v50, 5  ;;  %11381 = vmatpush3.bf16.msra.mxu0 %v12189_v56  ;;  %v688_v21 = vld [vmem:[%s12424_s22 + $0xb4] sm:$0xf] }
  0x4c   : > { %11303 = vmatmul.mubr.bf16.gmra.mxu0 %v12173_v30  ;;  %v986_v30 = vshll.u32 %v679_v24, 16  ;;  %v1018_v62 = vrot.slane %v1016_v53, 5  ;;  %v1022_v63 = vrot.slane %v1020_v54, 4  ;;  %v1031_v10 = vshrl.u32 %v685_v5, 16  ;;  %11462 = vmatprep.subr.bf16.mxu0 %v12617_v27  ;;  %v1465_v50 = vld [vmem:[%s12424_s22 + $0x4] sm:$0xf] }
  0x4d   : > { %11306 = vmatprep.mubr.bf16.mxu0 %v12177_v41  ;;  %11351 = vmatmul.mubr.bf16.gmra.mxu1 %v9986_v3  ;;  %v994_v41 = vrot.slane %v992_v32, 5  ;;  %v1028_v0 = vrot.slane %v1026_v55, 5  ;;  %v1013_v2 = vor.u32 %v1012_v59, %v1009_v58  ;;  %v1034_v11 = vshll.u32 %v685_v5, 16  ;;  %v1467_v58 = vld [vmem:[%s12424_s22 + $0xc] sm:$0xe] }
  0x4e   : > { %11354 = vmatprep.mubr.bf16.mxu1 %v9987_v26  ;;  %v988_v38 = vrot.slane %v986_v30, 5  ;;  %11425 = vmatpush3.bf16.msra.mxu1 %v12186_v20  ;;  %v1023_v4 = vor.u32 %v1022_v63, %v1018_v62  ;;  %v1050_v16 = vshll.u32 %v687_v9, 16  ;;  %v1033_v19 = vrot.slane %v1031_v10, 4  ;;  %v689_v26 = vld [vmem:[%s12424_s22 + $0xb8] sm:$0xf]  ;;  %v12193_v5 = vld [vmem:[%s12424_s22 + $0xc] sm:$0xff]  }
  0x4f   : > { %v999_v52 = vor.u32 %v998_v42, %v994_v41  ;;  %11426 = vmatprep.subr.bf16.mxu1 %v12190_v60  ;;  %v1014_v8 = vrot.slane %v1013_v2, 4  ;;  %v1036_v20 = vrot.slane %v1034_v11, 5  ;;  %v690_v30 = vld [vmem:[%s12424_s22 + $0xbc] sm:$0x1]  ;;  %v1055_v31 = vshrl.u32 %v688_v21, 16 }
  0x50   : > { %v989_v47 = vor.u32 %v988_v38, %v985_v36  ;;  %v1052_v25 = vrot.slane %v1050_v16, 5  ;;  %v1058_v32 = vshll.u32 %v688_v21, 16  ;;  %v1064_v34 = vshll.u32 %v689_v26, 16  ;;  %v1470_v11 = vld [vmem:[%s12424_s22 + $0x18] sm:$0xe] }
  0x51   : > { %v1000_v61 = vrot.slane %v999_v52, 4  ;;  %v1019_v18 = vsel %vm12447_vm2, %v1014_v8, %v1018_v62  ;;  %v1037_v28 = vor.u32 %v1036_v20, %v1033_v19  ;;  %v1068_v35 = vshrl.u32 %v689_v26, 16  ;;  %v1474_v20 = vld [vmem:[%s12424_s22 + $0x28] sm:$0xf]  ;;  %v1475_v21 = vld [vmem:[%s12424_s22 + $0x2c] sm:$0x1] }
  0x52   : > { %v990_v57 = vrot.slane %v989_v47, 4  ;;  %11427 = vmatpush3.bf16.msra.mxu1 %v12190_v60  ;;  %v1074_v36 = vshll.u32 %v690_v30, 16  ;;  %v1057_v39 = vrot.slane %v1055_v31, 4  ;;  %v1060_v40 = vrot.slane %v1058_v32, 5  ;;  %v1468_v60 = vld [vmem:[%s12424_s22 + $0x10] sm:$0xf] }
  0x53   : > { %v1005_v3 = vsel %vm12447_vm2, %v1000_v61, %v1004_v43  ;;  %11428 = vmatprep.subr.bf16.mxu1 %v12191_v12  ;;  %v1038_v38 = vrot.slane %v1037_v28, 4  ;;  %v1066_v42 = vrot.slane %v1064_v34, 5  ;;  %v1070_v43 = vrot.slane %v1068_v35, 4  ;;  %v1469_v61 = vld [vmem:[%s12424_s22 + $0x14] sm:$0x1]  ;;  %v12196_v30 = vld [vmem:[%s12424_s22 + $0x24] sm:$0xff]  }
  0x54   : > { %11307 = vmatmul.mubr.bf16.gmra.mxu0 %v12178_v6  ;;  %v995_v1 = vsel %vm12447_vm2, %v990_v57, %v994_v41  ;;  %v686_v6 = vld [vmem:[%s12424_s22 + $0xac] sm:$0xf]  ;;  %v1061_v45 = vor.u32 %v1060_v40, %v1057_v39  ;;  %v1076_v49 = vrot.slane %v1074_v36, 5  ;;  %v1565_v56 = vrot.slane %v1465_v50, 5  ;;  %v1476_v36 = vld [vmem:[%s12424_s22 + $0x30] sm:$0xe] }
  0x55   : > { %11310 = vmatprep.mubr.bf16.mxu0 %v12182_v13  ;;  %11355 = vmatmul.mubr.bf16.gmra.mxu1 %v9988_v46  ;;  %v9989_v7 = vcombine.low %v995_v1, %v1005_v3  ;;  %v1024_v13 = vrot.slane %v1023_v4, 4  ;;  %v1040_v14 = vshll.u32 %v686_v6, 16  ;;  %v1044_v15 = vshrl.u32 %v686_v6, 16  ;;  %v1464_v46 = vld [vmem:[%s12424_s22] sm:$0xe]  ;;  %v12198_v34 = vld [vmem:[%s15750_s1 + $0x128] sm:$0xff]  }
  0x56   : > { %11429 = vmatpush3.bf16.msra.mxu1 %v12191_v12  ;;  %v1071_v48 = vor.u32 %v1070_v43, %v1066_v42  ;;  %v10001_v53 = vrot.slane %v1464_v46, 9  ;;  %v1062_v55 = vrot.slane %v1061_v45, 4  ;;  %v10002_v62 = vrot.slane %v1467_v58, 9  ;;  %v1471_v12 = vld [vmem:[%s12424_s22 + $0x1c] sm:$0xf] }
  0x57   : > { %11358 = vmatprep.mubr.bf16.mxu1 %v9989_v7  ;;  %v1029_v22 = vsel %vm12447_vm2, %v1024_v13, %v1028_v0  ;;  %v1042_v23 = vrot.slane %v1040_v14, 5  ;;  %v1046_v24 = vrot.slane %v1044_v15, 4  ;;  %v1567_v1 = vrot.slane %v1565_v56, 4  ;;  %v1472_v13 = vld [vmem:[%s12424_s22 + $0x20] sm:$0x1] }
  0x58   : > { %v9990_v29 = vcombine.low %v1019_v18, %v1029_v22  ;;  %v1072_v59 = vrot.slane %v1071_v48, 4  ;;  %v1067_v63 = vsel %vm12447_vm2, %v1062_v55, %v1066_v42  ;;  %v1566_v0 = vsel %vm12629_vm5, %v10001_v53, %v1565_v56  ;;  %v1473_v18 = vld [vmem:[%s12424_s22 + $0x24] sm:$0xe]  ;;  %v1478_v39 = vld [vmem:[%s12424_s22 + $0x38] sm:$0x1] }
  0x59   : > { %v1047_v33 = vor.u32 %v1046_v24, %v1042_v23  ;;  %v1572_v2 = vrot.slane %v1468_v60, 5  ;;  %v1575_v4 = vrot.slane %v1469_v61, 5  ;;  %v10003_v15 = vrot.slane %v1470_v11, 9  ;;  %v12194_v24 = vld [vmem:[%s12424_s22 + $0x18] sm:$0xff]   ;;  %v1480_v45 = vld [vmem:[%s12424_s22 + $0x40] sm:$0xf] }
  0x5a   : > { %v1077_v3 = vsel %vm12447_vm2, %v1072_v59, %v1076_v49  ;;  %v1579_v16 = vrot.slane %v1471_v12, 5  ;;  %v10004_v22 = vrot.slane %v1473_v18, 9  ;;  %v1589_v28 = vrot.slane %v1475_v21, 5  ;;  %v1479_v43 = vld [vmem:[%s12424_s22 + $0x3c] sm:$0xe]  ;;  %v12201_v53 = vld [vmem:[%s15750_s1 + $0x120] sm:$0xff]  }
  0x5b   : > { %v1048_v41 = vrot.slane %v1047_v33, 4  ;;  %v9992_v6 = vcombine.low %v1067_v63, %v1077_v3  ;;  %v1573_v8 = vsel %vm12629_vm5, %v10002_v62, %v1572_v2  ;;  %v1574_v9 = vrot.slane %v1572_v2, 4  ;;  %v1481_v46 = vld [vmem:[%s12424_s22 + $0x44] sm:$0x1]  ;;  %v12199_v59 = vld [vmem:[%s12424_s22 + $0x3c] sm:$0xff]  }
  0x5c   : > { %11311 = vmatmul.mubr.bf16.gmra.mxu0 %v12183_v44  ;;  %v1043_v44 = vsel %vm12447_vm2, %v1038_v38, %v1042_v23  ;;  %v12195_v23 = vld [vmem:[%s15750_s1 + $0x130] sm:$0xff]   ;;  %v1581_v26 = vrot.slane %v1579_v16, 4  ;;  %v10005_v40 = vrot.slane %v1476_v36, 9  ;;  %v1596_v42 = vrot.slane %v1478_v39, 5  ;;  %v1482_v60 = vld [vmem:[%s12424_s22 + $0x48] sm:$0xe] }
  0x5d   : > { %11314 = vmatprep.mubr.bf16.mxu0 %v12187_v51  ;;  %11359 = vmatmul.mubr.bf16.gmra.mxu1 %v9990_v29  ;;  %v1053_v47 = vsel %vm12447_vm2, %v1048_v41, %v1052_v25  ;;  %v1466_v51 = vld [vmem:[%s12424_s22 + $0x8] sm:$0x1]  ;;  %v1576_v14 = vsel %vm12629_vm5, %v1574_v9, %v1575_v4  ;;  %v1580_v25 = vsel %vm12629_vm5, %v10003_v15, %v1579_v16  ;;  %v1586_v29 = vrot.slane %v1474_v20, 5  ;;  %v1477_v38 = vld [vmem:[%s12424_s22 + $0x34] sm:$0xf]  ;;  %v12207_v4 = vld [vmem:[%s15750_s1 + $0x178] sm:$0xff]  }
  0x5e   : > { %v9991_v54 = vcombine.low %v1043_v44, %v1053_v47  ;;  %v1568_v57 = vrot.slane %v1466_v51, 5  ;;  %v10034_v19 = vcombine.low %v1573_v8, %v1576_v14  ;;  %v1593_v41 = vrot.slane %v1477_v38, 5  ;;  %v1483_v61 = vld [vmem:[%s12424_s22 + $0x4c] sm:$0xf]  ;;  %v1484_v62 = vld [vmem:[%s12424_s22 + $0x50] sm:$0x1]  ;;  %11510 = vmatprep.subr.bf16.mxu1 %v12207_v4 }
  0x5f   : > { %v1587_v32 = vsel %vm12629_vm5, %v10004_v22, %v1586_v29  ;;  %v1588_v33 = vrot.slane %v1586_v29, 4  ;;  %v10006_v47 = vrot.slane %v1479_v43, 9  ;;  %v1600_v50 = vrot.slane %v1480_v45, 5  ;;  %v1485_v3 = vld [vmem:[%s12424_s22 + $0x54] sm:$0xe]  ;;  %v12204_v8 = vld [vmem:[%s15750_s1 + $0x118] sm:$0xff]  }
  0x60   : > { %11362 = vmatprep.mubr.bf16.mxu1 %v9991_v54  ;;  %v1569_v7 = vsel %vm12629_vm5, %v1567_v1, %v1568_v57  ;;  %v1594_v48 = vsel %vm12629_vm5, %v10005_v40, %v1593_v41  ;;  %v1595_v49 = vrot.slane %v1593_v41, 4  ;;  %v1603_v51 = vrot.slane %v1481_v46, 5  ;;  %v12197_v54 = vld [vmem:[%s12424_s22 + $0x30] sm:$0xff]   ;;  %v1489_v20 = vld [vmem:[%s12424_s22 + $0x64] sm:$0xf]  ;;  %v12200_v22 = vld [vmem:[%s12424_s22 + $0x48] sm:$0xff]  }
  0x61   : > { %v10033_v10 = vcombine.low %v1566_v0, %v1569_v7  ;;  %v1602_v56 = vrot.slane %v1600_v50, 4  ;;  %v1601_v58 = vsel %vm12629_vm5, %v10006_v47, %v1600_v50  ;;  %v10007_v0 = vrot.slane %v1482_v60, 9  ;;  %v1490_v21 = vld [vmem:[%s12424_s22 + $0x68] sm:$0x1]  ;;  %v12213_v39 = vld [vmem:[%s15750_s1 + $0x160] sm:$0xff]  }
  0x62   : > { %v1597_v55 = vsel %vm12629_vm5, %v1595_v49, %v1596_v42  ;;  %v1607_v1 = vrot.slane %v1483_v61, 5  ;;  %v1610_v2 = vrot.slane %v1484_v62, 5  ;;  %v10008_v7 = vrot.slane %v1485_v3, 9  ;;  %v12214_v42 = vld [vmem:[%s15750_s1 + $0x108] sm:$0xff]   ;;  %v1494_v45 = vld [vmem:[%s12424_s22 + $0x78] sm:$0xe] }
  0x63   : > { %v10037_v57 = vcombine.low %v1594_v48, %v1597_v55  ;;  %v1604_v63 = vsel %vm12629_vm5, %v1602_v56, %v1603_v51  ;;  %v1495_v46 = vld [vmem:[%s12424_s22 + $0x7c] sm:$0xf]  ;;  %v1496_v47 = vld [vmem:[%s12424_s22 + $0x80] sm:$0x1]  ;;  %v10011_v48 = vrot.slane %v1494_v45, 9  ;;  %v12205_v56 = vld [vmem:[%s12424_s22 + $0x6c] sm:$0xff]  }
  0x64   : > { %11315 = vmatmul.mubr.bf16.gmra.mxu0 %v12188_v17  ;;  %v1582_v17 = vrot.slane %v1472_v13, 5  ;;  %v1608_v9 = vsel %vm12629_vm5, %v10007_v0, %v1607_v1  ;;  %v12208_v13 = vld [vmem:[%s15750_s1 + $0x170] sm:$0xff]   ;;  %v10038_v14 = vcombine.low %v1601_v58, %v1604_v63  ;;  %v1635_v49 = vrot.slane %v1495_v46, 5  ;;  %v1497_v50 = vld [vmem:[%s12424_s22 + $0x84] sm:$0xe] }
  0x65   : > { %11363 = vmatmul.mubr.bf16.gmra.mxu1 %v9992_v6  ;;  %11382 = vmatprep.mubr.bf16.mxu0 %v10033_v10  ;;  %v1487_v6 = vld [vmem:[%s12424_s22 + $0x5c] sm:$0x1]  ;;  %v1609_v10 = vrot.slane %v1607_v1, 4  ;;  %v12203_v51 = vld [vmem:[%s12424_s22 + $0x60] sm:$0xff]   ;;  %v1499_v55 = vld [vmem:[%s12424_s22 + $0x8c] sm:$0x1] }
  0x66   : > { %11430 = vmatprep.mubr.bf16.mxu1 %v12193_v5  ;;  %v1583_v31 = vsel %vm12629_vm5, %v1581_v26, %v1582_v17  ;;  %v1486_v5 = vld [vmem:[%s12424_s22 + $0x58] sm:$0xf]  ;;  %v1617_v12 = vrot.slane %v1487_v6, 5  ;;  %v12209_v17 = vld [vmem:[%s15750_s1 + $0x110] sm:$0xff]   ;;  %v1491_v26 = vld [vmem:[%s12424_s22 + $0x6c] sm:$0xe]  ;;  %v1636_v62 = vsel %vm12629_vm5, %v10011_v48, %v1635_v49 }
  0x67   : > { %v10035_v35 = vcombine.low %v1580_v25, %v1583_v31  ;;  %v1614_v11 = vrot.slane %v1486_v5, 5  ;;  %v1611_v15 = vsel %vm12629_vm5, %v1609_v10, %v1610_v2  ;;  %v1624_v25 = vrot.slane %v1490_v21, 5  ;;  %v1493_v31 = vld [vmem:[%s12424_s22 + $0x74] sm:$0x1]  ;;  %v1500_v3 = vld [vmem:[%s12424_s22 + $0x90] sm:$0xe] }
  0x68   : > { %v10039_v18 = vcombine.low %v1608_v9, %v1611_v15  ;;  %v1631_v38 = vrot.slane %v1493_v31, 5  ;;  %v10012_v58 = vrot.slane %v1497_v50, 9  ;;  %v1645_v1 = vrot.slane %v1499_v55, 5  ;;  %v1502_v6 = vld [vmem:[%s12424_s22 + $0x98] sm:$0x1]  ;;  %v12218_v21 = vld [vmem:[%s15750_s1 + $0x150] sm:$0xff]  }
  0x69   : > { %v1616_v16 = vrot.slane %v1614_v11, 4  ;;  %v1615_v29 = vsel %vm12629_vm5, %v10008_v7, %v1614_v11  ;;  %v1652_v9 = vrot.slane %v1502_v6, 5  ;;  %v1503_v10 = vld [vmem:[%s12424_s22 + $0x9c] sm:$0xe]  ;;  %v1504_v11 = vld [vmem:[%s12424_s22 + $0xa0] sm:$0xf] }
  0x6a   : > { %v1656_v15 = vrot.slane %v1504_v11, 5  ;;  %v12222_v50 = vld [vmem:[%s15750_s1 + $0x148] sm:$0xff]   ;;  %v10130_v55 = vld [vmem:[%s12424_s22 + $0x10] sm:$0xf] }
  0x6c   : > { %11383 = vmatmul.mubr.bf16.vlgmr.msra.gmra.mxu0 %v10034_v19  ;;  %v1488_v19 = vld [vmem:[%s12424_s22 + $0x60] sm:$0xe] }
  0x6d   : > { %11463 = vmatpush3.bf16.msra.mxu0 %v12617_v27  ;;  %v1590_v27 = vsel %vm12629_vm5, %v1588_v33, %v1589_v28  ;;  %11386 = vmatprep.mubr.bf16.mxu0 %v10035_v35  ;;  %v12202_v28 = vld [vmem:[%s12424_s22 + $0x54] sm:$0xff]   ;;  %v12212_v33 = vld [vmem:[%s15750_s1 + $0x168] sm:$0xff]  }
  0x6e   : > { %11464 = vmatprep.subr.bf16.mxu0 %v12195_v23  ;;  %v10036_v44 = vcombine.low %v1587_v32, %v1590_v27  ;;  %11431 = vmatmul.mubr.bf16.vlgmr.msra.gmra.mxu1 %v12194_v24  ;;  %v1621_v24 = vrot.slane %v1489_v20, 5  ;;  %v10010_v32 = vrot.slane %v1491_v26, 9  ;;  %v10014_v20 = vrot.slane %v1503_v10, 9  ;;  %v1507_v26 = vld [vmem:[%s12424_s22 + $0xac] sm:$0xf] }
  0x6f   : > { %11434 = vmatprep.mubr.bf16.mxu1 %v12196_v30  ;;  %11511 = vmatpush3.bf16.msra.mxu1 %v12207_v4  ;;  %v1492_v30 = vld [vmem:[%s12424_s22 + $0x70] sm:$0xf]  ;;  %v1501_v4 = vld [vmem:[%s12424_s22 + $0x94] sm:$0xf] }
  0x70   : > { %11512 = vmatprep.subr.bf16.mxu1 %v12208_v13  ;;  %v1623_v35 = vrot.slane %v1621_v24, 4  ;;  %v1628_v36 = vrot.slane %v1492_v30, 5  ;;  %v1649_v7 = vrot.slane %v1501_v4, 5  ;;  %v1508_v30 = vld [vmem:[%s12424_s22 + $0xb0] sm:$0x1] }
  0x71   : > { %11465 = vmatpush3.bf16.msra.mxu0 %v12195_v23  ;;  %v10009_v23 = vrot.slane %v1488_v19, 9  ;;  %v12210_v19 = vld [vmem:[%s12424_s22 + $0x84] sm:$0xff]  }
  0x72   : > { %11466 = vmatprep.subr.bf16.mxu0 %v12198_v34  ;;  %v1625_v40 = vsel %vm12629_vm5, %v1623_v35, %v1624_v25  ;;  %v1630_v41 = vrot.slane %v1628_v36, 4  ;;  %v1629_v60 = vsel %vm12629_vm5, %v10010_v32, %v1628_v36  ;;  %v1506_v25 = vld [vmem:[%s12424_s22 + $0xa8] sm:$0xe]  ;;  %v1663_v32 = vrot.slane %v1507_v26, 5  ;;  %v1510_v35 = vld [vmem:[%s12424_s22 + $0xb8] sm:$0xf] }
  0x73   : > { %11513 = vmatpush3.bf16.msra.mxu1 %v12208_v13  ;;  %v1622_v27 = vsel %vm12629_vm5, %v10009_v23, %v1621_v24  ;;  %v1651_v13 = vrot.slane %v1649_v7, 4  ;;  %v10015_v31 = vrot.slane %v1506_v25, 9  ;;  %v1511_v36 = vld [vmem:[%s12424_s22 + $0xbc] sm:$0x1] }
  0x74   : > { %11387 = vmatmul.mubr.bf16.gmra.mxu0 %v10036_v44  ;;  %11514 = vmatprep.subr.bf16.mxu1 %v12212_v33  ;;  %v10041_v44 = vcombine.low %v1622_v27, %v1625_v40  ;;  %v1632_v61 = vsel %vm12629_vm5, %v1630_v41, %v1631_v38  ;;  %v1665_v38 = vrot.slane %v1663_v32, 4  ;;  %v1670_v27 = vrot.slane %v1510_v35, 5  ;;  %v12219_v40 = vld [vmem:[%s15750_s1 + $0x100] sm:$0xff]   ;;  %v12211_v41 = vld [vmem:[%s12424_s22 + $0x90] sm:$0xff]   ;;  %v10220_v35 = vld [vmem:[%s12424_s22 + $0x18] sm:$0xe] }
  0x75   : > { %11467 = vmatpush3.bf16.msra.mxu0 %v12198_v34  ;;  %11390 = vmatprep.mubr.bf16.mxu0 %v10037_v57  ;;  %v1618_v34 = vsel %vm12629_vm5, %v1616_v16, %v1617_v12  ;;  %v1637_v57 = vrot.slane %v1635_v49, 4  ;;  %v10042_v2 = vcombine.low %v1629_v60, %v1632_v61  ;;  %v12206_v12 = vld [vmem:[%s12424_s22 + $0x78] sm:$0xff]   ;;  %v1653_v23 = vsel %vm12629_vm5, %v1651_v13, %v1652_v9  ;;  %v12216_v9 = vld [vmem:[%s12424_s22 + $0xa8] sm:$0xff]  }
  0x76   : > { %11468 = vmatprep.subr.bf16.mxu0 %v12201_v53  ;;  %11435 = vmatmul.mubr.bf16.gmra.mxu1 %v12197_v54  ;;  %v10040_v43 = vcombine.low %v1615_v29, %v1618_v34  ;;  %v1498_v54 = vld [vmem:[%s12424_s22 + $0x88] sm:$0xf]  ;;  %v12217_v16 = vld [vmem:[%s15750_s1 + $0x158] sm:$0xff]   ;;  %v1658_v29 = vrot.slane %v1656_v15, 4  ;;  %v1509_v34 = vld [vmem:[%s12424_s22 + $0xb4] sm:$0xe]  ;;  %v1664_v48 = vsel %vm12629_vm5, %v10015_v31, %v1663_v32 }
  0x77   : > { %11438 = vmatprep.mubr.bf16.mxu1 %v12199_v59  ;;  %11515 = vmatpush3.bf16.msra.mxu1 %v12212_v33  ;;  %v1642_v59 = vrot.slane %v1498_v54, 5  ;;  %v10016_v45 = vrot.slane %v1509_v34, 9  ;;  %v1672_v46 = vrot.slane %v1670_v27, 4  ;;  %v10129_v54 = vld [vmem:[%s12424_s22 + $0xc] sm:$0xf]  ;;  %v2574_v60 = vshrl.u32 %v10130_v55, 16 }
  0x78   : > { %11516 = vmatprep.subr.bf16.mxu1 %v12213_v39 }
  0x79   : > { %11469 = vmatpush3.bf16.msra.mxu0 %v12201_v53  ;;  %v1638_v53 = vrot.slane %v1496_v47, 5  ;;  %v1644_v0 = vrot.slane %v1642_v59, 4  ;;  %v1673_v47 = vrot.slane %v1511_v36, 5  ;;  %v10221_v36 = vld [vmem:[%s12424_s22 + $0x1c] sm:$0xf] }
  0x7a   : > { %11470 = vmatprep.subr.bf16.mxu0 %v12204_v8 }
  0x7b   : > { %11517 = vmatpush3.bf16.msra.mxu1 %v12213_v39  ;;  %v1639_v63 = vsel %vm12629_vm5, %v1637_v57, %v1638_v53  ;;  %v1666_v39 = vrot.slane %v1508_v30, 5  ;;  %v12223_v53 = vld [vmem:[%s15750_s1 + $0x140] sm:$0xff]   ;;  %v2561_v57 = vshrl.u32 %v10129_v54, 16  ;;  %v10219_v30 = vld [vmem:[%s12424_s22 + $0x14] sm:$0x1] }
  0x7c   : > { %11391 = vmatmul.mubr.bf16.gmra.mxu0 %v10038_v14  ;;  %v10043_v5 = vcombine.low %v1636_v62, %v1639_v63  ;;  %v1505_v14 = vld [vmem:[%s12424_s22 + $0xa4] sm:$0x1]  ;;  %11518 = vmatprep.subr.bf16.mxu1 %v12217_v16  ;;  %v12806_v62 = vsel %vm12629_vm5, %v10016_v45, %v1670_v27  ;;  %v12810_v63 = vsel %vm12629_vm5, %v1672_v46, %v1673_v47  ;;  %v3431_v34 = vrot.slane %v10219_v30, 5  ;;  %v10136_v47 = vld [vmem:[%s12424_s22 + $0x28] sm:$0xf] }
  0x7d   : > { %11394 = vmatprep.mubr.bf16.mxu0 %v10039_v18  ;;  %11471 = vmatpush3.bf16.msra.mxu0 %v12204_v8  ;;  %v10013_v8 = vrot.slane %v1500_v3, 9  ;;  %v1646_v18 = vsel %vm12629_vm5, %v1644_v0, %v1645_v1  ;;  %v1667_v49 = vsel %vm12629_vm5, %v1665_v38, %v1666_v39  ;;  %v10132_v1 = vld [vmem:[%s12424_s22 + $0x18] sm:$0xf]  ;;  %v2563_v4 = vrot.slane %v2561_v57, 4 }
  0x7e   : > { %11472 = vmatprep.subr.bf16.mxu0 %v12209_v17  ;;  %11439 = vmatmul.mubr.bf16.gmra.mxu1 %v12200_v22  ;;  %v10047_v61 = vcombine.low %v1664_v48, %v1667_v49  ;;  %v12817_v3 = vld [vmem:[%s15750_s1 + $0x1b8] sm:$0xff]   ;;  %v2585_v11 = vshrl.u32 %v10132_v1, 16  ;;  %v10048_v31 = vcombine.low %v12806_v62, %v12810_v63  ;;  %v3435_v49 = vrot.slane %v10221_v36, 5 }
  0x7f   : > { %11442 = vmatprep.mubr.bf16.mxu1 %v12202_v28  ;;  %v1650_v22 = vsel %vm12629_vm5, %v10013_v8, %v1649_v7  ;;  %11519 = vmatpush3.bf16.msra.mxu1 %v12217_v16  ;;  %v1659_v28 = vrot.slane %v1505_v14, 5  ;;  %v2576_v7 = vrot.slane %v2574_v60, 4  ;;  %v10134_v8 = vld [vmem:[%s12424_s22 + $0x20] sm:$0x1]  ;;  %v12220_v14 = vld [vmem:[%s12424_s22 + $0xb4] sm:$0xff]   ;;  %v2618_v57 = vshll.u32 %v10136_v47, 16 }
  0x80   : > { %11520 = vmatprep.subr.bf16.mxu1 %v12218_v21  ;;  %v10045_v33 = vcombine.low %v1650_v22, %v1653_v23  ;;  %v10218_v23 = vld [vmem:[%s12424_s22 + $0x10] sm:$0xf]  ;;  %v3437_v63 = vrot.slane %v3435_v49, 4 }
  0x81   : > { %11473 = vmatpush3.bf16.msra.mxu0 %v12209_v17  ;;  %v1643_v17 = vsel %vm12629_vm5, %v10012_v58, %v1642_v59  ;;  %v2564_v58 = vshll.u32 %v10129_v54, 16  ;;  %v2570_v59 = vshll.u32 %v10130_v55, 16 }
  0x82   : > { %11474 = vmatprep.subr.bf16.mxu0 %v12214_v42  ;;  %v10044_v24 = vcombine.low %v1643_v17, %v1646_v18  ;;  %v2604_v18 = vshll.u32 %v10134_v8, 16  ;;  %v2622_v8 = vshrl.u32 %v10136_v47, 16 }
  0x83   : > { %11521 = vmatpush3.bf16.msra.mxu1 %v12218_v21  ;;  %v2572_v6 = vrot.slane %v2570_v59, 5  ;;  %v10139_v59 = vld [vmem:[%s12424_s22 + $0x34] sm:$0xf] }
  0x84   : > { %11395 = vmatmul.mubr.bf16.gmra.mxu0 %v10040_v43  ;;  %v1660_v43 = vsel %vm12629_vm5, %v1658_v29, %v1659_v28  ;;  %11522 = vmatprep.subr.bf16.mxu1 %v12222_v50  ;;  %v2606_v28 = vrot.slane %v2604_v18, 5  ;;  %v2624_v18 = vrot.slane %v2622_v8, 4 }
  0x85   : > { %11398 = vmatprep.mubr.bf16.mxu0 %v10041_v44  ;;  %11475 = vmatpush3.bf16.msra.mxu0 %v12214_v42  ;;  %v1657_v42 = vsel %vm12629_vm5, %v10014_v20, %v1656_v15  ;;  %v12215_v44 = vld [vmem:[%s12424_s22 + $0x9c] sm:$0xff]   ;;  %v2577_v16 = vor.u32 %v2576_v7, %v2572_v6  ;;  %v2587_v20 = vrot.slane %v2585_v11, 4  ;;  %v10223_v11 = vld [vmem:[%s12424_s22 + $0x24] sm:$0xe] }
  0x86   : > { %11443 = vmatmul.mubr.bf16.gmra.mxu1 %v12203_v51  ;;  %11476 = vmatprep.subr.bf16.mxu0 %v12219_v40  ;;  %v10046_v51 = vcombine.low %v1657_v42, %v1660_v43  ;;  %v10135_v42 = vld [vmem:[%s12424_s22 + $0x24] sm:$0xf] }
  0x87   : > { %11446 = vmatprep.mubr.bf16.mxu1 %v12205_v56  ;;  %v10131_v56 = vld [vmem:[%s12424_s22 + $0x14] sm:$0x1]  ;;  %11523 = vmatpush3.bf16.msra.mxu1 %v12222_v50  ;;  %v2578_v26 = vrot.slane %v2577_v16, 4  ;;  %v10224_v16 = vld [vmem:[%s12424_s22 + $0x28] sm:$0xf] }
  0x88   : > { %v2580_v0 = vshll.u32 %v10131_v56, 16  ;;  %11524 = vmatprep.subr.bf16.mxu1 %v12223_v53  ;;  %v2612_v56 = vshll.u32 %v10135_v42, 16 }
  0x89   : > { %11477 = vmatpush3.bf16.msra.mxu0 %v12219_v40  ;;  %v10222_v40 = vld [vmem:[%s12424_s22 + $0x20] sm:$0x1] }
  0x8a   : > { %v2582_v10 = vrot.slane %v2580_v0, 5  ;;  %11558 = vmatprep.subr.bf16.mxu0 %v12817_v3  ;;  %v3438_v50 = vrot.slane %v10222_v40, 5  ;;  %v12221_v0 = vld [vmem:[%s12424_s22 + $0xc0] sm:$0xff]   ;;  %v10141_v40 = vld [vmem:[%s12424_s22 + $0x3c] sm:$0xf] }
  0x8b   : > { %11525 = vmatpush3.bf16.msra.mxu1 %v12223_v53  ;;  %v2609_v53 = vshrl.u32 %v10135_v42, 16 }
  0x8c   : > { %11399 = vmatmul.mubr.bf16.gmra.mxu0 %v10042_v2  ;;  %v10133_v2 = vld [vmem:[%s12424_s22 + $0x1c] sm:$0xf]  ;;  %v2583_v39 = vsel %vm12447_vm2, %v2578_v26, %v2582_v10  ;;  %v12856_v7 = vsel %vm12629_vm5, %v3437_v63, %v3438_v50  ;;  %v10143_v50 = vld [vmem:[%s12424_s22 + $0x44] sm:$0x1] }
  0x8d   : > { %11402 = vmatprep.mubr.bf16.mxu0 %v10043_v5  ;;  %v2566_v5 = vrot.slane %v2564_v58, 5  ;;  %v2594_v13 = vshll.u32 %v10133_v2, 16  ;;  %v2598_v17 = vshrl.u32 %v10133_v2, 16  ;;  %v10138_v58 = vld [vmem:[%s12424_s22 + $0x30] sm:$0xf]  ;;  %v2611_v2 = vrot.slane %v2609_v53, 4 }
  0x8e   : > { %11447 = vmatmul.mubr.bf16.gmra.mxu1 %v12206_v12  ;;  %v2588_v12 = vshll.u32 %v10132_v1, 16  ;;  %v2633_v10 = vshrl.u32 %v10138_v58, 16  ;;  %v2676_v8 = vshll.u32 %v10143_v50, 16 }
  0x8f   : > { %11450 = vmatprep.mubr.bf16.mxu1 %v12210_v19  ;;  %v2567_v15 = vor.u32 %v2566_v5, %v2563_v4  ;;  %v10217_v19 = vld [vmem:[%s12424_s22 + $0xc] sm:$0xe]  ;;  %v2596_v22 = vrot.slane %v2594_v13, 5  ;;  %v2600_v29 = vrot.slane %v2598_v17, 4  ;;  %v2614_v4 = vrot.slane %v2612_v56, 5 }
  0x90   : > { %v2590_v21 = vrot.slane %v2588_v12, 5  ;;  %v2620_v5 = vrot.slane %v2618_v57, 5  ;;  %v10225_v17 = vld [vmem:[%s12424_s22 + $0x2c] sm:$0x1] }
  0x91   : > { %v2568_v25 = vrot.slane %v2567_v15, 4  ;;  %v2601_v27 = vor.u32 %v2600_v29, %v2596_v22  ;;  %v2615_v13 = vor.u32 %v2614_v4, %v2611_v2  ;;  %v2642_v15 = vshll.u32 %v10139_v59, 16  ;;  %v10146_v2 = vld [vmem:[%s12424_s22 + $0x50] sm:$0x1] }
  0x92   : > { %v2591_v32 = vor.u32 %v2590_v21, %v2587_v20  ;;  %v2635_v20 = vrot.slane %v2633_v10, 4  ;;  %v2646_v21 = vshrl.u32 %v10139_v59, 16  ;;  %v2625_v30 = vor.u32 %v2624_v18, %v2620_v5  ;;  %v10144_v59 = vld [vmem:[%s12424_s22 + $0x48] sm:$0xf]  ;;  %v12230_v4 = vld [vmem:[%s15750_s1 + $0x1f0] sm:$0xff]  }
  0x93   : > { %v2573_v38 = vsel %vm12447_vm2, %v2568_v25, %v2572_v6  ;;  %v2602_v48 = vrot.slane %v2601_v27, 4  ;;  %v10140_v6 = vld [vmem:[%s12424_s22 + $0x38] sm:$0x1]  ;;  %v2644_v26 = vrot.slane %v2642_v15, 5  ;;  %v3445_v27 = vrot.slane %v10225_v17, 5 }
  0x94   : > { %11403 = vmatmul.mubr.bf16.gmra.mxu0 %v10044_v24  ;;  %v10265_v24 = vrot.slane %v10217_v19, 9  ;;  %v10193_v43 = vcombine.low %v2573_v38, %v2583_v39  ;;  %v2652_v29 = vshll.u32 %v10140_v6, 16  ;;  %v10230_v15 = vld [vmem:[%s12424_s22 + $0x40] sm:$0xf]  ;;  %v2678_v18 = vrot.slane %v2676_v8, 5 }
  0x95   : > { %11406 = vmatprep.mubr.bf16.mxu0 %v10045_v33  ;;  %v3428_v33 = vrot.slane %v10218_v23, 5  ;;  %v2607_v60 = vsel %vm12447_vm2, %v2602_v48, %v2606_v28  ;;  %v10226_v23 = vld [vmem:[%s12424_s22 + $0x30] sm:$0xe]  ;;  %v10227_v28 = vld [vmem:[%s12424_s22 + $0x34] sm:$0xf] }
  0x96   : > { %11451 = vmatmul.mubr.bf16.gmra.mxu1 %v12211_v41  ;;  %v10266_v41 = vrot.slane %v10220_v35, 9  ;;  %v12229_v35 = vld [vmem:[%s15750_s1 + $0x1f8] sm:$0xff]   ;;  %v2654_v39 = vrot.slane %v2652_v29, 5  ;;  %v10268_v47 = vrot.slane %v10226_v23, 9  ;;  %v3449_v48 = vrot.slane %v10227_v28, 5 }
  0x97   : > { %11454 = vmatprep.mubr.bf16.mxu1 %v12215_v44  ;;  %v2592_v44 = vrot.slane %v2591_v32, 4  ;;  %v3429_v45 = vsel %vm12629_vm5, %v10265_v24, %v3428_v33  ;;  %v3430_v46 = vrot.slane %v3428_v33, 4  ;;  %v2616_v24 = vrot.slane %v2615_v13, 4  ;;  %11606 = vmatprep.subr.bf16.mxu1 %v12229_v35 }
  0x98   : > { %v12850_v62 = vsel %vm12629_vm5, %v10266_v41, %v3435_v49  ;;  %v10267_v32 = vrot.slane %v10223_v11, 9  ;;  %v3442_v33 = vrot.slane %v10224_v16, 5  ;;  %v2626_v41 = vrot.slane %v2625_v30, 4 }
  0x99   : > { %v2597_v54 = vsel %vm12447_vm2, %v2592_v44, %v2596_v22  ;;  %v3432_v55 = vsel %vm12629_vm5, %v3430_v46, %v3431_v34  ;;  %v10298_v12 = vcombine.low %v12850_v62, %v12856_v7  ;;  %v12225_v22 = vld [vmem:[%s15750_s1 + $0x1b0] sm:$0xff]   ;;  %v10228_v34 = vld [vmem:[%s12424_s22 + $0x38] sm:$0x1]  ;;  %v2621_v36 = vsel %vm12447_vm2, %v2616_v24, %v2620_v5 }
  0x9a   : > { %v10194_v1 = vcombine.low %v2597_v54, %v2607_v60  ;;  %v3444_v44 = vrot.slane %v3442_v33, 4  ;;  %v3452_v49 = vrot.slane %v10228_v34, 5  ;;  %v10145_v60 = vld [vmem:[%s12424_s22 + $0x4c] sm:$0xf]  ;;  %v3451_v63 = vrot.slane %v3449_v48, 4 }
  0x9b   : > { %v2681_v13 = vshrl.u32 %v10144_v59, 16  ;;  %v2690_v24 = vshll.u32 %v10145_v60, 16  ;;  %v2694_v28 = vshrl.u32 %v10145_v60, 16  ;;  %v2700_v30 = vshll.u32 %v10146_v2, 16 }
  0x9c   : > { %11407 = vmatmul.mubr.bf16.gmra.mxu0 %v10046_v51  ;;  %v10137_v51 = vld [vmem:[%s12424_s22 + $0x2c] sm:$0x1]  ;;  %v3446_v54 = vsel %vm12629_vm5, %v3444_v44, %v3445_v27  ;;  %v3453_v10 = vsel %vm12629_vm5, %v3451_v63, %v3452_v49 }
  0x9d   : > { %11410 = vmatprep.mubr.bf16.mxu0 %v10047_v61  ;;  %v10297_v61 = vcombine.low %v3429_v45, %v3432_v55  ;;  %v10142_v45 = vld [vmem:[%s12424_s22 + $0x40] sm:$0xf]  ;;  %v2657_v55 = vshrl.u32 %v10141_v40, 16 }
  0x9e   : > { %11455 = vmatmul.mubr.bf16.gmra.mxu1 %v12216_v9  ;;  %v2628_v9 = vshll.u32 %v10137_v51, 16  ;;  %v2666_v6 = vshll.u32 %v10142_v45, 16  ;;  %v2670_v7 = vshrl.u32 %v10142_v45, 16 }
  0x9f   : > { %11458 = vmatprep.mubr.bf16.mxu1 %v12220_v14  ;;  %v2636_v14 = vshll.u32 %v10138_v58, 16  ;;  %v12888_v58 = vsel %vm12629_vm5, %v10268_v47, %v3449_v48  ;;  %v12233_v48 = vld [vmem:[%s15750_s1 + $0x1e0] sm:$0xff]  }
  0xa0   : > { %v2630_v19 = vrot.slane %v2628_v9, 5  ;;  %v10229_v9 = vld [vmem:[%s12424_s22 + $0x3c] sm:$0xe]  ;;  %v10300_v16 = vcombine.low %v12888_v58, %v3453_v10  ;;  %v2672_v17 = vrot.slane %v2670_v7, 4  ;;  %v10149_v58 = vld [vmem:[%s12424_s22 + $0x5c] sm:$0x1] }
  0xa1   : > { %v2638_v25 = vrot.slane %v2636_v14, 5  ;;  %v2684_v14 = vshll.u32 %v10144_v59, 16  ;;  %v10150_v59 = vld [vmem:[%s12424_s22 + $0x60] sm:$0xf]  ;;  %v10151_v10 = vld [vmem:[%s12424_s22 + $0x64] sm:$0xf] }
  0xa2   : > { %v2631_v51 = vsel %vm12447_vm2, %v2626_v41, %v2630_v19  ;;  %v10231_v19 = vld [vmem:[%s12424_s22 + $0x44] sm:$0x1]  ;;  %v2702_v41 = vrot.slane %v2700_v30, 5  ;;  %v10238_v30 = vld [vmem:[%s12424_s22 + $0x60] sm:$0xe] }
  0xa3   : > { %v2639_v38 = vor.u32 %v2638_v25, %v2635_v20  ;;  %v10195_v56 = vcombine.low %v2621_v36, %v2631_v51  ;;  %v12227_v20 = vld [vmem:[%s15750_s1 + $0x1a0] sm:$0xff]   ;;  %v2686_v23 = vrot.slane %v2684_v14, 5  ;;  %v10232_v25 = vld [vmem:[%s12424_s22 + $0x48] sm:$0xe]  ;;  %v3456_v36 = vrot.slane %v10230_v15, 5 }
  0xa4   : > { %11411 = vmatmul.mubr.bf16.gmra.mxu0 %v10048_v31  ;;  %v2648_v31 = vrot.slane %v2646_v21, 4  ;;  %v10270_v51 = vrot.slane %v10232_v25, 9  ;;  %v12234_v14 = vld [vmem:[%s15750_s1 + $0x188] sm:$0xff]  }
  0xa5   : > { %11478 = vmatprep.mubr.bf16.mxu0 %v10193_v43  ;;  %v3443_v43 = vsel %vm12629_vm5, %v10267_v32, %v3442_v33  ;;  %v2640_v46 = vrot.slane %v2639_v38, 4  ;;  %v10233_v32 = vld [vmem:[%s12424_s22 + $0x4c] sm:$0xf]  ;;  %v10234_v38 = vld [vmem:[%s12424_s22 + $0x50] sm:$0x1]  ;;  %v3458_v47 = vrot.slane %v3456_v36, 4 }
  0xa6   : > { %11459 = vmatmul.mubr.bf16.gmra.mxu1 %v12221_v0  ;;  %v2649_v42 = vor.u32 %v2648_v31, %v2644_v26  ;;  %v10299_v57 = vcombine.low %v3443_v43, %v3446_v54  ;;  %v2659_v0 = vrot.slane %v2657_v55, 4  ;;  %v10269_v31 = vrot.slane %v10229_v9, 9  ;;  %v10147_v43 = vld [vmem:[%s12424_s22 + $0x54] sm:$0xf]  ;;  %v10148_v54 = vld [vmem:[%s12424_s22 + $0x58] sm:$0xf] }
  0xa7   : > { %11526 = vmatprep.mubr.bf16.mxu1 %v10297_v61  ;;  %v12226_v61 = vld [vmem:[%s15750_s1 + $0x1a8] sm:$0xff]   ;;  %v2708_v2 = vshll.u32 %v10147_v43, 16  ;;  %v2724_v9 = vshll.u32 %v10149_v58, 16  ;;  %v10155_v58 = vld [vmem:[%s12424_s22 + $0x74] sm:$0x1] }
  0xa8   : > { %v2650_v53 = vrot.slane %v2649_v42, 4  ;;  %v3459_v42 = vrot.slane %v10231_v19, 5  ;;  %v10236_v19 = vld [vmem:[%s12424_s22 + $0x58] sm:$0xf] }
  0xaa   : > { %v2655_v62 = vsel %vm12447_vm2, %v2650_v53, %v2654_v39  ;;  %v12228_v39 = vld [vmem:[%s15750_s1 + $0x198] sm:$0xff]   ;;  %v3463_v53 = vrot.slane %v10233_v32, 5  ;;  %v10240_v32 = vld [vmem:[%s12424_s22 + $0x68] sm:$0x1] }
  0xac   : > { %11479 = vmatmul.mubr.bf16.vlgmr.msra.gmra.mxu0 %v10194_v1  ;;  %v2660_v1 = vshll.u32 %v10141_v40, 16  ;;  %v2696_v40 = vrot.slane %v2694_v28, 4  ;;  %v3465_v63 = vrot.slane %v3463_v53, 4  ;;  %v2742_v28 = vshrl.u32 %v10151_v10, 16 }
  0xad   : > { %11559 = vmatpush3.bf16.msra.mxu0 %v12817_v3  ;;  %v2645_v3 = vsel %vm12447_vm2, %v2640_v46, %v2644_v26  ;;  %11482 = vmatprep.mubr.bf16.mxu0 %v10195_v56  ;;  %v12232_v26 = vld [vmem:[%s15750_s1 + $0x1e8] sm:$0xff]   ;;  %v3457_v46 = vsel %vm12629_vm5, %v10269_v31, %v3456_v36  ;;  %v10239_v31 = vld [vmem:[%s12424_s22 + $0x64] sm:$0xf] }
  0xae   : > { %11560 = vmatprep.subr.bf16.mxu0 %v12225_v22  ;;  %11527 = vmatmul.mubr.bf16.vlgmr.msra.gmra.mxu1 %v10298_v12  ;;  %v10196_v5 = vcombine.low %v2645_v3, %v2655_v62  ;;  %v2662_v11 = vrot.slane %v2660_v1, 5  ;;  %v2668_v12 = vrot.slane %v2666_v6, 5  ;;  %v3460_v3 = vsel %vm12629_vm5, %v3458_v47, %v3459_v42  ;;  %v12235_v6 = vld [vmem:[%s15750_s1 + $0x1d8] sm:$0xff]  }
  0xaf   : > { %11530 = vmatprep.mubr.bf16.mxu1 %v10299_v57  ;;  %11607 = vmatpush3.bf16.msra.mxu1 %v12229_v35  ;;  %v2692_v35 = vrot.slane %v2690_v24, 5  ;;  %v3466_v57 = vrot.slane %v10234_v38, 5  ;;  %v3464_v62 = vsel %vm12629_vm5, %v10270_v51, %v3463_v53  ;;  %v2705_v1 = vshrl.u32 %v10147_v43, 16  ;;  %v10237_v24 = vld [vmem:[%s12424_s22 + $0x5c] sm:$0x1] }
  0xb0   : > { %v2663_v21 = vor.u32 %v2662_v11, %v2659_v0  ;;  %11608 = vmatprep.subr.bf16.mxu1 %v12230_v4  ;;  %v2673_v29 = vor.u32 %v2672_v17, %v2668_v12  ;;  %v12231_v0 = vld [vmem:[%s15750_s1 + $0x190] sm:$0xff]   ;;  %v10152_v11 = vld [vmem:[%s12424_s22 + $0x68] sm:$0x1]  ;;  %v2710_v17 = vrot.slane %v2708_v2, 5  ;;  %v3470_v38 = vrot.slane %v10236_v19, 5 }
  0xb1   : > { %11561 = vmatpush3.bf16.msra.mxu0 %v12225_v22  ;;  %v2683_v22 = vrot.slane %v2681_v13, 4  ;;  %v2697_v50 = vor.u32 %v2696_v40, %v2692_v35  ;;  %v3467_v8 = vsel %vm12629_vm5, %v3465_v63, %v3466_v57  ;;  %v2729_v13 = vshrl.u32 %v10150_v59, 16  ;;  %v10153_v51 = vld [vmem:[%s12424_s22 + $0x6c] sm:$0xf]  ;;  %v10154_v53 = vld [vmem:[%s12424_s22 + $0x70] sm:$0xf] }
  0xb2   : > { %11562 = vmatprep.subr.bf16.mxu0 %v12226_v61  ;;  %v2664_v33 = vrot.slane %v2663_v21, 4  ;;  %v2674_v27 = vrot.slane %v2673_v29, 4  ;;  %v2738_v29 = vshll.u32 %v10151_v10, 16  ;;  %v3480_v57 = vrot.slane %v10240_v32, 5  ;;  %v10156_v63 = vld [vmem:[%s12424_s22 + $0x78] sm:$0xf] }
  0xb3   : > { %v2687_v34 = vor.u32 %v2686_v23, %v2683_v22  ;;  %11609 = vmatpush3.bf16.msra.mxu1 %v12230_v4  ;;  %v2698_v60 = vrot.slane %v2697_v50, 4  ;;  %v2714_v4 = vshll.u32 %v10148_v54, 16  ;;  %v2726_v22 = vrot.slane %v2724_v9, 5 }
  0xb4   : > { %11483 = vmatmul.mubr.bf16.gmra.mxu0 %v10196_v5  ;;  %v2669_v44 = vsel %vm12447_vm2, %v2664_v33, %v2668_v12  ;;  %11610 = vmatprep.subr.bf16.mxu1 %v12232_v26  ;;  %v2679_v49 = vsel %vm12447_vm2, %v2674_v27, %v2678_v18  ;;  %v2718_v5 = vshrl.u32 %v10148_v54, 16  ;;  %v2707_v12 = vrot.slane %v2705_v1, 4  ;;  %v10235_v18 = vld [vmem:[%s12424_s22 + $0x54] sm:$0xe]  ;;  %v12238_v54 = vld [vmem:[%s15750_s1 + $0x1c8] sm:$0xff]   ;;  %v12239_v1 = vld [vmem:[%s15750_s1 + $0x1c0] sm:$0xff]  }
  0xb5   : > { %11563 = vmatpush3.bf16.msra.mxu0 %v12226_v61  ;;  %v2688_v45 = vrot.slane %v2687_v34, 4  ;;  %v10197_v55 = vcombine.low %v2669_v44, %v2679_v49  ;;  %v10301_v61 = vcombine.low %v3457_v46, %v3460_v3  ;;  %v2703_v7 = vsel %vm12447_vm2, %v2698_v60, %v2702_v41  ;;  %v12236_v33 = vld [vmem:[%s15750_s1 + $0x1d0] sm:$0xff]   ;;  %v12237_v46 = vld [vmem:[%s15750_s1 + $0x180] sm:$0xff]  }
  0xb6   : > { %11564 = vmatprep.subr.bf16.mxu0 %v12227_v20  ;;  %11531 = vmatmul.mubr.bf16.gmra.mxu1 %v10300_v16  ;;  %v10302_v16 = vcombine.low %v3464_v62, %v3467_v8  ;;  %v2720_v21 = vrot.slane %v2718_v5, 4  ;;  %v2731_v23 = vrot.slane %v2729_v13, 4  ;;  %v2711_v25 = vor.u32 %v2710_v17, %v2707_v12  ;;  %v10241_v12 = vld [vmem:[%s12424_s22 + $0x6c] sm:$0xe]  ;;  %v12997_v17 = vld [vmem:[%s15750_s1 + $0x238] sm:$0xff]  }
  0xb7   : > { %v2693_v56 = vsel %vm12447_vm2, %v2688_v45, %v2692_v35  ;;  %11611 = vmatpush3.bf16.msra.mxu1 %v12232_v26  ;;  %11486 = vmatprep.mubr.bf16.mxu0 %v10197_v55  ;;  %v2732_v26 = vshll.u32 %v10150_v59, 16  ;;  %v2748_v35 = vshll.u32 %v10152_v11, 16  ;;  %v10271_v36 = vrot.slane %v10235_v18, 9 }
  0xb8   : > { %11612 = vmatprep.subr.bf16.mxu1 %v12233_v48  ;;  %11534 = vmatprep.mubr.bf16.mxu1 %v10301_v61  ;;  %v10198_v15 = vcombine.low %v2693_v56, %v2703_v7  ;;  %v2740_v40 = vrot.slane %v2738_v29, 5  ;;  %v2744_v41 = vrot.slane %v2742_v28, 4  ;;  %v3472_v45 = vrot.slane %v3470_v38, 4  ;;  %v10158_v7 = vld [vmem:[%s12424_s22 + $0x80] sm:$0x1] }
  0xb9   : > { %11565 = vmatpush3.bf16.msra.mxu0 %v12227_v20  ;;  %v2716_v20 = vrot.slane %v2714_v4, 5  ;;  %v2734_v27 = vrot.slane %v2732_v26, 5  ;;  %v2750_v43 = vrot.slane %v2748_v35, 5  ;;  %v3471_v44 = vsel %vm12629_vm5, %v10271_v36, %v3470_v38  ;;  %v10243_v29 = vld [vmem:[%s12424_s22 + $0x74] sm:$0x1] }
  0xba   : > { %11566 = vmatprep.subr.bf16.mxu0 %v12228_v39  ;;  %v2745_v49 = vor.u32 %v2744_v41, %v2740_v40  ;;  %v3473_v50 = vrot.slane %v10237_v24, 5  ;;  %v10272_v56 = vrot.slane %v10238_v30, 9  ;;  %v3477_v3 = vrot.slane %v10239_v31, 5 }
  0xbb   : > { %11613 = vmatpush3.bf16.msra.mxu1 %v12233_v48  ;;  %v2721_v34 = vor.u32 %v2720_v21, %v2716_v20  ;;  %v2735_v48 = vor.u32 %v2734_v27, %v2731_v23  ;;  %v2756_v10 = vshll.u32 %v10153_v51, 16  ;;  %v2762_v11 = vshll.u32 %v10154_v53, 16 }
  0xbc   : > { %11487 = vmatmul.mubr.bf16.gmra.mxu0 %v10198_v15  ;;  %11614 = vmatprep.subr.bf16.mxu1 %v12235_v6  ;;  %v2746_v61 = vrot.slane %v2745_v49, 4  ;;  %v3474_v62 = vsel %vm12629_vm5, %v3472_v45, %v3473_v50  ;;  %v3478_v4 = vsel %vm12629_vm5, %v10272_v56, %v3477_v3  ;;  %v3479_v5 = vrot.slane %v3477_v3, 4  ;;  %v10246_v49 = vld [vmem:[%s12424_s22 + $0x80] sm:$0x1] }
  0xbd   : > { %11567 = vmatpush3.bf16.msra.mxu0 %v12228_v39  ;;  %v2712_v39 = vrot.slane %v2711_v25, 4  ;;  %v2722_v42 = vrot.slane %v2721_v34, 4  ;;  %v2736_v60 = vrot.slane %v2735_v48, 4  ;;  %v10303_v2 = vcombine.low %v3471_v44, %v3474_v62 }
  0xbe   : > { %11568 = vmatprep.subr.bf16.mxu0 %v12231_v0  ;;  %11535 = vmatmul.mubr.bf16.gmra.mxu1 %v10302_v16  ;;  %v2751_v9 = vsel %vm12447_vm2, %v2746_v61, %v2750_v43  ;;  %v2766_v16 = vshrl.u32 %v10154_v53, 16  ;;  %v2758_v19 = vrot.slane %v2756_v10, 5  ;;  %v2772_v21 = vshll.u32 %v10155_v58, 16  ;;  %v10159_v53 = vld [vmem:[%s12424_s22 + $0x84] sm:$0xf] }
  0xbf   : > { %11615 = vmatpush3.bf16.msra.mxu1 %v12235_v6  ;;  %v2717_v47 = vsel %vm12447_vm2, %v2712_v39, %v2716_v20  ;;  %v2727_v55 = vsel %vm12447_vm2, %v2722_v42, %v2726_v22  ;;  %v2753_v6 = vshrl.u32 %v10153_v51, 16  ;;  %v2741_v8 = vsel %vm12447_vm2, %v2736_v60, %v2740_v40  ;;  %11538 = vmatprep.mubr.bf16.mxu1 %v10303_v2  ;;  %v10242_v22 = vld [vmem:[%s12424_s22 + $0x70] sm:$0xf]  ;;  %v10245_v39 = vld [vmem:[%s12424_s22 + $0x7c] sm:$0xf] }
  0xc0   : > { %11616 = vmatprep.subr.bf16.mxu1 %v12236_v33  ;;  %v10199_v59 = vcombine.low %v2717_v47, %v2727_v55  ;;  %v10200_v13 = vcombine.low %v2741_v8, %v2751_v9  ;;  %v2764_v20 = vrot.slane %v2762_v11, 5  ;;  %v2768_v23 = vrot.slane %v2766_v16, 4  ;;  %v10161_v58 = vld [vmem:[%s12424_s22 + $0x8c] sm:$0x1]  ;;  %v10247_v16 = vld [vmem:[%s12424_s22 + $0x84] sm:$0xe] }
  0xc1   : > { %11569 = vmatpush3.bf16.msra.mxu0 %v12231_v0  ;;  %v10157_v0 = vld [vmem:[%s12424_s22 + $0x7c] sm:$0xf]  ;;  %v2755_v15 = vrot.slane %v2753_v6, 4  ;;  %v2777_v24 = vshrl.u32 %v10156_v63, 16  ;;  %v2780_v25 = vshll.u32 %v10156_v63, 16  ;;  %v2774_v30 = vrot.slane %v2772_v21, 5 }
  0xc2   : > { %11570 = vmatprep.subr.bf16.mxu0 %v12234_v14  ;;  %11490 = vmatprep.mubr.bf16.mxu0 %v10199_v59  ;;  %v2786_v26 = vshll.u32 %v10157_v0, 16  ;;  %v2790_v31 = vshrl.u32 %v10157_v0, 16  ;;  %v2796_v32 = vshll.u32 %v10158_v7, 16  ;;  %v2769_v34 = vor.u32 %v2768_v23, %v2764_v20  ;;  %v10162_v63 = vld [vmem:[%s12424_s22 + $0x90] sm:$0xf] }
  0xc3   : > { %11617 = vmatpush3.bf16.msra.mxu1 %v12236_v33  ;;  %v2759_v28 = vor.u32 %v2758_v19, %v2755_v15  ;;  %v10244_v33 = vld [vmem:[%s12424_s22 + $0x78] sm:$0xe]  ;;  %v2779_v35 = vrot.slane %v2777_v24, 4  ;;  %v2782_v36 = vrot.slane %v2780_v25, 5  ;;  %v10273_v42 = vrot.slane %v10241_v12, 9 }
  0xc4   : > { %11618 = vmatprep.subr.bf16.mxu1 %v12238_v54  ;;  %11491 = vmatmul.mubr.bf16.gmra.mxu0 %v10200_v13  ;;  %v2788_v38 = vrot.slane %v2786_v26, 5  ;;  %v2792_v40 = vrot.slane %v2790_v31, 4  ;;  %v2798_v41 = vrot.slane %v2796_v32, 5  ;;  %v2770_v43 = vrot.slane %v2769_v34, 4  ;;  %v10163_v0 = vld [vmem:[%s12424_s22 + $0x94] sm:$0xf] }
  0xc5   : > { %11571 = vmatpush3.bf16.msra.mxu0 %v12234_v14  ;;  %v3481_v14 = vsel %vm12629_vm5, %v3479_v5, %v3480_v57  ;;  %v2760_v27 = vrot.slane %v2759_v28, 4  ;;  %v2783_v44 = vor.u32 %v2782_v36, %v2779_v35  ;;  %v3484_v45 = vrot.slane %v10242_v22, 5  ;;  %v10160_v57 = vld [vmem:[%s12424_s22 + $0x88] sm:$0xf]  ;;  %v10164_v15 = vld [vmem:[%s12424_s22 + $0x98] sm:$0x1] }
  0xc6   : > { %11572 = vmatprep.subr.bf16.mxu0 %v12237_v46  ;;  %v10304_v18 = vcombine.low %v3478_v4, %v3481_v14  ;;  %v2793_v48 = vor.u32 %v2792_v40, %v2788_v38  ;;  %v10274_v50 = vrot.slane %v10244_v33, 9  ;;  %v3491_v51 = vrot.slane %v10245_v39, 5  ;;  %v10248_v21 = vld [vmem:[%s12424_s22 + $0x88] sm:$0xf]  ;;  %v10249_v26 = vld [vmem:[%s12424_s22 + $0x8c] sm:$0x1] }
  0xc7   : > { %11619 = vmatpush3.bf16.msra.mxu1 %v12238_v54  ;;  %v2765_v47 = vsel %vm12447_vm2, %v2760_v27, %v2764_v20  ;;  %v2775_v54 = vsel %vm12447_vm2, %v2770_v43, %v2774_v30  ;;  %v2784_v55 = vrot.slane %v2783_v44, 4  ;;  %v3485_v56 = vsel %vm12629_vm5, %v10273_v42, %v3484_v45  ;;  %v10250_v32 = vld [vmem:[%s12424_s22 + $0x90] sm:$0xe] }
  0xc8   : > { %11539 = vmatmul.mubr.bf16.gmra.mxu1 %v10304_v18  ;;  %11620 = vmatprep.subr.bf16.mxu1 %v12239_v1  ;;  %v3486_v3 = vrot.slane %v3484_v45, 4  ;;  %v10201_v59 = vcombine.low %v2765_v47, %v2775_v54  ;;  %v2794_v60 = vrot.slane %v2793_v48, 4  ;;  %v3492_v61 = vsel %vm12629_vm5, %v10274_v50, %v3491_v51  ;;  %v10252_v48 = vld [vmem:[%s12424_s22 + $0x98] sm:$0x1] }
  0xc9   : > { %11573 = vmatpush3.bf16.msra.mxu0 %v12237_v46  ;;  %v3487_v46 = vrot.slane %v10243_v29, 5  ;;  %v3493_v62 = vrot.slane %v3491_v51, 4  ;;  %v3494_v4 = vrot.slane %v10246_v49, 5  ;;  %v2801_v5 = vshrl.u32 %v10159_v53, 16  ;;  %v10165_v51 = vld [vmem:[%s12424_s22 + $0x9c] sm:$0xf] }
  0xca   : > { %11654 = vmatprep.subr.bf16.mxu0 %v12997_v17  ;;  %11494 = vmatprep.mubr.bf16.mxu0 %v10201_v59  ;;  %v2799_v6 = vsel %vm12447_vm2, %v2794_v60, %v2798_v41  ;;  %v2804_v8 = vshll.u32 %v10159_v53, 16  ;;  %v2810_v9 = vshll.u32 %v10160_v57, 16  ;;  %v2814_v14 = vshrl.u32 %v10160_v57, 16  ;;  %v10167_v57 = vld [vmem:[%s12424_s22 + $0xa4] sm:$0x1] }
  0xcb   : > { %11621 = vmatpush3.bf16.msra.mxu1 %v12239_v1  ;;  %v2789_v1 = vsel %vm12447_vm2, %v2784_v55, %v2788_v38  ;;  %v3488_v2 = vsel %vm12629_vm5, %v3486_v3, %v3487_v46  ;;  %v3495_v11 = vsel %vm12629_vm5, %v3493_v62, %v3494_v4  ;;  %v2803_v13 = vrot.slane %v2801_v5, 4  ;;  %v10251_v38 = vld [vmem:[%s12424_s22 + $0x94] sm:$0xf]  ;;  %v10166_v3 = vld [vmem:[%s12424_s22 + $0xa0] sm:$0xf] }
  0xcc   : > { %v10305_v7 = vcombine.low %v3485_v56, %v3488_v2  ;;  %v10202_v10 = vcombine.low %v2789_v1, %v2799_v6  ;;  %v10306_v12 = vcombine.low %v3492_v61, %v3495_v11  ;;  %v2806_v18 = vrot.slane %v2804_v8, 5  ;;  %v10168_v62 = vld [vmem:[%s12424_s22 + $0xa8] sm:$0xf] }
  0xcd   : > { %v2812_v19 = vrot.slane %v2810_v9, 5  ;;  %v2820_v20 = vshll.u32 %v10161_v58, 16  ;;  %v2816_v22 = vrot.slane %v2814_v14, 4  ;;  %v2825_v23 = vshrl.u32 %v10162_v63, 16  ;;  %v10170_v14 = vld [vmem:[%s12424_s22 + $0xb0] sm:$0x1] }
  0xce   : > { %11542 = vmatprep.mubr.bf16.mxu1 %v10305_v7  ;;  %11495 = vmatmul.mubr.bf16.gmra.mxu0 %v10202_v10  ;;  %v2828_v24 = vshll.u32 %v10162_v63, 16  ;;  %v2834_v25 = vshll.u32 %v10163_v0, 16  ;;  %v2807_v29 = vor.u32 %v2806_v18, %v2803_v13  ;;  %v2838_v30 = vshrl.u32 %v10163_v0, 16  ;;  %v10169_v63 = vld [vmem:[%s12424_s22 + $0xac] sm:$0xf] }
  0xcf   : > { %v2822_v28 = vrot.slane %v2820_v20, 5  ;;  %v2844_v31 = vshll.u32 %v10164_v15, 16  ;;  %v2817_v33 = vor.u32 %v2816_v22, %v2812_v19  ;;  %v2827_v34 = vrot.slane %v2825_v23, 4  ;;  %v10253_v15 = vld [vmem:[%s12424_s22 + $0x9c] sm:$0xe] }
  0xd0   : > { %11543 = vmatmul.mubr.bf16.gmra.mxu1 %v10306_v12  ;;  %v2830_v35 = vrot.slane %v2828_v24, 5  ;;  %v2836_v36 = vrot.slane %v2834_v25, 5  ;;  %v2808_v39 = vrot.slane %v2807_v29, 4  ;;  %v2840_v27 = vrot.slane %v2838_v30, 4  ;;  %v10254_v20 = vld [vmem:[%s12424_s22 + $0xa0] sm:$0xf] }
  0xd1   : > { %v2846_v40 = vrot.slane %v2844_v31, 5  ;;  %v10275_v41 = vrot.slane %v10247_v16, 9  ;;  %v2818_v42 = vrot.slane %v2817_v33, 4  ;;  %v3498_v44 = vrot.slane %v10248_v21, 5  ;;  %v10255_v25 = vld [vmem:[%s12424_s22 + $0xa4] sm:$0x1] }
  0xd2   : > { %v2831_v43 = vor.u32 %v2830_v35, %v2827_v34  ;;  %v3501_v45 = vrot.slane %v10249_v26, 5  ;;  %v2813_v46 = vsel %vm12447_vm2, %v2808_v39, %v2812_v19  ;;  %v2841_v47 = vor.u32 %v2840_v27, %v2836_v36  ;;  %v10256_v31 = vld [vmem:[%s12424_s22 + $0xa8] sm:$0xe] }
  0xd3   : > { %v10276_v49 = vrot.slane %v10250_v32, 9  ;;  %v3505_v50 = vrot.slane %v10251_v38, 5  ;;  %v2823_v53 = vsel %vm12447_vm2, %v2818_v42, %v2822_v28  ;;  %v3499_v55 = vsel %vm12629_vm5, %v10275_v41, %v3498_v44 }
  0xd4   : > { %v2832_v54 = vrot.slane %v2831_v43, 4  ;;  %v3500_v56 = vrot.slane %v3498_v44, 4  ;;  %v10203_v58 = vcombine.low %v2813_v46, %v2823_v53  ;;  %v2842_v59 = vrot.slane %v2841_v47, 4  ;;  %v10258_v47 = vld [vmem:[%s12424_s22 + $0xb0] sm:$0x1] }
  0xd5   : > { %v3506_v60 = vsel %vm12629_vm5, %v10276_v49, %v3505_v50  ;;  %v3507_v61 = vrot.slane %v3505_v50, 4  ;;  %v3508_v2 = vrot.slane %v10252_v48, 5  ;;  %v2849_v4 = vshrl.u32 %v10165_v51, 16  ;;  %v10171_v50 = vld [vmem:[%s12424_s22 + $0xb4] sm:$0xf] }
  0xd6   : > { %v2837_v0 = vsel %vm12447_vm2, %v2832_v54, %v2836_v36  ;;  %v3502_v1 = vsel %vm12629_vm5, %v3500_v56, %v3501_v45  ;;  %11498 = vmatprep.mubr.bf16.mxu0 %v10203_v58  ;;  %v2847_v5 = vsel %vm12447_vm2, %v2842_v59, %v2846_v40  ;;  %v2852_v7 = vshll.u32 %v10165_v51, 16  ;;  %v10257_v36 = vld [vmem:[%s12424_s22 + $0xac] sm:$0xf] }
  0xd7   : > { %v10307_v6 = vcombine.low %v3499_v55, %v3502_v1  ;;  %v2858_v8 = vshll.u32 %v10166_v3, 16  ;;  %v10204_v9 = vcombine.low %v2837_v0, %v2847_v5  ;;  %v3509_v10 = vsel %vm12629_vm5, %v3507_v61, %v3508_v2  ;;  %v10175_v0 = vld [vmem:[%s12424_s22 + $0xc4] sm:$0xf] }
  0xd8   : > { %v2851_v11 = vrot.slane %v2849_v4, 4  ;;  %v2862_v13 = vshrl.u32 %v10166_v3, 16  ;;  %v10308_v16 = vcombine.low %v3506_v60, %v3509_v10  ;;  %v2854_v12 = vrot.slane %v2852_v7, 5  ;;  %v10172_v3 = vld [vmem:[%s12424_s22 + $0xb8] sm:$0xf] }
  0xd9   : > { %11546 = vmatprep.mubr.bf16.mxu1 %v10307_v6  ;;  %v2860_v18 = vrot.slane %v2858_v8, 5  ;;  %v2868_v19 = vshll.u32 %v10167_v57, 16  ;;  %11499 = vmatmul.mubr.bf16.gmra.mxu0 %v10204_v9  ;;  %v2873_v22 = vshrl.u32 %v10168_v62, 16  ;;  %v2876_v23 = vshll.u32 %v10168_v62, 16  ;;  %v10173_v57 = vld [vmem:[%s12424_s22 + $0xbc] sm:$0x1] }
  0xda   : > { %v2864_v21 = vrot.slane %v2862_v13, 4  ;;  %v2882_v24 = vshll.u32 %v10169_v63, 16  ;;  %11547 = vmatmul.mubr.bf16.gmra.mxu1 %v10308_v16  ;;  %v2855_v26 = vor.u32 %v2854_v12, %v2851_v11  ;;  %v2886_v28 = vshrl.u32 %v10169_v63, 16  ;;  %v10174_v63 = vld [vmem:[%s12424_s22 + $0xc0] sm:$0xf] }
  0xdb   : > { %v2870_v29 = vrot.slane %v2868_v19, 5  ;;  %v2892_v30 = vshll.u32 %v10170_v14, 16  ;;  %v2875_v33 = vrot.slane %v2873_v22, 4  ;;  %v2878_v34 = vrot.slane %v2876_v23, 5  ;;  %v10176_v7 = vld [vmem:[%s12424_s22 + $0xc8] sm:$0x1] }
  0xdc   : > { %v2865_v32 = vor.u32 %v2864_v21, %v2860_v18  ;;  %v2884_v35 = vrot.slane %v2882_v24, 5  ;;  %v2856_v38 = vrot.slane %v2855_v26, 4  ;;  %v2888_v39 = vrot.slane %v2886_v28, 4  ;;  %v10259_v19 = vld [vmem:[%s12424_s22 + $0xb4] sm:$0xe] }
  0xdd   : > { %v2894_v27 = vrot.slane %v2892_v30, 5  ;;  %v10277_v40 = vrot.slane %v10253_v15, 9  ;;  %v2879_v42 = vor.u32 %v2878_v34, %v2875_v33  ;;  %v3512_v43 = vrot.slane %v10254_v20, 5  ;;  %v10261_v26 = vld [vmem:[%s12424_s22 + $0xbc] sm:$0x1] }
  0xde   : > { %v2866_v41 = vrot.slane %v2865_v32, 4  ;;  %v3515_v44 = vrot.slane %v10255_v25, 5  ;;  %v2861_v45 = vsel %vm12447_vm2, %v2856_v38, %v2860_v18  ;;  %v2889_v46 = vor.u32 %v2888_v39, %v2884_v35  ;;  %v10260_v25 = vld [vmem:[%s12424_s22 + $0xb8] sm:$0xf]  ;;  %v10262_v33 = vld [vmem:[%s12424_s22 + $0xc0] sm:$0xe] }
  0xdf   : > { %v10278_v48 = vrot.slane %v10256_v31, 9  ;;  %v3519_v49 = vrot.slane %v10257_v36, 5  ;;  %v2880_v54 = vrot.slane %v2879_v42, 4  ;;  %v3513_v55 = vsel %vm12629_vm5, %v10277_v40, %v3512_v43  ;;  %v10263_v34 = vld [vmem:[%s12424_s22 + $0xc4] sm:$0xf] }
  0xe0   : > { %v2871_v53 = vsel %vm12447_vm2, %v2866_v41, %v2870_v29  ;;  %v3514_v56 = vrot.slane %v3512_v43, 4  ;;  %v2890_v60 = vrot.slane %v2889_v46, 4  ;;  %v3522_v5 = vrot.slane %v10258_v47, 5 }
  0xe1   : > { %v10205_v59 = vcombine.low %v2861_v45, %v2871_v53  ;;  %v3520_v61 = vsel %vm12629_vm5, %v10278_v48, %v3519_v49  ;;  %v3521_v62 = vrot.slane %v3519_v49, 4  ;;  %v2885_v2 = vsel %vm12447_vm2, %v2880_v54, %v2884_v35 }
  0xe2   : > { %v3516_v4 = vsel %vm12629_vm5, %v3514_v56, %v3515_v44  ;;  %v2897_v6 = vshrl.u32 %v10171_v50, 16  ;;  %v2895_v9 = vsel %vm12447_vm2, %v2890_v60, %v2894_v27  ;;  %v2900_v11 = vshll.u32 %v10171_v50, 16  ;;  %v10264_v60 = vld [vmem:[%s12424_s22 + $0xc8] sm:$0x1] }
  0xe3   : > { %11502 = vmatprep.mubr.bf16.mxu0 %v10205_v59  ;;  %v10309_v10 = vcombine.low %v3513_v55, %v3516_v4  ;;  %v2906_v13 = vshll.u32 %v10172_v3, 16  ;;  %v10206_v15 = vcombine.low %v2885_v2, %v2895_v9  ;;  %v3523_v16 = vsel %vm12629_vm5, %v3521_v62, %v3522_v5  ;;  %v10395_v9 = vld [vmem:[%s12424_s22 + $0x20] sm:$0x1] }
  0xe4   : > { %v2899_v12 = vrot.slane %v2897_v6, 4  ;;  %v2910_v18 = vshrl.u32 %v10172_v3, 16  ;;  %v10310_v21 = vcombine.low %v3520_v61, %v3523_v16  ;;  %v2902_v22 = vrot.slane %v2900_v11, 5 }
  0xe5   : > { %11550 = vmatprep.mubr.bf16.mxu1 %v10309_v10  ;;  %v2908_v23 = vrot.slane %v2906_v13, 5  ;;  %v2916_v24 = vshll.u32 %v10173_v57, 16  ;;  %11503 = vmatmul.mubr.bf16.gmra.mxu0 %v10206_v15  ;;  %v2921_v30 = vshrl.u32 %v10174_v63, 16  ;;  %v2924_v31 = vshll.u32 %v10174_v63, 16  ;;  %v10393_v63 = vld [vmem:[%s12424_s22 + $0x18] sm:$0xf] }
  0xe6   : > { %v2912_v28 = vrot.slane %v2910_v18, 4  ;;  %v2930_v32 = vshll.u32 %v10175_v0, 16  ;;  %11551 = vmatmul.mubr.bf16.gmra.mxu1 %v10310_v21  ;;  %v2903_v36 = vor.u32 %v2902_v22, %v2899_v12  ;;  %v2934_v39 = vshrl.u32 %v10175_v0, 16  ;;  %v10396_v12 = vld [vmem:[%s12424_s22 + $0x24] sm:$0xf] }
  0xe7   : > { %v2918_v38 = vrot.slane %v2916_v24, 5  ;;  %v2940_v27 = vshll.u32 %v10176_v7, 16  ;;  %v2923_v42 = vrot.slane %v2921_v30, 4  ;;  %v2926_v43 = vrot.slane %v2924_v31, 5  ;;  %v10394_v7 = vld [vmem:[%s12424_s22 + $0x1c] sm:$0xf] }
  0xe8   : > { %v2913_v41 = vor.u32 %v2912_v28, %v2908_v23  ;;  %v2932_v44 = vrot.slane %v2930_v32, 5  ;;  %v2904_v46 = vrot.slane %v2903_v36, 4  ;;  %v2936_v47 = vrot.slane %v2934_v39, 4 }
  0xe9   : > { %v2942_v48 = vrot.slane %v2940_v27, 5  ;;  %v10279_v49 = vrot.slane %v10259_v19, 9  ;;  %v2927_v54 = vor.u32 %v2926_v43, %v2923_v42  ;;  %v3526_v55 = vrot.slane %v10260_v25, 5  ;;  %v10398_v42 = vld [vmem:[%s12424_s22 + $0x2c] sm:$0x1] }
  0xea   : > { %v2914_v53 = vrot.slane %v2913_v41, 4  ;;  %v3529_v56 = vrot.slane %v10261_v26, 5  ;;  %v2909_v57 = vsel %vm12447_vm2, %v2904_v46, %v2908_v23  ;;  %v2937_v59 = vor.u32 %v2936_v47, %v2932_v44  ;;  %v12240_v23 = vld [vmem:[%s12424_s22 + $0x18] sm:$0xff]  }
  0xeb   : > { %v10280_v61 = vrot.slane %v10262_v33, 9  ;;  %v3533_v62 = vrot.slane %v10263_v34, 5  ;;  %v2928_v4 = vrot.slane %v2927_v54, 4  ;;  %v3527_v5 = vsel %vm12629_vm5, %v10279_v49, %v3526_v55 }
  0xec   : > { %v13064_v51 = vpop.f32.mrf.mxu0  ;;  %v2919_v2 = vsel %vm12447_vm2, %v2914_v53, %v2918_v38  ;;  %v3528_v6 = vrot.slane %v3526_v55, 4  ;;  %v2938_v13 = vrot.slane %v2937_v59, 4  ;;  %v3536_v22 = vrot.slane %v10264_v60, 5 }
  0xed   : > { %v13072_v58 = vpop.f32.mrf.mxu1  ;;  %v10207_v11 = vcombine.low %v2909_v57, %v2919_v2  ;;  %v3534_v15 = vsel %vm12629_vm5, %v10280_v61, %v3533_v62  ;;  %v3535_v16 = vrot.slane %v3533_v62, 4  ;;  %v2933_v19 = vsel %vm12447_vm2, %v2928_v4, %v2932_v44  ;;  %v10399_v57 = vld [vmem:[%s12424_s22 + $0x30] sm:$0xf]  ;;  %v12241_v2 = vld [vmem:[%s12424_s22 + $0x24] sm:$0xff]  }
  0xee   : > { %v13078_v1 = vpop.f32.mrf.mxu0  ;;  %v3530_v21 = vsel %vm12629_vm5, %v3528_v6, %v3529_v56  ;;  %v13138_v24 = vadd.f32 %v13072_v58, %v13064_v51  ;;  %v2943_v26 = vsel %vm12447_vm2, %v2938_v13, %v2942_v48  ;;  %v4424_v30 = vshrl.u32 %v10393_v63, 16  ;;  %v10397_v51 = vld [vmem:[%s12424_s22 + $0x28] sm:$0xf] }
  0xef   : > { %v13085_v8 = vpop.f32.mrf.mxu1  ;;  %11506 = vmatprep.mubr.bf16.mxu0 %v10207_v11  ;;  %v10311_v28 = vcombine.low %v3527_v5, %v3530_v21  ;;  %v4427_v31 = vshll.u32 %v10393_v63, 16  ;;  %v10208_v33 = vcombine.low %v2933_v19, %v2943_v26  ;;  %v3537_v34 = vsel %vm12629_vm5, %v3535_v16, %v3536_v22  ;;  %v12243_v19 = vld [vmem:[%s12424_s22 + $0x30] sm:$0xff]   ;;  %v10402_v21 = vld [vmem:[%s12424_s22 + $0x3c] sm:$0xf] }
  0xf0   : > { %v13089_v14 = vpop.f32.mrf.mxu0  ;;  %v4433_v36 = vshll.u32 %v10394_v7, 16  ;;  %v4437_v38 = vshrl.u32 %v10394_v7, 16  ;;  %v10312_v58 = vcombine.low %v3534_v15, %v3537_v34  ;;  %v4426_v39 = vrot.slane %v4424_v30, 4 }
  0xf1   : > { %v13094_v20 = vpop.f32.mrf.mxu1  ;;  %11554 = vmatprep.mubr.bf16.mxu1 %v10311_v28  ;;  %v4429_v27 = vrot.slane %v4427_v31, 5  ;;  %v4443_v41 = vshll.u32 %v10395_v9, 16  ;;  %11507 = vmatmul.mubr.bf16.gmra.mxu0 %v10208_v33  ;;  %v13154_v47 = vadd.f32 %v13085_v8, %v13078_v1  ;;  %v4448_v48 = vshrl.u32 %v10396_v12, 16  ;;  %v10400_v8 = vld [vmem:[%s12424_s22 + $0x34] sm:$0xf] }
  0xf2   : > { %v13098_v29 = vpop.f32.mrf.mxu0  ;;  %v4435_v44 = vrot.slane %v4433_v36, 5  ;;  %v4439_v46 = vrot.slane %v4437_v38, 4  ;;  %11555 = vmatmul.mubr.bf16.gmra.mxu1 %v10312_v58  ;;  %11574 = vmatprep.mubr.bf16.mxu0 %v12240_v23  ;;  %v4451_v55 = vshll.u32 %v10396_v12, 16  ;;  %v4457_v56 = vshll.u32 %v10397_v51, 16  ;;  %v10401_v9 = vld [vmem:[%s12424_s22 + $0x38] sm:$0x1] }
  0xf3   : > { %v13102_v35 = vpop.f32.mrf.mxu1  ;;  %v4430_v53 = vor.u32 %v4429_v27, %v4426_v39  ;;  %v4445_v54 = vrot.slane %v4443_v41, 5  ;;  %v4450_v61 = vrot.slane %v4448_v48, 4  ;;  %v4461_v62 = vshrl.u32 %v10397_v51, 16 }
  0xf4   : > { %v13104_v40 = vpop.f32.mrf.mxu0  ;;  %v4440_v60 = vor.u32 %v4439_v46, %v4435_v44  ;;  %v4467_v1 = vshll.u32 %v10398_v42, 16  ;;  %v4453_v5 = vrot.slane %v4451_v55, 5  ;;  %v4459_v6 = vrot.slane %v4457_v56, 5  ;;  %v10403_v42 = vld [vmem:[%s12424_s22 + $0x40] sm:$0xf] }
  0xf5   : > { %v13106_v45 = vpop.f32.mrf.mxu1  ;;  %v4431_v4 = vrot.slane %v4430_v53, 4  ;;  %v13167_v7 = vadd.f32 %v13094_v20, %v13089_v14  ;;  %v4463_v15 = vrot.slane %v4461_v62, 4  ;;  %v13174_v12 = vadd.f32 %v13102_v35, %v13098_v29  ;;  %v12245_v20 = vld [vmem:[%s15750_s1 + $0x230] sm:$0xff]  }
  0xf6   : > { %v13108_v50 = vpop.f32.mrf.mxu0  ;;  %v4441_v13 = vrot.slane %v4440_v60, 4  ;;  %v4469_v16 = vrot.slane %v4467_v1, 5  ;;  %v4454_v26 = vor.u32 %v4453_v5, %v4450_v61  ;;  %v13184_v14 = vadd.f32 %v13106_v45, %v13104_v40  ;;  %v12244_v60 = vld [vmem:[%s12424_s22 + $0x3c] sm:$0xff]  }
  0xf7   : > { %v13110_v3 = vpop.f32.mrf.mxu1  ;;  %v4436_v23 = vsel %vm12447_vm2, %v4431_v4, %v4435_v44  ;;  %v4472_v28 = vshrl.u32 %v10399_v57, 16  ;;  %v4464_v35 = vor.u32 %v4463_v15, %v4459_v6  ;;  %v4475_v31 = vshll.u32 %v10399_v57, 16 }
  0xf8   : > { %v13116_v0 = vpop.f32.mrf.mxu0  ;;  %v4446_v29 = vsel %vm12447_vm2, %v4441_v13, %v4445_v54  ;;  %v4481_v33 = vshll.u32 %v10400_v8, 16  ;;  %v4455_v38 = vrot.slane %v4454_v26, 4  ;;  %v4485_v45 = vshrl.u32 %v10400_v8, 16  ;;  %v10404_v54 = vld [vmem:[%s12424_s22 + $0x44] sm:$0x1] }
  0xf9   : > { %v13124_v10 = vpop.f32.mrf.mxu1  ;;  %v10457_v36 = vcombine.low %v4436_v23, %v4446_v29  ;;  %v4474_v40 = vrot.slane %v4472_v28, 4  ;;  %11575 = vmatmul.mubr.bf16.vlgmr.msra.gmra.mxu0 %v12241_v2  ;;  %v4465_v58 = vrot.slane %v4464_v35, 4  ;;  %v4477_v39 = vrot.slane %v4475_v31, 5  ;;  %v12251_v23 = vld [vmem:[%s15750_s1 + $0x220] sm:$0xff]  }
  0xfa   : > { %v13129_v18 = vpop.f32.mrf.mxu0  ;;  %v4483_v27 = vrot.slane %v4481_v33, 5  ;;  %v4491_v41 = vshll.u32 %v10401_v9, 16  ;;  %11655 = vmatpush3.bf16.msra.mxu0 %v12997_v17  ;;  %v4460_v46 = vsel %vm12447_vm2, %v4455_v38, %v4459_v6  ;;  %v4487_v48 = vrot.slane %v4485_v45, 4  ;;  %11578 = vmatprep.mubr.bf16.mxu0 %v12243_v19  ;;  %v12246_v6 = vld [vmem:[%s12424_s22 + $0x48] sm:$0xff]  }
  0xfb   : > { %v13140_v25 = vpop.f32.mrf.mxu1  ;;  %11622 = vmatprep.mubr.bf16.mxu1 %v10457_v36  ;;  %v13205_v53 = vadd.f32 %v13110_v3, %v13108_v50  ;;  %v4496_v55 = vshrl.u32 %v10402_v21, 16  ;;  %v4470_v57 = vsel %vm12447_vm2, %v4465_v58, %v4469_v16  ;;  %11656 = vmatprep.subr.bf16.mxu0 %v12245_v20  ;;  %v4478_v17 = vor.u32 %v4477_v39, %v4474_v40  ;;  %v12248_v50 = vld [vmem:[%s15750_s1 + $0x228] sm:$0xff]  }
  0xfc   : > { %v13144_v32 = vpop.f32.mrf.mxu0  ;;  %v4493_v61 = vrot.slane %v4491_v41, 5  ;;  %v4499_v62 = vshll.u32 %v10402_v21, 16  ;;  %v10405_v3 = vld [vmem:[%s12424_s22 + $0x48] sm:$0xf]  ;;  %v10458_v8 = vcombine.low %v4460_v46, %v4470_v57  ;;  %v4488_v2 = vor.u32 %v4487_v48, %v4483_v27  ;;  %v10406_v9 = vld [vmem:[%s12424_s22 + $0x4c] sm:$0xf] }
  0xfd   : > { %v13156_v49 = vpop.f32.mrf.mxu1  ;;  %v4498_v4 = vrot.slane %v4496_v55, 4  ;;  %v4505_v5 = vshll.u32 %v10403_v42, 16  ;;  %v4479_v15 = vrot.slane %v4478_v17, 4  ;;  %v4509_v19 = vshrl.u32 %v10403_v42, 16  ;;  %v10408_v48 = vld [vmem:[%s12424_s22 + $0x54] sm:$0xf] }
  0xfe   : > { %v13150_v43 = vpop.f32.mrf.mxu0  ;;  %v4501_v16 = vrot.slane %v4499_v62, 5  ;;  %v4515_v21 = vshll.u32 %v10404_v54, 16  ;;  %11623 = vmatmul.mubr.bf16.vlgmr.msra.gmra.mxu1 %v10458_v8  ;;  %v4489_v28 = vrot.slane %v4488_v2, 4  ;;  %11657 = vmatpush3.bf16.msra.mxu0 %v12245_v20  ;;  %v13230_v35 = vadd.f32 %v13124_v10, %v13116_v0  ;;  %v10407_v20 = vld [vmem:[%s12424_s22 + $0x50] sm:$0x1]  ;;  %v12254_v55 = vld [vmem:[%s15750_s1 + $0x218] sm:$0xff]  }
  0xff   : > { %v13162_v63 = vpop.f32.mrf.mxu1  ;;  %v4507_v29 = vrot.slane %v4505_v5, 5  ;;  %v13234_v31 = vadd.f32 %v13140_v25, %v13129_v18  ;;  %v4484_v36 = vsel %vm12447_vm2, %v4479_v15, %v4483_v27  ;;  %v4511_v40 = vrot.slane %v4509_v19, 4  ;;  %11658 = vmatprep.subr.bf16.mxu0 %v12248_v50  ;;  %v10409_v54 = vld [vmem:[%s12424_s22 + $0x58] sm:$0xf] }
 0x100   : > { %v13159_v59 = vpop.f32.mrf.mxu0  ;;  %v4502_v38 = vor.u32 %v4501_v16, %v4498_v4  ;;  %v4517_v45 = vrot.slane %v4515_v21, 5  ;;  %v4494_v0 = vsel %vm12447_vm2, %v4489_v28, %v4493_v61  ;;  %v13247_v10 = vadd.f32 %v13156_v49, %v13144_v32  ;;  %v10410_v61 = vld [vmem:[%s12424_s22 + $0x5c] sm:$0x1]  ;;  %v12247_v2 = vld [vmem:[%s12424_s22 + $0x54] sm:$0xff]   ;;  %v12249_v16 = vld [vmem:[%s12424_s22 + $0x60] sm:$0xff]  }
 0x101   : > { %v13178_v22 = vpop.f32.mrf.mxu1  ;;  %v4520_v18 = vshrl.u32 %v10405_v3, 16  ;;  %v4523_v25 = vshll.u32 %v10405_v3, 16  ;;  %11579 = vmatmul.mubr.bf16.gmra.mxu0 %v12244_v60  ;;  %v10459_v27 = vcombine.low %v4484_v36, %v4494_v0  ;;  %v4512_v42 = vor.u32 %v4511_v40, %v4507_v29  ;;  %v10411_v40 = vld [vmem:[%s12424_s22 + $0x60] sm:$0xf] }
 0x102   : > { %v13170_v11 = vpop.f32.mrf.mxu0  ;;  %v4503_v41 = vrot.slane %v4502_v38, 4  ;;  %v4529_v46 = vshll.u32 %v10406_v9, 16  ;;  %11582 = vmatprep.mubr.bf16.mxu0 %v12246_v6  ;;  %v4533_v57 = vshrl.u32 %v10406_v9, 16  ;;  %v4539_v17 = vshll.u32 %v10407_v20, 16  ;;  %11659 = vmatpush3.bf16.msra.mxu0 %v12248_v50 }
 0x103   : > { %v13193_v34 = vpop.f32.mrf.mxu1  ;;  %v4522_v32 = vrot.slane %v4520_v18, 4  ;;  %v4525_v49 = vrot.slane %v4523_v25, 5  ;;  %11626 = vmatprep.mubr.bf16.mxu1 %v10459_v27  ;;  %v4513_v8 = vrot.slane %v4512_v42, 4  ;;  %v13266_v5 = vadd.f32 %v13162_v63, %v13150_v43  ;;  %11660 = vmatprep.subr.bf16.mxu0 %v12251_v23  ;;  %v12257_v43 = vld [vmem:[%s15750_s1 + $0x210] sm:$0xff]  }
 0x104   : > { %v13189_v30 = vpop.f32.mrf.mxu0  ;;  %v4508_v3 = vsel %vm12447_vm2, %v4503_v41, %v4507_v29  ;;  %v4531_v4 = vrot.slane %v4529_v46, 5  ;;  %v4535_v50 = vrot.slane %v4533_v57, 4  ;;  %v4541_v9 = vrot.slane %v4539_v17, 5 }
 0x105   : > { %v13198_v44 = vpop.f32.mrf.mxu1  ;;  %v4526_v6 = vor.u32 %v4525_v49, %v4522_v32  ;;  %v4544_v15 = vshrl.u32 %v10408_v48, 16  ;;  %v4518_v28 = vsel %vm12447_vm2, %v4513_v8, %v4517_v45  ;;  %v4547_v29 = vshll.u32 %v10408_v48, 16  ;;  %v10412_v48 = vld [vmem:[%s12424_s22 + $0x64] sm:$0xf] }
 0x106   : > { %v13195_v51 = vpop.f32.mrf.mxu0  ;;  %v4553_v36 = vshll.u32 %v10409_v54, 16  ;;  %v4557_v38 = vshrl.u32 %v10409_v54, 16  ;;  %v10460_v63 = vcombine.low %v4508_v3, %v4518_v28  ;;  %v4536_v0 = vor.u32 %v4535_v50, %v4531_v4  ;;  %11661 = vmatpush3.bf16.msra.mxu0 %v12251_v23 }
 0x107   : > { %v13217_v1 = vpop.f32.mrf.mxu1  ;;  %v4527_v20 = vrot.slane %v4526_v6, 4  ;;  %v4546_v18 = vrot.slane %v4544_v15, 4  ;;  %v4549_v41 = vrot.slane %v4547_v29, 5  ;;  %v4563_v46 = vshll.u32 %v10410_v61, 16  ;;  %11662 = vmatprep.subr.bf16.mxu0 %v12254_v55  ;;  %v10415_v15 = vld [vmem:[%s12424_s22 + $0x70] sm:$0xf] }
 0x108   : > { %v13208_v56 = vpop.f32.mrf.mxu0  ;;  %v4555_v45 = vrot.slane %v4553_v36, 5  ;;  %v4559_v42 = vrot.slane %v4557_v38, 4  ;;  %11627 = vmatmul.mubr.bf16.gmra.mxu1 %v10460_v63  ;;  %v4537_v32 = vrot.slane %v4536_v0, 4  ;;  %v13288_v23 = vadd.f32 %v13178_v22, %v13159_v59  ;;  %v10413_v59 = vld [vmem:[%s12424_s22 + $0x68] sm:$0x1]  ;;  %v12250_v38 = vld [vmem:[%s12424_s22 + $0x6c] sm:$0xff]  }
 0x109   : > { %v13226_v26 = vpop.f32.mrf.mxu1  ;;  %v4532_v54 = vsel %vm12447_vm2, %v4527_v20, %v4531_v4  ;;  %v13292_v49 = vadd.f32 %v13193_v34, %v13170_v11  ;;  %11583 = vmatmul.mubr.bf16.gmra.mxu0 %v12247_v2  ;;  %v4550_v61 = vor.u32 %v4549_v41, %v4546_v18  ;;  %v4565_v8 = vrot.slane %v4563_v46, 5  ;;  %v10414_v22 = vld [vmem:[%s12424_s22 + $0x6c] sm:$0xf] }
 0x10a   : > { %v13221_v13 = vpop.f32.mrf.mxu0  ;;  %v4560_v3 = vor.u32 %v4559_v42, %v4555_v45  ;;  %v13300_v4 = vadd.f32 %v13198_v44, %v13189_v30  ;;  %v4542_v11 = vsel %vm12447_vm2, %v4537_v32, %v4541_v9  ;;  %11586 = vmatprep.mubr.bf16.mxu0 %v12249_v16  ;;  %v4568_v34 = vshrl.u32 %v10411_v40, 16  ;;  %11663 = vmatpush3.bf16.msra.mxu0 %v12254_v55  ;;  %v10416_v44 = vld [vmem:[%s12424_s22 + $0x74] sm:$0x1]  ;;  %v12260_v9 = vld [vmem:[%s15750_s1 + $0x208] sm:$0xff]  }
 0x10b   : > { %v13241_v58 = vpop.f32.mrf.mxu1  ;;  %v4571_v6 = vshll.u32 %v10411_v40, 16  ;;  %v4577_v50 = vshll.u32 %v10412_v48, 16  ;;  %v10461_v28 = vcombine.low %v4532_v54, %v4542_v11  ;;  %v4551_v29 = vrot.slane %v4550_v61, 4  ;;  %11664 = vmatprep.subr.bf16.mxu0 %v12257_v43 }
 0x10c   : > { %v13236_v33 = vpop.f32.mrf.mxu0  ;;  %v4561_v36 = vrot.slane %v4560_v3, 4  ;;  %v4581_v30 = vshrl.u32 %v10412_v48, 16  ;;  %v4570_v16 = vrot.slane %v4568_v34, 4  ;;  %v4587_v55 = vshll.u32 %v10413_v59, 16  ;;  %v12252_v48 = vld [vmem:[%s12424_s22 + $0x78] sm:$0xff]  }
 0x10d   : > { %v13257_v60 = vpop.f32.mrf.mxu1  ;;  %v4573_v40 = vrot.slane %v4571_v6, 5  ;;  %v4579_v20 = vrot.slane %v4577_v50, 5  ;;  %11630 = vmatprep.mubr.bf16.mxu1 %v10461_v28  ;;  %v4556_v18 = vsel %vm12447_vm2, %v4551_v29, %v4555_v45  ;;  %v13324_v46 = vadd.f32 %v13217_v1, %v13195_v51  ;;  %v12263_v51 = vld [vmem:[%s15750_s1 + $0x200] sm:$0xff]  }
 0x10e   : > { %v13249_v39 = vpop.f32.mrf.mxu0  ;;  %v4566_v41 = vsel %vm12447_vm2, %v4561_v36, %v4565_v8  ;;  %v4583_v42 = vrot.slane %v4581_v30, 4  ;;  %v4589_v3 = vrot.slane %v4587_v55, 5  ;;  %v4592_v59 = vshrl.u32 %v10414_v22, 16  ;;  %11665 = vmatpush3.bf16.msra.mxu0 %v12257_v43  ;;  %v10418_v55 = vld [vmem:[%s12424_s22 + $0x7c] sm:$0xf] }
 0x10f   : > { %v13269_v19 = vpop.f32.mrf.mxu1  ;;  %v10462_v32 = vcombine.low %v4556_v18, %v4566_v41  ;;  %v4574_v61 = vor.u32 %v4573_v40, %v4570_v16  ;;  %v4595_v34 = vshll.u32 %v10414_v22, 16  ;;  %v4601_v6 = vshll.u32 %v10415_v15, 16  ;;  %11666 = vmatprep.subr.bf16.mxu0 %v12260_v9  ;;  %v10417_v22 = vld [vmem:[%s12424_s22 + $0x78] sm:$0xf] }
 0x110   : > { %v13259_v62 = vpop.f32.mrf.mxu0  ;;  %v4584_v45 = vor.u32 %v4583_v42, %v4579_v20  ;;  %v4605_v8 = vshrl.u32 %v10415_v15, 16  ;;  %v4594_v28 = vrot.slane %v4592_v59, 4  ;;  %v4611_v29 = vshll.u32 %v10416_v44, 16 }
 0x111   : > { %v13279_v25 = vpop.f32.mrf.mxu1  ;;  %11631 = vmatmul.mubr.bf16.gmra.mxu1 %v10462_v32  ;;  %v4575_v1 = vrot.slane %v4574_v61, 4  ;;  %v13338_v43 = vadd.f32 %v13226_v26, %v13208_v56  ;;  %11587 = vmatmul.mubr.bf16.gmra.mxu0 %v12250_v38  ;;  %v4597_v30 = vrot.slane %v4595_v34, 5  ;;  %v4603_v16 = vrot.slane %v4601_v6, 5  ;;  %v10419_v38 = vld [vmem:[%s12424_s22 + $0x80] sm:$0x1] }
 0x112   : > { %v13271_v21 = vpop.f32.mrf.mxu0  ;;  %v4585_v15 = vrot.slane %v4584_v45, 4  ;;  %v4607_v40 = vrot.slane %v4605_v8, 4  ;;  %v4613_v41 = vrot.slane %v4611_v29, 5  ;;  %v13350_v56 = vadd.f32 %v13241_v58, %v13221_v13  ;;  %11590 = vmatprep.mubr.bf16.mxu0 %v12252_v48  ;;  %11667 = vmatpush3.bf16.msra.mxu0 %v12260_v9  ;;  %v10420_v45 = vld [vmem:[%s12424_s22 + $0x84] sm:$0xf] }
 0x113   : > { %15763 = vst [vmem:[#allocation5_spill] sm:$0xff] %v13271_v21  ;;  %v13294_v57 = vpop.f32.mrf.mxu1  ;;  %v4580_v44 = vsel %vm12447_vm2, %v4575_v1, %v4579_v20  ;;  %v13354_v26 = vadd.f32 %v13257_v60, %v13236_v33  ;;  %v4598_v20 = vor.u32 %v4597_v30, %v4594_v28  ;;  %v4616_v59 = vshrl.u32 %v10417_v22, 16  ;;  %11668 = vmatprep.subr.bf16.mxu0 %v12263_v51  ;;  %v12253_v58 = vld [vmem:[%s12424_s22 + $0x84] sm:$0xff]   ;;  %v10422_v6 = vld [vmem:[%s12424_s22 + $0x8c] sm:$0x1] }
 0x114   : > { %v13281_v27 = vpop.f32.mrf.mxu0  ;;  %15764 = vst [vmem:[#allocation6_spill] sm:$0xff] %v13294_v57  ;;  %v4590_v32 = vsel %vm12447_vm2, %v4585_v15, %v4589_v3  ;;  %v4608_v61 = vor.u32 %v4607_v40, %v4603_v16  ;;  %v4619_v48 = vshll.u32 %v10417_v22, 16  ;;  %v4625_v34 = vshll.u32 %v10418_v55, 16  ;;  %v10421_v60 = vld [vmem:[%s12424_s22 + $0x88] sm:$0xf]  ;;  %v12255_v40 = vld [vmem:[%s12424_s22 + $0x90] sm:$0xff]  }
 0x115   : > { %v13311_v63 = vpop.f32.mrf.mxu1  ;;  %v10463_v13 = vcombine.low %v4580_v44, %v4590_v32  ;;  %v4629_v33 = vshrl.u32 %v10418_v55, 16  ;;  %v4599_v9 = vrot.slane %v4598_v20, 4  ;;  %v4618_v29 = vrot.slane %v4616_v59, 4 }
 0x116   : > { %v13296_v17 = vpop.f32.mrf.mxu0  ;;  %v4609_v1 = vrot.slane %v4608_v61, 4  ;;  %v4621_v28 = vrot.slane %v4619_v48, 5  ;;  %v4627_v15 = vrot.slane %v4625_v34, 5  ;;  %v13371_v22 = vadd.f32 %v13269_v19, %v13249_v39  ;;  %11669 = vmatpush3.bf16.msra.mxu0 %v12263_v51 }
 0x117   : > { %v13327_v54 = vpop.f32.mrf.mxu1  ;;  %11634 = vmatprep.mubr.bf16.mxu1 %v10463_v13  ;;  %v4631_v30 = vrot.slane %v4629_v33, 4  ;;  %v4604_v44 = vsel %vm12447_vm2, %v4599_v9, %v4603_v16  ;;  %v4640_v20 = vshrl.u32 %v10420_v45, 16  ;;  %v4643_v39 = vshll.u32 %v10420_v45, 16  ;;  %v10423_v9 = vld [vmem:[%s12424_s22 + $0x90] sm:$0xf] }
 0x118   : > { %v13307_v2 = vpop.f32.mrf.mxu0  ;;  %15768 = vst [vmem:[#allocation10_spill] sm:$0xff] %v13371_v22  ;;  %v4622_v13 = vor.u32 %v4621_v28, %v4618_v29  ;;  %v4649_v34 = vshll.u32 %v10421_v60, 16  ;;  %v4653_v33 = vshrl.u32 %v10421_v60, 16  ;;  %v4659_v16 = vshll.u32 %v10422_v6, 16 }
 0x119   : > { %v13331_v50 = vpop.f32.mrf.mxu1  ;;  %v4632_v48 = vor.u32 %v4631_v30, %v4627_v15  ;;  %11591 = vmatmul.mubr.bf16.gmra.mxu0 %v12253_v58  ;;  %v4642_v51 = vrot.slane %v4640_v20, 4  ;;  %v4645_v29 = vrot.slane %v4643_v39, 5  ;;  %v13389_v45 = vadd.f32 %v13279_v25, %v13259_v62  ;;  %v10424_v58 = vld [vmem:[%s12424_s22 + $0x94] sm:$0xf] }
 0x11a   : > { %v13316_v0 = vpop.f32.mrf.mxu0  ;;  %11594 = vmatprep.mubr.bf16.mxu0 %v12255_v40  ;;  %v4651_v60 = vrot.slane %v4649_v34, 5  ;;  %v4655_v6 = vrot.slane %v4653_v33, 4  ;;  %v4661_v30 = vrot.slane %v4659_v16, 5  ;;  %v13404_v25 = vadd.f32 %v13311_v63, %v13281_v27  ;;  %v10426_v40 = vld [vmem:[%s12424_s22 + $0x9c] sm:$0xf] }
 0x11b   : > { %15765 = vst [vmem:[#allocation7_spill] sm:$0xff] %v13316_v0  ;;  %v13344_v18 = vpop.f32.mrf.mxu1  ;;  %15769 = vst [vmem:[#allocation11_spill] sm:$0xff] %v13389_v45  ;;  %v4646_v62 = vor.u32 %v4645_v29, %v4642_v51  ;;  %v4664_v33 = vshrl.u32 %v10423_v9, 16  ;;  %v4667_v16 = vshll.u32 %v10423_v9, 16  ;;  %v4673_v0 = vshll.u32 %v10424_v58, 16 }
 0x11c   : > { %v13329_v11 = vpop.f32.mrf.mxu0  ;;  %15766 = vst [vmem:[#allocation8_spill] sm:$0xff] %v13344_v18  ;;  %v4635_v18 = vshll.u32 %v10419_v38, 16  ;;  %v4614_v38 = vsel %vm12447_vm2, %v4609_v1, %v4613_v41  ;;  %v4633_v1 = vrot.slane %v4632_v48, 4  ;;  %15771 = vst [vmem:[#allocation13_spill] sm:$0xff] %v13404_v25  ;;  %v12258_v48 = vld [vmem:[%s12424_s22 + $0xa8] sm:$0xff]   ;;  %v4656_v34 = vor.u32 %v4655_v6, %v4651_v60 }
 0x11d   : > { %v13367_v3 = vpop.f32.mrf.mxu1  ;;  %v10464_v59 = vcombine.low %v4604_v44, %v4614_v38  ;;  %v12256_v44 = vld [vmem:[%s12424_s22 + $0x9c] sm:$0xff]   ;;  %v10425_v38 = vld [vmem:[%s12424_s22 + $0x98] sm:$0x1]  ;;  %v4677_v57 = vshrl.u32 %v10424_v58, 16  ;;  %v4666_v51 = vrot.slane %v4664_v33, 4  ;;  %v13413_v27 = vadd.f32 %v13327_v54, %v13296_v17 }
 0x11e   : > { %v13341_v36 = vpop.f32.mrf.mxu0  ;;  %v4637_v32 = vrot.slane %v4635_v18, 5  ;;  %v4623_v18 = vrot.slane %v4622_v13, 4  ;;  %v4675_v29 = vrot.slane %v4673_v0, 5  ;;  %v10428_v58 = vld [vmem:[%s12424_s22 + $0xa4] sm:$0x1] }
 0x11f   : > { %v13380_v61 = vpop.f32.mrf.mxu1  ;;  %11635 = vmatmul.mubr.bf16.gmra.mxu1 %v10464_v59  ;;  %15773 = vst [vmem:[#allocation15_spill] sm:$0xff] %v13413_v27  ;;  %v4679_v6 = vrot.slane %v4677_v57, 4 }
 0x120   : > { %v13357_v42 = vpop.f32.mrf.mxu0  ;;  %v4628_v59 = vsel %vm12447_vm2, %v4623_v18, %v4627_v15  ;;  %v4638_v13 = vsel %vm12447_vm2, %v4633_v1, %v4637_v32  ;;  %v4683_v15 = vshll.u32 %v10425_v38, 16  ;;  %v4657_v32 = vrot.slane %v4656_v34, 4 }
 0x121   : > { %v13385_v41 = vpop.f32.mrf.mxu1  ;;  %v10465_v39 = vcombine.low %v4628_v59, %v4638_v13  ;;  %v4669_v1 = vrot.slane %v4667_v16, 5  ;;  %11595 = vmatmul.mubr.bf16.gmra.mxu0 %v12256_v44  ;;  %v4680_v54 = vor.u32 %v4679_v6, %v4675_v29  ;;  %v10429_v44 = vld [vmem:[%s12424_s22 + $0xa8] sm:$0xf] }
 0x122   : > { %v13365_v8 = vpop.f32.mrf.mxu0  ;;  %v4685_v59 = vrot.slane %v4683_v15, 5  ;;  %v4662_v38 = vsel %vm12447_vm2, %v4657_v32, %v4661_v30  ;;  %11598 = vmatprep.mubr.bf16.mxu0 %v12258_v48  ;;  %v10430_v48 = vld [vmem:[%s12424_s22 + $0xac] sm:$0xf] }
 0x123   : > { %15767 = vst [vmem:[#allocation9_spill] sm:$0xff] %v13365_v8  ;;  %v13396_v20 = vpop.f32.mrf.mxu1  ;;  %v10427_v8 = vld [vmem:[%s12424_s22 + $0xa0] sm:$0xf]  ;;  %11638 = vmatprep.mubr.bf16.mxu1 %v10465_v39  ;;  %v4670_v13 = vor.u32 %v4669_v1, %v4666_v51  ;;  %v4691_v39 = vshll.u32 %v10426_v40, 16 }
 0x124   : > { %v13374_v55 = vpop.f32.mrf.mxu0  ;;  %15770 = vst [vmem:[#allocation12_spill] sm:$0xff] %v13396_v20  ;;  %v4647_v20 = vrot.slane %v4646_v62, 4  ;;  %v4688_v62 = vshrl.u32 %v10426_v40, 16  ;;  %v4697_v33 = vshll.u32 %v10427_v8, 16  ;;  %v4701_v16 = vshrl.u32 %v10427_v8, 16 }
 0x125   : > { %v13415_v63 = vpop.f32.mrf.mxu1  ;;  %v4671_v57 = vrot.slane %v4670_v13, 4  ;;  %v4693_v30 = vrot.slane %v4691_v39, 5  ;;  %v4681_v40 = vrot.slane %v4680_v54, 4  ;;  %v13431_v8 = vadd.f32 %v13331_v50, %v13307_v2  ;;  %v10431_v13 = vld [vmem:[%s12424_s22 + $0xb0] sm:$0x1]  ;;  %v12261_v54 = vld [vmem:[%s12424_s22 + $0xc0] sm:$0xff]  }
 0x126   : > { %v13382_v19 = vpop.f32.mrf.mxu0  ;;  %v4652_v9 = vsel %vm12447_vm2, %v4647_v20, %v4651_v60  ;;  %v4690_v60 = vrot.slane %v4688_v62, 4  ;;  %v4707_v20 = vshll.u32 %v10428_v58, 16  ;;  %v4699_v32 = vrot.slane %v4697_v33, 5 }
 0x127   : > { %v13422_v34 = vpop.f32.mrf.mxu1  ;;  %v10466_v17 = vcombine.low %v4652_v9, %v4662_v38  ;;  %v4703_v51 = vrot.slane %v4701_v16, 4  ;;  %15774 = vst [vmem:[#allocation16_spill] sm:$0xff] %v13431_v8  ;;  %v4676_v9 = vsel %vm12447_vm2, %v4671_v57, %v4675_v29  ;;  %v12259_v38 = vld [vmem:[%s12424_s22 + $0xb4] sm:$0xff]   ;;  %v4686_v39 = vsel %vm12447_vm2, %v4681_v40, %v4685_v59  ;;  %v10435_v8 = vld [vmem:[%s12424_s22 + $0xc0] sm:$0xf] }
 0x128   : > { %v13392_v28 = vpop.f32.mrf.mxu0  ;;  %v4694_v6 = vor.u32 %v4693_v30, %v4690_v60  ;;  %v4709_v58 = vrot.slane %v4707_v20, 5  ;;  %v13446_v2 = vadd.f32 %v13367_v3, %v13329_v11  ;;  %v4712_v50 = vshrl.u32 %v10429_v44, 16  ;;  %v10432_v30 = vld [vmem:[%s12424_s22 + $0xb4] sm:$0xf] }
 0x129   : > { %v13427_v15 = vpop.f32.mrf.mxu1  ;;  %11639 = vmatmul.mubr.bf16.gmra.mxu1 %v10466_v17  ;;  %v4704_v17 = vor.u32 %v4703_v51, %v4699_v32  ;;  %v10467_v29 = vcombine.low %v4676_v9, %v4686_v39  ;;  %v4715_v57 = vshll.u32 %v10429_v44, 16  ;;  %v4721_v60 = vshll.u32 %v10430_v48, 16  ;;  %11599 = vmatmul.mubr.bf16.gmra.mxu0 %v12259_v38 }
 0x12a   : > { %v13409_v18 = vpop.f32.mrf.mxu0  ;;  %15776 = vst [vmem:[#allocation18_spill] sm:$0xff] %v13446_v2  ;;  %v4695_v16 = vrot.slane %v4694_v6, 4  ;;  %v4714_v59 = vrot.slane %v4712_v50, 4  ;;  %v4725_v40 = vshrl.u32 %v10430_v48, 16  ;;  %v4731_v51 = vshll.u32 %v10431_v13, 16  ;;  %11602 = vmatprep.mubr.bf16.mxu0 %v12261_v54 }
 0x12b   : > { %15772 = vst [vmem:[#allocation14_spill] sm:$0xff] %v13409_v18  ;;  %v13440_v62 = vpop.f32.mrf.mxu1  ;;  %v10433_v18 = vld [vmem:[%s12424_s22 + $0xb8] sm:$0xf]  ;;  %11642 = vmatprep.mubr.bf16.mxu1 %v10467_v29  ;;  %v4717_v3 = vrot.slane %v4715_v57, 5  ;;  %v4723_v9 = vrot.slane %v4721_v60, 5  ;;  %v13461_v44 = vadd.f32 %v13380_v61, %v13341_v36  ;;  %v4736_v50 = vshrl.u32 %v10432_v30, 16 }
 0x12c   : > { %v13424_v0 = vpop.f32.mrf.mxu0  ;;  %15775 = vst [vmem:[#allocation17_spill] sm:$0xff] %v13440_v62  ;;  %v4705_v62 = vrot.slane %v4704_v17, 4  ;;  %v4700_v11 = vsel %vm12447_vm2, %v4695_v16, %v4699_v32  ;;  %v10434_v6 = vld [vmem:[%s12424_s22 + $0xbc] sm:$0x1]  ;;  %v4727_v13 = vrot.slane %v4725_v40, 4  ;;  %v4733_v17 = vrot.slane %v4731_v51, 5 }
 0x12d   : > { %15777 = vst [vmem:[#allocation19_spill] sm:$0xff] %v13461_v44  ;;  %v4718_v38 = vor.u32 %v4717_v3, %v4714_v59  ;;  %v4739_v16 = vshll.u32 %v10432_v30, 16  ;;  %v4745_v36 = vshll.u32 %v10433_v18, 16  ;;  %v4738_v60 = vrot.slane %v4736_v50, 4  ;;  %v12262_v30 = vld [vmem:[%s12424_s22 + $0xcc] sm:$0xff]  }
 0x12e   : > { %v13434_v1 = vpop.f32.mrf.mxu0  ;;  %v13452_v20 = vpop.f32.mrf.mxu1  ;;  %v4710_v48 = vsel %vm12447_vm2, %v4705_v62, %v4709_v58  ;;  %v4728_v57 = vor.u32 %v4727_v13, %v4723_v9  ;;  %v4749_v44 = vshrl.u32 %v10433_v18, 16  ;;  %v4755_v2 = vshll.u32 %v10434_v6, 16  ;;  %v10436_v51 = vld [vmem:[%s12424_s22 + $0xc4] sm:$0xf] }
 0x12f   : > { %v10468_v32 = vcombine.low %v4700_v11, %v4710_v48  ;;  %v4719_v62 = vrot.slane %v4718_v38, 4  ;;  %v4741_v54 = vrot.slane %v4739_v16, 5  ;;  %v4747_v40 = vrot.slane %v4745_v36, 5 }
 0x130   : > { %v13449_v33 = vpop.f32.mrf.mxu0  ;;  %v13464_v39 = vpop.f32.mrf.mxu1  ;;  %v13477_v59 = vadd.f32 %v13385_v41, %v13357_v42  ;;  %v4729_v3 = vrot.slane %v4728_v57, 4  ;;  %v4751_v18 = vrot.slane %v4749_v44, 4  ;;  %v4757_v6 = vrot.slane %v4755_v2, 5  ;;  %v10437_v42 = vld [vmem:[%s12424_s22 + $0xc8] sm:$0x1] }
 0x131   : > { %11643 = vmatmul.mubr.bf16.gmra.mxu1 %v10468_v32  ;;  %v4724_v13 = vsel %vm12447_vm2, %v4719_v62, %v4723_v9  ;;  %v4742_v50 = vor.u32 %v4741_v54, %v4738_v60  ;;  %v13489_v32 = vadd.f32 %v13415_v63, %v13374_v55  ;;  %v4760_v41 = vshrl.u32 %v10435_v8, 16  ;;  %v10438_v57 = vld [vmem:[%s12424_s22 + $0xcc] sm:$0xf]  ;;  %11603 = vmatmul.mubr.bf16.gmra.mxu0 %v12262_v30 }
 0x132   : > { %v13455_v21 = vpop.f32.mrf.mxu0  ;;  %v13470_v61 = vpop.f32.mrf.mxu1  ;;  %15778 = vst [vmem:[#allocation20_spill] sm:$0xff] %v13477_v59  ;;  %v4734_v16 = vsel %vm12447_vm2, %v4729_v3, %v4733_v17  ;;  %v4752_v44 = vor.u32 %v4751_v18, %v4747_v40  ;;  %v4763_v2 = vshll.u32 %v10435_v8, 16  ;;  %v4769_v36 = vshll.u32 %v10436_v51, 16  ;;  %v10439_v17 = vld [vmem:[%s12424_s22 + $0xd0] sm:$0xf] }
 0x133   : > { %15780 = vst [vmem:[#allocation22_spill] sm:$0xff] %v13489_v32  ;;  %v10469_v9 = vcombine.low %v4724_v13, %v4734_v16  ;;  %v4743_v60 = vrot.slane %v4742_v50, 4  ;;  %v4762_v55 = vrot.slane %v4760_v41, 4  ;;  %v4773_v63 = vshrl.u32 %v10436_v51, 16  ;;  %v10440_v51 = vld [vmem:[%s12424_s22 + $0xd4] sm:$0x1] }
 0x134   : > { %v13468_v29 = vpop.f32.mrf.mxu0  ;;  %v13481_v11 = vpop.f32.mrf.mxu1  ;;  %v4753_v54 = vrot.slane %v4752_v44, 4  ;;  %v4765_v32 = vrot.slane %v4763_v2, 5  ;;  %v4771_v59 = vrot.slane %v4769_v36, 5  ;;  %v4779_v27 = vshll.u32 %v10437_v42, 16 }
 0x135   : > { %15779 = vst [vmem:[#allocation21_spill] sm:$0xff] %v13481_v11  ;;  %11646 = vmatprep.mubr.bf16.mxu1 %v10469_v9  ;;  %v4748_v8 = vsel %vm12447_vm2, %v4743_v60, %v4747_v40  ;;  %v4775_v18 = vrot.slane %v4773_v63, 4  ;;  %v13508_v30 = vadd.f32 %v13422_v34, %v13382_v19  ;;  %v4784_v13 = vshrl.u32 %v10438_v57, 16  ;;  %v10481_v63 = vld [vmem:[%s12424_s22 + $0x18] sm:$0xe] }
 0x136   : > { %v13473_v58 = vpop.f32.mrf.mxu0  ;;  %v13492_v38 = vpop.f32.mrf.mxu1  ;;  %v4758_v42 = vsel %vm12447_vm2, %v4753_v54, %v4757_v6  ;;  %v4766_v41 = vor.u32 %v4765_v32, %v4762_v55  ;;  %v4781_v16 = vrot.slane %v4779_v27, 5  ;;  %v4787_v44 = vshll.u32 %v10438_v57, 16  ;;  %v10482_v19 = vld [vmem:[%s12424_s22 + $0x1c] sm:$0xf]  ;;  %v10483_v54 = vld [vmem:[%s12424_s22 + $0x20] sm:$0x1] }
 0x137   : > { %15781 = vst [vmem:[#allocation23_spill] sm:$0xff] %v13508_v30  ;;  %v10470_v40 = vcombine.low %v4748_v8, %v4758_v42  ;;  %v4776_v36 = vor.u32 %v4775_v18, %v4771_v59  ;;  %v4786_v9 = vrot.slane %v4784_v13, 4  ;;  %v4793_v60 = vshll.u32 %v10439_v17, 16 }
 0x138   : > { %v13483_v48 = vpop.f32.mrf.mxu0  ;;  %v13499_v62 = vpop.f32.mrf.mxu1  ;;  %v4767_v30 = vrot.slane %v4766_v41, 4  ;;  %v4789_v25 = vrot.slane %v4787_v44, 5  ;;  %v4797_v45 = vshrl.u32 %v10439_v17, 16  ;;  %v4803_v6 = vshll.u32 %v10440_v51, 16  ;;  %v10484_v51 = vld [vmem:[%s12424_s22 + $0x24] sm:$0xe] }
 0x139   : > { %11647 = vmatmul.mubr.bf16.gmra.mxu1 %v10470_v40  ;;  %v4777_v27 = vrot.slane %v4776_v36, 4  ;;  %v4795_v57 = vrot.slane %v4793_v60, 5  ;;  %v13526_v55 = vadd.f32 %v13427_v15, %v13392_v28  ;;  %v10485_v41 = vld [vmem:[%s12424_s22 + $0x28] sm:$0xf]  ;;  %v10529_v36 = vrot.slane %v10481_v63, 9 }
 0x13a   : > { %v13497_v11 = vpop.f32.mrf.mxu0  ;;  %v13511_v50 = vpop.f32.mrf.mxu1  ;;  %v4772_v18 = vsel %vm12447_vm2, %v4767_v30, %v4771_v59  ;;  %v4790_v13 = vor.u32 %v4789_v25, %v4786_v9  ;;  %v4799_v42 = vrot.slane %v4797_v45, 4  ;;  %v4805_v17 = vrot.slane %v4803_v6, 5  ;;  %v10486_v28 = vld [vmem:[%s12424_s22 + $0x2c] sm:$0x1] }
 0x13b   : > { %15783 = vst [vmem:[#allocation25_spill] sm:$0xff] %v13526_v55  ;;  %v4782_v40 = vsel %vm12447_vm2, %v4777_v27, %v4781_v16  ;;  %v5291_v60 = vrot.slane %v10482_v19, 5  ;;  %v1967_v45 = vadd.f32 %v13424_v0, %v13138_v24  ;;  %v10530_v9 = vrot.slane %v10484_v51, 9  ;;  %v10487_v0 = vld [vmem:[%s12424_s22 + $0x30] sm:$0xe] }
 0x13c   : > { %v13502_v3 = vpop.f32.mrf.mxu0  ;;  %v13519_v34 = vpop.f32.mrf.mxu1  ;;  %v10471_v55 = vcombine.low %v4772_v18, %v4782_v40  ;;  %v4791_v22 = vrot.slane %v4790_v13, 4  ;;  %v4800_v59 = vor.u32 %v4799_v42, %v4795_v57  ;;  %v5298_v63 = vrot.slane %v10485_v41, 5  ;;  %v10489_v51 = vld [vmem:[%s12424_s22 + $0x38] sm:$0x1] }
 0x13d   : > { %15782 = vst [vmem:[#allocation24_spill] sm:$0xff] %v13519_v34  ;;  %v5294_v34 = vrot.slane %v10483_v54, 5  ;;  %v5292_v30 = vsel %vm12629_vm5, %v10529_v36, %v5291_v60  ;;  %v5293_v16 = vrot.slane %v5291_v60, 4  ;;  %v5301_v27 = vrot.slane %v10486_v28, 5  ;;  %v10490_v36 = vld [vmem:[%s12424_s22 + $0x3c] sm:$0xe] }
 0x13e   : > { %v13515_v2 = vpop.f32.mrf.mxu0  ;;  %v13528_v8 = vpop.f32.mrf.mxu1  ;;  %11650 = vmatprep.mubr.bf16.mxu1 %v10471_v55  ;;  %v4796_v6 = vsel %vm12447_vm2, %v4791_v22, %v4795_v57  ;;  %v4801_v54 = vrot.slane %v4800_v59, 4  ;;  %v1965_v24 = vadd.f32 %v13434_v1, %v13154_v47  ;;  %v5299_v42 = vsel %vm12629_vm5, %v10530_v9, %v5298_v63  ;;  %v10488_v57 = vld [vmem:[%s12424_s22 + $0x34] sm:$0xf]  ;;  %v10491_v60 = vld [vmem:[%s12424_s22 + $0x40] sm:$0xf] }
 0x13f   : > { %v5295_v13 = vsel %vm12629_vm5, %v5293_v16, %v5294_v34  ;;  %v5300_v55 = vrot.slane %v5298_v63, 4  ;;  %v13561_v22 = vadd.f32 %v13452_v20, %v1967_v45  ;;  %v1968_v40 = vadd.f32 %v13449_v33, %v13167_v7  ;;  %v10492_v7 = vld [vmem:[%s12424_s22 + $0x44] sm:$0x1]  ;;  %v10493_v63 = vld [vmem:[%s12424_s22 + $0x48] sm:$0xe] }
 0x140   : > { %v13522_v32 = vpop.f32.mrf.mxu0  ;;  %v13539_v15 = vpop.f32.mrf.mxu1  ;;  %v4806_v47 = vsel %vm12447_vm2, %v4801_v54, %v4805_v17  ;;  %v10561_v1 = vcombine.low %v5292_v30, %v5295_v13  ;;  %v13572_v34 = vadd.f32 %v13464_v39, %v1965_v24  ;;  %v13582_v17 = vadd.f32 %v13455_v21, %v13174_v12  ;;  %v10495_v24 = vld [vmem:[%s12424_s22 + $0x50] sm:$0x1] }
 0x141   : > { %v10472_v28 = vcombine.low %v4796_v6, %v4806_v47  ;;  %v5302_v59 = vsel %vm12629_vm5, %v5300_v55, %v5301_v27  ;;  %v10531_v45 = vrot.slane %v10487_v0, 9  ;;  %v13588_v30 = vadd.f32 %v13470_v61, %v1968_v40  ;;  %v10494_v6 = vld [vmem:[%s12424_s22 + $0x4c] sm:$0xf] }
 0x142   : > { %v13534_v44 = vpop.f32.mrf.mxu0  ;;  %v13547_v19 = vpop.f32.mrf.mxu1  ;;  %11670 = vmatprep.mubr.bf16.mxu0 %v10561_v1  ;;  %v10562_v39 = vcombine.low %v5299_v42, %v5302_v59  ;;  %v5305_v16 = vrot.slane %v10488_v57, 5  ;;  %v5308_v9 = vrot.slane %v10489_v51, 5  ;;  %v1971_v12 = vadd.f32 %v13468_v29, %v13184_v14  ;;  %v10496_v57 = vld [vmem:[%s12424_s22 + $0x54] sm:$0xe]  ;;  %v10497_v51 = vld [vmem:[%s12424_s22 + $0x58] sm:$0xf] }
 0x143   : > { %11651 = vmatmul.mubr.bf16.gmra.mxu1 %v10472_v28  ;;  %v10532_v21 = vrot.slane %v10490_v36, 9  ;;  %v5312_v27 = vrot.slane %v10491_v60, 5  ;;  %v5315_v42 = vrot.slane %v10492_v7, 5  ;;  %v1969_v55 = vadd.f32 %v13473_v58, %v13205_v53  ;;  %v10498_v36 = vld [vmem:[%s12424_s22 + $0x5c] sm:$0x1] }
 0x144   : > { %v13543_v25 = vpop.f32.mrf.mxu0  ;;  %v13565_v41 = vpop.f32.mrf.mxu1  ;;  %11671 = vmatmul.mubr.bf16.vlgmr.msra.gmra.mxu0 %v10562_v39  ;;  %v5306_v61 = vsel %vm12629_vm5, %v10531_v45, %v5305_v16  ;;  %v5307_v13 = vrot.slane %v5305_v16, 4  ;;  %v13610_v1 = vadd.f32 %v13492_v38, %v1971_v12  ;;  %v1972_v40 = vadd.f32 %v13483_v48, %v13230_v35  ;;  %v10499_v39 = vld [vmem:[%s12424_s22 + $0x60] sm:$0xe] }
 0x145   : > { %v5313_v14 = vsel %vm12629_vm5, %v10532_v21, %v5312_v27  ;;  %v5314_v29 = vrot.slane %v5312_v27, 4  ;;  %v13620_v58 = vadd.f32 %v13499_v62, %v1969_v55  ;;  %v13624_v28 = vadd.f32 %v13497_v11, %v13234_v31  ;;  %v10500_v11 = vld [vmem:[%s12424_s22 + $0x64] sm:$0xf]  ;;  %v10502_v55 = vld [vmem:[%s12424_s22 + $0x6c] sm:$0xe] }
 0x146   : > { %v13554_v18 = vpop.f32.mrf.mxu0  ;;  %v13585_v33 = vpop.f32.mrf.mxu1  ;;  %v5309_v53 = vsel %vm12629_vm5, %v5307_v13, %v5308_v9  ;;  %v10533_v38 = vrot.slane %v10493_v63, 9  ;;  %v13631_v48 = vadd.f32 %v13511_v50, %v1972_v40  ;;  %v5319_v7 = vrot.slane %v10494_v6, 5  ;;  %v10501_v63 = vld [vmem:[%s12424_s22 + $0x68] sm:$0x1] }
 0x147   : > { %v10563_v45 = vcombine.low %v5306_v61, %v5309_v53  ;;  %v5316_v35 = vsel %vm12629_vm5, %v5314_v29, %v5315_v42  ;;  %v5322_v9 = vrot.slane %v10495_v24, 5  ;;  %v1975_v31 = vadd.f32 %v13502_v3, %v13247_v10  ;;  %v10503_v61 = vld [vmem:[%s12424_s22 + $0x70] sm:$0xf] }
 0x148   : > { %v13576_v20 = vpop.f32.mrf.mxu0  ;;  %v13597_v0 = vpop.f32.mrf.mxu1  ;;  %v10564_v62 = vcombine.low %v5313_v14, %v5316_v35  ;;  %v5320_v21 = vsel %vm12629_vm5, %v10533_v38, %v5319_v7  ;;  %v5321_v50 = vrot.slane %v5319_v7, 4  ;;  %v10534_v6 = vrot.slane %v10496_v57, 9  ;;  %v10505_v35 = vld [vmem:[%s12424_s22 + $0x78] sm:$0xe]  ;;  %v10506_v7 = vld [vmem:[%s12424_s22 + $0x7c] sm:$0xf] }
 0x149   : > { %11674 = vmatprep.mubr.bf16.mxu0 %v10563_v45  ;;  %v5326_v27 = vrot.slane %v10497_v51, 5  ;;  %v5329_v24 = vrot.slane %v10498_v36, 5  ;;  %v1973_v42 = vadd.f32 %v13515_v2, %v13266_v5  ;;  %v13650_v10 = vadd.f32 %v13528_v8, %v1975_v31  ;;  %v10504_v2 = vld [vmem:[%s12424_s22 + $0x74] sm:$0x1] }
 0x14a   : > { %v13592_v54 = vpop.f32.mrf.mxu0  ;;  %v13615_v60 = vpop.f32.mrf.mxu1  ;;  %v1976_v3 = vadd.f32 %v13522_v32, %v13288_v23  ;;  %v5323_v57 = vsel %vm12629_vm5, %v5321_v50, %v5322_v9  ;;  %v13663_v5 = vadd.f32 %v13534_v44, %v13292_v49  ;;  %v10535_v36 = vrot.slane %v10499_v39, 9  ;;  %v10507_v9 = vld [vmem:[%s12424_s22 + $0x80] sm:$0x1] }
 0x14b   : > { %v5327_v51 = vsel %vm12629_vm5, %v10534_v6, %v5326_v27  ;;  %v5328_v29 = vrot.slane %v5326_v27, 4  ;;  %v10565_v23 = vcombine.low %v5320_v21, %v5323_v57  ;;  %v13669_v32 = vadd.f32 %v13539_v15, %v1973_v42 }
 0x14c   : > { %v13605_v47 = vpop.f32.mrf.mxu0  ;;  %v13634_v16 = vpop.f32.mrf.mxu1  ;;  %11675 = vmatmul.mubr.bf16.gmra.mxu0 %v10564_v62  ;;  %v13672_v40 = vadd.f32 %v13547_v19, %v1976_v3  ;;  %v5333_v49 = vrot.slane %v10500_v11, 5  ;;  %v5336_v44 = vrot.slane %v10501_v63, 5  ;;  %v1979_v45 = vadd.f32 %v13543_v25, %v13300_v4  ;;  %v10509_v4 = vld [vmem:[%s12424_s22 + $0x88] sm:$0xf] }
 0x14d   : > { %15784 = vst [vmem:[#allocation26_spill] sm:$0xff] %v13634_v16  ;;  %v5330_v38 = vsel %vm12629_vm5, %v5328_v29, %v5329_v24  ;;  %11678 = vmatprep.mubr.bf16.mxu0 %v10565_v23  ;;  %v5340_v19 = vrot.slane %v10503_v61, 5  ;;  %v10536_v11 = vrot.slane %v10502_v55, 9  ;;  %v1977_v63 = vadd.f32 %v13554_v18, %v13324_v46  ;;  %v10508_v24 = vld [vmem:[%s12424_s22 + $0x84] sm:$0xe] }
 0x14e   : > { %v13626_v59 = vpop.f32.mrf.mxu0  ;;  %v13645_v13 = vpop.f32.mrf.mxu1  ;;  %v10566_v15 = vcombine.low %v5327_v51, %v5330_v38  ;;  %v5334_v31 = vsel %vm12629_vm5, %v10535_v36, %v5333_v49  ;;  %v5335_v21 = vrot.slane %v5333_v49, 4  ;;  %v5343_v6 = vrot.slane %v10504_v2, 5  ;;  %v10510_v18 = vld [vmem:[%s12424_s22 + $0x8c] sm:$0x1]  ;;  %v10511_v38 = vld [vmem:[%s12424_s22 + $0x90] sm:$0xe] }
 0x14f   : > { %v5342_v50 = vrot.slane %v5340_v19, 4  ;;  %v13693_v27 = vadd.f32 %v13585_v33, %v1979_v45  ;;  %v1980_v61 = vadd.f32 %v13576_v20, %v13338_v43  ;;  %v13701_v55 = vadd.f32 %v13597_v0, %v1977_v63  ;;  %v10512_v49 = vld [vmem:[%s12424_s22 + $0x94] sm:$0xf]  ;;  %v15802_v16 = vld [vmem:[#allocation22_spill] sm:$0xff] }
 0x150   : > { %v13640_v12 = vpop.f32.mrf.mxu0  ;;  %v13666_v8 = vpop.f32.mrf.mxu1  ;;  %v5337_v3 = vsel %vm12629_vm5, %v5335_v21, %v5336_v44  ;;  %v13705_v46 = vadd.f32 %v13592_v54, %v13350_v56  ;;  %v10537_v43 = vrot.slane %v10505_v35, 9  ;;  %v5347_v20 = vrot.slane %v10506_v7, 5  ;;  %v15789_v35 = vld [vmem:[#allocation10_spill] sm:$0xff] }
 0x151   : > { %v10567_v57 = vcombine.low %v5334_v31, %v5337_v3  ;;  %v13709_v51 = vadd.f32 %v13615_v60, %v1980_v61  ;;  %v5350_v2 = vrot.slane %v10507_v9, 5  ;;  %v1983_v0 = vadd.f32 %v13605_v47, %v13354_v26  ;;  %v15790_v47 = vld [vmem:[#allocation11_spill] sm:$0xff]  ;;  %v15792_v3 = vld [vmem:[#allocation13_spill] sm:$0xff] }
 0x152   : > { %v13655_v14 = vpop.f32.mrf.mxu0  ;;  %v11449_v62 = vpop.f32.mrf.mxu1  ;;  %15787 = vst [vmem:[#allocation29_spill] sm:$0xff] %v13705_v46  ;;  %v5341_v56 = vsel %vm12629_vm5, %v10536_v11, %v5340_v19  ;;  %v5344_v54 = vsel %vm12629_vm5, %v5342_v50, %v5343_v6  ;;  %v5349_v36 = vrot.slane %v5347_v20, 4  ;;  %v5354_v60 = vrot.slane %v10509_v4, 5  ;;  %v10513_v19 = vld [vmem:[%s12424_s22 + $0x98] sm:$0x1] }
 0x153   : > { %15785 = vst [vmem:[#allocation27_spill] sm:$0xff] %v13655_v14  ;;  %v10538_v45 = vrot.slane %v10508_v24, 9  ;;  %v1981_v7 = vadd.f32 %v13626_v59, %v15789_v35  ;;  %v13724_v26 = vadd.f32 %v13645_v13, %v1983_v0  ;;  %v5348_v31 = vsel %vm12629_vm5, %v10537_v43, %v5347_v20  ;;  %v13734_v4 = vld [vmem:[%s12424_s22 + $0xa0] sm:$0xf]  ;;  %v12264_v6 = vld [vmem:[%s15752_s3 + $0x38] sm:$0xff]  }
 0x154   : > { %v13674_v53 = vpop.f32.mrf.mxu0  ;;  %v13690_v25 = vpop.f32.mrf.mxu1  ;;  %11679 = vmatmul.mubr.bf16.gmra.mxu0 %v10566_v15  ;;  %v1984_v15 = vadd.f32 %v13640_v12, %v15790_v47  ;;  %v5351_v21 = vsel %vm12629_vm5, %v5349_v36, %v5350_v2  ;;  %v5356_v11 = vrot.slane %v5354_v60, 4  ;;  %v5357_v63 = vrot.slane %v10510_v18, 5  ;;  %v10514_v2 = vld [vmem:[%s12424_s22 + $0x9c] sm:$0xe]  ;;  %11702 = vmatprep.subr.bf16.mxu1 %v12264_v6 }
 0x155   : > { %15786 = vst [vmem:[#allocation28_spill] sm:$0xff] %v13690_v25  ;;  %11682 = vmatprep.mubr.bf16.mxu0 %v10567_v57  ;;  %v13737_v13 = vadd.f32 %v13666_v8, %v1981_v7  ;;  %v10568_v61 = vcombine.low %v5341_v56, %v5344_v54  ;;  %v5361_v24 = vrot.slane %v10512_v49, 5  ;;  %v1987_v18 = vadd.f32 %v13674_v53, %v15792_v3  ;;  %v13749_v57 = vld [vmem:[%s12424_s22 + $0xac] sm:$0xf]  ;;  %v10516_v53 = vld [vmem:[%s12424_s22 + $0xa4] sm:$0x1] }
 0x156   : > { %v13683_v39 = vpop.f32.mrf.mxu0  ;;  %v11452_v33 = vpop.f32.mrf.mxu1  ;;  %v13739_v50 = vadd.f32 %v11449_v62, %v1984_v15  ;;  %v10569_v8 = vcombine.low %v5348_v31, %v5351_v21  ;;  %v13753_v62 = vsel %vm12629_vm5, %v10538_v45, %v5354_v60  ;;  %v10539_v20 = vrot.slane %v10511_v38, 9  ;;  %v15793_v49 = vld [vmem:[#allocation15_spill] sm:$0xff]  ;;  %11703 = vmatpush3.bf16.msra.mxu1 %v12264_v6  ;;  %v15795_v45 = vld [vmem:[#allocation16_spill] sm:$0xff] }
 0x157   : > { %v5358_v56 = vsel %vm12629_vm5, %v5356_v11, %v5357_v63  ;;  %v5363_v54 = vrot.slane %v5361_v24, 4  ;;  %v5364_v36 = vrot.slane %v10513_v19, 5  ;;  %v1985_v35 = vadd.f32 %v13683_v39, %v15793_v49  ;;  %v10517_v7 = vld [vmem:[%s12424_s22 + $0xa8] sm:$0xe]  ;;  %v10519_v31 = vld [vmem:[%s12424_s22 + $0xb0] sm:$0x1] }
 0x158   : > { %v11405_v42 = vpop.f32.mrf.mxu0  ;;  %v2369_v23 = vpop.f32.mrf.mxu1  ;;  %v5368_v60 = vrot.slane %v13734_v4, 5  ;;  %v13765_v38 = vadd.f32 %v11452_v33, %v1987_v18  ;;  %v13772_v11 = vld [vmem:[%s12424_s22 + $0xb8] sm:$0xf]  ;;  %v10570_v63 = vcombine.low %v13753_v62, %v5358_v56  ;;  %v5375_v33 = vrot.slane %v13749_v57, 5  ;;  %v13779_v4 = vld [vmem:[%s12424_s22 + $0xb4] sm:$0xe] }
 0x159   : > { %v1988_v15 = vadd.f32 %v11405_v42, %v15795_v45  ;;  %v13769_v19 = vadd.f32 %v2369_v23, %v1985_v35  ;;  %v13782_v42 = vld [vmem:[%s12424_s22 + $0xbc] sm:$0x1]  ;;  %v5362_v23 = vsel %vm12629_vm5, %v10539_v20, %v5361_v24  ;;  %v10540_v18 = vrot.slane %v10514_v2, 9  ;;  %v13790_v62 = vld [vmem:[%s12424_s22 + $0xc4] sm:$0xf]  ;;  %v15798_v2 = vld [vmem:[#allocation19_spill] sm:$0xff] }
 0x15a   : > { %v13711_v29 = vpop.f32.mrf.mxu0  ;;  %v11453_v9 = vpop.f32.mrf.mxu1  ;;  %v5370_v57 = vrot.slane %v5368_v60, 4  ;;  %v5371_v49 = vrot.slane %v10516_v53, 5  ;;  %v10541_v35 = vrot.slane %v10517_v7, 9  ;;  %v13797_v24 = vld [vmem:[%s12424_s22 + $0xc8] sm:$0x1]  ;;  %v5377_v45 = vrot.slane %v5375_v33, 4 }
 0x15b   : > { %15788 = vst [vmem:[#allocation30_spill] sm:$0xff] %v13711_v29  ;;  %v13775_v6 = vadd.f32 %v11453_v9, %v1988_v15  ;;  %v13794_v15 = vld [vmem:[%s12424_s22 + $0xc0] sm:$0xe]  ;;  %v13812_v25 = vld [vmem:[%s12424_s22 + $0xd4] sm:$0x1] }
 0x15c   : > { %v11408_v44 = vpop.f32.mrf.mxu0  ;;  %v13741_v12 = vpop.f32.mrf.mxu1  ;;  %11683 = vmatmul.mubr.bf16.gmra.mxu0 %v10568_v61  ;;  %v5365_v61 = vsel %vm12629_vm5, %v5363_v54, %v5364_v36  ;;  %v5378_v54 = vrot.slane %v10519_v31, 5  ;;  %v12265_v31 = vld [vmem:[%s15752_s3 + $0x30] sm:$0xff]  }
 0x15d   : > { %15791 = vst [vmem:[#allocation10_spill] sm:$0xff] %v13741_v12  ;;  %11686 = vmatprep.mubr.bf16.mxu0 %v10569_v8  ;;  %v15796_v8 = vld [vmem:[#allocation18_spill] sm:$0xff]  ;;  %v13809_v12 = vld [vmem:[%s12424_s22 + $0xd0] sm:$0xf]  ;;  %v10571_v7 = vcombine.low %v5362_v23, %v5365_v61  ;;  %v5369_v23 = vsel %vm12629_vm5, %v10540_v18, %v5368_v60  ;;  %v15801_v61 = vrot.slane %v13772_v11, 5  ;;  %11704 = vmatprep.subr.bf16.mxu1 %v12265_v31  ;;  %v5392_v60 = vrot.slane %v13797_v24, 5 }
 0x15e   : > { %v1934_v59 = vpop.f32.mrf.mxu0  ;;  %v11456_v0 = vpop.f32.mrf.mxu1  ;;  %v1991_v9 = vadd.f32 %v11408_v44, %v15796_v8  ;;  %v15799_v44 = vld [vmem:[#allocation20_spill] sm:$0xff]  ;;  %11705 = vmatpush3.bf16.msra.mxu1 %v12265_v31  ;;  %v5379_v18 = vsel %vm12629_vm5, %v5377_v45, %v5378_v54 }
 0x15f   : > { %v1989_v36 = vadd.f32 %v1934_v59, %v15798_v2  ;;  %v10542_v59 = vrot.slane %v13779_v4, 9  ;;  %v5376_v4 = vsel %vm12629_vm5, %v10541_v35, %v5375_v33  ;;  %v5399_v33 = vrot.slane %v13812_v25, 5 }
 0x160   : > { %v11409_v43 = vpop.f32.mrf.mxu0  ;;  %v2385_v21 = vpop.f32.mrf.mxu1  ;;  %v13802_v37 = vadd.f32 %v11456_v0, %v1991_v9  ;;  %v5385_v0 = vrot.slane %v13782_v42, 5  ;;  %v10543_v42 = vrot.slane %v13794_v15, 9  ;;  %v15804_v15 = vld [vmem:[#allocation25_spill] sm:$0xff]  ;;  %v10573_v25 = vcombine.low %v5376_v4, %v5379_v18 }
 0x161   : > { %v1992_v8 = vadd.f32 %v11409_v43, %v15799_v44  ;;  %v13819_v9 = vadd.f32 %v2385_v21, %v1989_v36  ;;  %v5384_v44 = vrot.slane %v15801_v61, 4  ;;  %v5372_v21 = vsel %vm12629_vm5, %v5370_v57, %v5371_v49 }
 0x162   : > { %v13762_v47 = vpop.f32.mrf.mxu0  ;;  %v11457_v3 = vpop.f32.mrf.mxu1 }
 0x163   : > { %15794 = vst [vmem:[#allocation11_spill] sm:$0xff] %v13762_v47  ;;  %v13806_v47 = vld [vmem:[%s12424_s22 + $0xcc] sm:$0xe]  ;;  %v13821_v43 = vadd.f32 %v11457_v3, %v1992_v8 }
 0x164   : > { %v11412_v39 = vpop.f32.mrf.mxu0  ;;  %v13799_v20 = vpop.f32.mrf.mxu1  ;;  %11687 = vmatmul.mubr.bf16.gmra.mxu0 %v10570_v63  ;;  %v15803_v63 = vld [vmem:[#allocation23_spill] sm:$0xff] }
 0x165   : > { %15797 = vst [vmem:[#allocation13_spill] sm:$0xff] %v13799_v20  ;;  %v5389_v20 = vrot.slane %v13790_v62, 5  ;;  %v1995_v46 = vadd.f32 %v11412_v39, %v15802_v16  ;;  %11690 = vmatprep.mubr.bf16.mxu0 %v10571_v7  ;;  %v10544_v16 = vrot.slane %v13806_v47, 9  ;;  %v5396_v39 = vrot.slane %v13809_v12, 5 }
 0x166   : > { %v1950_v56 = vpop.f32.mrf.mxu0  ;;  %v11460_v29 = vpop.f32.mrf.mxu1  ;;  %v10572_v47 = vcombine.low %v5369_v23, %v5372_v21 }
 0x167   : > { %v1993_v62 = vadd.f32 %v1950_v56, %v15803_v63  ;;  %v5391_v49 = vrot.slane %v5389_v20, 4  ;;  %v13843_v35 = vadd.f32 %v11460_v29, %v1995_v46 }
 0x168   : > { %v11413_v53 = vpop.f32.mrf.mxu0  ;;  %v2401_v14 = vpop.f32.mrf.mxu1 }
 0x169   : > { %v1996_v24 = vadd.f32 %v11413_v53, %v15804_v15  ;;  %v13846_v8 = vadd.f32 %v2401_v14, %v1993_v62  ;;  %v5398_v53 = vrot.slane %v5396_v39, 4  ;;  %v5393_v18 = vsel %vm12629_vm5, %v5391_v49, %v5392_v60 }
 0x16a   : > { %v13823_v2 = vpop.f32.mrf.mxu0  ;;  %v11461_v57 = vpop.f32.mrf.mxu1 }
 0x16b   : > { %15800 = vst [vmem:[#allocation15_spill] sm:$0xff] %v13823_v2  ;;  %v13853_v12 = vadd.f32 %v11461_v57, %v1996_v24  ;;  %v5400_v60 = vsel %vm12629_vm5, %v5398_v53, %v5399_v33 }
 0x16c   : > { %v11480_v3 = vpop.f32.mrf.mxu0  ;;  %v13848_v7 = vpop.f32.mrf.mxu1  ;;  %11691 = vmatmul.mubr.bf16.gmra.mxu0 %v10572_v47 }
 0x16d   : > { %15805 = vst [vmem:[#allocation16_spill] sm:$0xff] %v13848_v7  ;;  %v13851_v45 = vadd.f32 %v11480_v3, %v13561_v22  ;;  %v12266_v22 = vld [vmem:[%s15752_s3 + $0x28] sm:$0xff]   ;;  %11694 = vmatprep.mubr.bf16.mxu0 %v10573_v25  ;;  %v5390_v3 = vsel %vm12629_vm5, %v10543_v42, %v5389_v20  ;;  %v12267_v42 = vld [vmem:[%s15752_s3 + $0x20] sm:$0xff]  }
 0x16e   : > { %v3107_v36 = vpop.f32.mrf.mxu0  ;;  %v13858_v46 = vpop.f32.mrf.mxu1  ;;  %11706 = vmatprep.subr.bf16.mxu1 %v12266_v22  ;;  %v10575_v62 = vcombine.low %v5390_v3, %v5393_v18 }
 0x16f   : > { %v13856_v56 = vadd.f32 %v3107_v36, %v13572_v34  ;;  %v15806_v34 = vmov %v15801_v61  ;;  %11707 = vmatpush3.bf16.msra.mxu1 %v12266_v22 }
 0x170   : > { %v11481_v54 = vpop.f32.mrf.mxu0  ;;  %v13865_v31 = vpop.f32.mrf.mxu1  ;;  %v5383_v61 = vsel %vm12629_vm5, %v10542_v59, %v15806_v34  ;;  %11708 = vmatprep.subr.bf16.mxu1 %v12267_v42 }
 0x171   : > { %v13861_v29 = vadd.f32 %v11481_v54, %v13588_v30  ;;  %v5386_v30 = vsel %vm12629_vm5, %v5384_v44, %v5385_v0 }
 0x172   : > { %v13863_v14 = vpop.f32.mrf.mxu0  ;;  %v13876_v21 = vpop.f32.mrf.mxu1  ;;  %v10574_v0 = vcombine.low %v5383_v61, %v5386_v30 }
 0x173   : > { %11709 = vmatpush3.bf16.msra.mxu1 %v12267_v42 }
 0x174   : > { %v11484_v23 = vpop.f32.mrf.mxu0  ;;  %v13885_v11 = vpop.f32.mrf.mxu1  ;;  %11695 = vmatmul.mubr.bf16.gmra.mxu0 %v10574_v0 }
 0x175   : > { %v13879_v4 = vadd.f32 %v11484_v23, %v13610_v1  ;;  %11698 = vmatprep.mubr.bf16.mxu0 %v10575_v62  ;;  %v12268_v23 = vld [vmem:[%s15752_s3 + $0x18] sm:$0xff]  }
 0x176   : > { %v3123_v63 = vpop.f32.mrf.mxu0  ;;  %v13890_v57 = vpop.f32.mrf.mxu1  ;;  %11710 = vmatprep.subr.bf16.mxu1 %v12268_v23  ;;  %v12275_v62 = vld [vmem:[%s15752_s3 + $0x58] sm:$0xff]  }
 0x177   : > { %v13888_v59 = vadd.f32 %v3123_v63, %v13620_v58  ;;  %v5397_v58 = vsel %vm12629_vm5, %v10544_v16, %v5396_v39  ;;  %v12270_v39 = vld [vmem:[%s15752_s3 + $0x70] sm:$0xff]   ;;  %11711 = vmatpush3.bf16.msra.mxu1 %v12268_v23 }
 0x178   : > { %v11485_v44 = vpop.f32.mrf.mxu0  ;;  %v13895_v15 = vpop.f32.mrf.mxu1  ;;  %v10576_v36 = vcombine.low %v5397_v58, %v5400_v60  ;;  %v12271_v60 = vld [vmem:[%s15752_s3 + $0x10] sm:$0xff]  }
 0x179   : > { %v13893_v1 = vadd.f32 %v11485_v44, %v13631_v48  ;;  %v12269_v48 = vld [vmem:[%s15752_s3 + $0x78] sm:$0xff]   ;;  %11712 = vmatprep.subr.bf16.mxu1 %v12271_v60 }
 0x17a   : > { %v13897_v20 = vpop.f32.mrf.mxu0  ;;  %v13906_v49 = vpop.f32.mrf.mxu1  ;;  %11750 = vmatprep.subr.bf16.mxu0 %v12269_v48 }
 0x17b   : > { %11751 = vmatpush3.bf16.msra.mxu0 %v12269_v48  ;;  %11713 = vmatpush3.bf16.msra.mxu1 %v12271_v60 }
 0x17c   : > { %v13911_v24 = vpop.f32.mrf.mxu1  ;;  %v11488_v47 = vpop.f32.mrf.mxu0  ;;  %11699 = vmatmul.mubr.bf16.gmra.mxu0 %v10576_v36  ;;  %11752 = vmatprep.subr.bf16.mxu0 %v12270_v39  ;;  %v12345_v36 = vmov 0.0  }
 0x17d   : > { %v13914_v54 = vadd.f32 %v11488_v47, %v13650_v10  ;;  %5864 = vst [vmem:[#allocation3 + $0x30] sm:$0xff] %v12345_v36  ;;  %5865 = vst [vmem:[#allocation3 + $0x38] sm:$0xff] %v12345_v36  ;;  %v12278_v47 = vld [vmem:[%s15752_s3 + $0x48] sm:$0xff]  }
 0x17e   : > { %v13916_v16 = vpop.f32.mrf.mxu1  ;;  %v3139_v52 = vpop.f32.mrf.mxu0  ;;  %5858 = vst [vmem:[#allocation3] sm:$0xff] %v12345_v36  ;;  %5859 = vst [vmem:[#allocation3 + $0x8] sm:$0xff] %v12345_v36 }
 0x17f   : > { %v13922_v33 = vadd.f32 %v3139_v52, %v13669_v32  ;;  %11753 = vmatpush3.bf16.msra.mxu0 %v12270_v39  ;;  %v12272_v32 = vld [vmem:[%s15752_s3 + $0x68] sm:$0xff]   ;;  %5860 = vst [vmem:[#allocation3 + $0x10] sm:$0x3] %v12345_v36  ;;  %5861 = vst [vmem:[#allocation3 + $0x18] sm:$0xff] %v12345_v36 }
 0x180   : > { %v13924_v25 = vpop.f32.mrf.mxu1  ;;  %v11489_v53 = vpop.f32.mrf.mxu0  ;;  %11754 = vmatprep.subr.bf16.mxu0 %v12272_v32  ;;  %5862 = vst [vmem:[#allocation3 + $0x20] sm:$0xff] %v12345_v36  ;;  %5863 = vst [vmem:[#allocation3 + $0x28] sm:$0x3] %v12345_v36 }
 0x181   : > { %v13927_v22 = vadd.f32 %v11489_v53, %v13672_v40  ;;  %v12273_v40 = vld [vmem:[%s15752_s3 + $0x60] sm:$0xff]   ;;  %5866 = vst [vmem:[#allocation3 + $0x40] sm:$0x3] %v12345_v36  ;;  %5867 = vst [vmem:[#allocation3 + $0x48] sm:$0xff] %v12345_v36 }
 0x182   : > { %v13929_v10 = vpop.f32.mrf.mxu1  ;;  %v13937_v34 = vpop.f32.mrf.mxu0  ;;  %5868 = vst [vmem:[#allocation3 + $0x50] sm:$0xff] %v12345_v36  ;;  %5869 = vst [vmem:[#allocation3 + $0x58] sm:$0x3] %v12345_v36 }
 0x183   : > { %11755 = vmatpush3.bf16.msra.mxu0 %v12272_v32  ;;  %5870 = vst [vmem:[#allocation3 + $0x60] sm:$0xff] %v12345_v36  ;;  %5871 = vst [vmem:[#allocation3 + $0x68] sm:$0xff] %v12345_v36  ;;  %v12274_v32 = vld [vmem:[%s15752_s3 + $0x8] sm:$0xff]  }
 0x184   : > { %v13939_v61 = vpop.f32.mrf.mxu1  ;;  %v11492_v30 = vpop.f32.mrf.mxu0  ;;  %11756 = vmatprep.subr.bf16.mxu0 %v12273_v40  ;;  %5872 = vst [vmem:[#allocation3 + $0x70] sm:$0x3] %v12345_v36  ;;  %5873 = vst [vmem:[#allocation3 + $0x78] sm:$0xff] %v12345_v36  ;;  %11714 = vmatprep.subr.bf16.mxu1 %v12274_v32 }
 0x185   : > { %v13945_v3 = vadd.f32 %v11492_v30, %v13693_v27  ;;  %5874 = vst [vmem:[#allocation3 + $0x80] sm:$0xff] %v12345_v36  ;;  %5875 = vst [vmem:[#allocation3 + $0x88] sm:$0x3] %v12345_v36  ;;  %11715 = vmatpush3.bf16.msra.mxu1 %v12274_v32  ;;  %v6250_v60 = vld [vmem:[#allocation3 + $0x1] sm:$0xff] }
 0x186   : > { %v3155_v63 = vpop.f32.mrf.mxu0  ;;  %5876 = vst [vmem:[#allocation3 + $0x90] sm:$0xff] %v12345_v36  ;;  %5877 = vst [vmem:[#allocation3 + $0x98] sm:$0xff] %v12345_v36 }
 0x187   : > { %11757 = vmatpush3.bf16.msra.mxu0 %v12273_v40  ;;  %v13950_v0 = vadd.f32 %v3155_v63, %v13701_v55  ;;  %v12276_v55 = vld [vmem:[%s15752_s3 + $0x50] sm:$0xff]   ;;  %5878 = vst [vmem:[#allocation3 + $0xa0] sm:$0x3] %v12345_v36  ;;  %5879 = vst [vmem:[#allocation3 + $0xa8] sm:$0xff] %v12345_v36  ;;  %v12279_v63 = vld [vmem:[%s15752_s3 + $0x40] sm:$0xff]  }
 0x188   : > { %v13947_v18 = vpop.f32.mrf.mxu1  ;;  %v11493_v42 = vpop.f32.mrf.mxu0  ;;  %11758 = vmatprep.subr.bf16.mxu0 %v12275_v62  ;;  %5880 = vst [vmem:[#allocation3 + $0xb0] sm:$0xff] %v12345_v36  ;;  %5881 = vst [vmem:[#allocation3 + $0xb8] sm:$0x3] %v12345_v36 }
 0x189   : > { %15807 = vst [vmem:[#allocation18_spill] sm:$0xff] %v13950_v0  ;;  %v13958_v58 = vadd.f32 %v11493_v42, %v13709_v51  ;;  %5882 = vst [vmem:[#allocation3 + $0xc0] sm:$0xff] %v12345_v36 }
 0x18a   : > { %v13952_v44 = vpop.f32.mrf.mxu1  ;;  %v13968_v48 = vpop.f32.mrf.mxu0  ;;  %5883 = vst [vmem:[#allocation3 + $0xc8] sm:$0xff] %v12345_v36  ;;  %5884 = vst [vmem:[#allocation3 + $0xd0] sm:$0x3] %v12345_v36 }
 0x18b   : > { %15808 = vst [vmem:[#allocation19_spill] sm:$0xff] %v13952_v44  ;;  %15809 = vst [vmem:[#allocation20_spill] sm:$0xff] %v13958_v58  ;;  %11759 = vmatpush3.bf16.msra.mxu0 %v12275_v62 }
 0x18c   : > { %v13960_v27 = vpop.f32.mrf.mxu1  ;;  %15811 = vst [vmem:[#allocation23_spill] sm:$0xff] %v13968_v48  ;;  %5885 = vst [vmem:[#allocation3 + $0xd8] sm:$0xff] %v12345_v36  ;;  %11760 = vmatprep.subr.bf16.mxu0 %v12276_v55 }
 0x18d   : > { %15810 = vst [vmem:[#allocation22_spill] sm:$0xff] %v13960_v27  ;;  %5886 = vst [vmem:[#allocation3 + $0xe0] sm:$0xff] %v12345_v36 }
 0x18e   : > { %5887 = vst [vmem:[#allocation3 + $0xe8] sm:$0x3] %v12345_v36  ;;  %5888 = vst [vmem:[#allocation3 + $0xf0] sm:$0xff] %v12345_v36  ;;  %v13970_v51 = vpop.f32.mrf.mxu1  ;;  %v11496_v52 = vpop.f32.mrf.mxu0 }
 0x18f   : > { %5889 = vst [vmem:[#allocation3 + $0xf8] sm:$0xff] %v12345_v36  ;;  %5890 = vst [vmem:[#allocation3 + $0x100] sm:$0x3] %v12345_v36  ;;  %11761 = vmatpush3.bf16.msra.mxu0 %v12276_v55  ;;  %v13976_v39 = vadd.f32 %v11496_v52, %v13724_v26  ;;  %v6251_v55 = vld [vmem:[#allocation3 + $0x9] sm:$0xff]  ;;  %v12277_v52 = vld [vmem:[%s15752_s3] sm:$0xff]  }
 0x190   : > { %5891 = vst [vmem:[#allocation3 + $0x108] sm:$0xff] %v12345_v36  ;;  %5892 = vst [vmem:[#allocation3 + $0x110] sm:$0xff] %v12345_v36  ;;  %v13978_v53 = vpop.f32.mrf.mxu1  ;;  %11762 = vmatprep.subr.bf16.mxu0 %v12278_v47  ;;  %v3171_v23 = vpop.f32.mrf.mxu0  ;;  %11716 = vmatprep.subr.bf16.mxu1 %v12277_v52 }
 0x191   : > { %5893 = vst [vmem:[#allocation3 + $0x118] sm:$0x3] %v12345_v36  ;;  %5894 = vst [vmem:[#allocation3 + $0x120] sm:$0xff] %v12345_v36  ;;  %v13984_v40 = vadd.f32 %v3171_v23, %v13737_v13  ;;  %v6282_v13 = vpack.c.bf16 %v6251_v55, %v6250_v60  ;;  %11717 = vmatpush3.bf16.msra.mxu1 %v12277_v52 }
 0x192   : > { %5895 = vst [vmem:[#allocation3 + $0x128] sm:$0xff] %v12345_v36  ;;  %5896 = vst [vmem:[#allocation3 + $0x130] sm:$0x3] %v12345_v36  ;;  %v13986_v30 = vpop.f32.mrf.mxu1  ;;  %v11497_v26 = vpop.f32.mrf.mxu0 }
 0x193   : > { %5897 = vst [vmem:[#allocation3 + $0x138] sm:$0xff] %v12345_v36  ;;  %5898 = vst [vmem:[#allocation3 + $0x140] sm:$0xff] %v12345_v36  ;;  %11763 = vmatpush3.bf16.msra.mxu0 %v12278_v47  ;;  %v13992_v62 = vadd.f32 %v11497_v26, %v13739_v50  ;;  %11766 = vmatprep.mubr.bf16.mxu0 %v6282_v13  ;;  %v12346_v13 = vmov 0.0|0.0  }
 0x194   : > { %5899 = vst [vmem:[#allocation3 + $0x148] sm:$0x3] %v12345_v36  ;;  %5900 = vst [vmem:[#allocation3 + $0x150] sm:$0xff] %v12345_v36  ;;  %v13994_v42 = vpop.f32.mrf.mxu1  ;;  %11764 = vmatprep.subr.bf16.mxu0 %v12279_v63  ;;  %11718 = vmatprep.mubr.bf16.mxu1 %v12346_v13 }
 0x195   : > { %5901 = vst [vmem:[#allocation3 + $0x158] sm:$0xff] %v12345_v36  ;;  %5902 = vst [vmem:[#allocation3 + $0x160] sm:$0x3] %v12345_v36 }
 0x196   : > { %5903 = vst [vmem:[#allocation3 + $0x168] sm:$0xff] %v12345_v36  ;;  %5904 = vst [vmem:[#allocation3 + $0x170] sm:$0xff] %v12345_v36  ;;  %v13998_v47 = vpop.f32.mrf.mxu1 }
 0x197   : > { %5905 = vst [vmem:[#allocation3 + $0x178] sm:$0x3] %v12345_v36  ;;  %5906 = vst [vmem:[#allocation3 + $0x180] sm:$0xff] %v12345_v36  ;;  %11765 = vmatpush3.bf16.msra.mxu0 %v12279_v63 }
 0x198   : > { %5907 = vst [vmem:[#allocation3 + $0x188] sm:$0xff] %v12345_v36  ;;  %5908 = vst [vmem:[#allocation3 + $0x190] sm:$0x3] %v12345_v36 }
 0x199   : > { %5909 = vst [vmem:[#allocation3 + $0x198] sm:$0xff] %v12345_v36  ;;  %5910 = vst [vmem:[#allocation3 + $0x1a0] sm:$0xff] %v12345_v36 }
 0x19a   : > { %5911 = vst [vmem:[#allocation3 + $0x1a8] sm:$0x3] %v12345_v36  ;;  %15812 = vst [vmem:[#allocation25_spill] sm:$0xff] %v13970_v51  ;;  %v13996_v36 = vpop.f32.mrf.mxu0  ;;  %v14006_v32 = vpop.f32.mrf.mxu1 }
 0x19b   : > { %15813 = vst [vmem:[#allocation31_spill] sm:$0xff] %v13976_v39  ;;  %15814 = vst [vmem:[#allocation32_spill] sm:$0xff] %v13978_v53 }
 0x19c   : > { %15815 = vst [vmem:[#allocation33_spill] sm:$0xff] %v13984_v40  ;;  %15816 = vst [vmem:[#allocation34_spill] sm:$0xff] %v13986_v30  ;;  %v11500_v23 = vpop.f32.mrf.mxu0  ;;  %v14011_v60 = vpop.f32.mrf.mxu1 }
 0x19d   : > { %15817 = vst [vmem:[#allocation35_spill] sm:$0xff] %v13992_v62  ;;  %15818 = vst [vmem:[#allocation36_spill] sm:$0xff] %v13994_v42  ;;  %v14004_v50 = vadd.f32 %v11500_v23, %v13765_v38  ;;  %v14021_v38 = vld [vmem:[%s15752_s3 + $0xb8] sm:$0xff]  }
 0x19e   : > { %15819 = vst [vmem:[#allocation37_spill] sm:$0xff] %v13996_v36  ;;  %15820 = vst [vmem:[#allocation38_spill] sm:$0xff] %v13998_v47  ;;  %v3187_v26 = vpop.f32.mrf.mxu0  ;;  %v14016_v2 = vpop.f32.mrf.mxu1  ;;  %11798 = vmatprep.subr.bf16.mxu1 %v14021_v38 }
 0x19f   : > { %15821 = vst [vmem:[#allocation39_spill] sm:$0xff] %v14004_v50  ;;  %15822 = vst [vmem:[#allocation40_spill] sm:$0xff] %v14006_v32  ;;  %v14009_v63 = vadd.f32 %v3187_v26, %v13769_v19 }
 0x1a0   : > { %15824 = vst [vmem:[#allocation42_spill] sm:$0xff] %v14011_v60  ;;  %v11501_v55 = vpop.f32.mrf.mxu0  ;;  %15826 = vst [vmem:[#allocation44_spill] sm:$0xff] %v14016_v2  ;;  %v14026_v19 = vpop.f32.mrf.mxu1 }
 0x1a1   : > { %15823 = vst [vmem:[#allocation41_spill] sm:$0xff] %v14009_v63  ;;  %v14014_v7 = vadd.f32 %v11501_v55, %v13775_v6  ;;  %15827 = vst [vmem:[#allocation45_spill] sm:$0xff] %v14021_v38 }
 0x1a2   : > { %v14023_v52 = vpop.f32.mrf.mxu0  ;;  %15829 = vst [vmem:[#allocation47_spill] sm:$0xff] %v14026_v19 }
 0x1a3   : > { %15825 = vst [vmem:[#allocation43_spill] sm:$0xff] %v14014_v7  ;;  %15828 = vst [vmem:[#allocation46_spill] sm:$0xff] %v14023_v52 }
 0x1a5   : > { %v11504_v23 = vpop.f32.mrf.mxu0 }
 0x1a6   : > { %v14029_v26 = vadd.f32 %v11504_v23, %v13802_v37  ;;  %v14031_v13 = vpop.f32.mrf.mxu1 }
 0x1a7   : > { %15831 = vst [vmem:[#allocation49_spill] sm:$0xff] %v14031_v13  ;;  %v3203_v6 = vpop.f32.mrf.mxu0 }
 0x1a8   : > { %15830 = vst [vmem:[#allocation48_spill] sm:$0xff] %v14029_v26  ;;  %v14034_v55 = vadd.f32 %v3203_v6, %v13819_v9  ;;  %v14036_v2 = vpop.f32.mrf.mxu1 }
 0x1a9   : > { %15833 = vst [vmem:[#allocation51_spill] sm:$0xff] %v14036_v2  ;;  %v11505_v7 = vpop.f32.mrf.mxu0 }
 0x1aa   : > { %15832 = vst [vmem:[#allocation50_spill] sm:$0xff] %v14034_v55  ;;  %v14039_v60 = vadd.f32 %v11505_v7, %v13821_v43  ;;  %v14041_v52 = vpop.f32.mrf.mxu1  ;;  %v14060_v43 = vld [vmem:[%s15752_s3 + $0xf8] sm:$0xff]  }
 0x1ab   : > { %15835 = vst [vmem:[#allocation53_spill] sm:$0xff] %v14041_v52  ;;  %v14043_v63 = vpop.f32.mrf.mxu0  ;;  %11846 = vmatprep.subr.bf16.mxu0 %v14060_v43 }
 0x1ac   : > { %15834 = vst [vmem:[#allocation52_spill] sm:$0xff] %v14039_v60  ;;  %15836 = vst [vmem:[#allocation54_spill] sm:$0xff] %v14043_v63  ;;  %v14045_v19 = vpop.f32.mrf.mxu1 }
 0x1ad   : > { %15837 = vst [vmem:[#allocation55_spill] sm:$0xff] %v14045_v19 }
 0x1b1   : > { %v11508_v37 = vpop.f32.mrf.mxu0 }
 0x1b2   : > { %v14048_v23 = vadd.f32 %v11508_v37, %v13843_v35  ;;  %v14050_v13 = vpop.f32.mrf.mxu1 }
 0x1b3   : > { %15839 = vst [vmem:[#allocation57_spill] sm:$0xff] %v14050_v13  ;;  %v3219_v9 = vpop.f32.mrf.mxu0 }
 0x1b4   : > { %15838 = vst [vmem:[#allocation56_spill] sm:$0xff] %v14048_v23  ;;  %v14053_v6 = vadd.f32 %v3219_v9, %v13846_v8  ;;  %v14055_v2 = vpop.f32.mrf.mxu1 }
 0x1b5   : > { %15841 = vst [vmem:[#allocation59_spill] sm:$0xff] %v14055_v2  ;;  %v11509_v7 = vpop.f32.mrf.mxu0 }
 0x1b6   : > { %15840 = vst [vmem:[#allocation58_spill] sm:$0xff] %v14053_v6  ;;  %v14063_v19 = vadd.f32 %v11509_v7, %v13853_v12  ;;  %v14068_v37 = vpop.f32.mrf.mxu1 }
 0x1b7   : > { %v14066_v35 = vpop.f32.mrf.mxu0  ;;  %15844 = vst [vmem:[#allocation62_spill] sm:$0xff] %v14068_v37 }
 0x1b8   : > { %15842 = vst [vmem:[#allocation60_spill] sm:$0xff] %v14063_v19  ;;  %15843 = vst [vmem:[#allocation61_spill] sm:$0xff] %v14066_v35  ;;  %v14070_v8 = vpop.f32.mrf.mxu1 }
 0x1b9   : > { %v11576_v13 = vpop.f32.mrf.mxu0  ;;  %15845 = vst [vmem:[#allocation63_spill] sm:$0xff] %v14070_v8 }
 0x1bb   : > { %v4152_v9 = vpop.f32.mrf.mxu0 }
 0x1bd   : > { %v11577_v2 = vpop.f32.mrf.mxu0 }
 0x1be   : > { %v11624_v6 = vpop.f32.mrf.mxu1 }
 0x1bf   : > { %v4155_v23 = vpop.f32.mrf.mxu0 }
 0x1c0   : > { %v4970_v60 = vpop.f32.mrf.mxu1 }
 0x1c1   : > { %v14072_v52 = vpop.f32.mrf.mxu0 }
 0x1c2   : > { %v11625_v7 = vpop.f32.mrf.mxu1 }
 0x1c3   : > { %v14074_v63 = vpop.f32.mrf.mxu0 }
 0x1c4   : > { %v14082_v37 = vpop.f32.mrf.mxu1 }
 0x1c5   : > { %v14076_v12 = vpop.f32.mrf.mxu0 }
 0x1c7   : > { %v14078_v19 = vpop.f32.mrf.mxu0 }
 0x1c8   : > { %v14088_v26 = vpop.f32.mrf.mxu1 }
 0x1c9   : > { %v14080_v35 = vpop.f32.mrf.mxu0 }
 0x1ca   : > { %v14094_v47 = vpop.f32.mrf.mxu1 }
 0x1cb   : > { %v14084_v55 = vpop.f32.mrf.mxu0 }
 0x1cc   : > { %v14100_v36 = vpop.f32.mrf.mxu1 }
 0x1cd   : > { %v14086_v8 = vpop.f32.mrf.mxu0 }
 0x1ce   : > { %v14106_v38 = vpop.f32.mrf.mxu1 }
 0x1cf   : > { %v14090_v32 = vpop.f32.mrf.mxu0 }
 0x1d1   : > { %v14092_v50 = vpop.f32.mrf.mxu0  ;;  %v14112_v51 = vpop.f32.mrf.mxu1 }
 0x1d2   : > { %15846 = vst [vmem:[#allocation64_spill] sm:$0xff] %v14092_v50 }
 0x1d3   : > { %v14096_v42 = vpop.f32.mrf.mxu0 }
 0x1d4   : > { %15847 = vst [vmem:[#allocation65_spill] sm:$0xff] %v14096_v42  ;;  %v14118_v42 = vpop.f32.mrf.mxu1 }
 0x1d5   : > { %v14098_v62 = vpop.f32.mrf.mxu0  ;;  %15855 = vst [vmem:[#allocation73_spill] sm:$0xff] %v14118_v42 }
 0x1d6   : > { %15848 = vst [vmem:[#allocation66_spill] sm:$0xff] %v14098_v62 }
 0x1d7   : > { %v14102_v30 = vpop.f32.mrf.mxu0 }
 0x1d8   : > { %15849 = vst [vmem:[#allocation67_spill] sm:$0xff] %v14102_v30  ;;  %v14124_v30 = vpop.f32.mrf.mxu1 }
 0x1d9   : > { %v14104_v40 = vpop.f32.mrf.mxu0  ;;  %15858 = vst [vmem:[#allocation76_spill] sm:$0xff] %v14124_v30 }
 0x1da   : > { %15850 = vst [vmem:[#allocation68_spill] sm:$0xff] %v14104_v40 }
 0x1db   : > { %v14108_v53 = vpop.f32.mrf.mxu0 }
 0x1dc   : > { %15851 = vst [vmem:[#allocation69_spill] sm:$0xff] %v14108_v53  ;;  %v14130_v53 = vpop.f32.mrf.mxu1 }
 0x1dd   : > { %v14110_v39 = vpop.f32.mrf.mxu0  ;;  %15861 = vst [vmem:[#allocation79_spill] sm:$0xff] %v14130_v53 }
 0x1de   : > { %15852 = vst [vmem:[#allocation70_spill] sm:$0xff] %v14110_v39 }
 0x1df   : > { %v14114_v27 = vpop.f32.mrf.mxu0 }
 0x1e0   : > { %15853 = vst [vmem:[#allocation71_spill] sm:$0xff] %v14114_v27  ;;  %v14136_v27 = vpop.f32.mrf.mxu1 }
 0x1e1   : > { %v14116_v58 = vpop.f32.mrf.mxu0  ;;  %15864 = vst [vmem:[#allocation82_spill] sm:$0xff] %v14136_v27 }
 0x1e2   : > { %15854 = vst [vmem:[#allocation72_spill] sm:$0xff] %v14116_v58 }
 0x1e3   : > { %v14120_v62 = vpop.f32.mrf.mxu0 }
 0x1e4   : > { %15856 = vst [vmem:[#allocation74_spill] sm:$0xff] %v14120_v62  ;;  %v14142_v62 = vpop.f32.mrf.mxu1 }
 0x1e5   : > { %v14122_v50 = vpop.f32.mrf.mxu0  ;;  %15867 = vst [vmem:[#allocation85_spill] sm:$0xff] %v14142_v62 }
 0x1e6   : > { %15857 = vst [vmem:[#allocation75_spill] sm:$0xff] %v14122_v50  ;;  %v14146_v30 = vpop.f32.mrf.mxu1 }
 0x1e7   : > { %v14126_v40 = vpop.f32.mrf.mxu0  ;;  %15869 = vst [vmem:[#allocation87_spill] sm:$0xff] %v14146_v30 }
 0x1e8   : > { %15859 = vst [vmem:[#allocation77_spill] sm:$0xff] %v14126_v40 }
 0x1e9   : > { %v14128_v48 = vpop.f32.mrf.mxu0 }
 0x1ea   : > { %15860 = vst [vmem:[#allocation78_spill] sm:$0xff] %v14128_v48  ;;  %v15871_v48 = vld [vmem:[#allocation21_spill] sm:$0xff] }
 0x1eb   : > { %v14132_v39 = vpop.f32.mrf.mxu0  ;;  %v2417_v53 = vadd.f32 %v15871_v48, %v13582_v17 }
 0x1ec   : > { %15862 = vst [vmem:[#allocation80_spill] sm:$0xff] %v14132_v39  ;;  %v14154_v39 = vpop.f32.mrf.mxu1 }
 0x1ed   : > { %v14134_v44 = vpop.f32.mrf.mxu0  ;;  %15872 = vst [vmem:[#allocation21_spill] sm:$0xff] %v14154_v39 }
 0x1ee   : > { %15863 = vst [vmem:[#allocation81_spill] sm:$0xff] %v14134_v44  ;;  %v3830_v44 = vadd.f32 %v13858_v46, %v13851_v45  ;;  %v14163_v30 = vpop.f32.mrf.mxu1  ;;  %v15873_v46 = vld [vmem:[#allocation24_spill] sm:$0xff] }
 0x1ef   : > { %v14138_v58 = vpop.f32.mrf.mxu0  ;;  %v2421_v39 = vadd.f32 %v15873_v46, %v13624_v28 }
 0x1f0   : > { %15865 = vst [vmem:[#allocation83_spill] sm:$0xff] %v14138_v58  ;;  %v3828_v58 = vadd.f32 %v13865_v31, %v13856_v56  ;;  %v4281_v62 = vadd.f32 %v11576_v13, %v3830_v44  ;;  %v14171_v56 = vld [vmem:[%s15751_s2] ss:$0 sm:$0xff] }
 0x1f1   : > { %v14140_v0 = vpop.f32.mrf.mxu0  ;;  %v15875_v13 = vld [vmem:[#allocation6_spill] sm:$0xff] }
 0x1f2   : > { %15866 = vst [vmem:[#allocation84_spill] sm:$0xff] %v14140_v0  ;;  %v3235_v0 = vadd.f32 %v13863_v14, %v2417_v53  ;;  %v5099_v48 = vadd.f32 %v11624_v6, %v4281_v62  ;;  %v3834_v14 = vadd.f32 %v13890_v57, %v13879_v4  ;;  %v3835_v57 = vadd.f32 %v13906_v49, %v13893_v1 }
 0x1f3   : > { %v14144_v50 = vpop.f32.mrf.mxu0 }
 0x1f4   : > { %15868 = vst [vmem:[#allocation86_spill] sm:$0xff] %v14144_v50  ;;  %v3831_v50 = vadd.f32 %v13876_v21, %v13861_v29  ;;  %v3829_v17 = vadd.f32 %v13885_v11, %v3235_v0  ;;  %v14175_v21 = vpop.f32.mrf.mxu1  ;;  %v3239_v11 = vadd.f32 %v13897_v20, %v2421_v39  ;;  %v4286_v49 = vadd.f32 %v14076_v12, %v3835_v57 }
 0x1f5   : > { %v14148_v40 = vpop.f32.mrf.mxu0 }
 0x1f6   : > { %15870 = vst [vmem:[#allocation88_spill] sm:$0xff] %v14148_v40  ;;  %v4279_v40 = vadd.f32 %v4152_v9, %v3828_v58  ;;  %v4282_v45 = vadd.f32 %v11577_v2, %v3831_v50  ;;  %v4280_v31 = vadd.f32 %v4155_v23, %v3829_v17  ;;  %v3832_v2 = vadd.f32 %v13895_v15, %v13888_v59  ;;  %v15874_v50 = vld [vmem:[#allocation5_spill] sm:$0xff]  ;;  %v14188_v15 = vpop.f32.mrf.mxu1  ;;  %v15877_v23 = vld [vmem:[#allocation8_spill] sm:$0xff] }
 0x1f7   : > { %v14159_v27 = vpop.f32.mrf.mxu0  ;;  %v4285_v58 = vadd.f32 %v14072_v52, %v3834_v14  ;;  %v1385_v4 = vadd.f32 %v15875_v13, %v15874_v50  ;;  %v15876_v52 = vld [vmem:[#allocation7_spill] sm:$0xff]  ;;  %v15878_v9 = vld [vmem:[#allocation9_spill] sm:$0xff]  ;;  %v3833_v1 = vadd.f32 %v13911_v24, %v3239_v11  ;;  %v15880_v14 = vld [vmem:[#allocation14_spill] sm:$0xff]  ;;  %v3838_v24 = vadd.f32 %v13916_v16, %v13914_v54 }
 0x1f8   : > { %v5097_v29 = vadd.f32 %v4970_v60, %v4279_v40  ;;  %v5100_v0 = vadd.f32 %v11625_v7, %v4282_v45  ;;  %v4283_v40 = vadd.f32 %v14074_v63, %v3832_v2  ;;  %v5098_v59 = vadd.f32 %v14082_v37, %v4280_v31  ;;  %v15879_v7 = vld [vmem:[#allocation12_spill] sm:$0xff]  ;;  %v14211_v11 = vpop.f32.mrf.mxu1  ;;  %v15882_v13 = vld [vmem:[#allocation27_spill] sm:$0xff] }
 0x1f9   : > { %v1389_v6 = vadd.f32 %v15877_v23, %v15876_v52  ;;  %v14195_v17 = vadd.f32 %v15879_v7, %v15878_v9  ;;  %v5103_v37 = vadd.f32 %v14088_v26, %v4285_v58  ;;  %v4284_v12 = vadd.f32 %v14078_v19, %v3833_v1 }
 0x1fa   : > { %v5101_v26 = vadd.f32 %v14094_v47, %v4283_v40  ;;  %v4289_v54 = vadd.f32 %v14080_v35, %v3838_v24  ;;  %v1982_v57 = vadd.f32 %v15882_v13, %v1385_v4  ;;  %v3839_v40 = vadd.f32 %v13929_v10, %v13927_v22  ;;  %v12286_v4 = vld [vmem:[%s15752_s3 + $0xf0] sm:$0xff]   ;;  %v15885_v10 = vld [vmem:[#allocation30_spill] sm:$0xff]  ;;  %v15890_v24 = vld [vmem:[#allocation19_spill] sm:$0xff] }
 0x1fc   : > { %v4290_v52 = vadd.f32 %v14086_v8, %v3839_v40  ;;  %v5107_v9 = vadd.f32 %v14112_v51, %v4289_v54  ;;  %v15887_v8 = vld [vmem:[#allocation73_spill] sm:$0xff] }
 0x204   : > { %v11672_v42 = vpop.f32.mrf.mxu0 }
 0x205   : > { %v5693_v44 = vadd.f32 %v11672_v42, %v5099_v48 }
 0x206   : > { %v5564_v28 = vpop.f32.mrf.mxu0 }
 0x207   : > { %v5796_v53 = vadd.f32 %v14171_v56, %v5693_v44  ;;  %v5691_v62 = vadd.f32 %v5564_v28, %v5097_v29  ;;  %v15881_v29 = vld [vmem:[#allocation17_spill] sm:$0xff]  ;;  %v2425_v44 = vadd.f32 %v13565_v41, %v13663_v5  ;;  %v5104_v5 = vadd.f32 %v14100_v36, %v4286_v49  ;;  %v14225_v36 = vpop.f32.mrf.mxu1 }
 0x208   : > { %v11673_v42 = vpop.f32.mrf.mxu0  ;;  %v14203_v31 = vadd.f32 %v15881_v29, %v15880_v14 }
 0x209   : > { %v5828_v20 = vmax.f32 %v5796_v53, 0.0  ;;  %v5794_v39 = vadd.f32 %v14171_v56, %v5691_v62  ;;  %v5694_v60 = vadd.f32 %v11673_v42, %v5100_v0  ;;  %v3836_v53 = vadd.f32 %v13924_v25, %v13922_v33 }
 0x20a   : > { %v5567_v63 = vpop.f32.mrf.mxu0  ;;  %v3243_v41 = vadd.f32 %v13937_v34, %v2425_v44  ;;  %v5102_v33 = vadd.f32 %v14106_v38, %v4284_v12  ;;  %v1986_v38 = vadd.f32 %v15885_v10, %v1389_v6  ;;  %v15889_v44 = vld [vmem:[#allocation18_spill] sm:$0xff]  ;;  %v15891_v12 = vld [vmem:[#allocation23_spill] sm:$0xff] }
 0x20b   : > { %5915 = vst [vmem:[#allocation3 + $0x31] sm:$0xff] %v5828_v20  ;;  %v5826_v48 = vmax.f32 %v5794_v39, 0.0  ;;  %v5797_v45 = vadd.f32 %v14171_v56, %v5694_v60  ;;  %v5692_v46 = vadd.f32 %v5567_v63, %v5098_v59  ;;  %v4287_v25 = vadd.f32 %v14084_v55, %v3836_v53  ;;  %v15884_v60 = vld [vmem:[#allocation26_spill] sm:$0xff]  ;;  %v15886_v63 = vld [vmem:[#allocation28_spill] sm:$0xff] }
 0x20c   : > { %v11676_v2 = vpop.f32.mrf.mxu0  ;;  %v3837_v55 = vadd.f32 %v13939_v61, %v3243_v41 }
 0x20d   : > { %5913 = vst [vmem:[#allocation3 + $0x19] sm:$0xff] %v5826_v48  ;;  %v5829_v28 = vmax.f32 %v5797_v45, 0.0  ;;  %v5795_v0 = vadd.f32 %v14171_v56, %v5692_v46  ;;  %v5697_v58 = vadd.f32 %v11676_v2, %v5103_v37  ;;  %v14239_v37 = vadd.f32 %v15886_v63, %v1982_v57  ;;  %v14246_v45 = vpop.f32.mrf.mxu1  ;;  %v15897_v57 = vld [vmem:[#allocation65_spill] sm:$0xff] }
 0x20e   : > { %v5580_v16 = vpop.f32.mrf.mxu0  ;;  %v4288_v6 = vadd.f32 %v14090_v32, %v3837_v55  ;;  %v5105_v51 = vadd.f32 %v15887_v8, %v4287_v25  ;;  %v15898_v55 = vld [vmem:[#allocation25_spill] sm:$0xff]  ;;  %v12289_v8 = vld [vmem:[%s15752_s3 + $0xe0] sm:$0xff]  }
 0x20f   : > { %5916 = vst [vmem:[#allocation3 + $0x39] sm:$0xff] %v5829_v28  ;;  %v5827_v19 = vmax.f32 %v5795_v0, 0.0  ;;  %v5800_v47 = vadd.f32 %v14171_v56, %v5697_v58  ;;  %v5695_v62 = vadd.f32 %v5580_v16, %v5101_v26  ;;  %v6284_v50 = vpack.c.bf16 %v5829_v28, %v5828_v20  ;;  %v15883_v20 = vld [vmem:[#allocation29_spill] sm:$0xff]  ;;  %v15892_v26 = vld [vmem:[#allocation64_spill] sm:$0xff] }
 0x210   : > { %v11677_v34 = vpop.f32.mrf.mxu0  ;;  %v2429_v22 = vadd.f32 %v15884_v60, %v15883_v20  ;;  %v15893_v58 = vld [vmem:[#allocation76_spill] sm:$0xff] }
 0x211   : > { %5914 = vst [vmem:[#allocation3 + $0x21] sm:$0xff] %v5827_v19  ;;  %v5832_v35 = vmax.f32 %v5800_v47, 0.0  ;;  %v5798_v42 = vadd.f32 %v14171_v56, %v5695_v62  ;;  %v5698_v59 = vadd.f32 %v11677_v34, %v5104_v5  ;;  %v6283_v39 = vpack.c.bf16 %v5827_v19, %v5826_v48  ;;  %v15894_v19 = vld [vmem:[#allocation20_spill] sm:$0xff]  ;;  %v15895_v47 = vld [vmem:[#allocation22_spill] sm:$0xff] }
 0x212   : > { %v5583_v23 = vpop.f32.mrf.mxu0  ;;  %v3842_v48 = vadd.f32 %v13947_v18, %v13945_v3  ;;  %v12288_v3 = vld [vmem:[%s15752_s3 + $0xe8] sm:$0xff]   ;;  %v15888_v18 = vld [vmem:[#allocation10_spill] sm:$0xff]  ;;  %v3247_v2 = vadd.f32 %v15891_v12, %v2429_v22  ;;  %v5108_v53 = vadd.f32 %v15893_v58, %v4290_v52  ;;  %v3843_v62 = vadd.f32 %v15895_v47, %v15894_v19  ;;  %v5949_v10 = vld [vmem:[#allocation3 + $0x30] sm:$0xff] }
 0x213   : > { %5919 = vst [vmem:[#allocation3 + $0x61] sm:$0xff] %v5832_v35  ;;  %v5830_v7 = vmax.f32 %v5798_v42, 0.0  ;;  %v5801_v1 = vadd.f32 %v14171_v56, %v5698_v59  ;;  %v5696_v49 = vadd.f32 %v5583_v23, %v5102_v33  ;;  %11767 = vmatmul.mubr.bf16.vlgmr.msra.gmra.mxu0 %v6283_v39  ;;  %v14253_v32 = vadd.f32 %v15888_v18, %v1986_v38  ;;  %v14267_v59 = vpop.f32.mrf.mxu1  ;;  %v12281_v38 = vld [vmem:[%s15752_s3 + $0xb0] sm:$0xff]   ;;  %v15904_v18 = vld [vmem:[#allocation67_spill] sm:$0xff]  ;;  %v15906_v12 = vld [vmem:[#allocation85_spill] sm:$0xff] }
 0x214   : > { %v11680_v61 = vpop.f32.mrf.mxu0  ;;  %11770 = vmatprep.mubr.bf16.mxu0 %v6284_v50  ;;  %11847 = vmatpush3.bf16.msra.mxu0 %v14060_v43  ;;  %v3840_v43 = vadd.f32 %v15890_v24, %v15889_v44  ;;  %v4293_v28 = vadd.f32 %v15892_v26, %v3842_v48  ;;  %v15896_v50 = vld [vmem:[#allocation79_spill] sm:$0xff]  ;;  %v5947_v25 = vld [vmem:[#allocation3 + $0x18] sm:$0xff]  ;;  %v15910_v19 = vld [vmem:[#allocation68_spill] sm:$0xff] }
 0x215   : > { %5917 = vst [vmem:[#allocation3 + $0x49] sm:$0xff] %v5830_v7  ;;  %v5833_v46 = vmax.f32 %v5801_v1, 0.0  ;;  %v5799_v14 = vadd.f32 %v14171_v56, %v5696_v49  ;;  %v5701_v29 = vadd.f32 %v11680_v61, %v5107_v9  ;;  %11848 = vmatprep.subr.bf16.mxu0 %v12286_v4  ;;  %v5106_v13 = vadd.f32 %v15896_v50, %v4288_v6  ;;  %v15900_v49 = vld [vmem:[#allocation82_spill] sm:$0xff]  ;;  %v14297_v26 = vpop.f32.mrf.mxu1  ;;  %v15911_v50 = vld [vmem:[#allocation87_spill] sm:$0xff] }
 0x216   : > { %v5596_v0 = vpop.f32.mrf.mxu0  ;;  %v5950_v16 = vld [vmem:[#allocation3 + $0x38] sm:$0xff]  ;;  %v4291_v40 = vadd.f32 %v15897_v57, %v3840_v43  ;;  %v5111_v63 = vadd.f32 %v15900_v49, %v4293_v28 }
 0x217   : > { %5920 = vst [vmem:[#allocation3 + $0x69] sm:$0xff] %v5833_v46  ;;  %v5831_v41 = vmax.f32 %v5799_v14, 0.0  ;;  %v14261_v5 = vadd.f32 %v14171_v56, %v5701_v29  ;;  %v5699_v54 = vadd.f32 %v5596_v0, %v5105_v51  ;;  %v6286_v42 = vpack.c.bf16 %v5833_v46, %v5832_v35  ;;  %v15901_v51 = vld [vmem:[#allocation11_spill] sm:$0xff]  ;;  %v15903_v29 = vld [vmem:[#allocation32_spill] sm:$0xff]  ;;  %v15905_v43 = vld [vmem:[#allocation45_spill] sm:$0xff] }
 0x218   : > { %v11681_v33 = vpop.f32.mrf.mxu0  ;;  %v5948_v34 = vld [vmem:[#allocation3 + $0x20] sm:$0xff]  ;;  %11849 = vmatpush3.bf16.msra.mxu0 %v12286_v4  ;;  %v3841_v35 = vadd.f32 %v15898_v55, %v3247_v2  ;;  %v14280_v9 = vpack.c.bf16 %v5950_v16, %v5949_v10  ;;  %v1990_v46 = vadd.f32 %v15901_v51, %v14195_v17  ;;  %v15902_v14 = vld [vmem:[#allocation31_spill] sm:$0xff]  ;;  %v5109_v2 = vadd.f32 %v15906_v12, %v4291_v40  ;;  %v15914_v10 = vld [vmem:[#allocation21_spill] sm:$0xff] }
 0x219   : > { %5918 = vst [vmem:[#allocation3 + $0x51] sm:$0xff] %v5831_v41  ;;  %v5836_v39 = vmax.f32 %v14261_v5, 0.0  ;;  %v14271_v20 = vadd.f32 %v14171_v56, %v5699_v54  ;;  %v5702_v60 = vadd.f32 %v11681_v33, %v5108_v53  ;;  %v14273_v22 = vpack.c.bf16 %v5948_v34, %v5947_v25  ;;  %11850 = vmatprep.subr.bf16.mxu0 %v12288_v3  ;;  %v15899_v4 = vld [vmem:[#allocation66_spill] sm:$0xff]  ;;  %v12282_v17 = vld [vmem:[%s15752_s3 + $0xa8] sm:$0xff]   ;;  %v15907_v53 = vld [vmem:[#allocation33_spill] sm:$0xff] }
 0x21a   : > { %v4294_v52 = vadd.f32 %v15899_v4, %v3843_v62  ;;  %v5599_v23 = vpop.f32.mrf.mxu0  ;;  %v6285_v1 = vpack.c.bf16 %v5831_v41, %v5830_v7  ;;  %v3846_v7 = vadd.f32 %v15903_v29, %v15902_v14  ;;  %v4292_v44 = vadd.f32 %v15904_v18, %v3841_v35  ;;  %v15908_v41 = vld [vmem:[#allocation34_spill] sm:$0xff]  ;;  %v15909_v54 = vld [vmem:[#allocation37_spill] sm:$0xff] }
 0x21b   : > { %5923 = vst [vmem:[#allocation3 + $0x91] sm:$0xff] %v5836_v39  ;;  %v5834_v48 = vmax.f32 %v14271_v20, 0.0  ;;  %v5805_v6 = vadd.f32 %v14171_v56, %v5702_v60  ;;  %v5700_v61 = vadd.f32 %v5599_v23, %v5106_v13  ;;  %11719 = vmatmul.mubr.bf16.vlgmr.msra.gmra.mxu1 %v14273_v22  ;;  %v3844_v5 = vadd.f32 %v15908_v41, %v15907_v53  ;;  %v12291_v34 = vld [vmem:[%s15752_s3 + $0xd8] sm:$0xff]   ;;  %v15913_v20 = vld [vmem:[#allocation36_spill] sm:$0xff]  ;;  %v5953_v51 = vld [vmem:[#allocation3 + $0x60] sm:$0xff] }
 0x21c   : > { %v11684_v24 = vpop.f32.mrf.mxu0  ;;  %11722 = vmatprep.mubr.bf16.mxu1 %v14280_v9  ;;  %11799 = vmatpush3.bf16.msra.mxu1 %v15905_v43  ;;  %v3251_v16 = vadd.f32 %v15909_v54, %v14239_v37  ;;  %v4297_v47 = vadd.f32 %v15910_v19, %v3846_v7  ;;  %v5112_v13 = vadd.f32 %v15911_v50, %v4294_v52  ;;  %v15912_v37 = vld [vmem:[#allocation35_spill] sm:$0xff]  ;;  %v12283_v14 = vld [vmem:[%s15752_s3 + $0xa0] sm:$0xff]  }
 0x21d   : > { %5921 = vst [vmem:[#allocation3 + $0x79] sm:$0xff] %v5834_v48  ;;  %v5837_v28 = vmax.f32 %v5805_v6, 0.0  ;;  %v5803_v0 = vadd.f32 %v14171_v56, %v5700_v61  ;;  %v5705_v58 = vadd.f32 %v11684_v24, %v5111_v63  ;;  %11771 = vmatmul.mubr.bf16.gmra.mxu0 %v6285_v1  ;;  %11800 = vmatprep.subr.bf16.mxu1 %v12281_v38  ;;  %v5951_v4 = vld [vmem:[#allocation3 + $0x48] sm:$0xff]  ;;  %v14319_v1 = vpop.f32.mrf.mxu1  ;;  %v15916_v29 = vld [vmem:[#allocation38_spill] sm:$0xff] }
 0x21e   : > { %v5612_v62 = vpop.f32.mrf.mxu0  ;;  %11774 = vmatprep.mubr.bf16.mxu0 %v6286_v42  ;;  %11851 = vmatpush3.bf16.msra.mxu0 %v12288_v3  ;;  %v5954_v25 = vld [vmem:[#allocation3 + $0x68] sm:$0xff]  ;;  %v3847_v60 = vadd.f32 %v15913_v20, %v15912_v37  ;;  %v5110_v42 = vadd.f32 %v15914_v10, %v4292_v44  ;;  %v15915_v3 = vld [vmem:[#allocation69_spill] sm:$0xff]  ;;  %v5115_v43 = vadd.f32 %v14163_v30, %v4297_v47 }
 0x21f   : > { %5924 = vst [vmem:[#allocation3 + $0x99] sm:$0xff] %v5837_v28  ;;  %v5835_v57 = vmax.f32 %v5803_v0, 0.0  ;;  %v14310_v40 = vadd.f32 %v14171_v56, %v5705_v58  ;;  %v5703_v33 = vadd.f32 %v5612_v62, %v5109_v2  ;;  %11852 = vmatprep.subr.bf16.mxu0 %v12289_v8  ;;  %v4295_v55 = vadd.f32 %v15915_v3, %v3844_v5  ;;  %v12292_v0 = vld [vmem:[%s15752_s3 + $0xd0] sm:$0xff]   ;;  %v15918_v58 = vld [vmem:[#allocation13_spill] sm:$0xff]  ;;  %v15921_v30 = vld [vmem:[#allocation71_spill] sm:$0xff]  ;;  %v14349_v19 = vpop.f32.mrf.mxu1 }
 0x220   : > { %v11685_v35 = vpop.f32.mrf.mxu0  ;;  %v5952_v52 = vld [vmem:[#allocation3 + $0x50] sm:$0xff]  ;;  %11801 = vmatpush3.bf16.msra.mxu1 %v12281_v38  ;;  %v6288_v23 = vpack.c.bf16 %v5837_v28, %v5836_v39  ;;  %v3845_v38 = vadd.f32 %v15916_v29, %v3251_v16  ;;  %v15917_v39 = vld [vmem:[#allocation70_spill] sm:$0xff]  ;;  %v14332_v44 = vpack.c.bf16 %v5954_v25, %v5953_v51  ;;  %v14342_v53 = vadd.f32 %v15918_v58, %v1990_v46  ;;  %v12284_v46 = vld [vmem:[%s15752_s3 + $0x98] sm:$0xff]  }
 0x221   : > { %5922 = vst [vmem:[#allocation3 + $0x81] sm:$0xff] %v5835_v57  ;;  %v5840_v49 = vmax.f32 %v14310_v40, 0.0  ;;  %v14323_v63 = vadd.f32 %v14171_v56, %v5703_v33  ;;  %v5706_v6 = vadd.f32 %v11685_v35, %v5112_v13  ;;  %v14325_v61 = vpack.c.bf16 %v5952_v52, %v5951_v4  ;;  %11802 = vmatprep.subr.bf16.mxu1 %v12282_v17  ;;  %v15922_v13 = vld [vmem:[#allocation41_spill] sm:$0xff]  ;;  %v15927_v35 = vld [vmem:[#allocation44_spill] sm:$0xff]  ;;  %v14371_v29 = vpop.f32.mrf.mxu1 }
 0x222   : > { %v4298_v7 = vadd.f32 %v15917_v39, %v3847_v60  ;;  %v5615_v18 = vpop.f32.mrf.mxu0  ;;  %v6287_v24 = vpack.c.bf16 %v5835_v57, %v5834_v48  ;;  %11853 = vmatpush3.bf16.msra.mxu0 %v12289_v8  ;;  %v15919_v48 = vld [vmem:[#allocation39_spill] sm:$0xff]  ;;  %v15920_v8 = vld [vmem:[#allocation40_spill] sm:$0xff]  ;;  %v4296_v5 = vadd.f32 %v15921_v30, %v3845_v38  ;;  %v5113_v16 = vadd.f32 %v14175_v21, %v4295_v55  ;;  %v15923_v57 = vld [vmem:[#allocation42_spill] sm:$0xff] }
 0x223   : > { %5927 = vst [vmem:[#allocation3 + $0xc1] sm:$0xff] %v5840_v49  ;;  %v5838_v12 = vmax.f32 %v14323_v63, 0.0  ;;  %v5809_v2 = vadd.f32 %v14171_v56, %v5706_v6  ;;  %v5704_v28 = vadd.f32 %v5615_v18, %v5110_v42  ;;  %11723 = vmatmul.mubr.bf16.gmra.mxu1 %v14325_v61  ;;  %11854 = vmatprep.subr.bf16.mxu0 %v12291_v34  ;;  %v15925_v21 = vld [vmem:[#allocation72_spill] sm:$0xff]  ;;  %v12294_v55 = vld [vmem:[%s15752_s3 + $0xc8] sm:$0xff]  }
 0x224   : > { %v3850_v41 = vadd.f32 %v15920_v8, %v15919_v48  ;;  %v11688_v54 = vpop.f32.mrf.mxu0  ;;  %11726 = vmatprep.mubr.bf16.mxu1 %v14332_v44  ;;  %11803 = vmatpush3.bf16.msra.mxu1 %v12282_v17  ;;  %v3848_v40 = vadd.f32 %v15923_v57, %v15922_v13  ;;  %v15924_v17 = vld [vmem:[#allocation46_spill] sm:$0xff]  ;;  %v5116_v20 = vadd.f32 %v14188_v15, %v4298_v7  ;;  %v5955_v63 = vld [vmem:[#allocation3 + $0x78] sm:$0xff] }
 0x225   : > { %5925 = vst [vmem:[#allocation3 + $0xa9] sm:$0xff] %v5838_v12  ;;  %v5841_v47 = vmax.f32 %v5809_v2, 0.0  ;;  %v5807_v62 = vadd.f32 %v14171_v56, %v5704_v28  ;;  %v5709_v50 = vadd.f32 %v11688_v54, %v5115_v43  ;;  %11775 = vmatmul.mubr.bf16.gmra.mxu0 %v6287_v24  ;;  %11804 = vmatprep.subr.bf16.mxu1 %v12283_v14  ;;  %v5957_v24 = vld [vmem:[#allocation3 + $0x90] sm:$0xff]  ;;  %v15929_v43 = vld [vmem:[#allocation47_spill] sm:$0xff]  ;;  %v12295_v54 = vld [vmem:[%s15752_s3 + $0xc0] sm:$0xff]  }
 0x226   : > { %v3255_v33 = vadd.f32 %v15924_v17, %v14253_v32  ;;  %v4301_v25 = vadd.f32 %v15925_v21, %v3850_v41  ;;  %v5628_v37 = vpop.f32.mrf.mxu0  ;;  %11778 = vmatprep.mubr.bf16.mxu0 %v6288_v23  ;;  %11855 = vmatpush3.bf16.msra.mxu0 %v12291_v34  ;;  %v5958_v3 = vld [vmem:[#allocation3 + $0x98] sm:$0xff]  ;;  %v15926_v32 = vld [vmem:[#allocation43_spill] sm:$0xff]  ;;  %v5114_v52 = vadd.f32 %v14211_v11, %v4296_v5  ;;  %v15928_v34 = vld [vmem:[#allocation74_spill] sm:$0xff] }
 0x227   : > { %5928 = vst [vmem:[#allocation3 + $0xc9] sm:$0xff] %v5841_v47  ;;  %v5839_v60 = vmax.f32 %v5807_v62, 0.0  ;;  %v14362_v10 = vadd.f32 %v14171_v56, %v5709_v50  ;;  %v5707_v42 = vadd.f32 %v5628_v37, %v5113_v16  ;;  %11856 = vmatprep.subr.bf16.mxu0 %v12292_v0  ;;  %v3851_v4 = vadd.f32 %v15927_v35, %v15926_v32  ;;  %v12287_v11 = vld [vmem:[%s15752_s3 + $0x90] sm:$0xff]   ;;  %v15931_v16 = vld [vmem:[#allocation15_spill] sm:$0xff] }
 0x228   : > { %v4299_v23 = vadd.f32 %v15928_v34, %v3848_v40  ;;  %v11689_v15 = vpop.f32.mrf.mxu0  ;;  %v5956_v6 = vld [vmem:[#allocation3 + $0x80] sm:$0xff]  ;;  %v6290_v51 = vpack.c.bf16 %v5841_v47, %v5840_v49  ;;  %11805 = vmatpush3.bf16.msra.mxu1 %v12283_v14  ;;  %v3849_v49 = vadd.f32 %v15929_v43, %v3255_v33  ;;  %v15930_v14 = vld [vmem:[#allocation75_spill] sm:$0xff]  ;;  %v14384_v58 = vpack.c.bf16 %v5958_v3, %v5957_v24  ;;  %v14400_v40 = vpop.f32.mrf.mxu1  ;;  %v15939_v34 = vld [vmem:[#allocation52_spill] sm:$0xff] }
 0x229   : > { %5926 = vst [vmem:[#allocation3 + $0xb1] sm:$0xff] %v5839_v60  ;;  %v5844_v38 = vmax.f32 %v14362_v10, 0.0  ;;  %v14375_v39 = vadd.f32 %v14171_v56, %v5707_v42  ;;  %v5710_v7 = vadd.f32 %v11689_v15, %v5116_v20  ;;  %v14377_v18 = vpack.c.bf16 %v5956_v6, %v5955_v63  ;;  %11806 = vmatprep.subr.bf16.mxu1 %v12284_v46  ;;  %v15936_v37 = vld [vmem:[#allocation51_spill] sm:$0xff] }
 0x22a   : > { %v4302_v2 = vadd.f32 %v15930_v14, %v3851_v4  ;;  %v5631_v28 = vpop.f32.mrf.mxu0  ;;  %v6289_v48 = vpack.c.bf16 %v5839_v60, %v5838_v12  ;;  %11857 = vmatpush3.bf16.msra.mxu0 %v12292_v0  ;;  %v5119_v8 = vadd.f32 %v14225_v36, %v4301_v25  ;;  %v1994_v47 = vadd.f32 %v15931_v16, %v14203_v31  ;;  %v15932_v12 = vld [vmem:[#allocation48_spill] sm:$0xff]  ;;  %v15933_v0 = vld [vmem:[#allocation49_spill] sm:$0xff]  ;;  %v12290_v31 = vld [vmem:[%s15752_s3 + $0x88] sm:$0xff]   ;;  %v14426_v24 = vpop.f32.mrf.mxu1 }
 0x22b   : > { %5931 = vst [vmem:[#allocation3 + $0xf1] sm:$0xff] %v5844_v38  ;;  %v5842_v41 = vmax.f32 %v14375_v39, 0.0  ;;  %v5813_v30 = vadd.f32 %v14171_v56, %v5710_v7  ;;  %v5708_v5 = vadd.f32 %v5631_v28, %v5114_v52  ;;  %11727 = vmatmul.mubr.bf16.gmra.mxu1 %v14377_v18  ;;  %11858 = vmatprep.subr.bf16.mxu0 %v12294_v55  ;;  %v15934_v36 = vld [vmem:[#allocation77_spill] sm:$0xff]  ;;  %v15935_v25 = vld [vmem:[#allocation50_spill] sm:$0xff] }
 0x22c   : > { %v3854_v62 = vadd.f32 %v15933_v0, %v15932_v12  ;;  %v4300_v50 = vadd.f32 %v15934_v36, %v3849_v49  ;;  %v11692_v13 = vpop.f32.mrf.mxu0  ;;  %11730 = vmatprep.mubr.bf16.mxu1 %v14384_v58  ;;  %11807 = vmatpush3.bf16.msra.mxu1 %v12284_v46  ;;  %v5117_v57 = vadd.f32 %v14246_v45, %v4299_v23  ;;  %v15937_v46 = vld [vmem:[#allocation54_spill] sm:$0xff]  ;;  %v15940_v23 = vld [vmem:[#allocation53_spill] sm:$0xff] }
 0x22d   : > { %5929 = vst [vmem:[#allocation3 + $0xd9] sm:$0xff] %v5842_v41  ;;  %v5845_v17 = vmax.f32 %v5813_v30, 0.0  ;;  %v5811_v33 = vadd.f32 %v14171_v56, %v5708_v5  ;;  %v5713_v21 = vadd.f32 %v11692_v13, %v5119_v8  ;;  %11779 = vmatmul.mubr.bf16.gmra.mxu0 %v6289_v48  ;;  %11808 = vmatprep.subr.bf16.mxu1 %v12287_v11  ;;  %v15938_v45 = vld [vmem:[#allocation78_spill] sm:$0xff]  ;;  %v15943_v48 = vld [vmem:[#allocation81_spill] sm:$0xff] }
 0x22e   : > { %v3852_v20 = vadd.f32 %v15936_v37, %v15935_v25  ;;  %v3259_v60 = vadd.f32 %v15937_v46, %v14342_v53  ;;  %v4305_v10 = vadd.f32 %v15938_v45, %v3854_v62  ;;  %v5644_v42 = vpop.f32.mrf.mxu0  ;;  %11782 = vmatprep.mubr.bf16.mxu0 %v6290_v51  ;;  %11859 = vmatpush3.bf16.msra.mxu0 %v12294_v55  ;;  %v5962_v52 = vld [vmem:[#allocation3 + $0xc8] sm:$0xff]  ;;  %v14420_v53 = vld [vmem:[%s15752_s3 + $0x178] sm:$0xff]   ;;  %v12293_v28 = vld [vmem:[%s15752_s3 + $0x80] sm:$0xff]   ;;  %v5082_v25 = vpop.f32.mrf.mxu1 }
 0x22f   : > { %v5120_v3 = vadd.f32 %v14267_v59, %v4302_v2  ;;  %5932 = vst [vmem:[#allocation3 + $0xf9] sm:$0xff] %v5845_v17  ;;  %v14412_v32 = vmax.f32 %v5811_v33, 0.0  ;;  %v14415_v35 = vadd.f32 %v14171_v56, %v5713_v21  ;;  %v5711_v4 = vadd.f32 %v5644_v42, %v5117_v57  ;;  %11860 = vmatprep.subr.bf16.mxu0 %v12295_v54  ;;  %v15941_v59 = vld [vmem:[#allocation80_spill] sm:$0xff]  ;;  %v5959_v51 = vld [vmem:[#allocation3 + $0xa8] sm:$0xff]  ;;  %v15950_v42 = vld [vmem:[#allocation61_spill] sm:$0xff] }
 0x230   : > { %v3855_v15 = vadd.f32 %v15940_v23, %v15939_v34  ;;  %v5118_v55 = vadd.f32 %v14297_v26, %v4300_v50  ;;  %v4303_v63 = vadd.f32 %v15941_v59, %v3852_v20  ;;  %v11693_v6 = vpop.f32.mrf.mxu0  ;;  %v5960_v39 = vld [vmem:[#allocation3 + $0xb0] sm:$0xff]  ;;  %v6292_v7 = vpack.c.bf16 %v5845_v17, %v5844_v38  ;;  %11809 = vmatpush3.bf16.msra.mxu1 %v12287_v11  ;;  %v5961_v26 = vld [vmem:[#allocation3 + $0xc0] sm:$0xff]  ;;  %v15942_v38 = vld [vmem:[#allocation55_spill] sm:$0xff] }
 0x231   : > { %5930 = vst [vmem:[#allocation3 + $0xe1] sm:$0xff] %v14412_v32  ;;  %v5848_v43 = vmax.f32 %v14415_v35, 0.0  ;;  %v14431_v49 = vadd.f32 %v14171_v56, %v5711_v4  ;;  %v5714_v14 = vadd.f32 %v11693_v6, %v5120_v3  ;;  %v14433_v2 = vpack.c.bf16 %v5960_v39, %v5959_v51  ;;  %11810 = vmatprep.subr.bf16.mxu1 %v12290_v31  ;;  %v15944_v50 = vld [vmem:[#allocation16_spill] sm:$0xff]  ;;  %v15946_v17 = vld [vmem:[#allocation57_spill] sm:$0xff]  ;;  %v15947_v21 = vld [vmem:[#allocation83_spill] sm:$0xff] }
 0x232   : > { %v3853_v11 = vadd.f32 %v15942_v38, %v3259_v60  ;;  %v4306_v8 = vadd.f32 %v15943_v48, %v3855_v15  ;;  %v5647_v30 = vpop.f32.mrf.mxu0  ;;  %v14440_v5 = vpack.c.bf16 %v5962_v52, %v5961_v26  ;;  %v6291_v16 = vpack.c.bf16 %v14412_v32, %v5842_v41  ;;  %11861 = vmatpush3.bf16.msra.mxu0 %v12295_v54  ;;  %v15945_v57 = vld [vmem:[#allocation56_spill] sm:$0xff]  ;;  %v15948_v60 = vld [vmem:[#allocation58_spill] sm:$0xff]  ;;  %v15949_v45 = vld [vmem:[#allocation59_spill] sm:$0xff] }
 0x233   : > { %v5123_v12 = vadd.f32 %v14319_v1, %v4305_v10  ;;  %5935 = vst [vmem:[#allocation3 + $0x121] sm:$0xff] %v5848_v43  ;;  %v5846_v0 = vmax.f32 %v14431_v49, 0.0  ;;  %v5817_v62 = vadd.f32 %v14171_v56, %v5714_v14  ;;  %v5712_v36 = vadd.f32 %v5647_v30, %v5118_v55  ;;  %11731 = vmatmul.mubr.bf16.gmra.mxu1 %v14433_v2  ;;  %v15951_v3 = vld [vmem:[#allocation84_spill] sm:$0xff]  ;;  %v15953_v59 = vld [vmem:[#allocation62_spill] sm:$0xff] }
 0x234   : > { %11942 = vmatprep.subr.bf16.mxu0 %v14420_v53  ;;  %v2445_v13 = vadd.f32 %v15944_v50, %v1994_v47  ;;  %v3858_v33 = vadd.f32 %v15946_v17, %v15945_v57  ;;  %v4304_v41 = vadd.f32 %v15947_v21, %v3853_v11  ;;  %v11696_v54 = vpop.f32.mrf.mxu0  ;;  %11734 = vmatprep.mubr.bf16.mxu1 %v14440_v5  ;;  %v14458_v47 = vld [vmem:[%s15752_s3 + $0x138] sm:$0xff]   ;;  %v15952_v55 = vld [vmem:[#allocation60_spill] sm:$0xff]  ;;  %v15954_v51 = vld [vmem:[#allocation86_spill] sm:$0xff] }
 0x235   : > { %11811 = vmatpush3.bf16.msra.mxu1 %v12290_v31  ;;  %v5121_v1 = vadd.f32 %v14349_v19, %v4303_v63  ;;  %5933 = vst [vmem:[#allocation3 + $0x109] sm:$0xff] %v5846_v0  ;;  %v5849_v37 = vmax.f32 %v5817_v62, 0.0  ;;  %v5815_v20 = vadd.f32 %v14171_v56, %v5712_v36  ;;  %v5717_v46 = vadd.f32 %v11696_v54, %v5123_v12  ;;  %v5963_v14 = vld [vmem:[#allocation3 + $0xd8] sm:$0xff]  ;;  %v5965_v30 = vld [vmem:[#allocation3 + $0xf0] sm:$0xff] }
 0x236   : > { %11783 = vmatmul.mubr.bf16.gmra.mxu0 %v6291_v16  ;;  %11812 = vmatprep.subr.bf16.mxu1 %v12293_v28  ;;  %v3856_v10 = vadd.f32 %v15949_v45, %v15948_v60  ;;  %v3263_v31 = vadd.f32 %v15950_v42, %v2445_v13  ;;  %v4309_v19 = vadd.f32 %v15951_v3, %v3858_v33  ;;  %v5660_v35 = vpop.f32.mrf.mxu0  ;;  %v5966_v15 = vld [vmem:[#allocation3 + $0xf8] sm:$0xff]  ;;  %v15955_v16 = vld [vmem:[#allocation63_spill] sm:$0xff]  ;;  %v15956_v12 = vld [vmem:[#allocation88_spill] sm:$0xff] }
 0x237   : > { %11786 = vmatprep.mubr.bf16.mxu0 %v6292_v7  ;;  %v5124_v4 = vadd.f32 %v14371_v29, %v4306_v8  ;;  %5936 = vst [vmem:[#allocation3 + $0x129] sm:$0xff] %v5849_v37  ;;  %v5847_v52 = vmax.f32 %v5815_v20, 0.0  ;;  %v5820_v34 = vadd.f32 %v14171_v56, %v5717_v46  ;;  %v5715_v23 = vadd.f32 %v5660_v35, %v5121_v1  ;;  %v11653_v7 = vpop.f32.mrf.mxu1 }
 0x238   : > { %v3859_v63 = vadd.f32 %v15953_v59, %v15952_v55  ;;  %v5122_v6 = vadd.f32 %v14400_v40, %v4304_v41  ;;  %v4307_v39 = vadd.f32 %v15954_v51, %v3856_v10  ;;  %v11697_v49 = vpop.f32.mrf.mxu0  ;;  %v5964_v26 = vld [vmem:[#allocation3 + $0xe0] sm:$0xff]  ;;  %v6294_v38 = vpack.c.bf16 %v5849_v37, %v5848_v43 }
 0x239   : > { %11813 = vmatpush3.bf16.msra.mxu1 %v12293_v28  ;;  %5934 = vst [vmem:[#allocation3 + $0x111] sm:$0xff] %v5847_v52  ;;  %v5852_v29 = vmax.f32 %v5820_v34, 0.0  ;;  %v5818_v11 = vadd.f32 %v14171_v56, %v5715_v23  ;;  %v5718_v48 = vadd.f32 %v11697_v49, %v5124_v4  ;;  %v14471_v8 = vpack.c.bf16 %v5964_v26, %v5963_v14  ;;  %v5085_v54 = vpop.f32.mrf.mxu1 }
 0x23a   : > { %11894 = vmatprep.subr.bf16.mxu1 %v14458_v47  ;;  %v3857_v40 = vadd.f32 %v15955_v16, %v3263_v31  ;;  %v4310_v62 = vadd.f32 %v15956_v12, %v3859_v63  ;;  %v5663_v36 = vpop.f32.mrf.mxu0  ;;  %v14476_v50 = vpack.c.bf16 %v5966_v15, %v5965_v30  ;;  %v14478_v43 = vpack.c.bf16 %v5847_v52, %v5846_v0  ;;  %v5969_v34 = vld [vmem:[#allocation3 + $0x120] sm:$0xff]  ;;  %v6621_v16 = vld [vmem:[#allocation3 + $0xa] sm:$0xff] }
 0x23b   : > { %v5127_v28 = vadd.f32 %v14426_v24, %v4309_v19  ;;  %5939 = vst [vmem:[#allocation3 + $0x151] sm:$0xff] %v5852_v29  ;;  %v5850_v13 = vmax.f32 %v5818_v11, 0.0  ;;  %v5821_v57 = vadd.f32 %v14171_v56, %v5718_v48  ;;  %v5716_v17 = vadd.f32 %v5663_v36, %v5122_v6  ;;  %11735 = vmatmul.mubr.bf16.gmra.mxu1 %v14471_v8 }
 0x23c   : > { %v4308_v33 = vadd.f32 %v14159_v27, %v3857_v40  ;;  %v11700_v21 = vpop.f32.mrf.mxu0  ;;  %11738 = vmatprep.mubr.bf16.mxu1 %v14476_v50  ;;  %v5125_v41 = vadd.f32 %v5082_v25, %v4307_v39  ;;  %v5128_v20 = vadd.f32 %v11653_v7, %v4310_v62  ;;  %v5967_v42 = vld [vmem:[#allocation3 + $0x108] sm:$0xff] }
 0x23d   : > { %5937 = vst [vmem:[#allocation3 + $0x139] sm:$0xff] %v5850_v13  ;;  %v14485_v1 = vmax.f32 %v5821_v57, 0.0  ;;  %v5819_v0 = vadd.f32 %v14171_v56, %v5716_v17  ;;  %v5721_v24 = vadd.f32 %v11700_v21, %v5127_v28  ;;  %v12302_v28 = vld [vmem:[%s15752_s3 + $0x170] sm:$0xff]   ;;  %v6623_v57 = vld [vmem:[#allocation3 + $0x22] sm:$0xff]  ;;  %v6625_v17 = vld [vmem:[#allocation3 + $0x3a] sm:$0xff] }
 0x23e   : > { %11787 = vmatmul.mubr.bf16.gmra.mxu0 %v14478_v43  ;;  %v5676_v37 = vpop.f32.mrf.mxu0  ;;  %v5970_v45 = vld [vmem:[#allocation3 + $0x128] sm:$0xff]  ;;  %v5126_v25 = vadd.f32 %v5085_v54, %v4308_v33 }
 0x23f   : > { %11790 = vmatprep.mubr.bf16.mxu0 %v6294_v38  ;;  %5940 = vst [vmem:[#allocation3 + $0x159] sm:$0xff] %v14485_v1  ;;  %v5851_v46 = vmax.f32 %v5819_v0, 0.0  ;;  %v5824_v27 = vadd.f32 %v14171_v56, %v5721_v24  ;;  %v5719_v60 = vadd.f32 %v5676_v37, %v5125_v41  ;;  %v6296_v3 = vpack.c.bf16 %v14485_v1, %v5852_v29  ;;  %v12304_v33 = vld [vmem:[%s15752_s3 + $0x168] sm:$0xff]   ;;  %v12297_v41 = vld [vmem:[%s15752_s3 + $0x130] sm:$0xff]  }
 0x240   : > { %v11701_v10 = vpop.f32.mrf.mxu0  ;;  %v5968_v31 = vld [vmem:[#allocation3 + $0x110] sm:$0xff]  ;;  %v14495_v15 = vpack.c.bf16 %v5970_v45, %v5969_v34  ;;  %v6628_v24 = vld [vmem:[#allocation3 + $0x62] sm:$0xff] }
 0x241   : > { %5938 = vst [vmem:[#allocation3 + $0x141] sm:$0xff] %v5851_v46  ;;  %v5856_v19 = vmax.f32 %v5824_v27, 0.0  ;;  %v5822_v35 = vadd.f32 %v14171_v56, %v5719_v60  ;;  %v5722_v4 = vadd.f32 %v11701_v10, %v5128_v20  ;;  %v14493_v52 = vpack.c.bf16 %v5968_v31, %v5967_v42  ;;  %v6626_v54 = vld [vmem:[#allocation3 + $0x4a] sm:$0xff]  ;;  %v6627_v0 = vld [vmem:[#allocation3 + $0x52] sm:$0xff]  ;;  %v6630_v60 = vld [vmem:[#allocation3 + $0x7a] sm:$0xff] }
 0x242   : > { %v5679_v23 = vpop.f32.mrf.mxu0  ;;  %v14497_v55 = vpack.c.bf16 %v5851_v46, %v5850_v13  ;;  %v5973_v11 = vld [vmem:[#allocation3 + $0x150] sm:$0xff]  ;;  %v6622_v13 = vld [vmem:[#allocation3 + $0x1a] sm:$0xff]  ;;  %v6631_v45 = vld [vmem:[#allocation3 + $0x82] sm:$0xff] }
 0x243   : > { %5943 = vst [vmem:[#allocation3 + $0x181] sm:$0xff] %v5856_v19  ;;  %v5854_v59 = vmax.f32 %v5822_v35, 0.0  ;;  %v5825_v63 = vadd.f32 %v14171_v56, %v5722_v4  ;;  %v5720_v6 = vadd.f32 %v5679_v23, %v5126_v25  ;;  %11739 = vmatmul.mubr.bf16.gmra.mxu1 %v14493_v52  ;;  %v14528_v21 = vpack.c.bf16 %v6623_v57, %v6622_v13  ;;  %v6629_v37 = vld [vmem:[#allocation3 + $0x6a] sm:$0xff]  ;;  %v12307_v20 = vld [vmem:[%s15752_s3 + $0x158] sm:$0xff]   ;;  %v6636_v34 = vld [vmem:[#allocation3 + $0xc2] sm:$0xff] }
 0x244   : > { %11742 = vmatprep.mubr.bf16.mxu1 %v14495_v15  ;;  %v5971_v38 = vld [vmem:[#allocation3 + $0x138] sm:$0xff]  ;;  %v14554_v46 = vpack.c.bf16 %v6629_v37, %v6628_v24  ;;  %v12310_v42 = vld [vmem:[%s15752_s3 + $0x148] sm:$0xff]   ;;  %v14569_v31 = vpack.c.bf16 %v6631_v45, %v6630_v60 }
 0x245   : > { %5941 = vst [vmem:[#allocation3 + $0x169] sm:$0xff] %v5854_v59  ;;  %v5857_v51 = vmax.f32 %v5825_v63, 0.0  ;;  %v5823_v39 = vadd.f32 %v14171_v56, %v5720_v6  ;;  %v6620_v56 = vld [vmem:[#allocation3 + $0x2] sm:$0xff]  ;;  %v12300_v27 = vld [vmem:[%s15752_s3 + $0x118] sm:$0xff]   ;;  %v6634_v35 = vld [vmem:[#allocation3 + $0xaa] sm:$0xff] }
 0x246   : > { %11791 = vmatmul.mubr.bf16.gmra.mxu0 %v14497_v55  ;;  %v5974_v14 = vld [vmem:[#allocation3 + $0x158] sm:$0xff]  ;;  %v6652_v62 = vpack.c.bf16 %v6621_v16, %v6620_v56  ;;  %v6637_v23 = vld [vmem:[#allocation3 + $0xca] sm:$0xff]  ;;  %v6644_v56 = vld [vmem:[#allocation3 + $0x122] sm:$0xff] }
 0x247   : > { %11794 = vmatprep.mubr.bf16.mxu0 %v6296_v3  ;;  %5944 = vst [vmem:[#allocation3 + $0x189] sm:$0xff] %v5857_v51  ;;  %v5855_v49 = vmax.f32 %v5823_v39, 0.0  ;;  %v14504_v26 = vpack.c.bf16 %v5857_v51, %v5856_v19  ;;  %v14510_v30 = vpack.c.bf16 %v5974_v14, %v5973_v11  ;;  %v6632_v25 = vld [vmem:[#allocation3 + $0x92] sm:$0xff]  ;;  %v6633_v10 = vld [vmem:[#allocation3 + $0x9a] sm:$0xff]  ;;  %v12306_v19 = vld [vmem:[%s15752_s3 + $0x108] sm:$0xff]   ;;  %v14594_v6 = vpack.c.bf16 %v6637_v23, %v6636_v34 }
 0x248   : > { %v5972_v7 = vld [vmem:[#allocation3 + $0x140] sm:$0xff]  ;;  %v14574_v3 = vpack.c.bf16 %v6633_v10, %v6632_v25  ;;  %v6635_v4 = vld [vmem:[#allocation3 + $0xb2] sm:$0xff]  ;;  %v7367_v60 = vld [vmem:[#allocation3 + $0x69] sm:$0xff] }
 0x249   : > { %5942 = vst [vmem:[#allocation3 + $0x171] sm:$0xff] %v5855_v49  ;;  %v14506_v29 = vpack.c.bf16 %v5972_v7, %v5971_v38  ;;  %v14508_v48 = vpack.c.bf16 %v5855_v49, %v5854_v59  ;;  %v12317_v59 = vld [vmem:[%s15752_s3 + $0x1f8] sm:$0xff]   ;;  %v14589_v63 = vpack.c.bf16 %v6635_v4, %v6634_v35  ;;  %v6639_v39 = vld [vmem:[#allocation3 + $0xe2] sm:$0xff] }
 0x24a   : > { %v6638_v51 = vld [vmem:[#allocation3 + $0xda] sm:$0xff]  ;;  %v6640_v49 = vld [vmem:[#allocation3 + $0xf2] sm:$0xff]  ;;  %v12326_v34 = vld [vmem:[%s15752_s3 + $0x1c8] sm:$0xff]  }
 0x24b   : > { %11743 = vmatmul.mubr.bf16.gmra.mxu1 %v14506_v29  ;;  %v6641_v14 = vld [vmem:[#allocation3 + $0xfa] sm:$0xff]  ;;  %v14603_v38 = vpack.c.bf16 %v6639_v39, %v6638_v51  ;;  %v6643_v11 = vld [vmem:[#allocation3 + $0x112] sm:$0xff]  ;;  %v12322_v51 = vld [vmem:[%s15752_s3 + $0x188] sm:$0xff]  }
 0x24c   : > { %11746 = vmatprep.mubr.bf16.mxu1 %v14510_v30  ;;  %v5975_v40 = vld [vmem:[#allocation3 + $0x168] sm:$0xff]  ;;  %v14605_v7 = vpack.c.bf16 %v6641_v14, %v6640_v49  ;;  %v7365_v24 = vld [vmem:[#allocation3 + $0x51] sm:$0xff]  ;;  %v7371_v35 = vld [vmem:[#allocation3 + $0x99] sm:$0xff] }
 0x24d   : > { %v7362_v37 = vld [vmem:[#allocation3 + $0x31] sm:$0xff]  ;;  %v7369_v45 = vld [vmem:[#allocation3 + $0x81] sm:$0xff]  ;;  %v7375_v39 = vld [vmem:[#allocation3 + $0xc9] sm:$0xff] }
 0x24e   : > { %11795 = vmatmul.mubr.bf16.gmra.mxu0 %v14508_v48  ;;  %v7021_v13 = vld [vmem:[#allocation3 + $0x188] sm:$0xff]  ;;  %v12323_v25 = vld [vmem:[%s15752_s3 + $0x1d8] sm:$0xff]  }
 0x24f   : > { %11862 = vmatprep.mubr.bf16.mxu0 %v14273_v22  ;;  %v6624_v22 = vld [vmem:[#allocation3 + $0x32] sm:$0xff]  ;;  %v7366_v10 = vld [vmem:[#allocation3 + $0x61] sm:$0xff] }
 0x250   : > { %v5976_v12 = vld [vmem:[#allocation3 + $0x170] sm:$0xff]  ;;  %v14697_v49 = vld [vmem:[#allocation3 + $0xd9] sm:$0xff]  ;;  %v7374_v14 = vld [vmem:[#allocation3 + $0xc1] sm:$0xff] }
 0x251   : > { %v14516_v36 = vpack.c.bf16 %v5976_v12, %v5975_v40  ;;  %v6646_v12 = vld [vmem:[#allocation3 + $0x13a] sm:$0xff]  ;;  %v7373_v4 = vld [vmem:[#allocation3 + $0xb1] sm:$0xff] }
 0x252   : > { %v7370_v23 = vld [vmem:[#allocation3 + $0x91] sm:$0xff] }
 0x253   : > { %11747 = vmatmul.mubr.bf16.gmra.mxu1 %v14516_v36 }
 0x254   : > { %11814 = vmatprep.mubr.bf16.mxu1 %v6652_v62  ;;  %v6647_v62 = vld [vmem:[#allocation3 + $0x142] sm:$0xff] }
 0x256   : > { %11863 = vmatmul.mubr.bf16.vlgmr.msra.gmra.mxu0 %v14280_v9  ;;  %v14533_v9 = vpack.c.bf16 %v6625_v17, %v6624_v22  ;;  %v7020_v22 = vld [vmem:[#allocation3 + $0x180] sm:$0xff] }
 0x257   : > { %11866 = vmatprep.mubr.bf16.mxu0 %v14325_v61  ;;  %11943 = vmatpush3.bf16.msra.mxu0 %v14420_v53  ;;  %v12305_v61 = vld [vmem:[%s15752_s3 + $0x160] sm:$0xff]   ;;  %v12298_v53 = vld [vmem:[%s15752_s3 + $0x128] sm:$0xff]   ;;  %v14624_v17 = vpack.c.bf16 %v7021_v13, %v7020_v22  ;;  %v8101_v13 = vld [vmem:[#allocation3 + $0x30] sm:$0xff] }
 0x258   : > { %11944 = vmatprep.subr.bf16.mxu0 %v12302_v28 }
 0x25b   : > { %11945 = vmatpush3.bf16.msra.mxu0 %v12302_v28  ;;  %11815 = vmatmul.mubr.bf16.vlgmr.msra.gmra.mxu1 %v14528_v21  ;;  %v6649_v28 = vld [vmem:[#allocation3 + $0x15a] sm:$0xff] }
 0x25c   : > { %11946 = vmatprep.subr.bf16.mxu0 %v12304_v33  ;;  %11818 = vmatprep.mubr.bf16.mxu1 %v14533_v9 }
 0x25d   : > { %11895 = vmatpush3.bf16.msra.mxu1 %v14458_v47  ;;  %v14549_v47 = vpack.c.bf16 %v6627_v0, %v6626_v54  ;;  %v12318_v54 = vld [vmem:[%s15752_s3 + $0x1f0] sm:$0xff]   ;;  %v7363_v0 = vld [vmem:[#allocation3 + $0x39] sm:$0xff] }
 0x25e   : > { %11867 = vmatmul.mubr.bf16.gmra.mxu0 %v14332_v44  ;;  %11896 = vmatprep.subr.bf16.mxu1 %v12297_v41  ;;  %v12299_v44 = vld [vmem:[%s15752_s3 + $0x120] sm:$0xff]  }
 0x25f   : > { %11870 = vmatprep.mubr.bf16.mxu0 %v14377_v18  ;;  %11947 = vmatpush3.bf16.msra.mxu0 %v12304_v33  ;;  %v12308_v18 = vld [vmem:[%s15752_s3 + $0x150] sm:$0xff]  }
 0x260   : > { %11948 = vmatprep.subr.bf16.mxu0 %v12305_v61  ;;  %v6651_v33 = vld [vmem:[#allocation3 + $0x172] sm:$0xff] }
 0x261   : > { %11897 = vmatpush3.bf16.msra.mxu1 %v12297_v41 }
 0x262   : > { %11898 = vmatprep.subr.bf16.mxu1 %v12298_v53 }
 0x263   : > { %11949 = vmatpush3.bf16.msra.mxu0 %v12305_v61  ;;  %11819 = vmatmul.mubr.bf16.gmra.mxu1 %v14549_v47  ;;  %v7360_v61 = vld [vmem:[#allocation3 + $0x19] sm:$0xff] }
 0x264   : > { %11950 = vmatprep.subr.bf16.mxu0 %v12307_v20  ;;  %11822 = vmatprep.mubr.bf16.mxu1 %v14554_v46 }
 0x265   : > { %11899 = vmatpush3.bf16.msra.mxu1 %v12298_v53 }
 0x266   : > { %11871 = vmatmul.mubr.bf16.gmra.mxu0 %v14384_v58  ;;  %11900 = vmatprep.subr.bf16.mxu1 %v12299_v44  ;;  %v12303_v58 = vld [vmem:[%s15752_s3 + $0x110] sm:$0xff]  }
 0x267   : > { %11874 = vmatprep.mubr.bf16.mxu0 %v14433_v2  ;;  %11951 = vmatpush3.bf16.msra.mxu0 %v12307_v20  ;;  %v12311_v2 = vld [vmem:[%s15752_s3 + $0x140] sm:$0xff]   ;;  %v14640_v20 = vpack.c.bf16 %v7363_v0, %v7362_v37  ;;  %v12330_v37 = vld [vmem:[%s15752_s3 + $0x228] sm:$0xff]  }
 0x268   : > { %11952 = vmatprep.subr.bf16.mxu0 %v12308_v18 }
 0x269   : > { %11901 = vmatpush3.bf16.msra.mxu1 %v12299_v44  ;;  %v7364_v44 = vld [vmem:[#allocation3 + $0x49] sm:$0xff] }
 0x26a   : > { %11902 = vmatprep.subr.bf16.mxu1 %v12300_v27 }
 0x26b   : > { %11953 = vmatpush3.bf16.msra.mxu0 %v12308_v18  ;;  %11823 = vmatmul.mubr.bf16.gmra.mxu1 %v14569_v31  ;;  %v12313_v18 = vld [vmem:[%s15752_s3 + $0x1b0] sm:$0xff]  }
 0x26c   : > { %11954 = vmatprep.subr.bf16.mxu0 %v12310_v42  ;;  %11826 = vmatprep.mubr.bf16.mxu1 %v14574_v3 }
 0x26d   : > { %11903 = vmatpush3.bf16.msra.mxu1 %v12300_v27  ;;  %v14645_v27 = vpack.c.bf16 %v7365_v24, %v7364_v44  ;;  %v8108_v44 = vld [vmem:[#allocation3 + $0x80] sm:$0xff] }
 0x26e   : > { %11875 = vmatmul.mubr.bf16.gmra.mxu0 %v14440_v5  ;;  %11904 = vmatprep.subr.bf16.mxu1 %v12303_v58  ;;  %v12309_v5 = vld [vmem:[%s15752_s3 + $0x100] sm:$0xff]  }
 0x26f   : > { %11878 = vmatprep.mubr.bf16.mxu0 %v14471_v8  ;;  %11955 = vmatpush3.bf16.msra.mxu0 %v12310_v42  ;;  %v12312_v8 = vld [vmem:[%s15752_s3 + $0x1b8] sm:$0xff]   ;;  %v14660_v42 = vpack.c.bf16 %v7367_v60, %v7366_v10  ;;  %v8109_v10 = vld [vmem:[#allocation3 + $0x90] sm:$0xff] }
 0x270   : > { %11956 = vmatprep.subr.bf16.mxu0 %v12311_v2  ;;  %v8107_v60 = vld [vmem:[#allocation3 + $0x78] sm:$0xff] }
 0x271   : > { %11905 = vmatpush3.bf16.msra.mxu1 %v12303_v58  ;;  %v12315_v58 = vld [vmem:[%s15752_s3 + $0x1a0] sm:$0xff]  }
 0x272   : > { %11906 = vmatprep.subr.bf16.mxu1 %v12306_v19 }
 0x273   : > { %11957 = vmatpush3.bf16.msra.mxu0 %v12311_v2  ;;  %11827 = vmatmul.mubr.bf16.gmra.mxu1 %v14589_v63 }
 0x274   : > { %12038 = vmatprep.subr.bf16.mxu0 %v12317_v59  ;;  %11830 = vmatprep.mubr.bf16.mxu1 %v14594_v6 }
 0x275   : > { %11907 = vmatpush3.bf16.msra.mxu1 %v12306_v19  ;;  %v12316_v19 = vld [vmem:[%s15752_s3 + $0x198] sm:$0xff]  }
 0x276   : > { %11879 = vmatmul.mubr.bf16.gmra.mxu0 %v14476_v50  ;;  %11908 = vmatprep.subr.bf16.mxu1 %v12309_v5  ;;  %v6642_v50 = vld [vmem:[#allocation3 + $0x10a] sm:$0xff] }
 0x277   : > { %11882 = vmatprep.mubr.bf16.mxu0 %v14493_v52  ;;  %v6645_v52 = vld [vmem:[#allocation3 + $0x12a] sm:$0xff]  ;;  %v14611_v16 = vpack.c.bf16 %v6643_v11, %v6642_v50  ;;  %v14699_v50 = vpack.c.bf16 %v7375_v39, %v7374_v14  ;;  %v7400_v11 = vpack.c.bf16 %v14412_v32, %v14697_v49 }
 0x278   : > { %v14613_v40 = vpack.c.bf16 %v6645_v52, %v6644_v56  ;;  %v7379_v56 = vld [vmem:[#allocation3 + $0xf9] sm:$0xff]  ;;  %v7378_v52 = vld [vmem:[#allocation3 + $0xf1] sm:$0xff]  ;;  %v7383_v32 = vld [vmem:[#allocation3 + $0x129] sm:$0xff] }
 0x279   : > { %11909 = vmatpush3.bf16.msra.mxu1 %v12309_v5  ;;  %v12319_v5 = vld [vmem:[%s15752_s3 + $0x190] sm:$0xff]   ;;  %v8111_v14 = vld [vmem:[#allocation3 + $0xa8] sm:$0xff] }
 0x27a   : > { %11990 = vmatprep.subr.bf16.mxu1 %v12312_v8 }
 0x27b   : > { %11831 = vmatmul.mubr.bf16.gmra.mxu1 %v14603_v38 }
 0x27c   : > { %11834 = vmatprep.mubr.bf16.mxu1 %v14605_v7 }
 0x27e   : > { %11883 = vmatmul.mubr.bf16.gmra.mxu0 %v14495_v15  ;;  %v6648_v15 = vld [vmem:[#allocation3 + $0x152] sm:$0xff] }
 0x27f   : > { %11886 = vmatprep.mubr.bf16.mxu0 %v14506_v29  ;;  %v14619_v29 = vpack.c.bf16 %v6647_v62, %v6646_v12  ;;  %v14621_v57 = vpack.c.bf16 %v6649_v28, %v6648_v15  ;;  %v14712_v12 = vpack.c.bf16 %v7379_v56, %v7378_v52  ;;  %v7760_v15 = vld [vmem:[#allocation3 + $0x182] sm:$0xff]  ;;  %v12333_v52 = vld [vmem:[%s15752_s3 + $0x210] sm:$0xff]  }
 0x283   : > { %11835 = vmatmul.mubr.bf16.gmra.mxu1 %v14611_v16 }
 0x284   : > { %11838 = vmatprep.mubr.bf16.mxu1 %v14613_v40 }
 0x286   : > { %11887 = vmatmul.mubr.bf16.gmra.mxu0 %v14510_v30  ;;  %v6650_v30 = vld [vmem:[#allocation3 + $0x16a] sm:$0xff] }
 0x287   : > { %11890 = vmatprep.mubr.bf16.mxu0 %v14516_v36  ;;  %v7361_v36 = vld [vmem:[#allocation3 + $0x21] sm:$0xff]  ;;  %v14629_v41 = vpack.c.bf16 %v6651_v33, %v6650_v30 }
 0x288   : > { %v7392_v53 = vpack.c.bf16 %v7361_v36, %v7360_v61  ;;  %v8106_v30 = vld [vmem:[#allocation3 + $0x68] sm:$0xff] }
 0x28b   : > { %11839 = vmatmul.mubr.bf16.gmra.mxu1 %v14619_v29 }
 0x28c   : > { %11842 = vmatprep.mubr.bf16.mxu1 %v14621_v57 }
 0x28e   : > { %11891 = vmatmul.mubr.bf16.gmra.mxu0 %v14624_v17 }
 0x28f   : > { %11958 = vmatprep.mubr.bf16.mxu0 %v14528_v21  ;;  %v12320_v21 = vld [vmem:[%s15752_s3 + $0x1e8] sm:$0xff]  }
 0x293   : > { %11843 = vmatmul.mubr.bf16.gmra.mxu1 %v14629_v41 }
 0x294   : > { %11910 = vmatprep.mubr.bf16.mxu1 %v7392_v53  ;;  %v12329_v53 = vld [vmem:[%s15752_s3 + $0x230] sm:$0xff]  }
 0x296   : > { %11959 = vmatmul.mubr.bf16.vlgmr.msra.gmra.mxu0 %v14533_v9  ;;  %v12321_v9 = vld [vmem:[%s15752_s3 + $0x1e0] sm:$0xff]  }
 0x297   : > { %11962 = vmatprep.mubr.bf16.mxu0 %v14549_v47  ;;  %12039 = vmatpush3.bf16.msra.mxu0 %v12317_v59  ;;  %v12314_v47 = vld [vmem:[%s15752_s3 + $0x1a8] sm:$0xff]   ;;  %v14680_v59 = vpack.c.bf16 %v7371_v35, %v7370_v23  ;;  %v12332_v23 = vld [vmem:[%s15752_s3 + $0x218] sm:$0xff]  }
 0x298   : > { %12040 = vmatprep.subr.bf16.mxu0 %v12318_v54 }
 0x29b   : > { %12041 = vmatpush3.bf16.msra.mxu0 %v12318_v54  ;;  %11911 = vmatmul.mubr.bf16.vlgmr.msra.gmra.mxu1 %v14640_v20 }
 0x29c   : > { %12042 = vmatprep.subr.bf16.mxu0 %v12320_v21  ;;  %11914 = vmatprep.mubr.bf16.mxu1 %v14645_v27 }
 0x29d   : > { %11991 = vmatpush3.bf16.msra.mxu1 %v12312_v8 }
 0x29e   : > { %11963 = vmatmul.mubr.bf16.gmra.mxu0 %v14554_v46  ;;  %11992 = vmatprep.subr.bf16.mxu1 %v12313_v18  ;;  %v7368_v46 = vld [vmem:[#allocation3 + $0x79] sm:$0xff] }
 0x29f   : > { %11966 = vmatprep.mubr.bf16.mxu0 %v14569_v31  ;;  %12043 = vmatpush3.bf16.msra.mxu0 %v12320_v21  ;;  %v14665_v2 = vpack.c.bf16 %v7369_v45, %v7368_v46  ;;  %v12324_v31 = vld [vmem:[%s15752_s3 + $0x1d0] sm:$0xff]   ;;  %v12331_v46 = vld [vmem:[%s15752_s3 + $0x220] sm:$0xff]  }
 0x2a0   : > { %12044 = vmatprep.subr.bf16.mxu0 %v12321_v9 }
 0x2a1   : > { %11993 = vmatpush3.bf16.msra.mxu1 %v12313_v18 }
 0x2a2   : > { %11994 = vmatprep.subr.bf16.mxu1 %v12314_v47 }
 0x2a3   : > { %12045 = vmatpush3.bf16.msra.mxu0 %v12321_v9  ;;  %11915 = vmatmul.mubr.bf16.gmra.mxu1 %v14660_v42 }
 0x2a4   : > { %12046 = vmatprep.subr.bf16.mxu0 %v12323_v25  ;;  %11918 = vmatprep.mubr.bf16.mxu1 %v14665_v2 }
 0x2a5   : > { %11995 = vmatpush3.bf16.msra.mxu1 %v12314_v47 }
 0x2a6   : > { %11967 = vmatmul.mubr.bf16.gmra.mxu0 %v14574_v3  ;;  %11996 = vmatprep.subr.bf16.mxu1 %v12315_v58  ;;  %v7372_v3 = vld [vmem:[#allocation3 + $0xa9] sm:$0xff] }
 0x2a7   : > { %11970 = vmatprep.mubr.bf16.mxu0 %v14589_v63  ;;  %12047 = vmatpush3.bf16.msra.mxu0 %v12323_v25  ;;  %v14685_v8 = vpack.c.bf16 %v7373_v4, %v7372_v3  ;;  %v12327_v63 = vld [vmem:[%s15752_s3 + $0x1c0] sm:$0xff]   ;;  %v8136_v25 = vpack.c.bf16 %v8108_v44, %v8107_v60  ;;  %v8112_v3 = vld [vmem:[#allocation3 + $0xb0] sm:$0xff] }
 0x2a8   : > { %12048 = vmatprep.subr.bf16.mxu0 %v12324_v31 }
 0x2a9   : > { %11997 = vmatpush3.bf16.msra.mxu1 %v12315_v58 }
 0x2aa   : > { %11998 = vmatprep.subr.bf16.mxu1 %v12316_v19 }
 0x2ab   : > { %12049 = vmatpush3.bf16.msra.mxu0 %v12324_v31  ;;  %11919 = vmatmul.mubr.bf16.gmra.mxu1 %v14680_v59 }
 0x2ac   : > { %12050 = vmatprep.subr.bf16.mxu0 %v12326_v34  ;;  %11922 = vmatprep.mubr.bf16.mxu1 %v14685_v8 }
 0x2ad   : > { %11999 = vmatpush3.bf16.msra.mxu1 %v12316_v19 }
 0x2ae   : > { %11971 = vmatmul.mubr.bf16.gmra.mxu0 %v14594_v6  ;;  %12000 = vmatprep.subr.bf16.mxu1 %v12319_v5  ;;  %v12325_v6 = vld [vmem:[%s15752_s3 + $0x180] sm:$0xff]  }
 0x2af   : > { %11974 = vmatprep.mubr.bf16.mxu0 %v14603_v38  ;;  %12051 = vmatpush3.bf16.msra.mxu0 %v12326_v34  ;;  %v12328_v38 = vld [vmem:[%s15752_s3 + $0x238] sm:$0xff]  }
 0x2b0   : > { %12052 = vmatprep.subr.bf16.mxu0 %v12327_v63 }
 0x2b1   : > { %12001 = vmatpush3.bf16.msra.mxu1 %v12319_v5 }
 0x2b2   : > { %12002 = vmatprep.subr.bf16.mxu1 %v12322_v51 }
 0x2b3   : > { %12053 = vmatpush3.bf16.msra.mxu0 %v12327_v63  ;;  %11923 = vmatmul.mubr.bf16.gmra.mxu1 %v14699_v50  ;;  %v8114_v63 = vld [vmem:[#allocation3 + $0xc8] sm:$0xff] }
 0x2b4   : > { %11926 = vmatprep.mubr.bf16.mxu1 %v7400_v11 }
 0x2b5   : > { %12003 = vmatpush3.bf16.msra.mxu1 %v12322_v51 }
 0x2b6   : > { %11975 = vmatmul.mubr.bf16.gmra.mxu0 %v14605_v7  ;;  %12004 = vmatprep.subr.bf16.mxu1 %v12325_v6  ;;  %v7382_v7 = vld [vmem:[#allocation3 + $0x121] sm:$0xff] }
 0x2b7   : > { %11978 = vmatprep.mubr.bf16.mxu0 %v14611_v16  ;;  %v14718_v62 = vpack.c.bf16 %v7383_v32, %v7382_v7  ;;  %v14723_v16 = vld [vmem:[#allocation3 + $0x151] sm:$0xff] }
 0x2b9   : > { %12005 = vmatpush3.bf16.msra.mxu1 %v12325_v6  ;;  %v8486_v6 = vld [vmem:[#allocation3 + $0xe1] sm:$0xff] }
 0x2ba   : > { %12086 = vmatprep.subr.bf16.mxu1 %v12328_v38 }
 0x2bb   : > { %11927 = vmatmul.mubr.bf16.gmra.mxu1 %v14712_v12 }
 0x2bc   : > { %11930 = vmatprep.mubr.bf16.mxu1 %v14478_v43  ;;  %v7761_v43 = vld [vmem:[#allocation3 + $0x18a] sm:$0xff] }
 0x2bd   : > { %v14728_v28 = vpack.c.bf16 %v7761_v43, %v7760_v15  ;;  %v8510_v43 = vpack.c.bf16 %v8486_v6, %v14697_v49 }
 0x2be   : > { %11979 = vmatmul.mubr.bf16.gmra.mxu0 %v14613_v40  ;;  %v7405_v40 = vpack.c.bf16 %v14485_v1, %v14723_v16  ;;  %v8104_v1 = vld [vmem:[#allocation3 + $0x50] sm:$0xff] }
 0x2bf   : > { %11982 = vmatprep.mubr.bf16.mxu0 %v14619_v29 }
 0x2c3   : > { %11931 = vmatmul.mubr.bf16.gmra.mxu1 %v14718_v62 }
 0x2c4   : > { %11934 = vmatprep.mubr.bf16.mxu1 %v14497_v55  ;;  %v8102_v55 = vld [vmem:[#allocation3 + $0x38] sm:$0xff] }
 0x2c5   : > { %v8133_v29 = vpack.c.bf16 %v8102_v55, %v8101_v13 }
 0x2c6   : > { %11983 = vmatmul.mubr.bf16.gmra.mxu0 %v14621_v57 }
 0x2c7   : > { %11986 = vmatprep.mubr.bf16.mxu0 %v14629_v41  ;;  %v8105_v41 = vld [vmem:[#allocation3 + $0x60] sm:$0xff] }
 0x2c8   : > { %v8135_v54 = vpack.c.bf16 %v8106_v30, %v8105_v41  ;;  %v8118_v30 = vld [vmem:[#allocation3 + $0xf8] sm:$0xff] }
 0x2cb   : > { %11935 = vmatmul.mubr.bf16.gmra.mxu1 %v7405_v40 }
 0x2cc   : > { %11938 = vmatprep.mubr.bf16.mxu1 %v14508_v48  ;;  %v8103_v48 = vld [vmem:[#allocation3 + $0x48] sm:$0xff] }
 0x2cd   : > { %v8134_v36 = vpack.c.bf16 %v8104_v1, %v8103_v48  ;;  %v8115_v48 = vld [vmem:[#allocation3 + $0xd8] sm:$0xff] }
 0x2ce   : > { %11987 = vmatmul.mubr.bf16.gmra.mxu0 %v14728_v28 }
 0x2cf   : > { %12054 = vmatprep.mubr.bf16.mxu0 %v14640_v20 }
 0x2d3   : > { %11939 = vmatmul.mubr.bf16.gmra.mxu1 %v14504_v26  ;;  %v11768_v57 = vpop.f32.mrf.mxu0 }
 0x2d4   : > { %12006 = vmatprep.mubr.bf16.mxu1 %v8133_v29  ;;  %v12334_v29 = vld [vmem:[%s15752_s3 + $0x208] sm:$0xff]  }
 0x2d5   : > { %v6429_v22 = vpop.f32.mrf.mxu0 }
 0x2d6   : > { %12055 = vmatmul.mubr.bf16.vlgmr.msra.gmra.mxu0 %v14645_v27  ;;  %v8110_v27 = vld [vmem:[#allocation3 + $0x98] sm:$0xff] }
 0x2d7   : > { %12058 = vmatprep.mubr.bf16.mxu0 %v14660_v42  ;;  %v11769_v33 = vpop.f32.mrf.mxu0 }
 0x2d9   : > { %v6432_v61 = vpop.f32.mrf.mxu0 }
 0x2db   : > { %v11720_v26 = vpop.f32.mrf.mxu1  ;;  %12007 = vmatmul.mubr.bf16.vlgmr.msra.gmra.mxu1 %v8134_v36  ;;  %v8490_v36 = vld [vmem:[#allocation3 + $0x111] sm:$0xff] }
 0x2dc   : > { %v14739_v0 = vadd.f32 %v11768_v57, %v11720_v26  ;;  %12010 = vmatprep.mubr.bf16.mxu1 %v8135_v54  ;;  %12087 = vmatpush3.bf16.msra.mxu1 %v12328_v38  ;;  %v8113_v38 = vld [vmem:[#allocation3 + $0xc0] sm:$0xff] }
 0x2dd   : > { %v6091_v24 = vpop.f32.mrf.mxu1  ;;  %v11772_v21 = vpop.f32.mrf.mxu0  ;;  %12088 = vmatprep.subr.bf16.mxu1 %v12329_v53  ;;  %v12335_v26 = vld [vmem:[%s15752_s3 + $0x200] sm:$0xff]  }
 0x2de   : > { %12059 = vmatmul.mubr.bf16.gmra.mxu0 %v14665_v2  ;;  %v14745_v20 = vadd.f32 %v6429_v22, %v6091_v24  ;;  %v8137_v2 = vpack.c.bf16 %v8110_v27, %v8109_v10  ;;  %v8116_v22 = vld [vmem:[#allocation3 + $0xe0] sm:$0xff] }
 0x2df   : > { %12062 = vmatprep.mubr.bf16.mxu0 %v14680_v59  ;;  %v11721_v18 = vpop.f32.mrf.mxu1  ;;  %v6445_v9 = vpop.f32.mrf.mxu0 }
 0x2e0   : > { %v14748_v47 = vadd.f32 %v11769_v33, %v11721_v18  ;;  %12089 = vmatpush3.bf16.msra.mxu1 %v12329_v53  ;;  %v8117_v53 = vld [vmem:[#allocation3 + $0xf0] sm:$0xff] }
 0x2e1   : > { %v6094_v45 = vpop.f32.mrf.mxu1  ;;  %v11773_v42 = vpop.f32.mrf.mxu0  ;;  %12090 = vmatprep.subr.bf16.mxu1 %v12330_v37 }
 0x2e2   : > { %v14753_v58 = vadd.f32 %v6432_v61, %v6094_v45  ;;  %v8140_v61 = vpack.c.bf16 %v8116_v22, %v8115_v48  ;;  %v8498_v22 = vld [vmem:[#allocation3 + $0x171] sm:$0xff] }
 0x2e3   : > { %v11724_v31 = vpop.f32.mrf.mxu1  ;;  %12011 = vmatmul.mubr.bf16.gmra.mxu1 %v8136_v25  ;;  %v6448_v19 = vpop.f32.mrf.mxu0  ;;  %v8120_v25 = vld [vmem:[#allocation3 + $0x110] sm:$0xff] }
 0x2e4   : > { %v14755_v35 = vadd.f32 %v11772_v21, %v11724_v31  ;;  %12014 = vmatprep.mubr.bf16.mxu1 %v8137_v2  ;;  %12091 = vmatpush3.bf16.msra.mxu1 %v12330_v37  ;;  %v8489_v21 = vld [vmem:[#allocation3 + $0x109] sm:$0xff] }
 0x2e5   : > { %v6107_v4 = vpop.f32.mrf.mxu1  ;;  %v11776_v34 = vpop.f32.mrf.mxu0  ;;  %12092 = vmatprep.subr.bf16.mxu1 %v12331_v46  ;;  %v8512_v18 = vpack.c.bf16 %v8490_v36, %v8489_v21  ;;  %v8119_v31 = vld [vmem:[#allocation3 + $0x108] sm:$0xff] }
 0x2e6   : > { %12063 = vmatmul.mubr.bf16.gmra.mxu0 %v14685_v8  ;;  %v14761_v59 = vadd.f32 %v6445_v9, %v6107_v4  ;;  %v8138_v8 = vpack.c.bf16 %v8112_v3, %v8111_v14  ;;  %v8493_v14 = vld [vmem:[#allocation3 + $0x139] sm:$0xff]  ;;  %v8500_v36 = vld [vmem:[#allocation3 + $0x189] sm:$0xff] }
 0x2e7   : > { %12066 = vmatprep.mubr.bf16.mxu0 %v14699_v50  ;;  %v11725_v5 = vpop.f32.mrf.mxu1  ;;  %v6461_v51 = vpop.f32.mrf.mxu0  ;;  %v8139_v50 = vpack.c.bf16 %v8114_v63, %v8113_v38 }
 0x2e8   : > { %v14764_v39 = vadd.f32 %v11773_v42, %v11725_v5  ;;  %12093 = vmatpush3.bf16.msra.mxu1 %v12331_v46  ;;  %v8122_v42 = vld [vmem:[#allocation3 + $0x128] sm:$0xff]  ;;  %v8496_v5 = vld [vmem:[#allocation3 + $0x159] sm:$0xff] }
 0x2e9   : > { %v6110_v11 = vpop.f32.mrf.mxu1  ;;  %v11777_v56 = vpop.f32.mrf.mxu0  ;;  %12094 = vmatprep.subr.bf16.mxu1 %v12332_v23  ;;  %v8515_v38 = vpack.c.bf16 %v8496_v5, %v14723_v16 }
 0x2ea   : > { %v14769_v32 = vadd.f32 %v6448_v19, %v6110_v11  ;;  %v8494_v19 = vld [vmem:[#allocation3 + $0x141] sm:$0xff] }
 0x2eb   : > { %v11728_v7 = vpop.f32.mrf.mxu1  ;;  %12015 = vmatmul.mubr.bf16.gmra.mxu1 %v8138_v8  ;;  %v6464_v15 = vpop.f32.mrf.mxu0  ;;  %v8514_v11 = vpack.c.bf16 %v8494_v19, %v8493_v14  ;;  %v8127_v19 = vld [vmem:[#allocation3 + $0x168] sm:$0xff] }
 0x2ec   : > { %v14772_v40 = vadd.f32 %v11776_v34, %v11728_v7  ;;  %12018 = vmatprep.mubr.bf16.mxu1 %v8139_v50  ;;  %12095 = vmatpush3.bf16.msra.mxu1 %v12332_v23  ;;  %v8142_v34 = vpack.c.bf16 %v8120_v25, %v8119_v31  ;;  %v8121_v23 = vld [vmem:[#allocation3 + $0x120] sm:$0xff] }
 0x2ed   : > { %v6123_v55 = vpop.f32.mrf.mxu1  ;;  %v11780_v13 = vpop.f32.mrf.mxu0  ;;  %12096 = vmatprep.subr.bf16.mxu1 %v12333_v52  ;;  %v8124_v7 = vld [vmem:[#allocation3 + $0x140] sm:$0xff] }
 0x2ee   : > { %12067 = vmatmul.mubr.bf16.gmra.mxu0 %v8510_v43  ;;  %v14777_v57 = vadd.f32 %v6461_v51, %v6123_v55  ;;  %v8143_v51 = vpack.c.bf16 %v8122_v42, %v8121_v23  ;;  %v8126_v43 = vld [vmem:[#allocation3 + $0x158] sm:$0xff] }
 0x2ef   : > { %12070 = vmatprep.mubr.bf16.mxu0 %v14712_v12  ;;  %v11729_v1 = vpop.f32.mrf.mxu1  ;;  %v6477_v49 = vpop.f32.mrf.mxu0  ;;  %v8141_v12 = vpack.c.bf16 %v8118_v30, %v8117_v53  ;;  %v8501_v25 = vld [vmem:[#allocation3 + $0x199] sm:$0xff] }
 0x2f0   : > { %v14780_v33 = vadd.f32 %v11777_v56, %v11729_v1  ;;  %12097 = vmatpush3.bf16.msra.mxu1 %v12333_v52 }
 0x2f1   : > { %v6126_v41 = vpop.f32.mrf.mxu1  ;;  %v11781_v54 = vpop.f32.mrf.mxu0  ;;  %12098 = vmatprep.subr.bf16.mxu1 %v12334_v29 }
 0x2f2   : > { %v14785_v24 = vadd.f32 %v6464_v15, %v6126_v41 }
 0x2f3   : > { %v11732_v37 = vpop.f32.mrf.mxu1  ;;  %12019 = vmatmul.mubr.bf16.gmra.mxu1 %v8140_v61  ;;  %v6480_v44 = vpop.f32.mrf.mxu0  ;;  %v8497_v61 = vld [vmem:[#allocation3 + $0x169] sm:$0xff] }
 0x2f4   : > { %v14787_v27 = vadd.f32 %v11780_v13, %v11732_v37  ;;  %12022 = vmatprep.mubr.bf16.mxu1 %v8141_v12  ;;  %12099 = vmatpush3.bf16.msra.mxu1 %v12334_v29  ;;  %v8123_v29 = vld [vmem:[#allocation3 + $0x138] sm:$0xff]  ;;  %v8499_v12 = vld [vmem:[#allocation3 + $0x181] sm:$0xff] }
 0x2f5   : > { %v6139_v9 = vpop.f32.mrf.mxu1  ;;  %12100 = vmatprep.subr.bf16.mxu1 %v12335_v26  ;;  %v8144_v30 = vpack.c.bf16 %v8124_v7, %v8123_v29  ;;  %v8517_v37 = vpack.c.bf16 %v8500_v36, %v8499_v12 }
 0x2f6   : > { %v11784_v60 = vpop.f32.mrf.mxu0  ;;  %12071 = vmatmul.mubr.bf16.gmra.mxu0 %v8512_v18  ;;  %v14789_v45 = vadd.f32 %v6477_v49, %v6139_v9  ;;  %v8125_v49 = vld [vmem:[#allocation3 + $0x150] sm:$0xff] }
 0x2f7   : > { %12074 = vmatprep.mubr.bf16.mxu0 %v14718_v62  ;;  %v11733_v10 = vpop.f32.mrf.mxu1  ;;  %v8145_v41 = vpack.c.bf16 %v8126_v43, %v8125_v49  ;;  %v8842_v43 = vld [vmem:[#allocation3 + $0x3a] sm:$0xff] }
 0x2f8   : > { %v6493_v46 = vpop.f32.mrf.mxu0  ;;  %v14792_v2 = vadd.f32 %v11781_v54, %v11733_v10  ;;  %12101 = vmatpush3.bf16.msra.mxu1 %v12335_v26  ;;  %v8516_v26 = vpack.c.bf16 %v8498_v22, %v8497_v61  ;;  %v8502_v10 = vld [vmem:[#allocation3 + $0x1a1] sm:$0xff] }
 0x2f9   : > { %v6142_v4 = vpop.f32.mrf.mxu1 }
 0x2fa   : > { %v11785_v3 = vpop.f32.mrf.mxu0  ;;  %v14794_v63 = vadd.f32 %v6480_v44, %v6142_v4 }
 0x2fb   : > { %v11736_v6 = vpop.f32.mrf.mxu1  ;;  %12023 = vmatmul.mubr.bf16.gmra.mxu1 %v8142_v34 }
 0x2fc   : > { %v6496_v62 = vpop.f32.mrf.mxu0  ;;  %v14796_v8 = vadd.f32 %v11784_v60, %v11736_v6  ;;  %12026 = vmatprep.mubr.bf16.mxu1 %v8143_v51  ;;  %v8128_v60 = vld [vmem:[#allocation3 + $0x170] sm:$0xff] }
 0x2fd   : > { %v6155_v56 = vpop.f32.mrf.mxu1  ;;  %v8146_v34 = vpack.c.bf16 %v8128_v60, %v8127_v19 }
 0x2fe   : > { %v11788_v52 = vpop.f32.mrf.mxu0  ;;  %12075 = vmatmul.mubr.bf16.gmra.mxu0 %v8514_v11  ;;  %v14799_v50 = vadd.f32 %v6493_v46, %v6155_v56 }
 0x2ff   : > { %12078 = vmatprep.mubr.bf16.mxu0 %v8515_v38  ;;  %v11737_v15 = vpop.f32.mrf.mxu1 }
 0x300   : > { %v6509_v55 = vpop.f32.mrf.mxu0  ;;  %v14801_v13 = vadd.f32 %v11785_v3, %v11737_v15  ;;  %v8518_v3 = vpack.c.bf16 %v8502_v10, %v8501_v25  ;;  %v8841_v15 = vld [vmem:[#allocation3 + $0x32] sm:$0xff] }
 0x301   : > { %v6158_v1 = vpop.f32.mrf.mxu1  ;;  %v8873_v49 = vpack.c.bf16 %v8842_v43, %v8841_v15  ;;  %v8850_v15 = vld [vmem:[#allocation3 + $0x9a] sm:$0xff] }
 0x302   : > { %v11789_v48 = vpop.f32.mrf.mxu0  ;;  %v14803_v16 = vadd.f32 %v6496_v62, %v6158_v1 }
 0x303   : > { %v11740_v53 = vpop.f32.mrf.mxu1  ;;  %12027 = vmatmul.mubr.bf16.gmra.mxu1 %v8144_v30 }
 0x304   : > { %v6512_v54 = vpop.f32.mrf.mxu0  ;;  %v14805_v21 = vadd.f32 %v11788_v52, %v11740_v53  ;;  %12030 = vmatprep.mubr.bf16.mxu1 %v8145_v41  ;;  %v12336_v52 = vld [vmem:[#allocation3] sm:$0xff] }
 0x305   : > { %v6171_v44 = vpop.f32.mrf.mxu1  ;;  %v8148_v7 = vpack.c.bf16 %v12336_v52, %v12336_v52 }
 0x306   : > { %v11792_v18 = vpop.f32.mrf.mxu0  ;;  %12079 = vmatmul.mubr.bf16.gmra.mxu0 %v8516_v26  ;;  %v14807_v9 = vadd.f32 %v6509_v55, %v6171_v44  ;;  %v8844_v26 = vld [vmem:[#allocation3 + $0x52] sm:$0xff]  ;;  %v8846_v44 = vld [vmem:[#allocation3 + $0x6a] sm:$0xff] }
 0x307   : > { %12082 = vmatprep.mubr.bf16.mxu0 %v8517_v37  ;;  %v11741_v42 = vpop.f32.mrf.mxu1  ;;  %v8845_v37 = vld [vmem:[#allocation3 + $0x62] sm:$0xff] }
 0x308   : > { %v6525_v46 = vpop.f32.mrf.mxu0  ;;  %v14809_v31 = vadd.f32 %v11789_v48, %v11741_v42  ;;  %v8875_v19 = vpack.c.bf16 %v8846_v44, %v8845_v37 }
 0x309   : > { %v6174_v4 = vpop.f32.mrf.mxu1 }
 0x30a   : > { %v11793_v23 = vpop.f32.mrf.mxu0  ;;  %v14811_v5 = vadd.f32 %v6512_v54, %v6174_v4  ;;  %v8843_v54 = vld [vmem:[#allocation3 + $0x4a] sm:$0xff] }
 0x30b   : > { %v11744_v51 = vpop.f32.mrf.mxu1  ;;  %12031 = vmatmul.mubr.bf16.gmra.mxu1 %v8146_v34  ;;  %v8874_v10 = vpack.c.bf16 %v8844_v26, %v8843_v54 }
 0x30c   : > { %v6528_v14 = vpop.f32.mrf.mxu0  ;;  %v14813_v6 = vadd.f32 %v11792_v18, %v11744_v51  ;;  %12034 = vmatprep.mubr.bf16.mxu1 %v14624_v17 }
 0x30d   : > { %v6187_v62 = vpop.f32.mrf.mxu1 }
 0x30e   : > { %v11796_v11 = vpop.f32.mrf.mxu0  ;;  %12083 = vmatmul.mubr.bf16.gmra.mxu0 %v8518_v3  ;;  %v14816_v38 = vadd.f32 %v6525_v46, %v6187_v62 }
 0x30f   : > { %v11745_v56 = vpop.f32.mrf.mxu1 }
 0x310   : > { %v6541_v55 = vpop.f32.mrf.mxu0  ;;  %v14818_v29 = vadd.f32 %v11793_v23, %v11745_v56  ;;  %v8848_v56 = vld [vmem:[#allocation3 + $0x82] sm:$0xff] }
 0x311   : > { %v6190_v22 = vpop.f32.mrf.mxu1 }
 0x312   : > { %v11797_v1 = vpop.f32.mrf.mxu0  ;;  %v14820_v30 = vadd.f32 %v6528_v14, %v6190_v22 }
 0x313   : > { %v11748_v48 = vpop.f32.mrf.mxu1  ;;  %12035 = vmatmul.mubr.bf16.gmra.mxu1 %v8148_v7  ;;  %v8849_v7 = vld [vmem:[#allocation3 + $0x92] sm:$0xff] }
 0x314   : > { %v6544_v17 = vpop.f32.mrf.mxu0  ;;  %v14822_v36 = vadd.f32 %v11796_v11, %v11748_v48  ;;  %12102 = vmatprep.mubr.bf16.mxu1 %v8873_v49  ;;  %v8847_v11 = vld [vmem:[#allocation3 + $0x7a] sm:$0xff] }
 0x315   : > { %v6203_v41 = vpop.f32.mrf.mxu1  ;;  %v8876_v49 = vpack.c.bf16 %v8848_v56, %v8847_v11 }
 0x316   : > { %v11864_v61 = vpop.f32.mrf.mxu0  ;;  %v14824_v53 = vadd.f32 %v6541_v55, %v6203_v41  ;;  %v8877_v41 = vpack.c.bf16 %v8850_v15, %v8849_v7 }
 0x317   : > { %v11749_v12 = vpop.f32.mrf.mxu1 }
 0x318   : > { %v7169_v18 = vpop.f32.mrf.mxu0  ;;  %v14826_v60 = vadd.f32 %v11797_v1, %v11749_v12 }
 0x319   : > { %v6206_v25 = vpop.f32.mrf.mxu1 }
 0x31a   : > { %v11865_v42 = vpop.f32.mrf.mxu0  ;;  %v14828_v46 = vadd.f32 %v6544_v17, %v6206_v25  ;;  %v8852_v25 = vld [vmem:[#allocation3 + $0xb2] sm:$0xff] }
 0x31b   : > { %v11816_v4 = vpop.f32.mrf.mxu1  ;;  %12103 = vmatmul.mubr.bf16.vlgmr.msra.gmra.mxu1 %v8874_v10 }
 0x31c   : > { %v7172_v34 = vpop.f32.mrf.mxu0  ;;  %v6928_v23 = vadd.f32 %v11816_v4, %v14739_v0  ;;  %12106 = vmatprep.mubr.bf16.mxu1 %v8875_v19 }
 0x31d   : > { %v6799_v3 = vpop.f32.mrf.mxu1 }
 0x31e   : > { %v11868_v51 = vpop.f32.mrf.mxu0  ;;  %v14831_v14 = vadd.f32 %v11864_v61, %v6928_v23  ;;  %v6926_v62 = vadd.f32 %v6799_v3, %v14745_v20 }
 0x31f   : > { %v11817_v52 = vpop.f32.mrf.mxu1 }
 0x320   : > { %v7185_v43 = vpop.f32.mrf.mxu0  ;;  %v14834_v55 = vadd.f32 %v7169_v18, %v6926_v62  ;;  %v6929_v22 = vadd.f32 %v11817_v52, %v14748_v47  ;;  %v8851_v18 = vld [vmem:[#allocation3 + $0xaa] sm:$0xff] }
 0x321   : > { %v6802_v1 = vpop.f32.mrf.mxu1  ;;  %v8878_v3 = vpack.c.bf16 %v8852_v25, %v8851_v18 }
 0x322   : > { %v11869_v0 = vpop.f32.mrf.mxu0  ;;  %v14837_v48 = vadd.f32 %v11865_v42, %v6929_v22  ;;  %v6927_v17 = vadd.f32 %v6802_v1, %v14753_v58  ;;  %v8853_v42 = vld [vmem:[#allocation3 + $0xc2] sm:$0xff]  ;;  %v8854_v58 = vld [vmem:[#allocation3 + $0xca] sm:$0xff]  ;;  %v8855_v1 = vld [vmem:[#allocation3 + $0xda] sm:$0xff] }
 0x323   : > { %v11820_v61 = vpop.f32.mrf.mxu1  ;;  %12107 = vmatmul.mubr.bf16.gmra.mxu1 %v8876_v49  ;;  %v8879_v11 = vpack.c.bf16 %v8854_v58, %v8853_v42  ;;  %v8856_v49 = vld [vmem:[#allocation3 + $0xe2] sm:$0xff] }
 0x324   : > { %v7188_v20 = vpop.f32.mrf.mxu0  ;;  %v14840_v54 = vadd.f32 %v7172_v34, %v6927_v17  ;;  %v6932_v26 = vadd.f32 %v11820_v61, %v14755_v35  ;;  %12110 = vmatprep.mubr.bf16.mxu1 %v8877_v41  ;;  %v8857_v17 = vld [vmem:[#allocation3 + $0xf2] sm:$0xff] }
 0x325   : > { %v6815_v12 = vpop.f32.mrf.mxu1 }
 0x326   : > { %v11872_v37 = vpop.f32.mrf.mxu0  ;;  %v14843_v44 = vadd.f32 %v11868_v51, %v6932_v26  ;;  %v6930_v47 = vadd.f32 %v6815_v12, %v14761_v59  ;;  %v8880_v12 = vpack.c.bf16 %v8856_v49, %v8855_v1 }
 0x327   : > { %v11821_v10 = vpop.f32.mrf.mxu1 }
 0x328   : > { %v7201_v19 = vpop.f32.mrf.mxu0  ;;  %v14846_v4 = vadd.f32 %v7185_v43, %v6930_v47  ;;  %v6933_v34 = vadd.f32 %v11821_v10, %v14764_v39 }
 0x329   : > { %v6818_v23 = vpop.f32.mrf.mxu1 }
 0x32a   : > { %v11873_v35 = vpop.f32.mrf.mxu0  ;;  %v14849_v62 = vadd.f32 %v11869_v0, %v6933_v34  ;;  %v6931_v51 = vadd.f32 %v6818_v23, %v14769_v32  ;;  %v8858_v32 = vld [vmem:[#allocation3 + $0xfa] sm:$0xff]  ;;  %v8859_v23 = vld [vmem:[#allocation3 + $0x10a] sm:$0xff] }
 0x32b   : > { %v11824_v56 = vpop.f32.mrf.mxu1  ;;  %12111 = vmatmul.mubr.bf16.gmra.mxu1 %v8878_v3  ;;  %v8881_v18 = vpack.c.bf16 %v8858_v32, %v8857_v17  ;;  %v8860_v3 = vld [vmem:[#allocation3 + $0x112] sm:$0xff] }
 0x32c   : > { %v7204_v59 = vpop.f32.mrf.mxu0  ;;  %v14852_v52 = vadd.f32 %v7188_v20, %v6931_v51  ;;  %v6936_v7 = vadd.f32 %v11824_v56, %v14772_v40  ;;  %12114 = vmatprep.mubr.bf16.mxu1 %v8879_v11  ;;  %v8861_v51 = vld [vmem:[#allocation3 + $0x122] sm:$0xff] }
 0x32d   : > { %v6831_v15 = vpop.f32.mrf.mxu1 }
 0x32e   : > { %v11876_v43 = vpop.f32.mrf.mxu0  ;;  %v14855_v22 = vadd.f32 %v11872_v37, %v6936_v7  ;;  %v6934_v39 = vadd.f32 %v6831_v15, %v14777_v57  ;;  %v8882_v15 = vpack.c.bf16 %v8860_v3, %v8859_v23 }
 0x32f   : > { %v11825_v0 = vpop.f32.mrf.mxu1 }
 0x330   : > { %v7217_v41 = vpop.f32.mrf.mxu0  ;;  %v14858_v61 = vadd.f32 %v7201_v19, %v6934_v39  ;;  %v6937_v20 = vadd.f32 %v11825_v0, %v14780_v33 }
 0x331   : > { %v6834_v26 = vpop.f32.mrf.mxu1 }
 0x332   : > { %v11877_v40 = vpop.f32.mrf.mxu0  ;;  %v14861_v47 = vadd.f32 %v11873_v35, %v6937_v20  ;;  %v6935_v37 = vadd.f32 %v6834_v26, %v14785_v24  ;;  %v8862_v24 = vld [vmem:[#allocation3 + $0x12a] sm:$0xff]  ;;  %v8863_v26 = vld [vmem:[#allocation3 + $0x13a] sm:$0xff] }
 0x333   : > { %v11828_v25 = vpop.f32.mrf.mxu1  ;;  %12115 = vmatmul.mubr.bf16.gmra.mxu1 %v8880_v12  ;;  %v8883_v1 = vpack.c.bf16 %v8862_v24, %v8861_v51  ;;  %v8864_v12 = vld [vmem:[#allocation3 + $0x142] sm:$0xff] }
 0x334   : > { %v7220_v57 = vpop.f32.mrf.mxu0  ;;  %v14864_v10 = vadd.f32 %v7204_v59, %v6935_v37  ;;  %v6940_v42 = vadd.f32 %v11828_v25, %v14787_v27  ;;  %12118 = vmatprep.mubr.bf16.mxu1 %v8881_v18  ;;  %v8865_v37 = vld [vmem:[#allocation3 + $0x152] sm:$0xff] }
 0x335   : > { %v6847_v58 = vpop.f32.mrf.mxu1 }
 0x336   : > { %v11880_v19 = vpop.f32.mrf.mxu0  ;;  %v14867_v34 = vadd.f32 %v11876_v43, %v6940_v42  ;;  %v6938_v33 = vadd.f32 %v6847_v58, %v14789_v45  ;;  %v8884_v58 = vpack.c.bf16 %v8864_v12, %v8863_v26  ;;  %v8871_v12 = vld [vmem:[#allocation3 + $0x19a] sm:$0xff] }
 0x337   : > { %v11829_v35 = vpop.f32.mrf.mxu1 }
 0x338   : > { %v7233_v11 = vpop.f32.mrf.mxu0  ;;  %v14870_v56 = vadd.f32 %v7217_v41, %v6938_v33  ;;  %v6941_v59 = vadd.f32 %v11829_v35, %v14792_v2 }
 0x339   : > { %v6850_v7 = vpop.f32.mrf.mxu1 }
 0x33a   : > { %v11881_v27 = vpop.f32.mrf.mxu0  ;;  %v14873_v39 = vadd.f32 %v11877_v40, %v6941_v59  ;;  %v6939_v43 = vadd.f32 %v6850_v7, %v14794_v63  ;;  %v8866_v63 = vld [vmem:[#allocation3 + $0x15a] sm:$0xff]  ;;  %v8867_v7 = vld [vmem:[#allocation3 + $0x16a] sm:$0xff] }
 0x33b   : > { %v11832_v49 = vpop.f32.mrf.mxu1  ;;  %12119 = vmatmul.mubr.bf16.gmra.mxu1 %v8882_v15  ;;  %v8885_v23 = vpack.c.bf16 %v8866_v63, %v8865_v37  ;;  %v8868_v15 = vld [vmem:[#allocation3 + $0x172] sm:$0xff] }
 0x33c   : > { %v7236_v45 = vpop.f32.mrf.mxu0  ;;  %v14876_v0 = vadd.f32 %v7220_v57, %v6939_v43  ;;  %v6944_v17 = vadd.f32 %v11832_v49, %v14796_v8  ;;  %12122 = vmatprep.mubr.bf16.mxu1 %v8883_v1 }
 0x33d   : > { %v6863_v32 = vpop.f32.mrf.mxu1 }
 0x33e   : > { %v11884_v41 = vpop.f32.mrf.mxu0  ;;  %v14879_v20 = vadd.f32 %v11880_v19, %v6944_v17  ;;  %v6942_v2 = vadd.f32 %v6863_v32, %v14799_v50 }
 0x33f   : > { %v11833_v40 = vpop.f32.mrf.mxu1 }
 0x340   : > { %v7249_v18 = vpop.f32.mrf.mxu0  ;;  %v14882_v25 = vadd.f32 %v7233_v11, %v6942_v2  ;;  %v6945_v57 = vadd.f32 %v11833_v40, %v14801_v13  ;;  %v8872_v40 = vld [vmem:[#allocation3 + $0x1a2] sm:$0xff] }
 0x341   : > { %v6866_v42 = vpop.f32.mrf.mxu1 }
 0x342   : > { %v11885_v8 = vpop.f32.mrf.mxu0  ;;  %v14885_v33 = vadd.f32 %v11881_v27, %v6945_v57  ;;  %v6943_v19 = vadd.f32 %v6866_v42, %v14803_v16  ;;  %v8888_v42 = vpack.c.bf16 %v8872_v40, %v8871_v12 }
 0x343   : > { %v11836_v3 = vpop.f32.mrf.mxu1  ;;  %12123 = vmatmul.mubr.bf16.gmra.mxu1 %v8884_v58 }
 0x344   : > { %v7252_v50 = vpop.f32.mrf.mxu0  ;;  %v14888_v35 = vadd.f32 %v7236_v45, %v6943_v19  ;;  %v6948_v51 = vadd.f32 %v11836_v3, %v14805_v21  ;;  %12126 = vmatprep.mubr.bf16.mxu1 %v8885_v23  ;;  %v8886_v45 = vpack.c.bf16 %v8868_v15, %v8867_v7 }
 0x345   : > { %v6879_v24 = vpop.f32.mrf.mxu1 }
 0x346   : > { %v11888_v11 = vpop.f32.mrf.mxu0  ;;  %v14891_v59 = vadd.f32 %v11884_v41, %v6948_v51  ;;  %v6946_v13 = vadd.f32 %v6879_v24, %v14807_v9 }
 0x347   : > { %v11837_v27 = vpop.f32.mrf.mxu1 }
 0x348   : > { %v7265_v43 = vpop.f32.mrf.mxu0  ;;  %v14894_v16 = vadd.f32 %v7249_v18, %v6946_v13  ;;  %v6949_v1 = vadd.f32 %v11837_v27, %v14809_v31 }
 0x349   : > { %v6882_v49 = vpop.f32.mrf.mxu1 }
 0x34a   : > { %v11889_v17 = vpop.f32.mrf.mxu0  ;;  %v14897_v32 = vadd.f32 %v11885_v8, %v6949_v1  ;;  %v6947_v21 = vadd.f32 %v6882_v49, %v14811_v5 }
 0x34b   : > { %v11840_v2 = vpop.f32.mrf.mxu1  ;;  %12127 = vmatmul.mubr.bf16.gmra.mxu1 %v8886_v45 }
 0x34c   : > { %v7268_v41 = vpop.f32.mrf.mxu0  ;;  %v14900_v26 = vadd.f32 %v7252_v50, %v6947_v21  ;;  %v6952_v9 = vadd.f32 %v11840_v2, %v14813_v6  ;;  %12130 = vmatprep.mubr.bf16.mxu1 %v14728_v28 }
 0x34d   : > { %v6895_v37 = vpop.f32.mrf.mxu1 }
 0x34e   : > { %v11892_v31 = vpop.f32.mrf.mxu0  ;;  %v14904_v63 = vadd.f32 %v11888_v11, %v6952_v9  ;;  %v6950_v18 = vadd.f32 %v6895_v37, %v14816_v38 }
 0x34f   : > { %v11841_v57 = vpop.f32.mrf.mxu1 }
 0x350   : > { %v7281_v5 = vpop.f32.mrf.mxu0  ;;  %v14907_v58 = vadd.f32 %v7265_v43, %v6950_v18  ;;  %v6953_v8 = vadd.f32 %v11841_v57, %v14818_v29 }
 0x351   : > { %v6898_v19 = vpop.f32.mrf.mxu1 }
 0x352   : > { %v11893_v23 = vpop.f32.mrf.mxu0  ;;  %v14910_v6 = vadd.f32 %v11889_v17, %v6953_v8  ;;  %v6951_v28 = vadd.f32 %v6898_v19, %v14820_v30 }
 0x353   : > { %v11844_v3 = vpop.f32.mrf.mxu1  ;;  %12131 = vmatmul.mubr.bf16.gmra.mxu1 %v8888_v42 }
 0x354   : > { %v7284_v50 = vpop.f32.mrf.mxu0  ;;  %v14913_v51 = vadd.f32 %v7268_v41, %v6951_v28  ;;  %v6956_v38 = vadd.f32 %v11844_v3, %v14822_v36 }
 0x355   : > { %v6911_v24 = vpop.f32.mrf.mxu1 }
 0x356   : > { %v14916_v11 = vpop.f32.mrf.mxu0  ;;  %v14918_v13 = vadd.f32 %v11892_v31, %v6956_v38  ;;  %v6954_v29 = vadd.f32 %v6911_v24, %v14824_v53 }
 0x357   : > { %v11845_v7 = vpop.f32.mrf.mxu1 }
 0x358   : > { %v14921_v15 = vpop.f32.mrf.mxu0  ;;  %v14923_v27 = vadd.f32 %v7281_v5, %v6954_v29  ;;  %v6957_v30 = vadd.f32 %v11845_v7, %v14826_v60 }
 0x359   : > { %v6914_v43 = vpop.f32.mrf.mxu1 }
 0x35a   : > { %v14926_v1 = vpop.f32.mrf.mxu0  ;;  %v14928_v49 = vadd.f32 %v11893_v23, %v6957_v30  ;;  %v6955_v36 = vadd.f32 %v6914_v43, %v14828_v46 }
 0x35b   : > { %v11912_v45 = vpop.f32.mrf.mxu1 }
 0x35c   : > { %v14931_v17 = vpop.f32.mrf.mxu0  ;;  %v14933_v21 = vadd.f32 %v7284_v50, %v6955_v36  ;;  %v14936_v53 = vadd.f32 %v11912_v45, %v14831_v14 }
 0x35d   : > { %v7539_v2 = vpop.f32.mrf.mxu1 }
 0x35e   : > { %v14938_v41 = vpop.f32.mrf.mxu0  ;;  %v14941_v60 = vadd.f32 %v7539_v2, %v14834_v55 }
 0x35f   : > { %v11913_v9 = vpop.f32.mrf.mxu1 }
 0x360   : > { %v14943_v12 = vpop.f32.mrf.mxu0  ;;  %v14946_v40 = vadd.f32 %v11913_v9, %v14837_v48 }
 0x361   : > { %v7542_v46 = vpop.f32.mrf.mxu1 }
 0x362   : > { %v14948_v37 = vpop.f32.mrf.mxu0  ;;  %v14951_v31 = vadd.f32 %v7542_v46, %v14840_v54 }
 0x363   : > { %v11916_v14 = vpop.f32.mrf.mxu1 }
 0x364   : > { %v14953_v18 = vpop.f32.mrf.mxu0  ;;  %v14956_v57 = vadd.f32 %v11916_v14, %v14843_v44 }
 0x365   : > { %v7555_v55 = vpop.f32.mrf.mxu1 }
 0x366   : > { %v14958_v42 = vpop.f32.mrf.mxu0  ;;  %v14961_v5 = vadd.f32 %v7555_v55, %v14846_v4 }
 0x367   : > { %v11917_v48 = vpop.f32.mrf.mxu1 }
 0x368   : > { %v14963_v8 = vpop.f32.mrf.mxu0  ;;  %v14966_v19 = vadd.f32 %v11917_v48, %v14849_v62 }
 0x369   : > { %v7558_v54 = vpop.f32.mrf.mxu1 }
 0x36a   : > { %v14968_v23 = vpop.f32.mrf.mxu0  ;;  %v14971_v28 = vadd.f32 %v7558_v54, %v14852_v52 }
 0x36b   : > { %v11920_v44 = vpop.f32.mrf.mxu1 }
 0x36c   : > { %v14973_v3 = vpop.f32.mrf.mxu0  ;;  %v14976_v50 = vadd.f32 %v11920_v44, %v14855_v22 }
 0x36d   : > { %v7571_v4 = vpop.f32.mrf.mxu1 }
 0x36e   : > { %v14978_v38 = vpop.f32.mrf.mxu0  ;;  %v14981_v24 = vadd.f32 %v7571_v4, %v14858_v61 }
 0x36f   : > { %v11921_v62 = vpop.f32.mrf.mxu1 }
 0x370   : > { %v14983_v29 = vpop.f32.mrf.mxu0  ;;  %v14986_v7 = vadd.f32 %v11921_v62, %v14861_v47 }
 0x371   : > { %v7574_v52 = vpop.f32.mrf.mxu1 }
 0x372   : > { %v14988_v30 = vpop.f32.mrf.mxu0  ;;  %v14991_v43 = vadd.f32 %v7574_v52, %v14864_v10 }
 0x373   : > { %v11924_v22 = vpop.f32.mrf.mxu1 }
 0x374   : > { %v14993_v36 = vpop.f32.mrf.mxu0  ;;  %v14996_v45 = vadd.f32 %v11924_v22, %v14867_v34 }
 0x375   : > { %v7587_v61 = vpop.f32.mrf.mxu1 }
 0x376   : > { %v14998_v2 = vpop.f32.mrf.mxu0  ;;  %v15001_v9 = vadd.f32 %v7587_v61, %v14870_v56 }
 0x377   : > { %v11925_v47 = vpop.f32.mrf.mxu1 }
 0x378   : > { %v15003_v46 = vpop.f32.mrf.mxu0  ;;  %v15006_v14 = vadd.f32 %v11925_v47, %v14873_v39 }
 0x379   : > { %v7590_v10 = vpop.f32.mrf.mxu1 }
 0x37a   : > { %v15008_v55 = vpop.f32.mrf.mxu0  ;;  %v15011_v48 = vadd.f32 %v7590_v10, %v14876_v0 }
 0x37b   : > { %v11928_v34 = vpop.f32.mrf.mxu1 }
 0x37c   : > { %v15013_v54 = vpop.f32.mrf.mxu0  ;;  %v15016_v44 = vadd.f32 %v11928_v34, %v14879_v20 }
 0x37d   : > { %15957 = vst [vmem:[#allocation24_spill] sm:$0xff] %v15013_v54  ;;  %v7603_v56 = vpop.f32.mrf.mxu1  ;;  %v10793_v54 = vld [vmem:[%s12424_s22 + $0x24] sm:$0xf] }
 0x37e   : > { %v15018_v4 = vpop.f32.mrf.mxu0  ;;  %v15021_v62 = vadd.f32 %v7603_v56, %v14882_v25 }
 0x37f   : > { %15958 = vst [vmem:[#allocation5_spill] sm:$0xff] %v15018_v4  ;;  %v11929_v39 = vpop.f32.mrf.mxu1 }
 0x380   : > { %v15023_v52 = vpop.f32.mrf.mxu0  ;;  %v15026_v22 = vadd.f32 %v11929_v39, %v14885_v33 }
 0x381   : > { %15959 = vst [vmem:[#allocation6_spill] sm:$0xff] %v15023_v52  ;;  %v7606_v0 = vpop.f32.mrf.mxu1 }
 0x382   : > { %v15028_v61 = vpop.f32.mrf.mxu0  ;;  %v15031_v47 = vadd.f32 %v7606_v0, %v14888_v35 }
 0x383   : > { %15960 = vst [vmem:[#allocation7_spill] sm:$0xff] %v15028_v61  ;;  %v11932_v20 = vpop.f32.mrf.mxu1 }
 0x384   : > { %15961 = vst [vmem:[#allocation8_spill] sm:$0xff] %v15031_v47  ;;  %v15033_v10 = vpop.f32.mrf.mxu0  ;;  %v15036_v34 = vadd.f32 %v11932_v20, %v14891_v59 }
 0x385   : > { %15962 = vst [vmem:[#allocation9_spill] sm:$0xff] %v15033_v10  ;;  %v7619_v25 = vpop.f32.mrf.mxu1 }
 0x386   : > { %15963 = vst [vmem:[#allocation12_spill] sm:$0xff] %v15036_v34  ;;  %v15038_v56 = vpop.f32.mrf.mxu0  ;;  %v15041_v52 = vadd.f32 %v7619_v25, %v14894_v16  ;;  %v10789_v34 = vld [vmem:[%s12424_s22 + $0x14] sm:$0x1] }
 0x387   : > { %15964 = vst [vmem:[#allocation14_spill] sm:$0xff] %v15038_v56  ;;  %v11933_v33 = vpop.f32.mrf.mxu1 }
 0x388   : > { %15965 = vst [vmem:[#allocation17_spill] sm:$0xff] %v15041_v52  ;;  %v15043_v39 = vpop.f32.mrf.mxu0  ;;  %v15046_v35 = vadd.f32 %v11933_v33, %v14897_v32 }
 0x389   : > { %15966 = vst [vmem:[#allocation27_spill] sm:$0xff] %v15043_v39  ;;  %v7622_v0 = vpop.f32.mrf.mxu1 }
 0x38a   : > { %15967 = vst [vmem:[#allocation29_spill] sm:$0xff] %v15046_v35  ;;  %v15048_v10 = vpop.f32.mrf.mxu0  ;;  %v15051_v59 = vadd.f32 %v7622_v0, %v14900_v26  ;;  %v10790_v26 = vld [vmem:[%s12424_s22 + $0x18] sm:$0xf]  ;;  %v10791_v0 = vld [vmem:[%s12424_s22 + $0x1c] sm:$0xf] }
 0x38b   : > { %15968 = vst [vmem:[#allocation26_spill] sm:$0xff] %v15048_v10  ;;  %v11936_v20 = vpop.f32.mrf.mxu1 }
 0x38c   : > { %15969 = vst [vmem:[#allocation30_spill] sm:$0xff] %v15051_v59  ;;  %v15053_v56 = vpop.f32.mrf.mxu0  ;;  %v15056_v16 = vadd.f32 %v11936_v20, %v14904_v63 }
 0x38d   : > { %15970 = vst [vmem:[#allocation28_spill] sm:$0xff] %v15053_v56  ;;  %v7635_v25 = vpop.f32.mrf.mxu1  ;;  %v10787_v56 = vld [vmem:[%s12424_s22 + $0xc] sm:$0xf] }
 0x38e   : > { %15971 = vst [vmem:[#allocation73_spill] sm:$0xff] %v15056_v16  ;;  %v15058_v61 = vpop.f32.mrf.mxu0  ;;  %v15061_v39 = vadd.f32 %v7635_v25, %v14907_v58  ;;  %v9355_v16 = vshrl.u32 %v10790_v26, 16  ;;  %v9358_v58 = vshll.u32 %v10790_v26, 16  ;;  %v9364_v25 = vshll.u32 %v10791_v0, 16 }
 0x38f   : > { %15972 = vst [vmem:[#allocation10_spill] sm:$0xff] %v15058_v61  ;;  %v11937_v32 = vpop.f32.mrf.mxu1 }
 0x390   : > { %15973 = vst [vmem:[#allocation18_spill] sm:$0xff] %v15061_v39  ;;  %v15063_v33 = vpop.f32.mrf.mxu0  ;;  %v15066_v10 = vadd.f32 %v11937_v32, %v14910_v6  ;;  %v9331_v6 = vshrl.u32 %v10787_v56, 16  ;;  %v9334_v32 = vshll.u32 %v10787_v56, 16  ;;  %v15085_v4 = vrot.slane %v9364_v25, 5 }
 0x391   : > { %15974 = vst [vmem:[#allocation19_spill] sm:$0xff] %v15063_v33  ;;  %v7638_v59 = vpop.f32.mrf.mxu1  ;;  %v9368_v33 = vshrl.u32 %v10791_v0, 16 }
 0x392   : > { %15975 = vst [vmem:[#allocation23_spill] sm:$0xff] %v15066_v10  ;;  %v15072_v63 = vadd.f32 %v7638_v59, %v14913_v51  ;;  %v15074_v20 = vpop.f32.mrf.mxu0  ;;  %v10788_v51 = vld [vmem:[%s12424_s22 + $0x10] sm:$0xf]  ;;  %v9336_v26 = vrot.slane %v9334_v32, 5 }
 0x393   : > { %15977 = vst [vmem:[#allocation76_spill] sm:$0xff] %v15074_v20  ;;  %v11940_v61 = vpop.f32.mrf.mxu1  ;;  %v9357_v20 = vrot.slane %v9355_v16, 4  ;;  %v9370_v56 = vrot.slane %v9368_v33, 4  ;;  %v10796_v33 = vld [vmem:[%s12424_s22 + $0x30] sm:$0xf] }
 0x394   : > { %15976 = vst [vmem:[#allocation64_spill] sm:$0xff] %v15072_v63  ;;  %v15077_v39 = vadd.f32 %v11940_v61, %v14918_v13  ;;  %v15082_v52 = vpop.f32.mrf.mxu0  ;;  %v9360_v63 = vrot.slane %v9358_v58, 5  ;;  %v9333_v61 = vrot.slane %v9331_v6, 4 }
 0x395   : > { %v7651_v10 = vpop.f32.mrf.mxu1  ;;  %15980 = vst [vmem:[#allocation79_spill] sm:$0xff] %v15082_v52  ;;  %v9371_v6 = vor.u32 %v9370_v56, %v15085_v4 }
 0x396   : > { %15978 = vst [vmem:[#allocation20_spill] sm:$0xff] %v15077_v39  ;;  %v15080_v35 = vadd.f32 %v7651_v10, %v14923_v27  ;;  %v9340_v39 = vshll.u32 %v10788_v51, 16  ;;  %v9344_v27 = vshrl.u32 %v10788_v51, 16  ;;  %v10792_v10 = vld [vmem:[%s12424_s22 + $0x20] sm:$0x1]  ;;  %v15094_v16 = vpop.f32.mrf.mxu0  ;;  %v9361_v25 = vor.u32 %v9360_v63, %v9357_v20 }
 0x397   : > { %v11941_v59 = vpop.f32.mrf.mxu1  ;;  %15983 = vst [vmem:[#allocation66_spill] sm:$0xff] %v15094_v16  ;;  %v9374_v32 = vshll.u32 %v10792_v10, 16  ;;  %v9403_v16 = vshrl.u32 %v10796_v33, 16  ;;  %v9372_v20 = vrot.slane %v9371_v6, 4  ;;  %v9350_v10 = vshll.u32 %v10789_v34, 16 }
 0x398   : > { %15979 = vst [vmem:[#allocation22_spill] sm:$0xff] %v15080_v35  ;;  %v15088_v13 = vadd.f32 %v11941_v59, %v14928_v49  ;;  %v9337_v49 = vor.u32 %v9336_v26, %v9333_v61  ;;  %v9346_v35 = vrot.slane %v9344_v27, 4  ;;  %v15102_v51 = vpop.f32.mrf.mxu0  ;;  %v9382_v27 = vshll.u32 %v10793_v54, 16  ;;  %v10794_v34 = vld [vmem:[%s12424_s22 + $0x28] sm:$0xf] }
 0x399   : > { %v7654_v0 = vpop.f32.mrf.mxu1  ;;  %15986 = vst [vmem:[#allocation31_spill] sm:$0xff] %v15102_v51  ;;  %v9376_v61 = vrot.slane %v9374_v32, 5  ;;  %v9405_v6 = vrot.slane %v9403_v16, 4  ;;  %v9352_v16 = vrot.slane %v9350_v10, 5 }
 0x39a   : > { %15981 = vst [vmem:[#allocation65_spill] sm:$0xff] %v15088_v13  ;;  %v15092_v52 = vadd.f32 %v7654_v0, %v14933_v21  ;;  %v9342_v13 = vrot.slane %v9340_v39, 5  ;;  %v10797_v0 = vld [vmem:[%s12424_s22 + $0x34] sm:$0xf]  ;;  %v9338_v63 = vrot.slane %v9337_v49, 4  ;;  %v9379_v39 = vshrl.u32 %v10793_v54, 16  ;;  %v15111_v51 = vpop.f32.mrf.mxu0 }
 0x39b   : > { %v15096_v58 = vpop.f32.mrf.mxu1  ;;  %15988 = vst [vmem:[#allocation67_spill] sm:$0xff] %v15111_v51  ;;  %v9416_v47 = vshrl.u32 %v10797_v0, 16  ;;  %v15126_v54 = vadd.f32 %v14926_v1, %v14946_v40  ;;  %v9384_v51 = vrot.slane %v9382_v27, 5 }
 0x39c   : > { %15982 = vst [vmem:[#allocation25_spill] sm:$0xff] %v15092_v52  ;;  %15984 = vst [vmem:[#allocation82_spill] sm:$0xff] %v15096_v58  ;;  %v9406_v52 = vshll.u32 %v10796_v33, 16  ;;  %v9362_v58 = vrot.slane %v9361_v25, 4  ;;  %v9347_v56 = vor.u32 %v9346_v35, %v9342_v13  ;;  %v15119_v25 = vadd.f32 %v14921_v15, %v14941_v60  ;;  %v15138_v1 = vpop.f32.mrf.mxu0 }
 0x39d   : > { %v15100_v59 = vpop.f32.mrf.mxu1  ;;  %v9377_v15 = vsel %vm12447_vm2, %v9372_v20, %v9376_v61  ;;  %v10798_v61 = vld [vmem:[%s12424_s22 + $0x38] sm:$0x1] }
 0x39e   : > { %15985 = vst [vmem:[#allocation11_spill] sm:$0xff] %v15100_v59  ;;  %v9412_v59 = vshll.u32 %v10797_v0, 16  ;;  %v9408_v35 = vrot.slane %v9406_v52, 5  ;;  %v9367_v33 = vsel %vm12447_vm2, %v9362_v58, %v15085_v4  ;;  %v9348_v52 = vrot.slane %v9347_v56, 4 }
 0x39f   : > { %v15106_v21 = vpop.f32.mrf.mxu1  ;;  %v9381_v0 = vrot.slane %v9379_v39, 4  ;;  %v9392_v4 = vshrl.u32 %v10794_v34, 16  ;;  %v9418_v58 = vrot.slane %v9416_v47, 4  ;;  %v15151_v39 = vadd.f32 %v14938_v41, %v14956_v57 }
 0x3a0   : > { %15987 = vst [vmem:[#allocation32_spill] sm:$0xff] %v15106_v21  ;;  %v15115_v21 = vadd.f32 %v14916_v11, %v14936_v53  ;;  %v9343_v11 = vsel %vm12447_vm2, %v9338_v63, %v9342_v13  ;;  %v10802_v53 = vld [vmem:[%s12424_s22 + $0x48] sm:$0xf]  ;;  %v15140_v40 = vrot.slane %v9412_v59, 5  ;;  %v15144_v13 = vadd.f32 %v14931_v17, %v14951_v31 }
 0x3a1   : > { %v15109_v26 = vpop.f32.mrf.mxu1  ;;  %v9409_v20 = vor.u32 %v9408_v35, %v9405_v6  ;;  %v9451_v56 = vshrl.u32 %v10802_v53, 16  ;;  %v9454_v10 = vshll.u32 %v10802_v53, 16  ;;  %v15155_v47 = vadd.f32 %v14943_v12, %v14961_v5  ;;  %v10803_v35 = vld [vmem:[%s12424_s22 + $0x4c] sm:$0xf]  ;;  %v10799_v12 = vld [vmem:[%s12424_s22 + $0x3c] sm:$0xf]  ;;  %v15173_v5 = vpop.f32.mrf.mxu0 }
 0x3a2   : > { %v15157_v59 = vunpack.c.l.bf16 %v9367_v33  ;;  %v15159_v17 = vunpack.c.l.bf16 %v9343_v11  ;;  %v15163_v31 = vadd.f32 %v14948_v37, %v14966_v19  ;;  %v15167_v6 = vunpack.c.l.bf16 %v9377_v15  ;;  %v10800_v37 = vld [vmem:[%s12424_s22 + $0x40] sm:$0xf] }
 0x3a3   : > { %v15121_v49 = vpop.f32.mrf.mxu1  ;;  %v9353_v41 = vsel %vm12447_vm2, %v9348_v52, %v9352_v16  ;;  %v9385_v57 = vor.u32 %v9384_v51, %v9381_v0  ;;  %v9419_v33 = vor.u32 %v9418_v58, %v15140_v40  ;;  %v9422_v11 = vshll.u32 %v10798_v61, 16 }
 0x3a4   : > { %15989 = vst [vmem:[#allocation45_spill] sm:$0xff] %v15121_v49  ;;  %v9388_v49 = vshll.u32 %v10794_v34, 16  ;;  %15992 = vst [vmem:[#allocation33_spill] sm:$0xff] %v15157_v59  ;;  %v9394_v53 = vrot.slane %v9392_v4, 4  ;;  %v15179_v19 = vadd.f32 %v14953_v18, %v14971_v28  ;;  %v9453_v52 = vrot.slane %v9451_v56, 4  ;;  %v15188_v18 = vpop.f32.mrf.mxu0 }
 0x3a5   : > { %v15136_v60 = vpop.f32.mrf.mxu1  ;;  %15993 = vst [vmem:[#allocation34_spill] sm:$0xff] %v15159_v17  ;;  %15995 = vst [vmem:[#allocation68_spill] sm:$0xff] %v15167_v6  ;;  %v9410_v6 = vrot.slane %v9409_v20, 4  ;;  %v10795_v17 = vld [vmem:[%s12424_s22 + $0x2c] sm:$0x1]  ;;  %v9456_v51 = vrot.slane %v9454_v10, 5  ;;  %v15186_v58 = vunpack.c.l.bf16 %v9353_v41  ;;  %v15192_v10 = vadd.f32 %v14958_v42, %v14976_v50 }
 0x3a6   : > { %v9390_v34 = vrot.slane %v9388_v49, 5  ;;  %v9460_v16 = vshll.u32 %v10803_v35, 16  ;;  %v9464_v0 = vshrl.u32 %v10803_v35, 16  ;;  %v9427_v59 = vshrl.u32 %v10799_v12, 16  ;;  %v10808_v42 = vld [vmem:[%s12424_s22 + $0x60] sm:$0xf] }
 0x3a7   : > { %v15146_v63 = vpop.f32.mrf.mxu1  ;;  %v9386_v4 = vrot.slane %v9385_v57, 4  ;;  %v9436_v61 = vshll.u32 %v10800_v37, 16  ;;  %v9420_v28 = vrot.slane %v9419_v33, 4  ;;  %v9424_v20 = vrot.slane %v9422_v11, 5 }
 0x3a8   : > { %15991 = vst [vmem:[#allocation85_spill] sm:$0xff] %v15146_v63  ;;  %v9440_v63 = vshrl.u32 %v10800_v37, 16  ;;  %v9398_v56 = vshll.u32 %v10795_v17, 16  ;;  %v15196_v35 = vadd.f32 %v14963_v8, %v14981_v24  ;;  %v9415_v57 = vsel %vm12447_vm2, %v9410_v6, %v15140_v40  ;;  %v10804_v37 = vld [vmem:[%s12424_s22 + $0x50] sm:$0x1]  ;;  %v15215_v6 = vpop.f32.mrf.mxu0 }
 0x3a9   : > { %v15165_v27 = vpop.f32.mrf.mxu1  ;;  %v9462_v33 = vrot.slane %v9460_v16, 5  ;;  %v9429_v17 = vrot.slane %v9427_v59, 4  ;;  %v15207_v50 = vadd.f32 %v14968_v23, %v14986_v7  ;;  %v9391_v24 = vsel %vm12447_vm2, %v9386_v4, %v9390_v34  ;;  %v10801_v23 = vld [vmem:[%s12424_s22 + $0x44] sm:$0x1]  ;;  %v10805_v7 = vld [vmem:[%s12424_s22 + $0x54] sm:$0xf] }
 0x3aa   : > { %15994 = vst [vmem:[#allocation37_spill] sm:$0xff] %v15165_v27  ;;  %v9430_v27 = vshll.u32 %v10799_v12, 16  ;;  %v9457_v12 = vor.u32 %v9456_v51, %v9453_v52  ;;  %v9442_v40 = vrot.slane %v9440_v63, 4  ;;  %v15217_v52 = vunpack.c.l.bf16 %v9415_v57 }
 0x3ab   : > { %v15181_v15 = vpop.f32.mrf.mxu1  ;;  %15998 = vst [vmem:[#allocation36_spill] sm:$0xff] %v15207_v50  ;;  %v9425_v59 = vsel %vm12447_vm2, %v9420_v28, %v9424_v20  ;;  %v9400_v51 = vrot.slane %v9398_v56, 5  ;;  %v9502_v4 = vshll.u32 %v10808_v42, 16  ;;  %v15227_v63 = vadd.f32 %v14973_v3, %v14991_v43  ;;  %v10809_v56 = vld [vmem:[%s12424_s22 + $0x64] sm:$0xf]  ;;  %v15243_v43 = vpop.f32.mrf.mxu0 }
 0x3ac   : > { %15996 = vst [vmem:[#allocation87_spill] sm:$0xff] %v15181_v15  ;;  %v9395_v15 = vor.u32 %v9394_v53, %v9390_v34  ;;  %v9432_v11 = vrot.slane %v9430_v27, 5  ;;  %v9466_v53 = vrot.slane %v9464_v0, 4  ;;  %v9458_v0 = vrot.slane %v9457_v12, 4 }
 0x3ad   : > { %v15184_v49 = vpop.f32.mrf.mxu1  ;;  %v9499_v34 = vshrl.u32 %v10808_v42, 16  ;;  %v9446_v20 = vshll.u32 %v10801_v23, 16  ;;  %v9478_v12 = vshll.u32 %v10805_v7, 16  ;;  %v15241_v3 = vadd.f32 %v14983_v29, %v15001_v9 }
 0x3ae   : > { %v9396_v27 = vrot.slane %v9395_v15, 4  ;;  %v9433_v57 = vor.u32 %v9432_v11, %v9429_v17  ;;  %v9467_v50 = vor.u32 %v9466_v53, %v9462_v33  ;;  %v15245_v17 = vunpack.c.l.bf16 %v9425_v59 }
 0x3af   : > { %v15198_v41 = vpop.f32.mrf.mxu1  ;;  %16003 = vst [vmem:[#allocation13_spill] sm:$0xff] %v15241_v3  ;;  %v9463_v42 = vsel %vm12447_vm2, %v9458_v0, %v9462_v33  ;;  %v9508_v29 = vshll.u32 %v10809_v56, 16  ;;  %v9512_v9 = vshrl.u32 %v10809_v56, 16  ;;  %v9448_v3 = vrot.slane %v9446_v20, 5  ;;  %v15260_v33 = vpop.f32.mrf.mxu0 }
 0x3b0   : > { %15997 = vst [vmem:[#allocation35_spill] sm:$0xff] %v15198_v41  ;;  %v15213_v41 = vrot.slane %v9436_v61, 5  ;;  %v15229_v61 = vunpack.c.l.bf16 %v9391_v24  ;;  %v9401_v11 = vsel %vm12447_vm2, %v9396_v27, %v9400_v51  ;;  %v9434_v23 = vrot.slane %v9433_v57, 4  ;;  %v10814_v57 = vld [vmem:[%s12424_s22 + $0x78] sm:$0xf] }
 0x3b1   : > { %v15209_v8 = vpop.f32.mrf.mxu1  ;;  %v9480_v27 = vrot.slane %v9478_v12, 5  ;;  %v15258_v51 = vadd.f32 %v14988_v30, %v15006_v14  ;;  %v15274_v30 = vunpack.c.l.bf16 %v9463_v42  ;;  %v9514_v20 = vrot.slane %v9512_v9, 4  ;;  %v10807_v42 = vld [vmem:[%s12424_s22 + $0x5c] sm:$0x1]  ;;  %v16019_v9 = vld [vmem:[#allocation12_spill] sm:$0xff] }
 0x3b2   : > { %15999 = vst [vmem:[#allocation21_spill] sm:$0xff] %v15209_v8  ;;  %v9470_v8 = vshll.u32 %v10804_v37, 16  ;;  %v9443_v15 = vor.u32 %v9442_v40, %v15213_v41  ;;  %v15237_v37 = vadd.f32 %v14978_v38, %v14996_v45  ;;  %v9501_v40 = vrot.slane %v9499_v34, 4  ;;  %v10806_v45 = vld [vmem:[%s12424_s22 + $0x58] sm:$0xf] }
 0x3b3   : > { %v15223_v16 = vpop.f32.mrf.mxu1  ;;  %v9504_v38 = vrot.slane %v9502_v4, 5  ;;  %16006 = vst [vmem:[#allocation71_spill] sm:$0xff] %v15258_v51  ;;  %v9484_v0 = vshll.u32 %v10806_v45, 16  ;;  %v9488_v34 = vshrl.u32 %v10806_v45, 16  ;;  %v9547_v45 = vshrl.u32 %v10814_v57, 16 }
 0x3b4   : > { %16000 = vst [vmem:[#allocation69_spill] sm:$0xff] %v15223_v16  ;;  %v9475_v16 = vshrl.u32 %v10805_v7, 16  ;;  %16002 = vst [vmem:[#allocation70_spill] sm:$0xff] %v15237_v37  ;;  %v9472_v24 = vrot.slane %v9470_v8, 5  ;;  %v9468_v7 = vrot.slane %v9467_v50, 4  ;;  %v9444_v59 = vrot.slane %v9443_v15, 4 }
 0x3b5   : > { %v15231_v28 = vpop.f32.mrf.mxu1  ;;  %v15262_v8 = vunpack.c.l.bf16 %v9401_v11  ;;  %v15266_v50 = vadd.f32 %v14993_v36, %v15011_v48  ;;  %v9505_v14 = vor.u32 %v9504_v38, %v9501_v40  ;;  %v9439_v15 = vsel %vm12447_vm2, %v9434_v23, %v15213_v41  ;;  %v10810_v11 = vld [vmem:[%s12424_s22 + $0x68] sm:$0x1]  ;;  %v16013_v23 = vld [vmem:[#allocation8_spill] sm:$0xff] }
 0x3b6   : > { %16001 = vst [vmem:[#allocation38_spill] sm:$0xff] %v15231_v28  ;;  %v9477_v37 = vrot.slane %v9475_v16, 4  ;;  %v15270_v16 = vadd.f32 %v14998_v2, %v15016_v44  ;;  %v9473_v36 = vsel %vm12447_vm2, %v9468_v7, %v9472_v24  ;;  %v9510_v48 = vrot.slane %v9508_v29, 5  ;;  %v15296_v24 = vpop.f32.mrf.mxu0 }
 0x3b7   : > { %v15249_v53 = vpop.f32.mrf.mxu1  ;;  %16007 = vst [vmem:[#allocation41_spill] sm:$0xff] %v15266_v50  ;;  %v15284_v2 = vadd.f32 %v15003_v46, %v15021_v62  ;;  %v15288_v44 = vadd.f32 %v15008_v55, %v15026_v22  ;;  %v9449_v12 = vsel %vm12447_vm2, %v9444_v59, %v9448_v3  ;;  %v9486_v40 = vrot.slane %v9484_v0, 5  ;;  %v10811_v62 = vld [vmem:[%s12424_s22 + $0x6c] sm:$0xf]  ;;  %v16014_v55 = vld [vmem:[#allocation24_spill] sm:$0xff]  ;;  %v16020_v59 = vld [vmem:[#allocation5_spill] sm:$0xff] }
 0x3b8   : > { %16004 = vst [vmem:[#allocation39_spill] sm:$0xff] %v15249_v53  ;;  %16008 = vst [vmem:[#allocation42_spill] sm:$0xff] %v15270_v16  ;;  %v9481_v41 = vor.u32 %v9480_v27, %v9477_v37  ;;  %v9490_v38 = vrot.slane %v9488_v34, 4  ;;  %v9550_v46 = vshll.u32 %v10814_v57, 16  ;;  %v15301_v22 = vadd.f32 %v16014_v55, %v16013_v23  ;;  %v10821_v50 = vld [vmem:[%s12424_s22 + $0x94] sm:$0xf] }
 0x3b9   : > { %v15254_v28 = vpop.f32.mrf.mxu1  ;;  %16010 = vst [vmem:[#allocation72_spill] sm:$0xff] %v15284_v2  ;;  %16011 = vst [vmem:[#allocation43_spill] sm:$0xff] %v15288_v44  ;;  %v15305_v29 = vunpack.c.l.bf16 %v9439_v15  ;;  %v15307_v37 = vunpack.c.l.bf16 %v9473_v36  ;;  %v9506_v3 = vrot.slane %v9505_v14, 4  ;;  %v15311_v27 = vadd.f32 %v16020_v59, %v16019_v9  ;;  %v10815_v44 = vld [vmem:[%s12424_s22 + $0x7c] sm:$0xf]  ;;  %v16025_v2 = vld [vmem:[#allocation6_spill] sm:$0xff] }
 0x3ba   : > { %16005 = vst [vmem:[#allocation40_spill] sm:$0xff] %v15254_v28  ;;  %16015 = vst [vmem:[#allocation74_spill] sm:$0xff] %v15301_v22  ;;  %v15313_v0 = vunpack.c.l.bf16 %v9449_v12  ;;  %v9515_v34 = vor.u32 %v9514_v20, %v9510_v48  ;;  %v9518_v57 = vshll.u32 %v10810_v11, 16  ;;  %v9482_v23 = vrot.slane %v9481_v41, 4  ;;  %v10812_v22 = vld [vmem:[%s12424_s22 + $0x70] sm:$0xf] }
 0x3bb   : > { %v15272_v4 = vpop.f32.mrf.mxu1  ;;  %16017 = vst [vmem:[#allocation75_spill] sm:$0xff] %v15305_v29  ;;  %16018 = vst [vmem:[#allocation15_spill] sm:$0xff] %v15307_v37  ;;  %v9494_v55 = vshll.u32 %v10807_v42, 16  ;;  %v9523_v15 = vshrl.u32 %v10811_v62, 16  ;;  %v16024_v36 = vld [vmem:[#allocation17_spill] sm:$0xff]  ;;  %v9491_v9 = vor.u32 %v9490_v38, %v9486_v40  ;;  %v9549_v12 = vrot.slane %v9547_v45, 4 }
 0x3bc   : > { %16009 = vst [vmem:[#allocation46_spill] sm:$0xff] %v15272_v4  ;;  %16021 = vst [vmem:[#allocation48_spill] sm:$0xff] %v15311_v27  ;;  %v15321_v14 = vadd.f32 %v16025_v2, %v16024_v36  ;;  %v15323_v4 = vpop.f32.mrf.mxu0  ;;  %v9552_v59 = vrot.slane %v9550_v46, 5  ;;  %v16027_v20 = vld [vmem:[#allocation29_spill] sm:$0xff]  ;;  %v16028_v11 = vld [vmem:[#allocation7_spill] sm:$0xff]  ;;  %v9511_v41 = vsel %vm12447_vm2, %v9506_v3, %v9510_v48  ;;  %v9556_v42 = vshll.u32 %v10815_v44, 16 }
 0x3bd   : > { %v15290_v56 = vpop.f32.mrf.mxu1  ;;  %16022 = vst [vmem:[#allocation49_spill] sm:$0xff] %v15313_v0  ;;  %v15327_v27 = vadd.f32 %v16028_v11, %v16027_v20  ;;  %v10820_v0 = vld [vmem:[%s12424_s22 + $0x90] sm:$0xf]  ;;  %v9516_v2 = vrot.slane %v9515_v34, 4  ;;  %v9520_v36 = vrot.slane %v9518_v57, 5  ;;  %v9536_v16 = vshrl.u32 %v10812_v22, 16 }
 0x3be   : > { %16012 = vst [vmem:[#allocation44_spill] sm:$0xff] %v15290_v56  ;;  %16026 = vst [vmem:[#allocation50_spill] sm:$0xff] %v15321_v14  ;;  %v9532_v14 = vshll.u32 %v10812_v22, 16  ;;  %v9487_v45 = vsel %vm12447_vm2, %v9482_v23, %v9486_v40  ;;  %v9496_v46 = vrot.slane %v9494_v55, 5  ;;  %v9525_v20 = vrot.slane %v9523_v15, 4  ;;  %v16032_v57 = vld [vmem:[#allocation30_spill] sm:$0xff] }
 0x3bf   : > { %v15303_v7 = vpop.f32.mrf.mxu1  ;;  %16029 = vst [vmem:[#allocation51_spill] sm:$0xff] %v15327_v27  ;;  %v15338_v27 = vpop.f32.mrf.mxu0  ;;  %v9492_v48 = vrot.slane %v9491_v9, 4  ;;  %v9595_v3 = vshrl.u32 %v10820_v0, 16  ;;  %v10817_v34 = vld [vmem:[%s12424_s22 + $0x84] sm:$0xf]  ;;  %v16033_v22 = vld [vmem:[#allocation9_spill] sm:$0xff]  ;;  %v15347_v40 = vunpack.c.l.bf16 %v9511_v41 }
 0x3c0   : > { %16016 = vst [vmem:[#allocation47_spill] sm:$0xff] %v15303_v7  ;;  %v9526_v7 = vshll.u32 %v10811_v62, 16  ;;  %v9560_v62 = vshrl.u32 %v10815_v44, 16  ;;  %v9553_v44 = vor.u32 %v9552_v59, %v9549_v12  ;;  %v9558_v23 = vrot.slane %v9556_v42, 5  ;;  %v16037_v55 = vld [vmem:[#allocation73_spill] sm:$0xff]  ;;  %v16038_v15 = vld [vmem:[#allocation14_spill] sm:$0xff] }
 0x3c1   : > { %v15316_v56 = vpop.f32.mrf.mxu1  ;;  %16036 = vst [vmem:[#allocation80_spill] sm:$0xff] %v15347_v40  ;;  %v15351_v28 = vadd.f32 %v16038_v15, %v16037_v55  ;;  %v9534_v9 = vrot.slane %v9532_v14, 5  ;;  %v10816_v12 = vld [vmem:[%s12424_s22 + $0x80] sm:$0x1]  ;;  %v9538_v59 = vrot.slane %v9536_v16, 4  ;;  %v9571_v42 = vshrl.u32 %v10817_v34, 16 }
 0x3c2   : > { %16023 = vst [vmem:[#allocation77_spill] sm:$0xff] %v15316_v56  ;;  %v9528_v11 = vrot.slane %v9526_v7, 5  ;;  %v9562_v7 = vrot.slane %v9560_v62, 4  ;;  %v10813_v41 = vld [vmem:[%s12424_s22 + $0x74] sm:$0x1]  ;;  %v9574_v62 = vshll.u32 %v10817_v34, 16  ;;  %v9497_v55 = vsel %vm12447_vm2, %v9492_v48, %v9496_v46 }
 0x3c3   : > { %v15329_v56 = vpop.f32.mrf.mxu1  ;;  %16039 = vst [vmem:[#allocation55_spill] sm:$0xff] %v15351_v28  ;;  %v9554_v15 = vrot.slane %v9553_v44, 4  ;;  %v9566_v28 = vshll.u32 %v10816_v12, 16  ;;  %v9573_v46 = vrot.slane %v9571_v42, 4  ;;  %v16044_v44 = vld [vmem:[#allocation18_spill] sm:$0xff]  ;;  %v15379_v12 = vunpack.c.l.bf16 %v9497_v55  ;;  %v16049_v55 = vld [vmem:[#allocation23_spill] sm:$0xff] }
 0x3c4   : > { %16030 = vst [vmem:[#allocation54_spill] sm:$0xff] %v15329_v56  ;;  %v9598_v56 = vshll.u32 %v10820_v0, 16  ;;  %v9521_v0 = vsel %vm12447_vm2, %v9516_v2, %v9520_v36  ;;  %v9597_v2 = vrot.slane %v9595_v3, 4  ;;  %v9563_v16 = vor.u32 %v9562_v7, %v9558_v23 }
 0x3c5   : > { %v15334_v38 = vpop.f32.mrf.mxu1  ;;  %v15371_v34 = vunpack.c.l.bf16 %v9521_v0  ;;  %v9576_v48 = vrot.slane %v9574_v62, 5  ;;  %16047 = vst [vmem:[#allocation58_spill] sm:$0xff] %v15379_v12 }
 0x3c6   : > { %16031 = vst [vmem:[#allocation78_spill] sm:$0xff] %v15334_v38  ;;  %v15343_v38 = vadd.f32 %v16033_v22, %v16032_v57  ;;  %v15359_v57 = vunpack.c.l.bf16 %v9487_v45  ;;  %v9529_v22 = vor.u32 %v9528_v11, %v9525_v20  ;;  %v9600_v14 = vrot.slane %v9598_v56, 5  ;;  %v16045_v56 = vld [vmem:[#allocation27_spill] sm:$0xff] }
 0x3c7   : > { %v15345_v37 = vpop.f32.mrf.mxu1  ;;  %v9608_v45 = vshrl.u32 %v10821_v50, 16  ;;  %v9542_v20 = vshll.u32 %v10813_v41, 16  ;;  %v15375_v3 = vadd.f32 %v16045_v56, %v16044_v44  ;;  %v9564_v0 = vrot.slane %v9563_v16, 4  ;;  %v10822_v56 = vld [vmem:[%s12424_s22 + $0x98] sm:$0x1]  ;;  %v16056_v16 = vld [vmem:[#allocation20_spill] sm:$0xff] }
 0x3c8   : > { %16034 = vst [vmem:[#allocation52_spill] sm:$0xff] %v15343_v38  ;;  %16035 = vst [vmem:[#allocation53_spill] sm:$0xff] %v15345_v37  ;;  %v10818_v38 = vld [vmem:[%s12424_s22 + $0x88] sm:$0xf]  ;;  %v15363_v37 = vpop.f32.mrf.mxu0  ;;  %v9530_v51 = vrot.slane %v9529_v22, 4  ;;  %v9568_v22 = vrot.slane %v9566_v28, 5 }
 0x3c9   : > { %v15357_v29 = vpop.f32.mrf.mxu1  ;;  %16041 = vst [vmem:[#allocation16_spill] sm:$0xff] %v15359_v57  ;;  %v9539_v57 = vor.u32 %v9538_v59, %v9534_v9  ;;  %v9580_v11 = vshll.u32 %v10818_v38, 16  ;;  %v9584_v40 = vshrl.u32 %v10818_v38, 16  ;;  %16046 = vst [vmem:[#allocation83_spill] sm:$0xff] %v15375_v3  ;;  %v9601_v38 = vor.u32 %v9600_v14, %v9597_v2 }
 0x3ca   : > { %16040 = vst [vmem:[#allocation81_spill] sm:$0xff] %v15357_v29  ;;  %v9604_v29 = vshll.u32 %v10821_v50, 16  ;;  %v15377_v7 = vpop.f32.mrf.mxu0  ;;  %v9559_v50 = vsel %vm12447_vm2, %v9554_v15, %v9558_v23  ;;  %v9610_v42 = vrot.slane %v9608_v45, 4  ;;  %v16052_v23 = vld [vmem:[#allocation64_spill] sm:$0xff]  ;;  %v9535_v28 = vsel %vm12447_vm2, %v9530_v51, %v9534_v9  ;;  %v16057_v45 = vld [vmem:[#allocation10_spill] sm:$0xff] }
 0x3cb   : > { %v15367_v36 = vpop.f32.mrf.mxu1  ;;  %v9540_v62 = vrot.slane %v9539_v57, 4  ;;  %v15385_v44 = vrot.slane %v9580_v11, 5  ;;  %v9586_v3 = vrot.slane %v9584_v40, 4  ;;  %v16053_v15 = vld [vmem:[#allocation28_spill] sm:$0xff]  ;;  %v10819_v57 = vld [vmem:[%s12424_s22 + $0x8c] sm:$0x1]  ;;  %v9569_v9 = vsel %vm12447_vm2, %v9564_v0, %v9568_v22 }
 0x3cc   : > { %16042 = vst [vmem:[#allocation56_spill] sm:$0xff] %v15367_v36  ;;  %v9606_v41 = vrot.slane %v9604_v29, 5  ;;  %v16050_v36 = vld [vmem:[#allocation26_spill] sm:$0xff]  ;;  %v15394_v2 = vadd.f32 %v16053_v15, %v16052_v23  ;;  %v9577_v29 = vor.u32 %v9576_v48, %v9573_v46  ;;  %v16059_v11 = vld [vmem:[#allocation19_spill] sm:$0xff]  ;;  %v9602_v23 = vrot.slane %v9601_v38, 4 }
 0x3cd   : > { %v15369_v53 = vpop.f32.mrf.mxu1  ;;  %v15390_v12 = vadd.f32 %v16050_v36, %v16049_v55  ;;  %v16058_v40 = vld [vmem:[#allocation22_spill] sm:$0xff]  ;;  %v15409_v36 = vpop.f32.mrf.mxu0  ;;  %v15411_v55 = vunpack.c.l.bf16 %v9559_v50  ;;  %v10826_v15 = vld [vmem:[%s12424_s22 + $0xa8] sm:$0xf]  ;;  %v9614_v48 = vshll.u32 %v10822_v56, 16  ;;  %v9587_v50 = vor.u32 %v9586_v3, %v15385_v44 }
 0x3ce   : > { %16043 = vst [vmem:[#allocation57_spill] sm:$0xff] %v15369_v53  ;;  %v9544_v53 = vrot.slane %v9542_v20, 5  ;;  %16054 = vst [vmem:[#allocation84_spill] sm:$0xff] %v15394_v2  ;;  %v15403_v20 = vadd.f32 %v16057_v45, %v16056_v16  ;;  %v16062_v2 = vld [vmem:[#allocation76_spill] sm:$0xff]  ;;  %v9611_v46 = vor.u32 %v9610_v42, %v9606_v41  ;;  %v15422_v16 = vunpack.c.l.bf16 %v9535_v28  ;;  %v16067_v0 = vld [vmem:[#allocation11_spill] sm:$0xff] }
 0x3cf   : > { %v15383_v59 = vpop.f32.mrf.mxu1  ;;  %16051 = vst [vmem:[#allocation61_spill] sm:$0xff] %v15390_v12  ;;  %v9590_v38 = vshll.u32 %v10819_v57, 16  ;;  %v8407_v22 = vadd.f32 %v16067_v0, %v15119_v25  ;;  %v16068_v42 = vld [vmem:[#allocation32_spill] sm:$0xff]  ;;  %v15435_v28 = vpop.f32.mrf.mxu0  ;;  %v9607_v3 = vsel %vm12447_vm2, %v9602_v23, %v9606_v41  ;;  %v9616_v25 = vrot.slane %v9614_v48, 5  ;;  %v16072_v0 = vld [vmem:[#allocation79_spill] sm:$0xff]  ;;  %v16074_v23 = vld [vmem:[#allocation66_spill] sm:$0xff] }
 0x3d0   : > { %16048 = vst [vmem:[#allocation59_spill] sm:$0xff] %v15383_v59  ;;  %v15407_v59 = vadd.f32 %v16059_v11, %v16058_v40  ;;  %v9545_v45 = vsel %vm12447_vm2, %v9540_v62, %v9544_v53  ;;  %v16065_v40 = vld [vmem:[#allocation82_spill] sm:$0xff]  ;;  %v9578_v11 = vrot.slane %v9577_v29, 4  ;;  %v8410_v56 = vadd.f32 %v16068_v42, %v15126_v54  ;;  %v16069_v62 = vld [vmem:[#allocation45_spill] sm:$0xff]  ;;  %v16076_v48 = vld [vmem:[#allocation31_spill] sm:$0xff] }
 0x3d1   : > { %v15396_v14 = vpop.f32.mrf.mxu1  ;;  %v15437_v53 = vunpack.c.l.bf16 %v9569_v9  ;;  %v8413_v29 = vadd.f32 %v16069_v62, %v15151_v39  ;;  %v16071_v54 = vld [vmem:[#allocation25_spill] sm:$0xff]  ;;  %v15452_v9 = vunpack.c.l.bf16 %v9545_v45  ;;  %v9592_v41 = vrot.slane %v9590_v38, 5 }
 0x3d2   : > { %16055 = vst [vmem:[#allocation60_spill] sm:$0xff] %v15396_v14  ;;  %16060 = vst [vmem:[#allocation62_spill] sm:$0xff] %v15407_v59  ;;  %v16061_v14 = vld [vmem:[#allocation65_spill] sm:$0xff]  ;;  %v9646_v59 = vshll.u32 %v10826_v15, 16  ;;  %v15450_v42 = vadd.f32 %v16072_v0, %v16071_v54  ;;  %v8777_v62 = vadd.f32 %v16076_v48, %v8407_v22  ;;  %v15462_v0 = vpop.f32.mrf.mxu0  ;;  %v15464_v45 = vunpack.c.l.bf16 %v9607_v3 }
 0x3d3   : > { %v15416_v12 = vadd.f32 %v16062_v2, %v16061_v14  ;;  %v15418_v51 = vpop.f32.mrf.mxu1  ;;  %v8409_v2 = vadd.f32 %v16065_v40, %v15115_v21  ;;  %v8408_v21 = vadd.f32 %v15109_v26, %v15144_v13  ;;  %v10827_v40 = vld [vmem:[%s12424_s22 + $0xac] sm:$0xf]  ;;  %v9583_v13 = vsel %vm12447_vm2, %v9578_v11, %v15385_v44  ;;  %v10823_v38 = vld [vmem:[%s12424_s22 + $0x9c] sm:$0xf]  ;;  %v15474_v44 = vld [vmem:[%s15753_s4] ss:$0 sm:$0xff] }
 0x3d4   : > { %16064 = vst [vmem:[#allocation63_spill] sm:$0xff] %v15418_v51  ;;  %16073 = vst [vmem:[#allocation8_spill] sm:$0xff] %v15450_v42  ;;  %v16078_v22 = vld [vmem:[#allocation85_spill] sm:$0xff]  ;;  %v9622_v48 = vshll.u32 %v10823_v38, 16 }
 0x3d5   : > { %16063 = vst [vmem:[#allocation86_spill] sm:$0xff] %v15416_v12  ;;  %v15429_v14 = vpop.f32.mrf.mxu1  ;;  %v9643_v12 = vshrl.u32 %v10826_v15, 16  ;;  %v9612_v15 = vrot.slane %v9611_v46, 4  ;;  %v8779_v51 = vadd.f32 %v16074_v23, %v8409_v2  ;;  %v9648_v46 = vrot.slane %v9646_v59, 5 }
 0x3d6   : > { %16066 = vst [vmem:[#allocation88_spill] sm:$0xff] %v15429_v14  ;;  %v9588_v14 = vrot.slane %v9587_v50, 4  ;;  %v9652_v50 = vshll.u32 %v10827_v40, 16  ;;  %v8778_v2 = vadd.f32 %v15138_v1, %v8408_v21  ;;  %v8783_v23 = vadd.f32 %v15173_v5, %v8413_v29  ;;  %v10824_v21 = vld [vmem:[%s12424_s22 + $0xa0] sm:$0xf] }
 0x3d7   : > { %v15445_v57 = vpop.f32.mrf.mxu1  ;;  %v9645_v39 = vrot.slane %v9643_v12, 4  ;;  %v8411_v12 = vadd.f32 %v15136_v60, %v15155_v47  ;;  %v9617_v11 = vsel %vm12447_vm2, %v9612_v15, %v9616_v25  ;;  %v15480_v1 = vunpack.c.l.bf16 %v9583_v13  ;;  %v16079_v13 = vld [vmem:[#allocation37_spill] sm:$0xff] }
 0x3d8   : > { %16070 = vst [vmem:[#allocation4_spill] sm:$0xff] %v15445_v57  ;;  %v16077_v57 = vld [vmem:[#allocation67_spill] sm:$0xff]  ;;  %v9593_v5 = vsel %vm12447_vm2, %v9588_v14, %v9592_v41  ;;  %v9656_v29 = vshrl.u32 %v10827_v40, 16  ;;  %v15489_v42 = vunpack.c.l.bf16 %v9617_v11  ;;  %v8412_v14 = vadd.f32 %v16079_v13, %v15179_v19 }
 0x3d9   : > { %v15455_v26 = vpop.f32.mrf.mxu1  ;;  %v8780_v54 = vadd.f32 %v16077_v57, %v8410_v56  ;;  %v8414_v56 = vadd.f32 %v16078_v22, %v15163_v31  ;;  %v9649_v47 = vor.u32 %v9648_v46, %v9645_v39  ;;  %v9619_v57 = vshrl.u32 %v10823_v38, 16  ;;  %v16080_v46 = vld [vmem:[#allocation33_spill] sm:$0xff]  ;;  %v16082_v13 = vld [vmem:[#allocation87_spill] sm:$0xff] }
 0x3da   : > { %16075 = vst [vmem:[#allocation24_spill] sm:$0xff] %v15455_v26  ;;  %v15485_v26 = vpop.f32.mrf.mxu0  ;;  %v9654_v31 = vrot.slane %v9652_v50, 5  ;;  %v9628_v40 = vshll.u32 %v10824_v21, 16  ;;  %v9658_v11 = vrot.slane %v9656_v29, 4  ;;  %v9632_v29 = vshrl.u32 %v10824_v21, 16 }
 0x3db   : > { %v12104_v59 = vpop.f32.mrf.mxu1  ;;  %v8784_v39 = vadd.f32 %v15215_v6, %v8414_v56  ;;  %v9650_v19 = vrot.slane %v9649_v47, 4  ;;  %v9621_v50 = vrot.slane %v9619_v57, 4  ;;  %v16081_v56 = vld [vmem:[#allocation34_spill] sm:$0xff] }
 0x3dc   : > { %v9149_v3 = vadd.f32 %v12104_v59, %v8779_v51  ;;  %v8781_v51 = vadd.f32 %v15188_v18, %v8411_v12  ;;  %v15494_v59 = vunpack.c.l.bf16 %v9593_v5  ;;  %v9624_v12 = vrot.slane %v9622_v48, 5 }
 0x3dd   : > { %v9020_v60 = vpop.f32.mrf.mxu1  ;;  %v15512_v57 = vrot.slane %v9628_v40, 5 }
 0x3de   : > { %v9252_v15 = vadd.f32 %v15474_v44, %v9149_v3  ;;  %v9147_v25 = vadd.f32 %v9020_v60, %v8777_v62  ;;  %v15504_v3 = vpop.f32.mrf.mxu0 }
 0x3df   : > { %v12105_v41 = vpop.f32.mrf.mxu1 }
 0x3e0   : > { %v9780_v38 = vadd.f32 %v16080_v46, %v9252_v15  ;;  %v9250_v22 = vadd.f32 %v15474_v44, %v9147_v25  ;;  %v9150_v62 = vadd.f32 %v12105_v41, %v8780_v54  ;;  %v10828_v15 = vld [vmem:[%s12424_s22 + $0xb0] sm:$0x1]  ;;  %v8782_v25 = vadd.f32 %v15243_v43, %v8412_v14 }
 0x3e1   : > { %v9023_v18 = vpop.f32.mrf.mxu1  ;;  %v8417_v41 = vadd.f32 %v16082_v13, %v15192_v10  ;;  %v16083_v46 = vld [vmem:[#allocation68_spill] sm:$0xff]  ;;  %v9655_v43 = vsel %vm12447_vm2, %v9650_v19, %v9654_v31  ;;  %v9625_v14 = vor.u32 %v9624_v12, %v9621_v50  ;;  %v9659_v10 = vor.u32 %v9658_v11, %v9654_v31  ;;  %v15520_v13 = vpop.f32.mrf.mxu0 }
 0x3e2   : > { %v9812_v6 = vmax.f32 %v9780_v38, 0.0  ;;  %v9778_v5 = vadd.f32 %v16081_v56, %v9250_v22  ;;  %v9253_v60 = vadd.f32 %v15474_v44, %v9150_v62  ;;  %v9148_v54 = vadd.f32 %v9023_v18, %v8778_v2  ;;  %v10825_v62 = vld [vmem:[%s12424_s22 + $0xa4] sm:$0x1] }
 0x3e3   : > { %v12108_v47 = vpop.f32.mrf.mxu1  ;;  %v9662_v18 = vshll.u32 %v10828_v15, 16  ;;  %v9634_v19 = vrot.slane %v9632_v29, 4  ;;  %v9638_v50 = vshll.u32 %v10825_v62, 16  ;;  %v16084_v15 = vld [vmem:[#allocation36_spill] sm:$0xff] }
 0x3e4   : > { %9844 = vst [vmem:[%s15502_s6 + $0x10] sm:$0xff] %v9812_v6  ;;  %v9810_v48 = vmax.f32 %v9778_v5, 0.0  ;;  %v9781_v38 = vadd.f32 %v16083_v46, %v9253_v60  ;;  %v9251_v22 = vadd.f32 %v15474_v44, %v9148_v54  ;;  %v9153_v56 = vadd.f32 %v12108_v47, %v8783_v23  ;;  %v16085_v47 = vld [vmem:[#allocation35_spill] sm:$0xff] }
 0x3e5   : > { %v9036_v2 = vpop.f32.mrf.mxu1  ;;  %v8787_v23 = vadd.f32 %v15260_v33, %v8417_v41  ;;  %v8415_v60 = vadd.f32 %v15184_v49, %v15196_v35  ;;  %v15533_v33 = vunpack.c.l.bf16 %v9655_v43  ;;  %v9626_v41 = vrot.slane %v9625_v14, 4  ;;  %v15537_v35 = vpop.f32.mrf.mxu0 }
 0x3e6   : > { %9842 = vst [vmem:[%s15502_s6] sm:$0xff] %v9810_v48  ;;  %v9813_v21 = vmax.f32 %v9781_v38, 0.0  ;;  %v9779_v40 = vadd.f32 %v15186_v58, %v9251_v22  ;;  %v9256_v6 = vadd.f32 %v15474_v44, %v9153_v56  ;;  %v9151_v5 = vadd.f32 %v9036_v2, %v8781_v51  ;;  %v16086_v56 = vld [vmem:[#allocation21_spill] sm:$0xff] }
 0x3e7   : > { %v12109_v54 = vpop.f32.mrf.mxu1  ;;  %v8418_v51 = vadd.f32 %v16085_v47, %v16084_v15  ;;  %v15535_v49 = vrot.slane %v9659_v10, 4  ;;  %v8785_v22 = vadd.f32 %v15296_v24, %v8415_v60  ;;  %v8416_v62 = vadd.f32 %v16086_v56, %v15227_v63 }
 0x3e8   : > { %9845 = vst [vmem:[%s15502_s6 + $0x18] sm:$0xff] %v9813_v21  ;;  %v9811_v31 = vmax.f32 %v9779_v40, 0.0  ;;  %v9784_v12 = vadd.f32 %v15217_v52, %v9256_v6  ;;  %v9254_v11 = vadd.f32 %v15474_v44, %v9151_v5  ;;  %v9154_v58 = vadd.f32 %v12109_v54, %v8784_v39  ;;  %v15543_v39 = vld [vmem:[%s12424_s22 + $0xc0] sm:$0xf]  ;;  %v16088_v5 = vld [vmem:[#allocation69_spill] sm:$0xff] }
 0x3e9   : > { %v9039_v48 = vpop.f32.mrf.mxu1  ;;  %v9664_v43 = vrot.slane %v9662_v18, 5  ;;  %v9635_v14 = vor.u32 %v9634_v19, %v15512_v57  ;;  %v16087_v6 = vld [vmem:[#allocation70_spill] sm:$0xff]  ;;  %v15555_v54 = vrot.slane %v9638_v50, 5  ;;  %v9691_v63 = vshrl.u32 %v15543_v39, 16  ;;  %v15558_v18 = vpop.f32.mrf.mxu0 }
 0x3ea   : > { %9843 = vst [vmem:[%s15502_s6 + $0x8] sm:$0xff] %v9811_v31  ;;  %v9816_v29 = vmax.f32 %v9784_v12, 0.0  ;;  %v9782_v46 = vadd.f32 %v15229_v61, %v9254_v11  ;;  %v9257_v52 = vadd.f32 %v15474_v44, %v9154_v58  ;;  %v9152_v38 = vadd.f32 %v9039_v48, %v8782_v25  ;;  %v16089_v12 = vld [vmem:[#allocation13_spill] sm:$0xff]  ;;  %v16090_v11 = vld [vmem:[#allocation38_spill] sm:$0xff] }
 0x3eb   : > { %v12112_v2 = vpop.f32.mrf.mxu1  ;;  %v8788_v25 = vadd.f32 %v15323_v4, %v8418_v51  ;;  %v8421_v24 = vadd.f32 %v16088_v5, %v16087_v6  ;;  %v8786_v4 = vadd.f32 %v15338_v27, %v8416_v62  ;;  %v8419_v58 = vadd.f32 %v16090_v11, %v16089_v12  ;;  %v16093_v62 = vld [vmem:[#allocation75_spill] sm:$0xff] }
 0x3ec   : > { %9848 = vst [vmem:[%s15502_s6 + $0x30] sm:$0xff] %v9816_v29  ;;  %v9814_v10 = vmax.f32 %v9782_v46, 0.0  ;;  %v9785_v21 = vadd.f32 %v15245_v17, %v9257_v52  ;;  %v9255_v61 = vadd.f32 %v15474_v44, %v9152_v38  ;;  %v9157_v40 = vadd.f32 %v12112_v2, %v8787_v23  ;;  %v15574_v46 = vld [vmem:[%s12424_s22 + $0xc4] sm:$0xf]  ;;  %v16091_v52 = vld [vmem:[#allocation71_spill] sm:$0xff] }
 0x3ed   : > { %v9052_v60 = vpop.f32.mrf.mxu1  ;;  %v9631_v15 = vsel %vm12447_vm2, %v9626_v41, %v15512_v57  ;;  %v9694_v47 = vshll.u32 %v15543_v39, 16  ;;  %v8791_v27 = vadd.f32 %v15363_v37, %v8421_v24  ;;  %v16092_v38 = vld [vmem:[#allocation39_spill] sm:$0xff]  ;;  %v9665_v57 = vsel %vm12447_vm2, %v15535_v49, %v9664_v43  ;;  %v15582_v39 = vpop.f32.mrf.mxu0 }
 0x3ee   : > { %9846 = vst [vmem:[%s15502_s6 + $0x20] sm:$0xff] %v9814_v10  ;;  %v9817_v19 = vmax.f32 %v9785_v21, 0.0  ;;  %v9783_v17 = vadd.f32 %v15262_v8, %v9255_v61  ;;  %v9260_v23 = vadd.f32 %v15474_v44, %v9157_v40  ;;  %v9155_v31 = vadd.f32 %v9052_v60, %v8785_v22  ;;  %v16094_v61 = vld [vmem:[#allocation41_spill] sm:$0xff]  ;;  %v16095_v40 = vld [vmem:[#allocation40_spill] sm:$0xff] }
 0x3ef   : > { %v12113_v50 = vpop.f32.mrf.mxu1  ;;  %v8422_v22 = vadd.f32 %v16092_v38, %v16091_v52  ;;  %v9636_v41 = vrot.slane %v9635_v14, 4  ;;  %v8789_v37 = vadd.f32 %v15377_v7, %v8419_v58  ;;  %v15590_v5 = vunpack.c.l.bf16 %v9631_v15  ;;  %v16096_v14 = vld [vmem:[#allocation15_spill] sm:$0xff]  ;;  %v16098_v7 = vld [vmem:[#allocation46_spill] sm:$0xff]  ;;  %v15604_v58 = vpop.f32.mrf.mxu0  ;;  %v16099_v15 = vld [vmem:[#allocation49_spill] sm:$0xff] }
 0x3f0   : > { %9849 = vst [vmem:[%s15502_s6 + $0x38] sm:$0xff] %v9817_v19  ;;  %v9815_v51 = vmax.f32 %v9783_v17, 0.0  ;;  %v9788_v8 = vadd.f32 %v15274_v30, %v9260_v23  ;;  %v9258_v48 = vadd.f32 %v15474_v44, %v9155_v31  ;;  %v9158_v29 = vadd.f32 %v12113_v50, %v8788_v25  ;;  %v16097_v23 = vld [vmem:[#allocation42_spill] sm:$0xff] }
 0x3f1   : > { %v9055_v56 = vpop.f32.mrf.mxu1  ;;  %v8420_v25 = vadd.f32 %v16095_v40, %v16094_v61  ;;  %v9700_v49 = vshll.u32 %v15574_v46, 16  ;;  %v8792_v17 = vadd.f32 %v15409_v36, %v8422_v22  ;;  %v8425_v31 = vadd.f32 %v16098_v7, %v16097_v23 }
 0x3f2   : > { %9847 = vst [vmem:[%s15502_s6 + $0x28] sm:$0xff] %v9815_v51  ;;  %v9820_v30 = vmax.f32 %v9788_v8, 0.0  ;;  %v9786_v2 = vadd.f32 %v16093_v62, %v9258_v48  ;;  %v9261_v10 = vadd.f32 %v15474_v44, %v9158_v29  ;;  %v9156_v21 = vadd.f32 %v9055_v56, %v8786_v4  ;;  %v16100_v29 = vld [vmem:[#allocation72_spill] sm:$0xff] }
 0x3f3   : > { %v12116_v6 = vpop.f32.mrf.mxu1  ;;  %v15599_v12 = vunpack.c.l.bf16 %v9665_v57  ;;  %v9641_v11 = vsel %vm12447_vm2, %v9636_v41, %v15555_v54  ;;  %v8790_v48 = vadd.f32 %v15435_v28, %v8420_v25  ;;  %v9693_v22 = vrot.slane %v9691_v63, 4  ;;  %v16102_v57 = vld [vmem:[#allocation80_spill] sm:$0xff]  ;;  %v15622_v63 = vpop.f32.mrf.mxu0 }
 0x3f4   : > { %9852 = vst [vmem:[%s15502_s6 + $0x50] sm:$0xff] %v9820_v30  ;;  %v9818_v43 = vmax.f32 %v9786_v2, 0.0  ;;  %v9789_v24 = vadd.f32 %v16096_v14, %v9261_v10  ;;  %v9259_v60 = vadd.f32 %v15474_v44, %v9156_v21  ;;  %v9161_v19 = vadd.f32 %v12116_v6, %v8791_v27  ;;  %v16101_v27 = vld [vmem:[#allocation44_spill] sm:$0xff]  ;;  %v16103_v10 = vld [vmem:[#allocation43_spill] sm:$0xff] }
 0x3f5   : > { %v9068_v4 = vpop.f32.mrf.mxu1  ;;  %v8423_v52 = vadd.f32 %v16101_v27, %v16100_v29  ;;  %v9696_v56 = vrot.slane %v9694_v47, 5  ;;  %v8795_v2 = vadd.f32 %v15462_v0, %v8425_v31  ;;  %v16104_v21 = vld [vmem:[#allocation47_spill] sm:$0xff]  ;;  %v15618_v61 = vunpack.c.l.bf16 %v9641_v11  ;;  %v16105_v25 = vld [vmem:[#allocation16_spill] sm:$0xff] }
 0x3f6   : > { %9850 = vst [vmem:[%s15502_s6 + $0x40] sm:$0xff] %v9818_v43  ;;  %v9821_v50 = vmax.f32 %v9789_v24, 0.0  ;;  %v9787_v51 = vadd.f32 %v16099_v15, %v9259_v60  ;;  %v9264_v8 = vadd.f32 %v15474_v44, %v9161_v19  ;;  %v9159_v36 = vadd.f32 %v9068_v4, %v8789_v37  ;;  %v10829_v0 = vld [vmem:[%s12424_s22 + $0xb4] sm:$0xf]  ;;  %v16106_v60 = vld [vmem:[#allocation74_spill] sm:$0xff]  ;;  %v16107_v19 = vld [vmem:[#allocation77_spill] sm:$0xff] }
 0x3f7   : > { %v12117_v38 = vpop.f32.mrf.mxu1  ;;  %v8426_v28 = vadd.f32 %v16104_v21, %v16103_v10  ;;  %v15620_v40 = vrot.slane %v9700_v49, 5  ;;  %v8793_v24 = vadd.f32 %v15485_v26, %v8423_v52  ;;  %v9697_v49 = vor.u32 %v9696_v56, %v9693_v22  ;;  %v15636_v15 = vld [vmem:[%s12424_s22 + $0xb8] sm:$0xf]  ;;  %v16108_v26 = vld [vmem:[#allocation48_spill] sm:$0xff]  ;;  %v15641_v52 = vpop.f32.mrf.mxu0 }
 0x3f8   : > { %9853 = vst [vmem:[%s15502_s6 + $0x58] sm:$0xff] %v9821_v50  ;;  %v9819_v54 = vmax.f32 %v9787_v51, 0.0  ;;  %v9792_v41 = vadd.f32 %v16102_v57, %v9264_v8  ;;  %v9262_v30 = vadd.f32 %v15474_v44, %v9159_v36  ;;  %v9162_v62 = vadd.f32 %v12117_v38, %v8792_v17  ;;  %v16109_v8 = vld [vmem:[#allocation54_spill] sm:$0xff] }
 0x3f9   : > { %v9071_v37 = vpop.f32.mrf.mxu1  ;;  %v8424_v17 = vadd.f32 %v16107_v19, %v16106_v60  ;;  %v9704_v7 = vshrl.u32 %v15574_v46, 16  ;;  %v8796_v51 = vadd.f32 %v15504_v3, %v8426_v28  ;;  %v8429_v36 = vadd.f32 %v16109_v8, %v16108_v26  ;;  %v16110_v38 = vld [vmem:[#allocation58_spill] sm:$0xff] }
 0x3fa   : > { %9851 = vst [vmem:[%s15502_s6 + $0x48] sm:$0xff] %v9819_v54  ;;  %v9824_v47 = vmax.f32 %v9792_v41, 0.0  ;;  %v9790_v6 = vadd.f32 %v16105_v25, %v9262_v30  ;;  %v9265_v43 = vadd.f32 %v15474_v44, %v9162_v62  ;;  %v9160_v14 = vadd.f32 %v9071_v37, %v8790_v48  ;;  %v16111_v57 = vld [vmem:[#allocation50_spill] sm:$0xff]  ;;  %v16113_v25 = vld [vmem:[#allocation51_spill] sm:$0xff] }
 0x3fb   : > { %v12120_v23 = vpop.f32.mrf.mxu1  ;;  %v9667_v29 = vshrl.u32 %v10829_v0, 16  ;;  %v9670_v27 = vshll.u32 %v10829_v0, 16  ;;  %v8794_v54 = vadd.f32 %v15520_v13, %v8424_v17  ;;  %v16112_v3 = vld [vmem:[#allocation78_spill] sm:$0xff]  ;;  %v9676_v62 = vshll.u32 %v15636_v15, 16  ;;  %v16114_v13 = vld [vmem:[#allocation53_spill] sm:$0xff] }
 0x3fc   : > { %9856 = vst [vmem:[%s15502_s6 + $0x70] sm:$0xff] %v9824_v47  ;;  %v9822_v31 = vmax.f32 %v9790_v6, 0.0  ;;  %v9793_v4 = vadd.f32 %v15371_v34, %v9265_v43  ;;  %v9263_v11 = vadd.f32 %v15474_v44, %v9160_v14  ;;  %v9165_v50 = vadd.f32 %v12120_v23, %v8795_v2 }
 0x3fd   : > { %v9084_v48 = vpop.f32.mrf.mxu1  ;;  %v8427_v41 = vadd.f32 %v16112_v3, %v16111_v57  ;;  %v9680_v2 = vshrl.u32 %v15636_v15, 16  ;;  %v8799_v47 = vadd.f32 %v15537_v35, %v8429_v36  ;;  %v8430_v6 = vadd.f32 %v16114_v13, %v16113_v25  ;;  %v16115_v35 = vld [vmem:[#allocation52_spill] sm:$0xff]  ;;  %v16117_v36 = vld [vmem:[#allocation55_spill] sm:$0xff]  ;;  %v16120_v57 = vld [vmem:[#allocation57_spill] sm:$0xff] }
 0x3fe   : > { %9854 = vst [vmem:[%s15502_s6 + $0x60] sm:$0xff] %v9822_v31  ;;  %v9825_v46 = vmax.f32 %v9793_v4, 0.0  ;;  %v9791_v34 = vadd.f32 %v16110_v38, %v9263_v11  ;;  %v9268_v22 = vadd.f32 %v15474_v44, %v9165_v50  ;;  %v9163_v56 = vadd.f32 %v9084_v48, %v8793_v24  ;;  %v12081_v24 = vpop.f32.mrf.mxu0  ;;  %v16116_v31 = vld [vmem:[#allocation81_spill] sm:$0xff]  ;;  %v16118_v48 = vld [vmem:[#allocation56_spill] sm:$0xff]  ;;  %v16122_v13 = vld [vmem:[#allocation59_spill] sm:$0xff] }
 0x3ff   : > { %v12121_v30 = vpop.f32.mrf.mxu1  ;;  %v15657_v14 = vrot.slane %v9697_v49, 4  ;;  %v9706_v0 = vrot.slane %v9704_v7, 4  ;;  %v8797_v23 = vadd.f32 %v15558_v18, %v8427_v41  ;;  %v8428_v4 = vadd.f32 %v16116_v31, %v16115_v35  ;;  %v16121_v25 = vld [vmem:[#allocation61_spill] sm:$0xff]  ;;  %v16123_v35 = vld [vmem:[#allocation84_spill] sm:$0xff] }
 0x400   : > { %9857 = vst [vmem:[%s15502_s6 + $0x78] sm:$0xff] %v9825_v46  ;;  %v9823_v10 = vmax.f32 %v9791_v34, 0.0  ;;  %v9796_v21 = vadd.f32 %v15411_v55, %v9268_v22  ;;  %v9266_v28 = vadd.f32 %v15474_v44, %v9163_v56  ;;  %v9166_v37 = vadd.f32 %v12121_v30, %v8796_v51  ;;  %v16124_v31 = vld [vmem:[#allocation60_spill] sm:$0xff] }
 0x401   : > { %v9087_v43 = vpop.f32.mrf.mxu1  ;;  %v9669_v50 = vrot.slane %v9667_v29, 4  ;;  %v9672_v49 = vrot.slane %v9670_v27, 5  ;;  %v8800_v8 = vadd.f32 %v15582_v39, %v8430_v6  ;;  %v8433_v18 = vadd.f32 %v16118_v48, %v16117_v36  ;;  %v8749_v27 = vpop.f32.mrf.mxu0 }
 0x402   : > { %9855 = vst [vmem:[%s15502_s6 + $0x68] sm:$0xff] %v9823_v10  ;;  %v9828_v60 = vmax.f32 %v9796_v21, 0.0  ;;  %v9794_v19 = vadd.f32 %v15422_v16, %v9266_v28  ;;  %v9269_v55 = vadd.f32 %v15474_v44, %v9166_v37  ;;  %v9164_v17 = vadd.f32 %v9087_v43, %v8794_v54  ;;  %v10834_v16 = vld [vmem:[%s12424_s22 + $0xc8] sm:$0x1] }
 0x403   : > { %v12124_v11 = vpop.f32.mrf.mxu1  ;;  %v15672_v38 = vrot.slane %v9676_v62, 5  ;;  %v9707_v29 = vor.u32 %v9706_v0, %v15620_v40  ;;  %v8798_v39 = vadd.f32 %v15604_v58, %v8428_v4  ;;  %v16119_v54 = vld [vmem:[#allocation83_spill] sm:$0xff]  ;;  %v9703_v30 = vsel %vm12447_vm2, %v15657_v14, %v15620_v40  ;;  %v12084_v10 = vpop.f32.mrf.mxu0  ;;  %v10831_v58 = vld [vmem:[%s12424_s22 + $0xbc] sm:$0x1] }
 0x404   : > { %9860 = vst [vmem:[%s15502_s6 + $0x90] sm:$0xff] %v9828_v60  ;;  %v9826_v7 = vmax.f32 %v9794_v19, 0.0  ;;  %v9797_v15 = vadd.f32 %v15437_v53, %v9269_v55  ;;  %v9267_v51 = vadd.f32 %v15474_v44, %v9164_v17  ;;  %v9169_v26 = vadd.f32 %v12124_v11, %v8799_v47 }
 0x405   : > { %v9100_v46 = vpop.f32.mrf.mxu1  ;;  %v8431_v3 = vadd.f32 %v16120_v57, %v16119_v54  ;;  %v9710_v62 = vshll.u32 %v10834_v16, 16  ;;  %v8803_v47 = vadd.f32 %v15622_v63, %v8433_v18  ;;  %v8434_v6 = vadd.f32 %v16122_v13, %v16121_v25 }
 0x406   : > { %9858 = vst [vmem:[%s15502_s6 + $0x80] sm:$0xff] %v9826_v7  ;;  %v9829_v34 = vmax.f32 %v9797_v15, 0.0  ;;  %v9795_v53 = vadd.f32 %v15452_v9, %v9267_v51  ;;  %v9272_v22 = vadd.f32 %v15474_v44, %v9169_v26  ;;  %v9167_v56 = vadd.f32 %v9100_v46, %v8797_v23  ;;  %v8762_v15 = vpop.f32.mrf.mxu0  ;;  %v16125_v26 = vld [vmem:[#allocation63_spill] sm:$0xff] }
 0x407   : > { %v12125_v41 = vpop.f32.mrf.mxu1  ;;  %v9673_v0 = vor.u32 %v9672_v49, %v9669_v50  ;;  %v9682_v60 = vrot.slane %v9680_v2, 4  ;;  %v8801_v23 = vadd.f32 %v15641_v52, %v8431_v3  ;;  %v8432_v63 = vadd.f32 %v16124_v31, %v16123_v35 }
 0x408   : > { %9861 = vst [vmem:[%s15502_s6 + $0x98] sm:$0xff] %v9829_v34  ;;  %v9827_v21 = vmax.f32 %v9795_v53, 0.0  ;;  %v9800_v9 = vadd.f32 %v15464_v45, %v9272_v22  ;;  %v9270_v28 = vadd.f32 %v15474_v44, %v9167_v56  ;;  %v9170_v37 = vadd.f32 %v12125_v41, %v8800_v8  ;;  %v16126_v34 = vld [vmem:[#allocation62_spill] sm:$0xff]  ;;  %v16127_v53 = vld [vmem:[#allocation88_spill] sm:$0xff] }
 0x409   : > { %v9103_v43 = vpop.f32.mrf.mxu1  ;;  %v9708_v11 = vrot.slane %v9707_v29, 4  ;;  %v9686_v7 = vshll.u32 %v10831_v58, 16  ;;  %v8804_v51 = vadd.f32 %v12081_v24, %v8434_v6  ;;  %v8437_v52 = vadd.f32 %v16125_v26, %v15403_v20  ;;  %v12085_v20 = vpop.f32.mrf.mxu0  ;;  %v16131_v6 = vld [vmem:[#allocation24_spill] sm:$0xff] }
 0x40a   : > { %9859 = vst [vmem:[%s15502_s6 + $0x88] sm:$0xff] %v9827_v21  ;;  %v9832_v19 = vmax.f32 %v9800_v9, 0.0  ;;  %v9798_v55 = vadd.f32 %v15480_v1, %v9270_v28  ;;  %v9273_v17 = vadd.f32 %v15474_v44, %v9170_v37  ;;  %v9168_v45 = vadd.f32 %v9103_v43, %v8798_v39  ;;  %v16128_v21 = vld [vmem:[#allocation86_spill] sm:$0xff]  ;;  %v16129_v9 = vld [vmem:[#allocation4_spill] sm:$0xff] }
 0x40b   : > { %v12128_v4 = vpop.f32.mrf.mxu1  ;;  %v9674_v8 = vrot.slane %v9673_v0, 4  ;;  %v9683_v36 = vor.u32 %v9682_v60, %v15672_v38  ;;  %v8435_v24 = vadd.f32 %v16127_v53, %v16126_v34  ;;  %v9712_v56 = vrot.slane %v9710_v62, 5 }
 0x40c   : > { %9864 = vst [vmem:[%s15502_s6 + $0xb0] sm:$0xff] %v9832_v19  ;;  %v9830_v50 = vmax.f32 %v9798_v55, 0.0  ;;  %v9801_v2 = vadd.f32 %v15489_v42, %v9273_v17  ;;  %v9271_v49 = vadd.f32 %v15474_v44, %v9168_v45  ;;  %v9173_v1 = vadd.f32 %v12128_v4, %v8803_v47  ;;  %v8765_v19 = vpop.f32.mrf.mxu0 }
 0x40d   : > { %v9116_v16 = vpop.f32.mrf.mxu1  ;;  %v8802_v42 = vadd.f32 %v8749_v27, %v8432_v63  ;;  %v9688_v39 = vrot.slane %v9686_v7, 5  ;;  %v8438_v27 = vadd.f32 %v16129_v9, %v16128_v21  ;;  %v9679_v37 = vsel %vm12447_vm2, %v9674_v8, %v15672_v38 }
 0x40e   : > { %9862 = vst [vmem:[%s15502_s6 + $0xa0] sm:$0xff] %v9830_v50  ;;  %v9833_v48 = vmax.f32 %v9801_v2, 0.0  ;;  %v9799_v18 = vadd.f32 %v15494_v59, %v9271_v49  ;;  %v9276_v46 = vadd.f32 %v15474_v44, %v9173_v1  ;;  %v9171_v29 = vadd.f32 %v9116_v16, %v8801_v23 }
 0x40f   : > { %v12129_v22 = vpop.f32.mrf.mxu1  ;;  %v8807_v59 = vadd.f32 %v12084_v10, %v8437_v52  ;;  %v9684_v62 = vrot.slane %v9683_v36, 4  ;;  %v8805_v13 = vadd.f32 %v8762_v15, %v8435_v24  ;;  %v16130_v10 = vld [vmem:[#allocation8_spill] sm:$0xff]  ;;  %v9776_v38 = vunpack.c.l.bf16 %v9703_v30 }
 0x410   : > { %9865 = vst [vmem:[%s15502_s6 + $0xb8] sm:$0xff] %v9833_v48  ;;  %v9831_v54 = vmax.f32 %v9799_v18, 0.0  ;;  %v9804_v57 = vadd.f32 %v15533_v33, %v9276_v46  ;;  %v9274_v3 = vadd.f32 %v15474_v44, %v9171_v29  ;;  %v9174_v41 = vadd.f32 %v12129_v22, %v8804_v51 }
 0x411   : > { %v9119_v28 = vpop.f32.mrf.mxu1  ;;  %v8436_v43 = vadd.f32 %v16131_v6, %v16130_v10  ;;  %v9713_v60 = vsel %vm12447_vm2, %v9708_v11, %v9712_v56  ;;  %v8808_v23 = vadd.f32 %v12085_v20, %v8438_v27  ;;  %v9774_v31 = vunpack.c.l.bf16 %v9679_v37 }
 0x412   : > { %9863 = vst [vmem:[%s15502_s6 + $0xa8] sm:$0xff] %v9831_v54  ;;  %v9836_v58 = vmax.f32 %v9804_v57, 0.0  ;;  %v9802_v47 = vadd.f32 %v15590_v5, %v9274_v3  ;;  %v9277_v33 = vadd.f32 %v15474_v44, %v9174_v41  ;;  %v9172_v25 = vadd.f32 %v9119_v28, %v8802_v42 }
 0x413   : > { %v12132_v0 = vpop.f32.mrf.mxu1  ;;  %v9689_v63 = vsel %vm12447_vm2, %v9684_v62, %v9688_v39  ;;  %v8806_v11 = vadd.f32 %v8765_v19, %v8436_v43  ;;  %v9777_v7 = vunpack.c.l.bf16 %v9713_v60 }
 0x414   : > { %9868 = vst [vmem:[%s15502_s6 + $0xd0] sm:$0xff] %v9836_v58  ;;  %v9834_v5 = vmax.f32 %v9802_v47, 0.0  ;;  %v9805_v55 = vadd.f32 %v15599_v12, %v9277_v33  ;;  %v9275_v17 = vadd.f32 %v15474_v44, %v9172_v25  ;;  %v9177_v45 = vadd.f32 %v12132_v0, %v8807_v59 }
 0x415   : > { %v9132_v35 = vpop.f32.mrf.mxu1  ;;  %v9775_v1 = vunpack.c.l.bf16 %v9689_v63 }
 0x416   : > { %9866 = vst [vmem:[%s15502_s6 + $0xc0] sm:$0xff] %v9834_v5  ;;  %v9837_v40 = vmax.f32 %v9805_v55, 0.0  ;;  %v9803_v14 = vadd.f32 %v15618_v61, %v9275_v17  ;;  %v9280_v30 = vadd.f32 %v15474_v44, %v9177_v45  ;;  %v9175_v4 = vadd.f32 %v9132_v35, %v8805_v13 }
 0x417   : > { %v12133_v12 = vpop.f32.mrf.mxu1 }
 0x418   : > { %9869 = vst [vmem:[%s15502_s6 + $0xd8] sm:$0xff] %v9837_v40  ;;  %v9835_v15 = vmax.f32 %v9803_v14, 0.0  ;;  %v9808_v50 = vadd.f32 %v9776_v38, %v9280_v30  ;;  %v9278_v2 = vadd.f32 %v15474_v44, %v9175_v4  ;;  %v9178_v32 = vadd.f32 %v12133_v12, %v8808_v23 }
 0x419   : > { %v9135_v49 = vpop.f32.mrf.mxu1 }
 0x41a   : > { %9867 = vst [vmem:[%s15502_s6 + $0xc8] sm:$0xff] %v9835_v15  ;;  %v9840_v61 = vmax.f32 %v9808_v50, 0.0  ;;  %v9806_v51 = vadd.f32 %v9774_v31, %v9278_v2  ;;  %v9281_v26 = vadd.f32 %v15474_v44, %v9178_v32  ;;  %v9176_v52 = vadd.f32 %v9135_v49, %v8806_v11 }
 0x41c   : > { %9872 = vst [vmem:[%s15502_s6 + $0xf0] sm:$0xff] %v9840_v61  ;;  %v9838_v16 = vmax.f32 %v9806_v51, 0.0  ;;  %v9809_v8 = vadd.f32 %v9777_v7, %v9281_v26  ;;  %v9279_v36 = vadd.f32 %v15474_v44, %v9176_v52 }
 0x41e   : > { %9870 = vst [vmem:[%s15502_s6 + $0xe0] sm:$0xff] %v9838_v16  ;;  %v9841_v48 = vmax.f32 %v9809_v8, 0.0  ;;  %v9807_v18 = vadd.f32 %v9775_v1, %v9279_v36 }
 0x420   : > { %9873 = vst [vmem:[%s15502_s6 + $0xf8] sm:$0xff] %v9841_v48  ;;  %v9839_v46 = vmax.f32 %v9807_v18, 0.0 }
 0x422   : > { %9871 = vst [vmem:[%s15502_s6 + $0xe8] sm:$0xff] %v9839_v46 }
 0x423 PF: > { %s15_s18 = sadd.s32 1, %s12343_s18  }
 0x424   : > { %p12_p4 = scmp.ge.s32.totalorder %s15_s18, 4  }
 0x426   :  { %14 = sbr.rel (!%p12_p4) target bundleno = 1 (0x1), region = 90 }

</bundles_post_ra>
